<compile_context>
chip_gen: v7x
topology: tpu7x:2x2x1
jax: 0.10.0
libtpu: 0.0.40
codegen_flags: <defaults>
</compile_context>

<pallas_src>
import jax
import jax.numpy as jnp
from jax import lax
from jax.experimental import pallas as pl
from jax.experimental.pallas import tpu as pltpu

EPS = 1e-5
CPAD = 128          # lane-dense channel padding
COUT_FINAL = 48     # real channel count of the final feature map

# (name, kernel_size, in_channels) in forward order
LAYERS = [("conv1", 9, 1), ("G1c1", 5, 1), ("G1c2", 5, 32),
          ("conv2", 9, 48), ("G2c1", 5, 48), ("G2c2", 5, 32),
          ("conv3", 9, 48), ("G3c1", 5, 48), ("G3c2", 5, 32)]

SHIFT_ROW = {name: i for i, (name, _, _) in enumerate(LAYERS)}
MXU_OFF = {}
_off = 0
for _name, _k, _cin in LAYERS:
    if _cin > 1:
        MXU_OFF[_name] = _off
        _off += _k
N_TAPS = _off        # 43


# ----------------------------------------------------------------------------
# Fused kernel
# ----------------------------------------------------------------------------
def feature_kernel(x_ref, wc1_ref, wg1a_ref, wmxu_ref, shift_ref, o_ref):
    # x_ref: (BB, L, 128) f32, single input channel replicated across lanes.
    x = x_ref[...]

    def bias_relu(y, name):
        r = SHIFT_ROW[name]
        return jnp.maximum(y + shift_ref[r:r + 1, :], 0.0)

    def conv_cin1(inp, w_ref, name):
        """Valid Conv1d for Cin=1 as K broadcast-FMAs on the VPU.

        inp: (BB, L, 128) with the 1-channel signal replicated across lanes.
        w_ref: (K, 128) f32, row k = BN-folded weights of tap k (Cout in lanes).
        """
        K = w_ref.shape[0]
        n, L, C = inp.shape
        Lout = L - K + 1
        acc = inp[:, 0:Lout, :] * w_ref[0:1, :]
        for k in range(1, K):
            acc = acc + inp[:, k:k + Lout, :] * w_ref[k:k + 1, :]
        return bias_relu(acc, name)

    def conv_mxu(inp, name, K):
        """Valid Conv1d via K accumulating per-tap MXU matmuls (bf16 x bf16
        -> f32 accumulate)."""
        n, L, C = inp.shape
        Lout = L - K + 1
        off = MXU_OFF[name]
        xb = inp.astype(jnp.bfloat16)          # one cast per layer
        acc = jnp.dot(xb[:, 0:Lout, :].reshape(n * Lout, C), wmxu_ref[off],
                      preferred_element_type=jnp.float32)
        for k in range(1, K):
            acc = acc + jnp.dot(xb[:, k:k + Lout, :].reshape(n * Lout, C),
                                wmxu_ref[off + k],
                                preferred_element_type=jnp.float32)
        return bias_relu(acc.reshape(n, Lout, C), name)

    def add_pool(a, b):
        """MaxPool1d(kernel=2, stride=2)(a + b) along the length axis."""
        n, L, C = a.shape
        Lp = L // 2
        s = (a + b)[:, :2 * Lp, :]
        return jnp.max(s.reshape(n, Lp, 2, C), axis=2)

    # stage 1
    s1 = conv_cin1(x, wc1_ref, "conv1")        # (BB, L-8, 128)
    g = conv_cin1(x, wg1a_ref, "G1c1")         # (BB, L-4, 128)
    g = conv_mxu(g, "G1c2", 5)                 # (BB, L-8, 128)
    p = add_pool(s1, g)

    # stage 2
    s2 = conv_mxu(p, "conv2", 9)
    g = conv_mxu(p, "G2c1", 5)
    g = conv_mxu(g, "G2c2", 5)
    p = add_pool(s2, g)

    # stage 3
    s3 = conv_mxu(p, "conv3", 9)
    g = conv_mxu(p, "G3c1", 5)
    g = conv_mxu(g, "G3c2", 5)
    p = add_pool(s3, g)

    o_ref[...] = p.astype(o_ref.dtype)


# ----------------------------------------------------------------------------
# Parameters (deterministic synthetic init, PyTorch-style shapes)
# ----------------------------------------------------------------------------
def make_conv_bn(key, cin, cout, k):
    k1, k2, k3, k4 = jax.random.split(key, 4)
    w = 0.1 * jax.random.normal(k1, (cout, cin, k), jnp.float32)   # (Cout,Cin,K)
    b = 0.1 * jax.random.normal(k2, (cout,), jnp.float32)
    gamma = 1.0 + 0.1 * jax.random.normal(k3, (cout,), jnp.float32)
    beta = 0.1 * jax.random.normal(k4, (cout,), jnp.float32)
    mean = jnp.zeros((cout,), jnp.float32)       # running_mean init
    var = jnp.ones((cout,), jnp.float32)         # running_var init
    return {"w_oik": w, "b": b, "gamma": gamma, "beta": beta,
            "mean": mean, "var": var}


def init_params(key):
    keys = jax.random.split(key, 9)
    return {
        "conv1": make_conv_bn(keys[0], 1, 48, 9),
        "conv2": make_conv_bn(keys[1], 48, 48, 9),
        "conv3": make_conv_bn(keys[2], 48, 48, 9),
        "G1": {"c1": make_conv_bn(keys[3], 1, 32, 5),
               "c2": make_conv_bn(keys[4], 32, 48, 5)},
        "G2": {"c1": make_conv_bn(keys[5], 48, 32, 5),
               "c2": make_conv_bn(keys[6], 32, 48, 5)},
        "G3": {"c1": make_conv_bn(keys[7], 48, 32, 5),
               "c2": make_conv_bn(keys[8], 32, 48, 5)},
    }


def pack_params(params):
    """Fold BN into conv weights and pack them into kernel-ready arrays."""
    by_name = {
        "conv1": params["conv1"], "conv2": params["conv2"], "conv3": params["conv3"],
        "G1c1": params["G1"]["c1"], "G1c2": params["G1"]["c2"],
        "G2c1": params["G2"]["c1"], "G2c2": params["G2"]["c2"],
        "G3c1": params["G3"]["c1"], "G3c2": params["G3"]["c2"],
    }

    shifts = jnp.zeros((len(LAYERS), CPAD), jnp.float32)
    cin1 = {}
    mxu_taps = []
    for i, (name, K, cin) in enumerate(LAYERS):
        p = by_name[name]
        scale = p["gamma"] / jnp.sqrt(p["var"] + EPS)
        shift = p["beta"] + (p["b"] - p["mean"]) * scale
        w = p["w_oik"] * scale[:, None, None]          # (Cout, Cin, K), BN folded
        cout = w.shape[0]
        assert w.shape == (cout, cin, K)
        shifts = shifts.at[i, :cout].set(shift)
        if cin == 1:
            wk = jnp.zeros((K, CPAD), jnp.float32).at[:, :cout].set(w[:, 0, :].T)
            cin1[name] = wk
        else:
            for k in range(K):
                tap = jnp.zeros((CPAD, CPAD), jnp.float32)
                tap = tap.at[:cin, :cout].set(w[:, :, k].T)      # (Cin, Cout)
                mxu_taps.append(tap)

    assert len(mxu_taps) == N_TAPS
    wmxu = jnp.stack(mxu_taps, axis=0).astype(jnp.bfloat16)      # (43, 128, 128)
    return {"wc1": cin1["conv1"], "wg1a": cin1["G1c1"],
            "wmxu": wmxu, "shifts": shifts}


# ----------------------------------------------------------------------------
# Forward pass (single fused pallas_call)
# ----------------------------------------------------------------------------
def feature_forward_pallas(x_ncl, params, *, num_blocks=None):
    N, Cin, L = x_ncl.shape
    assert Cin == 1, "Feature.conv1 expects a single input channel"
    l1 = L - 8;  p1 = l1 // 2
    l2 = p1 - 8; p2 = l2 // 2
    l3 = p2 - 8; p3 = l3 // 2
    assert l1 > 0 and l2 > 0 and l3 > 0 and p3 > 0, "input length too short"

    if num_blocks is None:
        # Two batch blocks keep both v7x TensorCores busy; on single-TC
        # v5e/v6e the extra grid step costs ~0.35us (pass num_blocks=1 there).
        num_blocks = 2 if N >= 2 else 1
    bb = -(-N // num_blocks)              # batch items per grid step
    n_pad = num_blocks * bb

    # Layout plumbing: NCL -> (N, L, 128) with the single channel replicated
    # across all 128 lanes (lets the Cin=1 convs run as pure VPU tap-FMAs).
    x = jnp.transpose(x_ncl, (0, 2, 1))                 # (N, L, 1)
    x = jnp.broadcast_to(x, (N, L, CPAD)).astype(jnp.float32)
    if n_pad != N:
        x = jnp.concatenate(
            [x, jnp.zeros((n_pad - N, L, CPAD), jnp.float32)], axis=0)

    pk = pack_params(params)

    out = pl.pallas_call(
        feature_kernel,
        out_shape=jax.ShapeDtypeStruct((n_pad, p3, CPAD), jnp.float32),
        grid=(num_blocks,),
        in_specs=[
            pl.BlockSpec((bb, L, CPAD), lambda i: (i, 0, 0)),
            pl.BlockSpec(pk["wc1"].shape, lambda i: (0, 0)),        # grid-invariant
            pl.BlockSpec(pk["wg1a"].shape, lambda i: (0, 0)),       # grid-invariant
            pl.BlockSpec(pk["wmxu"].shape, lambda i: (0, 0, 0)),    # grid-invariant
            pl.BlockSpec(pk["shifts"].shape, lambda i: (0, 0)),     # grid-invariant
        ],
        out_specs=pl.BlockSpec((bb, p3, CPAD), lambda i: (i, 0, 0)),
        compiler_params=pltpu.CompilerParams(
            dimension_semantics=("parallel",),
            vmem_limit_bytes=32 * 1024 * 1024),
    )(x, pk["wc1"], pk["wg1a"], pk["wmxu"], pk["shifts"])

    # Slice valid batch/channels and flatten channel-major (matches
    # PyTorch's x.view(N, C*L)).
    out = out[:N, :, :COUT_FINAL]             # (N, p3, 48)
    out = jnp.transpose(out, (0, 2, 1))       # (N, 48, p3)
    return out.reshape(N, -1)


# ----------------------------------------------------------------------------
# Pure-JAX reference (mirrors the PyTorch module, eval-mode BN)
# ----------------------------------------------------------------------------
def _conv_bn_relu_ref(x_ncl, p):
    y = lax.conv_general_dilated(
        x_ncl, p["w_oik"], window_strides=(1,), padding="VALID",
        dimension_numbers=("NCH", "OIH", "NCH"))
    y = y + p["b"][None, :, None]
    y = (y - p["mean"][None, :, None]) / jnp.sqrt(p["var"][None, :, None] + EPS)
    y = y * p["gamma"][None, :, None] + p["beta"][None, :, None]
    return jnp.maximum(y, 0.0)


def _maxpool_ref(x_ncl):
    N, C, L = x_ncl.shape
    Lp = L // 2
    return x_ncl[:, :, :2 * Lp].reshape(N, C, Lp, 2).max(-1)


def feature_forward_ref(x_ncl, params):
    def resblock(x, p):
        return _conv_bn_relu_ref(_conv_bn_relu_ref(x, p["c1"]), p["c2"])

    s1 = _conv_bn_relu_ref(x_ncl, params["conv1"])
    x = _maxpool_ref(s1 + resblock(x_ncl, params["G1"]))
    s2 = _conv_bn_relu_ref(x, params["conv2"])
    x = _maxpool_ref(s2 + resblock(x, params["G2"]))
    s3 = _conv_bn_relu_ref(x, params["conv3"])
    x = _maxpool_ref(s3 + resblock(x, params["G3"]))
    return x.reshape(x.shape[0], -1)


# ----------------------------------------------------------------------------
if __name__ == "__main__":
    key = jax.random.PRNGKey(0)
    kx, kp = jax.random.split(key)

    N, L = 2, 128                        # x: (batch, 1 channel, length)
    x = jax.random.normal(kx, (N, 1, L), jnp.float32)
    params = init_params(kp)

    out = feature_forward_pallas(x, params)
    out = jax.block_until_ready(out)

    ref = feature_forward_ref(x, params)
    assert out.shape == ref.shape, (out.shape, ref.shape)
    # Tolerance accounts for bf16 weight/activation quantization in the MXU
    # layers (f32 accumulation); reference is full f32.
    max_err = float(jnp.max(jnp.abs(out - ref)))
    assert jnp.allclose(out, ref, rtol=2e-2, atol=5e-2), max_err

    print("KERNEL_OK")
</pallas_src>

<mosaic_0001>
module attributes {stable_mosaic.version = 11 : i64} {
  func.func @feature_kernel(%arg0: i32, %arg1: memref<1x128x128xf32, #tpu.memory_space<vmem>>, %arg2: memref<9x128xf32, #tpu.memory_space<vmem>>, %arg3: memref<5x128xf32, #tpu.memory_space<vmem>>, %arg4: memref<43x128x128xbf16, #tpu.memory_space<vmem>>, %arg5: memref<9x128xf32, #tpu.memory_space<vmem>>, %arg6: memref<1x9x128xf32, #tpu.memory_space<vmem>>) attributes {dimension_semantics = [#tpu.dimension_semantics<parallel>], iteration_bounds = array<i64: 2>, scalar_prefetch = 0 : i64, scratch_operands = 0 : i64, tpu.core_type = #tpu.core_type<tc>, window_params = [{transform_indices = @transform_0, window_bounds = array<i64: 1, 128, 128>}, {pipeline_mode = #tpu.pipeline_mode<synchronous>, transform_indices = @transform_1, window_bounds = array<i64: 9, 128>}, {pipeline_mode = #tpu.pipeline_mode<synchronous>, transform_indices = @transform_2, window_bounds = array<i64: 5, 128>}, {pipeline_mode = #tpu.pipeline_mode<synchronous>, transform_indices = @transform_3, window_bounds = array<i64: 43, 128, 128>}, {pipeline_mode = #tpu.pipeline_mode<synchronous>, transform_indices = @transform_4, window_bounds = array<i64: 9, 128>}, {transform_indices = @transform_5, window_bounds = array<i64: 1, 9, 128>}]} {
    %c0 = arith.constant 0 : index
    %c0_0 = arith.constant 0 : index
    %c0_1 = arith.constant 0 : index
    %0 = vector.load %arg1[%c0, %c0_0, %c0_1] : memref<1x128x128xf32, #tpu.memory_space<vmem>>, vector<1x128x128xf32>
    %1 = vector.extract_strided_slice %0 {offsets = [0, 0, 0], sizes = [1, 120, 128], strides = [1, 1, 1]} : vector<1x128x128xf32> to vector<1x120x128xf32>
    %c0_2 = arith.constant 0 : index
    %c0_3 = arith.constant 0 : index
    %2 = vector.load %arg2[%c0_2, %c0_3] : memref<9x128xf32, #tpu.memory_space<vmem>>, vector<1x128xf32>
    %3 = vector.shape_cast %2 : vector<1x128xf32> to vector<1x1x128xf32>
    %4 = vector.broadcast %3 : vector<1x1x128xf32> to vector<1x120x128xf32>
    %5 = arith.mulf %1, %4 : vector<1x120x128xf32>
    %6 = vector.extract_strided_slice %0 {offsets = [0, 1, 0], sizes = [1, 120, 128], strides = [1, 1, 1]} : vector<1x128x128xf32> to vector<1x120x128xf32>
    %c1 = arith.constant 1 : index
    %c0_4 = arith.constant 0 : index
    %7 = vector.load %arg2[%c1, %c0_4] : memref<9x128xf32, #tpu.memory_space<vmem>>, vector<1x128xf32>
    %8 = vector.shape_cast %7 : vector<1x128xf32> to vector<1x1x128xf32>
    %9 = vector.broadcast %8 : vector<1x1x128xf32> to vector<1x120x128xf32>
    %10 = arith.mulf %6, %9 : vector<1x120x128xf32>
    %11 = arith.addf %5, %10 : vector<1x120x128xf32>
    %12 = vector.extract_strided_slice %0 {offsets = [0, 2, 0], sizes = [1, 120, 128], strides = [1, 1, 1]} : vector<1x128x128xf32> to vector<1x120x128xf32>
    %c2 = arith.constant 2 : index
    %c0_5 = arith.constant 0 : index
    %13 = vector.load %arg2[%c2, %c0_5] : memref<9x128xf32, #tpu.memory_space<vmem>>, vector<1x128xf32>
    %14 = vector.shape_cast %13 : vector<1x128xf32> to vector<1x1x128xf32>
    %15 = vector.broadcast %14 : vector<1x1x128xf32> to vector<1x120x128xf32>
    %16 = arith.mulf %12, %15 : vector<1x120x128xf32>
    %17 = arith.addf %11, %16 : vector<1x120x128xf32>
    %18 = vector.extract_strided_slice %0 {offsets = [0, 3, 0], sizes = [1, 120, 128], strides = [1, 1, 1]} : vector<1x128x128xf32> to vector<1x120x128xf32>
    %c3 = arith.constant 3 : index
    %c0_6 = arith.constant 0 : index
    %19 = vector.load %arg2[%c3, %c0_6] : memref<9x128xf32, #tpu.memory_space<vmem>>, vector<1x128xf32>
    %20 = vector.shape_cast %19 : vector<1x128xf32> to vector<1x1x128xf32>
    %21 = vector.broadcast %20 : vector<1x1x128xf32> to vector<1x120x128xf32>
    %22 = arith.mulf %18, %21 : vector<1x120x128xf32>
    %23 = arith.addf %17, %22 : vector<1x120x128xf32>
    %24 = vector.extract_strided_slice %0 {offsets = [0, 4, 0], sizes = [1, 120, 128], strides = [1, 1, 1]} : vector<1x128x128xf32> to vector<1x120x128xf32>
    %c4 = arith.constant 4 : index
    %c0_7 = arith.constant 0 : index
    %25 = vector.load %arg2[%c4, %c0_7] : memref<9x128xf32, #tpu.memory_space<vmem>>, vector<1x128xf32>
    %26 = vector.shape_cast %25 : vector<1x128xf32> to vector<1x1x128xf32>
    %27 = vector.broadcast %26 : vector<1x1x128xf32> to vector<1x120x128xf32>
    %28 = arith.mulf %24, %27 : vector<1x120x128xf32>
    %29 = arith.addf %23, %28 : vector<1x120x128xf32>
    %30 = vector.extract_strided_slice %0 {offsets = [0, 5, 0], sizes = [1, 120, 128], strides = [1, 1, 1]} : vector<1x128x128xf32> to vector<1x120x128xf32>
    %c5 = arith.constant 5 : index
    %c0_8 = arith.constant 0 : index
    %31 = vector.load %arg2[%c5, %c0_8] : memref<9x128xf32, #tpu.memory_space<vmem>>, vector<1x128xf32>
    %32 = vector.shape_cast %31 : vector<1x128xf32> to vector<1x1x128xf32>
    %33 = vector.broadcast %32 : vector<1x1x128xf32> to vector<1x120x128xf32>
    %34 = arith.mulf %30, %33 : vector<1x120x128xf32>
    %35 = arith.addf %29, %34 : vector<1x120x128xf32>
    %36 = vector.extract_strided_slice %0 {offsets = [0, 6, 0], sizes = [1, 120, 128], strides = [1, 1, 1]} : vector<1x128x128xf32> to vector<1x120x128xf32>
    %c6 = arith.constant 6 : index
    %c0_9 = arith.constant 0 : index
    %37 = vector.load %arg2[%c6, %c0_9] : memref<9x128xf32, #tpu.memory_space<vmem>>, vector<1x128xf32>
    %38 = vector.shape_cast %37 : vector<1x128xf32> to vector<1x1x128xf32>
    %39 = vector.broadcast %38 : vector<1x1x128xf32> to vector<1x120x128xf32>
    %40 = arith.mulf %36, %39 : vector<1x120x128xf32>
    %41 = arith.addf %35, %40 : vector<1x120x128xf32>
    %42 = vector.extract_strided_slice %0 {offsets = [0, 7, 0], sizes = [1, 120, 128], strides = [1, 1, 1]} : vector<1x128x128xf32> to vector<1x120x128xf32>
    %c7 = arith.constant 7 : index
    %c0_10 = arith.constant 0 : index
    %43 = vector.load %arg2[%c7, %c0_10] : memref<9x128xf32, #tpu.memory_space<vmem>>, vector<1x128xf32>
    %44 = vector.shape_cast %43 : vector<1x128xf32> to vector<1x1x128xf32>
    %45 = vector.broadcast %44 : vector<1x1x128xf32> to vector<1x120x128xf32>
    %46 = arith.mulf %42, %45 : vector<1x120x128xf32>
    %47 = arith.addf %41, %46 : vector<1x120x128xf32>
    %48 = vector.extract_strided_slice %0 {offsets = [0, 8, 0], sizes = [1, 120, 128], strides = [1, 1, 1]} : vector<1x128x128xf32> to vector<1x120x128xf32>
    %c8 = arith.constant 8 : index
    %c0_11 = arith.constant 0 : index
    %49 = vector.load %arg2[%c8, %c0_11] : memref<9x128xf32, #tpu.memory_space<vmem>>, vector<1x128xf32>
    %50 = vector.shape_cast %49 : vector<1x128xf32> to vector<1x1x128xf32>
    %51 = vector.broadcast %50 : vector<1x1x128xf32> to vector<1x120x128xf32>
    %52 = arith.mulf %48, %51 : vector<1x120x128xf32>
    %53 = arith.addf %47, %52 : vector<1x120x128xf32>
    %c0_12 = arith.constant 0 : index
    %c0_13 = arith.constant 0 : index
    %54 = vector.load %arg5[%c0_12, %c0_13] : memref<9x128xf32, #tpu.memory_space<vmem>>, vector<1x128xf32>
    %55 = vector.shape_cast %54 : vector<1x128xf32> to vector<1x1x128xf32>
    %56 = vector.broadcast %55 : vector<1x1x128xf32> to vector<1x120x128xf32>
    %57 = arith.addf %53, %56 : vector<1x120x128xf32>
    %cst = arith.constant 0.000000e+00 : f32
    %58 = vector.broadcast %cst : f32 to vector<1x120x128xf32>
    %59 = arith.maximumf %57, %58 : vector<1x120x128xf32>
    %60 = vector.extract_strided_slice %0 {offsets = [0, 0, 0], sizes = [1, 124, 128], strides = [1, 1, 1]} : vector<1x128x128xf32> to vector<1x124x128xf32>
    %c0_14 = arith.constant 0 : index
    %c0_15 = arith.constant 0 : index
    %61 = vector.load %arg3[%c0_14, %c0_15] : memref<5x128xf32, #tpu.memory_space<vmem>>, vector<1x128xf32>
    %62 = vector.shape_cast %61 : vector<1x128xf32> to vector<1x1x128xf32>
    %63 = vector.broadcast %62 : vector<1x1x128xf32> to vector<1x124x128xf32>
    %64 = arith.mulf %60, %63 : vector<1x124x128xf32>
    %65 = vector.extract_strided_slice %0 {offsets = [0, 1, 0], sizes = [1, 124, 128], strides = [1, 1, 1]} : vector<1x128x128xf32> to vector<1x124x128xf32>
    %c1_16 = arith.constant 1 : index
    %c0_17 = arith.constant 0 : index
    %66 = vector.load %arg3[%c1_16, %c0_17] : memref<5x128xf32, #tpu.memory_space<vmem>>, vector<1x128xf32>
    %67 = vector.shape_cast %66 : vector<1x128xf32> to vector<1x1x128xf32>
    %68 = vector.broadcast %67 : vector<1x1x128xf32> to vector<1x124x128xf32>
    %69 = arith.mulf %65, %68 : vector<1x124x128xf32>
    %70 = arith.addf %64, %69 : vector<1x124x128xf32>
    %71 = vector.extract_strided_slice %0 {offsets = [0, 2, 0], sizes = [1, 124, 128], strides = [1, 1, 1]} : vector<1x128x128xf32> to vector<1x124x128xf32>
    %c2_18 = arith.constant 2 : index
    %c0_19 = arith.constant 0 : index
    %72 = vector.load %arg3[%c2_18, %c0_19] : memref<5x128xf32, #tpu.memory_space<vmem>>, vector<1x128xf32>
    %73 = vector.shape_cast %72 : vector<1x128xf32> to vector<1x1x128xf32>
    %74 = vector.broadcast %73 : vector<1x1x128xf32> to vector<1x124x128xf32>
    %75 = arith.mulf %71, %74 : vector<1x124x128xf32>
    %76 = arith.addf %70, %75 : vector<1x124x128xf32>
    %77 = vector.extract_strided_slice %0 {offsets = [0, 3, 0], sizes = [1, 124, 128], strides = [1, 1, 1]} : vector<1x128x128xf32> to vector<1x124x128xf32>
    %c3_20 = arith.constant 3 : index
    %c0_21 = arith.constant 0 : index
    %78 = vector.load %arg3[%c3_20, %c0_21] : memref<5x128xf32, #tpu.memory_space<vmem>>, vector<1x128xf32>
    %79 = vector.shape_cast %78 : vector<1x128xf32> to vector<1x1x128xf32>
    %80 = vector.broadcast %79 : vector<1x1x128xf32> to vector<1x124x128xf32>
    %81 = arith.mulf %77, %80 : vector<1x124x128xf32>
    %82 = arith.addf %76, %81 : vector<1x124x128xf32>
    %83 = vector.extract_strided_slice %0 {offsets = [0, 4, 0], sizes = [1, 124, 128], strides = [1, 1, 1]} : vector<1x128x128xf32> to vector<1x124x128xf32>
    %c4_22 = arith.constant 4 : index
    %c0_23 = arith.constant 0 : index
    %84 = vector.load %arg3[%c4_22, %c0_23] : memref<5x128xf32, #tpu.memory_space<vmem>>, vector<1x128xf32>
    %85 = vector.shape_cast %84 : vector<1x128xf32> to vector<1x1x128xf32>
    %86 = vector.broadcast %85 : vector<1x1x128xf32> to vector<1x124x128xf32>
    %87 = arith.mulf %83, %86 : vector<1x124x128xf32>
    %88 = arith.addf %82, %87 : vector<1x124x128xf32>
    %c1_24 = arith.constant 1 : index
    %c0_25 = arith.constant 0 : index
    %89 = vector.load %arg5[%c1_24, %c0_25] : memref<9x128xf32, #tpu.memory_space<vmem>>, vector<1x128xf32>
    %90 = vector.shape_cast %89 : vector<1x128xf32> to vector<1x1x128xf32>
    %91 = vector.broadcast %90 : vector<1x1x128xf32> to vector<1x124x128xf32>
    %92 = arith.addf %88, %91 : vector<1x124x128xf32>
    %cst_26 = arith.constant 0.000000e+00 : f32
    %93 = vector.broadcast %cst_26 : f32 to vector<1x124x128xf32>
    %94 = arith.maximumf %92, %93 : vector<1x124x128xf32>
    %95 = arith.truncf %94 : vector<1x124x128xf32> to vector<1x124x128xbf16>
    %96 = vector.extract_strided_slice %95 {offsets = [0, 0, 0], sizes = [1, 120, 128], strides = [1, 1, 1]} : vector<1x124x128xbf16> to vector<1x120x128xbf16>
    %97 = vector.shape_cast %96 : vector<1x120x128xbf16> to vector<120x128xbf16>
    %c0_27 = arith.constant 0 : index
    %c0_28 = arith.constant 0 : index
    %c0_29 = arith.constant 0 : index
    %98 = vector.load %arg4[%c0_27, %c0_28, %c0_29] : memref<43x128x128xbf16, #tpu.memory_space<vmem>>, vector<1x128x128xbf16>
    %99 = vector.shape_cast %98 : vector<1x128x128xbf16> to vector<128x128xbf16>
    %cst_30 = arith.constant dense<0.000000e+00> : vector<120x128xf32>
    %100 = tpu.matmul %97, %99, %cst_30 {dimension_numbers = #tpu.dot_dimension_numbers<[1], [0], [0], [1], [0, 0, 1, 1], [], []>} : vector<120x128xbf16>, vector<128x128xbf16>, vector<120x128xf32> -> vector<120x128xf32>
    %101 = vector.extract_strided_slice %95 {offsets = [0, 1, 0], sizes = [1, 120, 128], strides = [1, 1, 1]} : vector<1x124x128xbf16> to vector<1x120x128xbf16>
    %102 = vector.shape_cast %101 : vector<1x120x128xbf16> to vector<120x128xbf16>
    %c1_31 = arith.constant 1 : index
    %c0_32 = arith.constant 0 : index
    %c0_33 = arith.constant 0 : index
    %103 = vector.load %arg4[%c1_31, %c0_32, %c0_33] : memref<43x128x128xbf16, #tpu.memory_space<vmem>>, vector<1x128x128xbf16>
    %104 = vector.shape_cast %103 : vector<1x128x128xbf16> to vector<128x128xbf16>
    %cst_34 = arith.constant dense<0.000000e+00> : vector<120x128xf32>
    %105 = tpu.matmul %102, %104, %cst_34 {dimension_numbers = #tpu.dot_dimension_numbers<[1], [0], [0], [1], [0, 0, 1, 1], [], []>} : vector<120x128xbf16>, vector<128x128xbf16>, vector<120x128xf32> -> vector<120x128xf32>
    %106 = arith.addf %100, %105 : vector<120x128xf32>
    %107 = vector.extract_strided_slice %95 {offsets = [0, 2, 0], sizes = [1, 120, 128], strides = [1, 1, 1]} : vector<1x124x128xbf16> to vector<1x120x128xbf16>
    %108 = vector.shape_cast %107 : vector<1x120x128xbf16> to vector<120x128xbf16>
    %c2_35 = arith.constant 2 : index
    %c0_36 = arith.constant 0 : index
    %c0_37 = arith.constant 0 : index
    %109 = vector.load %arg4[%c2_35, %c0_36, %c0_37] : memref<43x128x128xbf16, #tpu.memory_space<vmem>>, vector<1x128x128xbf16>
    %110 = vector.shape_cast %109 : vector<1x128x128xbf16> to vector<128x128xbf16>
    %cst_38 = arith.constant dense<0.000000e+00> : vector<120x128xf32>
    %111 = tpu.matmul %108, %110, %cst_38 {dimension_numbers = #tpu.dot_dimension_numbers<[1], [0], [0], [1], [0, 0, 1, 1], [], []>} : vector<120x128xbf16>, vector<128x128xbf16>, vector<120x128xf32> -> vector<120x128xf32>
    %112 = arith.addf %106, %111 : vector<120x128xf32>
    %113 = vector.extract_strided_slice %95 {offsets = [0, 3, 0], sizes = [1, 120, 128], strides = [1, 1, 1]} : vector<1x124x128xbf16> to vector<1x120x128xbf16>
    %114 = vector.shape_cast %113 : vector<1x120x128xbf16> to vector<120x128xbf16>
    %c3_39 = arith.constant 3 : index
    %c0_40 = arith.constant 0 : index
    %c0_41 = arith.constant 0 : index
    %115 = vector.load %arg4[%c3_39, %c0_40, %c0_41] : memref<43x128x128xbf16, #tpu.memory_space<vmem>>, vector<1x128x128xbf16>
    %116 = vector.shape_cast %115 : vector<1x128x128xbf16> to vector<128x128xbf16>
    %cst_42 = arith.constant dense<0.000000e+00> : vector<120x128xf32>
    %117 = tpu.matmul %114, %116, %cst_42 {dimension_numbers = #tpu.dot_dimension_numbers<[1], [0], [0], [1], [0, 0, 1, 1], [], []>} : vector<120x128xbf16>, vector<128x128xbf16>, vector<120x128xf32> -> vector<120x128xf32>
    %118 = arith.addf %112, %117 : vector<120x128xf32>
    %119 = vector.extract_strided_slice %95 {offsets = [0, 4, 0], sizes = [1, 120, 128], strides = [1, 1, 1]} : vector<1x124x128xbf16> to vector<1x120x128xbf16>
    %120 = vector.shape_cast %119 : vector<1x120x128xbf16> to vector<120x128xbf16>
    %c4_43 = arith.constant 4 : index
    %c0_44 = arith.constant 0 : index
    %c0_45 = arith.constant 0 : index
    %121 = vector.load %arg4[%c4_43, %c0_44, %c0_45] : memref<43x128x128xbf16, #tpu.memory_space<vmem>>, vector<1x128x128xbf16>
    %122 = vector.shape_cast %121 : vector<1x128x128xbf16> to vector<128x128xbf16>
    %cst_46 = arith.constant dense<0.000000e+00> : vector<120x128xf32>
    %123 = tpu.matmul %120, %122, %cst_46 {dimension_numbers = #tpu.dot_dimension_numbers<[1], [0], [0], [1], [0, 0, 1, 1], [], []>} : vector<120x128xbf16>, vector<128x128xbf16>, vector<120x128xf32> -> vector<120x128xf32>
    %124 = arith.addf %118, %123 : vector<120x128xf32>
    %125 = vector.shape_cast %124 : vector<120x128xf32> to vector<1x120x128xf32>
    %c2_47 = arith.constant 2 : index
    %c0_48 = arith.constant 0 : index
    %126 = vector.load %arg5[%c2_47, %c0_48] : memref<9x128xf32, #tpu.memory_space<vmem>>, vector<1x128xf32>
    %127 = vector.shape_cast %126 : vector<1x128xf32> to vector<1x1x128xf32>
    %128 = vector.broadcast %127 : vector<1x1x128xf32> to vector<1x120x128xf32>
    %129 = arith.addf %125, %128 : vector<1x120x128xf32>
    %cst_49 = arith.constant 0.000000e+00 : f32
    %130 = vector.broadcast %cst_49 : f32 to vector<1x120x128xf32>
    %131 = arith.maximumf %129, %130 : vector<1x120x128xf32>
    %132 = arith.addf %59, %131 : vector<1x120x128xf32>
    %133 = vector.shape_cast %132 : vector<1x120x128xf32> to vector<1x60x2x128xf32>
    %cst_50 = arith.constant dense<0xFF800000> : vector<1x60x128xf32>
    %134 = vector.multi_reduction <maximumf>, %133, %cst_50 [2] : vector<1x60x2x128xf32> to vector<1x60x128xf32>
    %135 = arith.truncf %134 : vector<1x60x128xf32> to vector<1x60x128xbf16>
    %136 = vector.extract_strided_slice %135 {offsets = [0, 0, 0], sizes = [1, 52, 128], strides = [1, 1, 1]} : vector<1x60x128xbf16> to vector<1x52x128xbf16>
    %137 = vector.shape_cast %136 : vector<1x52x128xbf16> to vector<52x128xbf16>
    %c5_51 = arith.constant 5 : index
    %c0_52 = arith.constant 0 : index
    %c0_53 = arith.constant 0 : index
    %138 = vector.load %arg4[%c5_51, %c0_52, %c0_53] : memref<43x128x128xbf16, #tpu.memory_space<vmem>>, vector<1x128x128xbf16>
    %139 = vector.shape_cast %138 : vector<1x128x128xbf16> to vector<128x128xbf16>
    %cst_54 = arith.constant dense<0.000000e+00> : vector<52x128xf32>
    %140 = tpu.matmul %137, %139, %cst_54 {dimension_numbers = #tpu.dot_dimension_numbers<[1], [0], [0], [1], [0, 0, 1, 1], [], []>} : vector<52x128xbf16>, vector<128x128xbf16>, vector<52x128xf32> -> vector<52x128xf32>
    %141 = vector.extract_strided_slice %135 {offsets = [0, 1, 0], sizes = [1, 52, 128], strides = [1, 1, 1]} : vector<1x60x128xbf16> to vector<1x52x128xbf16>
    %142 = vector.shape_cast %141 : vector<1x52x128xbf16> to vector<52x128xbf16>
    %c6_55 = arith.constant 6 : index
    %c0_56 = arith.constant 0 : index
    %c0_57 = arith.constant 0 : index
    %143 = vector.load %arg4[%c6_55, %c0_56, %c0_57] : memref<43x128x128xbf16, #tpu.memory_space<vmem>>, vector<1x128x128xbf16>
    %144 = vector.shape_cast %143 : vector<1x128x128xbf16> to vector<128x128xbf16>
    %cst_58 = arith.constant dense<0.000000e+00> : vector<52x128xf32>
    %145 = tpu.matmul %142, %144, %cst_58 {dimension_numbers = #tpu.dot_dimension_numbers<[1], [0], [0], [1], [0, 0, 1, 1], [], []>} : vector<52x128xbf16>, vector<128x128xbf16>, vector<52x128xf32> -> vector<52x128xf32>
    %146 = arith.addf %140, %145 : vector<52x128xf32>
    %147 = vector.extract_strided_slice %135 {offsets = [0, 2, 0], sizes = [1, 52, 128], strides = [1, 1, 1]} : vector<1x60x128xbf16> to vector<1x52x128xbf16>
    %148 = vector.shape_cast %147 : vector<1x52x128xbf16> to vector<52x128xbf16>
    %c7_59 = arith.constant 7 : index
    %c0_60 = arith.constant 0 : index
    %c0_61 = arith.constant 0 : index
    %149 = vector.load %arg4[%c7_59, %c0_60, %c0_61] : memref<43x128x128xbf16, #tpu.memory_space<vmem>>, vector<1x128x128xbf16>
    %150 = vector.shape_cast %149 : vector<1x128x128xbf16> to vector<128x128xbf16>
    %cst_62 = arith.constant dense<0.000000e+00> : vector<52x128xf32>
    %151 = tpu.matmul %148, %150, %cst_62 {dimension_numbers = #tpu.dot_dimension_numbers<[1], [0], [0], [1], [0, 0, 1, 1], [], []>} : vector<52x128xbf16>, vector<128x128xbf16>, vector<52x128xf32> -> vector<52x128xf32>
    %152 = arith.addf %146, %151 : vector<52x128xf32>
    %153 = vector.extract_strided_slice %135 {offsets = [0, 3, 0], sizes = [1, 52, 128], strides = [1, 1, 1]} : vector<1x60x128xbf16> to vector<1x52x128xbf16>
    %154 = vector.shape_cast %153 : vector<1x52x128xbf16> to vector<52x128xbf16>
    %c8_63 = arith.constant 8 : index
    %c0_64 = arith.constant 0 : index
    %c0_65 = arith.constant 0 : index
    %155 = vector.load %arg4[%c8_63, %c0_64, %c0_65] : memref<43x128x128xbf16, #tpu.memory_space<vmem>>, vector<1x128x128xbf16>
    %156 = vector.shape_cast %155 : vector<1x128x128xbf16> to vector<128x128xbf16>
    %cst_66 = arith.constant dense<0.000000e+00> : vector<52x128xf32>
    %157 = tpu.matmul %154, %156, %cst_66 {dimension_numbers = #tpu.dot_dimension_numbers<[1], [0], [0], [1], [0, 0, 1, 1], [], []>} : vector<52x128xbf16>, vector<128x128xbf16>, vector<52x128xf32> -> vector<52x128xf32>
    %158 = arith.addf %152, %157 : vector<52x128xf32>
    %159 = vector.extract_strided_slice %135 {offsets = [0, 4, 0], sizes = [1, 52, 128], strides = [1, 1, 1]} : vector<1x60x128xbf16> to vector<1x52x128xbf16>
    %160 = vector.shape_cast %159 : vector<1x52x128xbf16> to vector<52x128xbf16>
    %c9 = arith.constant 9 : index
    %c0_67 = arith.constant 0 : index
    %c0_68 = arith.constant 0 : index
    %161 = vector.load %arg4[%c9, %c0_67, %c0_68] : memref<43x128x128xbf16, #tpu.memory_space<vmem>>, vector<1x128x128xbf16>
    %162 = vector.shape_cast %161 : vector<1x128x128xbf16> to vector<128x128xbf16>
    %cst_69 = arith.constant dense<0.000000e+00> : vector<52x128xf32>
    %163 = tpu.matmul %160, %162, %cst_69 {dimension_numbers = #tpu.dot_dimension_numbers<[1], [0], [0], [1], [0, 0, 1, 1], [], []>} : vector<52x128xbf16>, vector<128x128xbf16>, vector<52x128xf32> -> vector<52x128xf32>
    %164 = arith.addf %158, %163 : vector<52x128xf32>
    %165 = vector.extract_strided_slice %135 {offsets = [0, 5, 0], sizes = [1, 52, 128], strides = [1, 1, 1]} : vector<1x60x128xbf16> to vector<1x52x128xbf16>
    %166 = vector.shape_cast %165 : vector<1x52x128xbf16> to vector<52x128xbf16>
    %c10 = arith.constant 10 : index
    %c0_70 = arith.constant 0 : index
    %c0_71 = arith.constant 0 : index
    %167 = vector.load %arg4[%c10, %c0_70, %c0_71] : memref<43x128x128xbf16, #tpu.memory_space<vmem>>, vector<1x128x128xbf16>
    %168 = vector.shape_cast %167 : vector<1x128x128xbf16> to vector<128x128xbf16>
    %cst_72 = arith.constant dense<0.000000e+00> : vector<52x128xf32>
    %169 = tpu.matmul %166, %168, %cst_72 {dimension_numbers = #tpu.dot_dimension_numbers<[1], [0], [0], [1], [0, 0, 1, 1], [], []>} : vector<52x128xbf16>, vector<128x128xbf16>, vector<52x128xf32> -> vector<52x128xf32>
    %170 = arith.addf %164, %169 : vector<52x128xf32>
    %171 = vector.extract_strided_slice %135 {offsets = [0, 6, 0], sizes = [1, 52, 128], strides = [1, 1, 1]} : vector<1x60x128xbf16> to vector<1x52x128xbf16>
    %172 = vector.shape_cast %171 : vector<1x52x128xbf16> to vector<52x128xbf16>
    %c11 = arith.constant 11 : index
    %c0_73 = arith.constant 0 : index
    %c0_74 = arith.constant 0 : index
    %173 = vector.load %arg4[%c11, %c0_73, %c0_74] : memref<43x128x128xbf16, #tpu.memory_space<vmem>>, vector<1x128x128xbf16>
    %174 = vector.shape_cast %173 : vector<1x128x128xbf16> to vector<128x128xbf16>
    %cst_75 = arith.constant dense<0.000000e+00> : vector<52x128xf32>
    %175 = tpu.matmul %172, %174, %cst_75 {dimension_numbers = #tpu.dot_dimension_numbers<[1], [0], [0], [1], [0, 0, 1, 1], [], []>} : vector<52x128xbf16>, vector<128x128xbf16>, vector<52x128xf32> -> vector<52x128xf32>
    %176 = arith.addf %170, %175 : vector<52x128xf32>
    %177 = vector.extract_strided_slice %135 {offsets = [0, 7, 0], sizes = [1, 52, 128], strides = [1, 1, 1]} : vector<1x60x128xbf16> to vector<1x52x128xbf16>
    %178 = vector.shape_cast %177 : vector<1x52x128xbf16> to vector<52x128xbf16>
    %c12 = arith.constant 12 : index
    %c0_76 = arith.constant 0 : index
    %c0_77 = arith.constant 0 : index
    %179 = vector.load %arg4[%c12, %c0_76, %c0_77] : memref<43x128x128xbf16, #tpu.memory_space<vmem>>, vector<1x128x128xbf16>
    %180 = vector.shape_cast %179 : vector<1x128x128xbf16> to vector<128x128xbf16>
    %cst_78 = arith.constant dense<0.000000e+00> : vector<52x128xf32>
    %181 = tpu.matmul %178, %180, %cst_78 {dimension_numbers = #tpu.dot_dimension_numbers<[1], [0], [0], [1], [0, 0, 1, 1], [], []>} : vector<52x128xbf16>, vector<128x128xbf16>, vector<52x128xf32> -> vector<52x128xf32>
    %182 = arith.addf %176, %181 : vector<52x128xf32>
    %183 = vector.extract_strided_slice %135 {offsets = [0, 8, 0], sizes = [1, 52, 128], strides = [1, 1, 1]} : vector<1x60x128xbf16> to vector<1x52x128xbf16>
    %184 = vector.shape_cast %183 : vector<1x52x128xbf16> to vector<52x128xbf16>
    %c13 = arith.constant 13 : index
    %c0_79 = arith.constant 0 : index
    %c0_80 = arith.constant 0 : index
    %185 = vector.load %arg4[%c13, %c0_79, %c0_80] : memref<43x128x128xbf16, #tpu.memory_space<vmem>>, vector<1x128x128xbf16>
    %186 = vector.shape_cast %185 : vector<1x128x128xbf16> to vector<128x128xbf16>
    %cst_81 = arith.constant dense<0.000000e+00> : vector<52x128xf32>
    %187 = tpu.matmul %184, %186, %cst_81 {dimension_numbers = #tpu.dot_dimension_numbers<[1], [0], [0], [1], [0, 0, 1, 1], [], []>} : vector<52x128xbf16>, vector<128x128xbf16>, vector<52x128xf32> -> vector<52x128xf32>
    %188 = arith.addf %182, %187 : vector<52x128xf32>
    %189 = vector.shape_cast %188 : vector<52x128xf32> to vector<1x52x128xf32>
    %c3_82 = arith.constant 3 : index
    %c0_83 = arith.constant 0 : index
    %190 = vector.load %arg5[%c3_82, %c0_83] : memref<9x128xf32, #tpu.memory_space<vmem>>, vector<1x128xf32>
    %191 = vector.shape_cast %190 : vector<1x128xf32> to vector<1x1x128xf32>
    %192 = vector.broadcast %191 : vector<1x1x128xf32> to vector<1x52x128xf32>
    %193 = arith.addf %189, %192 : vector<1x52x128xf32>
    %cst_84 = arith.constant 0.000000e+00 : f32
    %194 = vector.broadcast %cst_84 : f32 to vector<1x52x128xf32>
    %195 = arith.maximumf %193, %194 : vector<1x52x128xf32>
    %196 = arith.truncf %134 : vector<1x60x128xf32> to vector<1x60x128xbf16>
    %197 = vector.extract_strided_slice %196 {offsets = [0, 0, 0], sizes = [1, 56, 128], strides = [1, 1, 1]} : vector<1x60x128xbf16> to vector<1x56x128xbf16>
    %198 = vector.shape_cast %197 : vector<1x56x128xbf16> to vector<56x128xbf16>
    %c14 = arith.constant 14 : index
    %c0_85 = arith.constant 0 : index
    %c0_86 = arith.constant 0 : index
    %199 = vector.load %arg4[%c14, %c0_85, %c0_86] : memref<43x128x128xbf16, #tpu.memory_space<vmem>>, vector<1x128x128xbf16>
    %200 = vector.shape_cast %199 : vector<1x128x128xbf16> to vector<128x128xbf16>
    %cst_87 = arith.constant dense<0.000000e+00> : vector<56x128xf32>
    %201 = tpu.matmul %198, %200, %cst_87 {dimension_numbers = #tpu.dot_dimension_numbers<[1], [0], [0], [1], [0, 0, 1, 1], [], []>} : vector<56x128xbf16>, vector<128x128xbf16>, vector<56x128xf32> -> vector<56x128xf32>
    %202 = vector.extract_strided_slice %196 {offsets = [0, 1, 0], sizes = [1, 56, 128], strides = [1, 1, 1]} : vector<1x60x128xbf16> to vector<1x56x128xbf16>
    %203 = vector.shape_cast %202 : vector<1x56x128xbf16> to vector<56x128xbf16>
    %c15 = arith.constant 15 : index
    %c0_88 = arith.constant 0 : index
    %c0_89 = arith.constant 0 : index
    %204 = vector.load %arg4[%c15, %c0_88, %c0_89] : memref<43x128x128xbf16, #tpu.memory_space<vmem>>, vector<1x128x128xbf16>
    %205 = vector.shape_cast %204 : vector<1x128x128xbf16> to vector<128x128xbf16>
    %cst_90 = arith.constant dense<0.000000e+00> : vector<56x128xf32>
    %206 = tpu.matmul %203, %205, %cst_90 {dimension_numbers = #tpu.dot_dimension_numbers<[1], [0], [0], [1], [0, 0, 1, 1], [], []>} : vector<56x128xbf16>, vector<128x128xbf16>, vector<56x128xf32> -> vector<56x128xf32>
    %207 = arith.addf %201, %206 : vector<56x128xf32>
    %208 = vector.extract_strided_slice %196 {offsets = [0, 2, 0], sizes = [1, 56, 128], strides = [1, 1, 1]} : vector<1x60x128xbf16> to vector<1x56x128xbf16>
    %209 = vector.shape_cast %208 : vector<1x56x128xbf16> to vector<56x128xbf16>
    %c16 = arith.constant 16 : index
    %c0_91 = arith.constant 0 : index
    %c0_92 = arith.constant 0 : index
    %210 = vector.load %arg4[%c16, %c0_91, %c0_92] : memref<43x128x128xbf16, #tpu.memory_space<vmem>>, vector<1x128x128xbf16>
    %211 = vector.shape_cast %210 : vector<1x128x128xbf16> to vector<128x128xbf16>
    %cst_93 = arith.constant dense<0.000000e+00> : vector<56x128xf32>
    %212 = tpu.matmul %209, %211, %cst_93 {dimension_numbers = #tpu.dot_dimension_numbers<[1], [0], [0], [1], [0, 0, 1, 1], [], []>} : vector<56x128xbf16>, vector<128x128xbf16>, vector<56x128xf32> -> vector<56x128xf32>
    %213 = arith.addf %207, %212 : vector<56x128xf32>
    %214 = vector.extract_strided_slice %196 {offsets = [0, 3, 0], sizes = [1, 56, 128], strides = [1, 1, 1]} : vector<1x60x128xbf16> to vector<1x56x128xbf16>
    %215 = vector.shape_cast %214 : vector<1x56x128xbf16> to vector<56x128xbf16>
    %c17 = arith.constant 17 : index
    %c0_94 = arith.constant 0 : index
    %c0_95 = arith.constant 0 : index
    %216 = vector.load %arg4[%c17, %c0_94, %c0_95] : memref<43x128x128xbf16, #tpu.memory_space<vmem>>, vector<1x128x128xbf16>
    %217 = vector.shape_cast %216 : vector<1x128x128xbf16> to vector<128x128xbf16>
    %cst_96 = arith.constant dense<0.000000e+00> : vector<56x128xf32>
    %218 = tpu.matmul %215, %217, %cst_96 {dimension_numbers = #tpu.dot_dimension_numbers<[1], [0], [0], [1], [0, 0, 1, 1], [], []>} : vector<56x128xbf16>, vector<128x128xbf16>, vector<56x128xf32> -> vector<56x128xf32>
    %219 = arith.addf %213, %218 : vector<56x128xf32>
    %220 = vector.extract_strided_slice %196 {offsets = [0, 4, 0], sizes = [1, 56, 128], strides = [1, 1, 1]} : vector<1x60x128xbf16> to vector<1x56x128xbf16>
    %221 = vector.shape_cast %220 : vector<1x56x128xbf16> to vector<56x128xbf16>
    %c18 = arith.constant 18 : index
    %c0_97 = arith.constant 0 : index
    %c0_98 = arith.constant 0 : index
    %222 = vector.load %arg4[%c18, %c0_97, %c0_98] : memref<43x128x128xbf16, #tpu.memory_space<vmem>>, vector<1x128x128xbf16>
    %223 = vector.shape_cast %222 : vector<1x128x128xbf16> to vector<128x128xbf16>
    %cst_99 = arith.constant dense<0.000000e+00> : vector<56x128xf32>
    %224 = tpu.matmul %221, %223, %cst_99 {dimension_numbers = #tpu.dot_dimension_numbers<[1], [0], [0], [1], [0, 0, 1, 1], [], []>} : vector<56x128xbf16>, vector<128x128xbf16>, vector<56x128xf32> -> vector<56x128xf32>
    %225 = arith.addf %219, %224 : vector<56x128xf32>
    %226 = vector.shape_cast %225 : vector<56x128xf32> to vector<1x56x128xf32>
    %c4_100 = arith.constant 4 : index
    %c0_101 = arith.constant 0 : index
    %227 = vector.load %arg5[%c4_100, %c0_101] : memref<9x128xf32, #tpu.memory_space<vmem>>, vector<1x128xf32>
    %228 = vector.shape_cast %227 : vector<1x128xf32> to vector<1x1x128xf32>
    %229 = vector.broadcast %228 : vector<1x1x128xf32> to vector<1x56x128xf32>
    %230 = arith.addf %226, %229 : vector<1x56x128xf32>
    %cst_102 = arith.constant 0.000000e+00 : f32
    %231 = vector.broadcast %cst_102 : f32 to vector<1x56x128xf32>
    %232 = arith.maximumf %230, %231 : vector<1x56x128xf32>
    %233 = arith.truncf %232 : vector<1x56x128xf32> to vector<1x56x128xbf16>
    %234 = vector.extract_strided_slice %233 {offsets = [0, 0, 0], sizes = [1, 52, 128], strides = [1, 1, 1]} : vector<1x56x128xbf16> to vector<1x52x128xbf16>
    %235 = vector.shape_cast %234 : vector<1x52x128xbf16> to vector<52x128xbf16>
    %c19 = arith.constant 19 : index
    %c0_103 = arith.constant 0 : index
    %c0_104 = arith.constant 0 : index
    %236 = vector.load %arg4[%c19, %c0_103, %c0_104] : memref<43x128x128xbf16, #tpu.memory_space<vmem>>, vector<1x128x128xbf16>
    %237 = vector.shape_cast %236 : vector<1x128x128xbf16> to vector<128x128xbf16>
    %cst_105 = arith.constant dense<0.000000e+00> : vector<52x128xf32>
    %238 = tpu.matmul %235, %237, %cst_105 {dimension_numbers = #tpu.dot_dimension_numbers<[1], [0], [0], [1], [0, 0, 1, 1], [], []>} : vector<52x128xbf16>, vector<128x128xbf16>, vector<52x128xf32> -> vector<52x128xf32>
    %239 = vector.extract_strided_slice %233 {offsets = [0, 1, 0], sizes = [1, 52, 128], strides = [1, 1, 1]} : vector<1x56x128xbf16> to vector<1x52x128xbf16>
    %240 = vector.shape_cast %239 : vector<1x52x128xbf16> to vector<52x128xbf16>
    %c20 = arith.constant 20 : index
    %c0_106 = arith.constant 0 : index
    %c0_107 = arith.constant 0 : index
    %241 = vector.load %arg4[%c20, %c0_106, %c0_107] : memref<43x128x128xbf16, #tpu.memory_space<vmem>>, vector<1x128x128xbf16>
    %242 = vector.shape_cast %241 : vector<1x128x128xbf16> to vector<128x128xbf16>
    %cst_108 = arith.constant dense<0.000000e+00> : vector<52x128xf32>
    %243 = tpu.matmul %240, %242, %cst_108 {dimension_numbers = #tpu.dot_dimension_numbers<[1], [0], [0], [1], [0, 0, 1, 1], [], []>} : vector<52x128xbf16>, vector<128x128xbf16>, vector<52x128xf32> -> vector<52x128xf32>
    %244 = arith.addf %238, %243 : vector<52x128xf32>
    %245 = vector.extract_strided_slice %233 {offsets = [0, 2, 0], sizes = [1, 52, 128], strides = [1, 1, 1]} : vector<1x56x128xbf16> to vector<1x52x128xbf16>
    %246 = vector.shape_cast %245 : vector<1x52x128xbf16> to vector<52x128xbf16>
    %c21 = arith.constant 21 : index
    %c0_109 = arith.constant 0 : index
    %c0_110 = arith.constant 0 : index
    %247 = vector.load %arg4[%c21, %c0_109, %c0_110] : memref<43x128x128xbf16, #tpu.memory_space<vmem>>, vector<1x128x128xbf16>
    %248 = vector.shape_cast %247 : vector<1x128x128xbf16> to vector<128x128xbf16>
    %cst_111 = arith.constant dense<0.000000e+00> : vector<52x128xf32>
    %249 = tpu.matmul %246, %248, %cst_111 {dimension_numbers = #tpu.dot_dimension_numbers<[1], [0], [0], [1], [0, 0, 1, 1], [], []>} : vector<52x128xbf16>, vector<128x128xbf16>, vector<52x128xf32> -> vector<52x128xf32>
    %250 = arith.addf %244, %249 : vector<52x128xf32>
    %251 = vector.extract_strided_slice %233 {offsets = [0, 3, 0], sizes = [1, 52, 128], strides = [1, 1, 1]} : vector<1x56x128xbf16> to vector<1x52x128xbf16>
    %252 = vector.shape_cast %251 : vector<1x52x128xbf16> to vector<52x128xbf16>
    %c22 = arith.constant 22 : index
    %c0_112 = arith.constant 0 : index
    %c0_113 = arith.constant 0 : index
    %253 = vector.load %arg4[%c22, %c0_112, %c0_113] : memref<43x128x128xbf16, #tpu.memory_space<vmem>>, vector<1x128x128xbf16>
    %254 = vector.shape_cast %253 : vector<1x128x128xbf16> to vector<128x128xbf16>
    %cst_114 = arith.constant dense<0.000000e+00> : vector<52x128xf32>
    %255 = tpu.matmul %252, %254, %cst_114 {dimension_numbers = #tpu.dot_dimension_numbers<[1], [0], [0], [1], [0, 0, 1, 1], [], []>} : vector<52x128xbf16>, vector<128x128xbf16>, vector<52x128xf32> -> vector<52x128xf32>
    %256 = arith.addf %250, %255 : vector<52x128xf32>
    %257 = vector.extract_strided_slice %233 {offsets = [0, 4, 0], sizes = [1, 52, 128], strides = [1, 1, 1]} : vector<1x56x128xbf16> to vector<1x52x128xbf16>
    %258 = vector.shape_cast %257 : vector<1x52x128xbf16> to vector<52x128xbf16>
    %c23 = arith.constant 23 : index
    %c0_115 = arith.constant 0 : index
    %c0_116 = arith.constant 0 : index
    %259 = vector.load %arg4[%c23, %c0_115, %c0_116] : memref<43x128x128xbf16, #tpu.memory_space<vmem>>, vector<1x128x128xbf16>
    %260 = vector.shape_cast %259 : vector<1x128x128xbf16> to vector<128x128xbf16>
    %cst_117 = arith.constant dense<0.000000e+00> : vector<52x128xf32>
    %261 = tpu.matmul %258, %260, %cst_117 {dimension_numbers = #tpu.dot_dimension_numbers<[1], [0], [0], [1], [0, 0, 1, 1], [], []>} : vector<52x128xbf16>, vector<128x128xbf16>, vector<52x128xf32> -> vector<52x128xf32>
    %262 = arith.addf %256, %261 : vector<52x128xf32>
    %263 = vector.shape_cast %262 : vector<52x128xf32> to vector<1x52x128xf32>
    %c5_118 = arith.constant 5 : index
    %c0_119 = arith.constant 0 : index
    %264 = vector.load %arg5[%c5_118, %c0_119] : memref<9x128xf32, #tpu.memory_space<vmem>>, vector<1x128xf32>
    %265 = vector.shape_cast %264 : vector<1x128xf32> to vector<1x1x128xf32>
    %266 = vector.broadcast %265 : vector<1x1x128xf32> to vector<1x52x128xf32>
    %267 = arith.addf %263, %266 : vector<1x52x128xf32>
    %cst_120 = arith.constant 0.000000e+00 : f32
    %268 = vector.broadcast %cst_120 : f32 to vector<1x52x128xf32>
    %269 = arith.maximumf %267, %268 : vector<1x52x128xf32>
    %270 = arith.addf %195, %269 : vector<1x52x128xf32>
    %271 = vector.shape_cast %270 : vector<1x52x128xf32> to vector<1x26x2x128xf32>
    %cst_121 = arith.constant dense<0xFF800000> : vector<1x26x128xf32>
    %272 = vector.multi_reduction <maximumf>, %271, %cst_121 [2] : vector<1x26x2x128xf32> to vector<1x26x128xf32>
    %273 = arith.truncf %272 : vector<1x26x128xf32> to vector<1x26x128xbf16>
    %274 = vector.extract_strided_slice %273 {offsets = [0, 0, 0], sizes = [1, 18, 128], strides = [1, 1, 1]} : vector<1x26x128xbf16> to vector<1x18x128xbf16>
    %275 = vector.shape_cast %274 : vector<1x18x128xbf16> to vector<18x128xbf16>
    %c24 = arith.constant 24 : index
    %c0_122 = arith.constant 0 : index
    %c0_123 = arith.constant 0 : index
    %276 = vector.load %arg4[%c24, %c0_122, %c0_123] : memref<43x128x128xbf16, #tpu.memory_space<vmem>>, vector<1x128x128xbf16>
    %277 = vector.shape_cast %276 : vector<1x128x128xbf16> to vector<128x128xbf16>
    %cst_124 = arith.constant dense<0.000000e+00> : vector<18x128xf32>
    %278 = tpu.matmul %275, %277, %cst_124 {dimension_numbers = #tpu.dot_dimension_numbers<[1], [0], [0], [1], [0, 0, 1, 1], [], []>} : vector<18x128xbf16>, vector<128x128xbf16>, vector<18x128xf32> -> vector<18x128xf32>
    %279 = vector.extract_strided_slice %273 {offsets = [0, 1, 0], sizes = [1, 18, 128], strides = [1, 1, 1]} : vector<1x26x128xbf16> to vector<1x18x128xbf16>
    %280 = vector.shape_cast %279 : vector<1x18x128xbf16> to vector<18x128xbf16>
    %c25 = arith.constant 25 : index
    %c0_125 = arith.constant 0 : index
    %c0_126 = arith.constant 0 : index
    %281 = vector.load %arg4[%c25, %c0_125, %c0_126] : memref<43x128x128xbf16, #tpu.memory_space<vmem>>, vector<1x128x128xbf16>
    %282 = vector.shape_cast %281 : vector<1x128x128xbf16> to vector<128x128xbf16>
    %cst_127 = arith.constant dense<0.000000e+00> : vector<18x128xf32>
    %283 = tpu.matmul %280, %282, %cst_127 {dimension_numbers = #tpu.dot_dimension_numbers<[1], [0], [0], [1], [0, 0, 1, 1], [], []>} : vector<18x128xbf16>, vector<128x128xbf16>, vector<18x128xf32> -> vector<18x128xf32>
    %284 = arith.addf %278, %283 : vector<18x128xf32>
    %285 = vector.extract_strided_slice %273 {offsets = [0, 2, 0], sizes = [1, 18, 128], strides = [1, 1, 1]} : vector<1x26x128xbf16> to vector<1x18x128xbf16>
    %286 = vector.shape_cast %285 : vector<1x18x128xbf16> to vector<18x128xbf16>
    %c26 = arith.constant 26 : index
    %c0_128 = arith.constant 0 : index
    %c0_129 = arith.constant 0 : index
    %287 = vector.load %arg4[%c26, %c0_128, %c0_129] : memref<43x128x128xbf16, #tpu.memory_space<vmem>>, vector<1x128x128xbf16>
    %288 = vector.shape_cast %287 : vector<1x128x128xbf16> to vector<128x128xbf16>
    %cst_130 = arith.constant dense<0.000000e+00> : vector<18x128xf32>
    %289 = tpu.matmul %286, %288, %cst_130 {dimension_numbers = #tpu.dot_dimension_numbers<[1], [0], [0], [1], [0, 0, 1, 1], [], []>} : vector<18x128xbf16>, vector<128x128xbf16>, vector<18x128xf32> -> vector<18x128xf32>
    %290 = arith.addf %284, %289 : vector<18x128xf32>
    %291 = vector.extract_strided_slice %273 {offsets = [0, 3, 0], sizes = [1, 18, 128], strides = [1, 1, 1]} : vector<1x26x128xbf16> to vector<1x18x128xbf16>
    %292 = vector.shape_cast %291 : vector<1x18x128xbf16> to vector<18x128xbf16>
    %c27 = arith.constant 27 : index
    %c0_131 = arith.constant 0 : index
    %c0_132 = arith.constant 0 : index
    %293 = vector.load %arg4[%c27, %c0_131, %c0_132] : memref<43x128x128xbf16, #tpu.memory_space<vmem>>, vector<1x128x128xbf16>
    %294 = vector.shape_cast %293 : vector<1x128x128xbf16> to vector<128x128xbf16>
    %cst_133 = arith.constant dense<0.000000e+00> : vector<18x128xf32>
    %295 = tpu.matmul %292, %294, %cst_133 {dimension_numbers = #tpu.dot_dimension_numbers<[1], [0], [0], [1], [0, 0, 1, 1], [], []>} : vector<18x128xbf16>, vector<128x128xbf16>, vector<18x128xf32> -> vector<18x128xf32>
    %296 = arith.addf %290, %295 : vector<18x128xf32>
    %297 = vector.extract_strided_slice %273 {offsets = [0, 4, 0], sizes = [1, 18, 128], strides = [1, 1, 1]} : vector<1x26x128xbf16> to vector<1x18x128xbf16>
    %298 = vector.shape_cast %297 : vector<1x18x128xbf16> to vector<18x128xbf16>
    %c28 = arith.constant 28 : index
    %c0_134 = arith.constant 0 : index
    %c0_135 = arith.constant 0 : index
    %299 = vector.load %arg4[%c28, %c0_134, %c0_135] : memref<43x128x128xbf16, #tpu.memory_space<vmem>>, vector<1x128x128xbf16>
    %300 = vector.shape_cast %299 : vector<1x128x128xbf16> to vector<128x128xbf16>
    %cst_136 = arith.constant dense<0.000000e+00> : vector<18x128xf32>
    %301 = tpu.matmul %298, %300, %cst_136 {dimension_numbers = #tpu.dot_dimension_numbers<[1], [0], [0], [1], [0, 0, 1, 1], [], []>} : vector<18x128xbf16>, vector<128x128xbf16>, vector<18x128xf32> -> vector<18x128xf32>
    %302 = arith.addf %296, %301 : vector<18x128xf32>
    %303 = vector.extract_strided_slice %273 {offsets = [0, 5, 0], sizes = [1, 18, 128], strides = [1, 1, 1]} : vector<1x26x128xbf16> to vector<1x18x128xbf16>
    %304 = vector.shape_cast %303 : vector<1x18x128xbf16> to vector<18x128xbf16>
    %c29 = arith.constant 29 : index
    %c0_137 = arith.constant 0 : index
    %c0_138 = arith.constant 0 : index
    %305 = vector.load %arg4[%c29, %c0_137, %c0_138] : memref<43x128x128xbf16, #tpu.memory_space<vmem>>, vector<1x128x128xbf16>
    %306 = vector.shape_cast %305 : vector<1x128x128xbf16> to vector<128x128xbf16>
    %cst_139 = arith.constant dense<0.000000e+00> : vector<18x128xf32>
    %307 = tpu.matmul %304, %306, %cst_139 {dimension_numbers = #tpu.dot_dimension_numbers<[1], [0], [0], [1], [0, 0, 1, 1], [], []>} : vector<18x128xbf16>, vector<128x128xbf16>, vector<18x128xf32> -> vector<18x128xf32>
    %308 = arith.addf %302, %307 : vector<18x128xf32>
    %309 = vector.extract_strided_slice %273 {offsets = [0, 6, 0], sizes = [1, 18, 128], strides = [1, 1, 1]} : vector<1x26x128xbf16> to vector<1x18x128xbf16>
    %310 = vector.shape_cast %309 : vector<1x18x128xbf16> to vector<18x128xbf16>
    %c30 = arith.constant 30 : index
    %c0_140 = arith.constant 0 : index
    %c0_141 = arith.constant 0 : index
    %311 = vector.load %arg4[%c30, %c0_140, %c0_141] : memref<43x128x128xbf16, #tpu.memory_space<vmem>>, vector<1x128x128xbf16>
    %312 = vector.shape_cast %311 : vector<1x128x128xbf16> to vector<128x128xbf16>
    %cst_142 = arith.constant dense<0.000000e+00> : vector<18x128xf32>
    %313 = tpu.matmul %310, %312, %cst_142 {dimension_numbers = #tpu.dot_dimension_numbers<[1], [0], [0], [1], [0, 0, 1, 1], [], []>} : vector<18x128xbf16>, vector<128x128xbf16>, vector<18x128xf32> -> vector<18x128xf32>
    %314 = arith.addf %308, %313 : vector<18x128xf32>
    %315 = vector.extract_strided_slice %273 {offsets = [0, 7, 0], sizes = [1, 18, 128], strides = [1, 1, 1]} : vector<1x26x128xbf16> to vector<1x18x128xbf16>
    %316 = vector.shape_cast %315 : vector<1x18x128xbf16> to vector<18x128xbf16>
    %c31 = arith.constant 31 : index
    %c0_143 = arith.constant 0 : index
    %c0_144 = arith.constant 0 : index
    %317 = vector.load %arg4[%c31, %c0_143, %c0_144] : memref<43x128x128xbf16, #tpu.memory_space<vmem>>, vector<1x128x128xbf16>
    %318 = vector.shape_cast %317 : vector<1x128x128xbf16> to vector<128x128xbf16>
    %cst_145 = arith.constant dense<0.000000e+00> : vector<18x128xf32>
    %319 = tpu.matmul %316, %318, %cst_145 {dimension_numbers = #tpu.dot_dimension_numbers<[1], [0], [0], [1], [0, 0, 1, 1], [], []>} : vector<18x128xbf16>, vector<128x128xbf16>, vector<18x128xf32> -> vector<18x128xf32>
    %320 = arith.addf %314, %319 : vector<18x128xf32>
    %321 = vector.extract_strided_slice %273 {offsets = [0, 8, 0], sizes = [1, 18, 128], strides = [1, 1, 1]} : vector<1x26x128xbf16> to vector<1x18x128xbf16>
    %322 = vector.shape_cast %321 : vector<1x18x128xbf16> to vector<18x128xbf16>
    %c32 = arith.constant 32 : index
    %c0_146 = arith.constant 0 : index
    %c0_147 = arith.constant 0 : index
    %323 = vector.load %arg4[%c32, %c0_146, %c0_147] : memref<43x128x128xbf16, #tpu.memory_space<vmem>>, vector<1x128x128xbf16>
    %324 = vector.shape_cast %323 : vector<1x128x128xbf16> to vector<128x128xbf16>
    %cst_148 = arith.constant dense<0.000000e+00> : vector<18x128xf32>
    %325 = tpu.matmul %322, %324, %cst_148 {dimension_numbers = #tpu.dot_dimension_numbers<[1], [0], [0], [1], [0, 0, 1, 1], [], []>} : vector<18x128xbf16>, vector<128x128xbf16>, vector<18x128xf32> -> vector<18x128xf32>
    %326 = arith.addf %320, %325 : vector<18x128xf32>
    %327 = vector.shape_cast %326 : vector<18x128xf32> to vector<1x18x128xf32>
    %c6_149 = arith.constant 6 : index
    %c0_150 = arith.constant 0 : index
    %328 = vector.load %arg5[%c6_149, %c0_150] : memref<9x128xf32, #tpu.memory_space<vmem>>, vector<1x128xf32>
    %329 = vector.shape_cast %328 : vector<1x128xf32> to vector<1x1x128xf32>
    %330 = vector.broadcast %329 : vector<1x1x128xf32> to vector<1x18x128xf32>
    %331 = arith.addf %327, %330 : vector<1x18x128xf32>
    %cst_151 = arith.constant 0.000000e+00 : f32
    %332 = vector.broadcast %cst_151 : f32 to vector<1x18x128xf32>
    %333 = arith.maximumf %331, %332 : vector<1x18x128xf32>
    %334 = arith.truncf %272 : vector<1x26x128xf32> to vector<1x26x128xbf16>
    %335 = vector.extract_strided_slice %334 {offsets = [0, 0, 0], sizes = [1, 22, 128], strides = [1, 1, 1]} : vector<1x26x128xbf16> to vector<1x22x128xbf16>
    %336 = vector.shape_cast %335 : vector<1x22x128xbf16> to vector<22x128xbf16>
    %c33 = arith.constant 33 : index
    %c0_152 = arith.constant 0 : index
    %c0_153 = arith.constant 0 : index
    %337 = vector.load %arg4[%c33, %c0_152, %c0_153] : memref<43x128x128xbf16, #tpu.memory_space<vmem>>, vector<1x128x128xbf16>
    %338 = vector.shape_cast %337 : vector<1x128x128xbf16> to vector<128x128xbf16>
    %cst_154 = arith.constant dense<0.000000e+00> : vector<22x128xf32>
    %339 = tpu.matmul %336, %338, %cst_154 {dimension_numbers = #tpu.dot_dimension_numbers<[1], [0], [0], [1], [0, 0, 1, 1], [], []>} : vector<22x128xbf16>, vector<128x128xbf16>, vector<22x128xf32> -> vector<22x128xf32>
    %340 = vector.extract_strided_slice %334 {offsets = [0, 1, 0], sizes = [1, 22, 128], strides = [1, 1, 1]} : vector<1x26x128xbf16> to vector<1x22x128xbf16>
    %341 = vector.shape_cast %340 : vector<1x22x128xbf16> to vector<22x128xbf16>
    %c34 = arith.constant 34 : index
    %c0_155 = arith.constant 0 : index
    %c0_156 = arith.constant 0 : index
    %342 = vector.load %arg4[%c34, %c0_155, %c0_156] : memref<43x128x128xbf16, #tpu.memory_space<vmem>>, vector<1x128x128xbf16>
    %343 = vector.shape_cast %342 : vector<1x128x128xbf16> to vector<128x128xbf16>
    %cst_157 = arith.constant dense<0.000000e+00> : vector<22x128xf32>
    %344 = tpu.matmul %341, %343, %cst_157 {dimension_numbers = #tpu.dot_dimension_numbers<[1], [0], [0], [1], [0, 0, 1, 1], [], []>} : vector<22x128xbf16>, vector<128x128xbf16>, vector<22x128xf32> -> vector<22x128xf32>
    %345 = arith.addf %339, %344 : vector<22x128xf32>
    %346 = vector.extract_strided_slice %334 {offsets = [0, 2, 0], sizes = [1, 22, 128], strides = [1, 1, 1]} : vector<1x26x128xbf16> to vector<1x22x128xbf16>
    %347 = vector.shape_cast %346 : vector<1x22x128xbf16> to vector<22x128xbf16>
    %c35 = arith.constant 35 : index
    %c0_158 = arith.constant 0 : index
    %c0_159 = arith.constant 0 : index
    %348 = vector.load %arg4[%c35, %c0_158, %c0_159] : memref<43x128x128xbf16, #tpu.memory_space<vmem>>, vector<1x128x128xbf16>
    %349 = vector.shape_cast %348 : vector<1x128x128xbf16> to vector<128x128xbf16>
    %cst_160 = arith.constant dense<0.000000e+00> : vector<22x128xf32>
    %350 = tpu.matmul %347, %349, %cst_160 {dimension_numbers = #tpu.dot_dimension_numbers<[1], [0], [0], [1], [0, 0, 1, 1], [], []>} : vector<22x128xbf16>, vector<128x128xbf16>, vector<22x128xf32> -> vector<22x128xf32>
    %351 = arith.addf %345, %350 : vector<22x128xf32>
    %352 = vector.extract_strided_slice %334 {offsets = [0, 3, 0], sizes = [1, 22, 128], strides = [1, 1, 1]} : vector<1x26x128xbf16> to vector<1x22x128xbf16>
    %353 = vector.shape_cast %352 : vector<1x22x128xbf16> to vector<22x128xbf16>
    %c36 = arith.constant 36 : index
    %c0_161 = arith.constant 0 : index
    %c0_162 = arith.constant 0 : index
    %354 = vector.load %arg4[%c36, %c0_161, %c0_162] : memref<43x128x128xbf16, #tpu.memory_space<vmem>>, vector<1x128x128xbf16>
    %355 = vector.shape_cast %354 : vector<1x128x128xbf16> to vector<128x128xbf16>
    %cst_163 = arith.constant dense<0.000000e+00> : vector<22x128xf32>
    %356 = tpu.matmul %353, %355, %cst_163 {dimension_numbers = #tpu.dot_dimension_numbers<[1], [0], [0], [1], [0, 0, 1, 1], [], []>} : vector<22x128xbf16>, vector<128x128xbf16>, vector<22x128xf32> -> vector<22x128xf32>
    %357 = arith.addf %351, %356 : vector<22x128xf32>
    %358 = vector.extract_strided_slice %334 {offsets = [0, 4, 0], sizes = [1, 22, 128], strides = [1, 1, 1]} : vector<1x26x128xbf16> to vector<1x22x128xbf16>
    %359 = vector.shape_cast %358 : vector<1x22x128xbf16> to vector<22x128xbf16>
    %c37 = arith.constant 37 : index
    %c0_164 = arith.constant 0 : index
    %c0_165 = arith.constant 0 : index
    %360 = vector.load %arg4[%c37, %c0_164, %c0_165] : memref<43x128x128xbf16, #tpu.memory_space<vmem>>, vector<1x128x128xbf16>
    %361 = vector.shape_cast %360 : vector<1x128x128xbf16> to vector<128x128xbf16>
    %cst_166 = arith.constant dense<0.000000e+00> : vector<22x128xf32>
    %362 = tpu.matmul %359, %361, %cst_166 {dimension_numbers = #tpu.dot_dimension_numbers<[1], [0], [0], [1], [0, 0, 1, 1], [], []>} : vector<22x128xbf16>, vector<128x128xbf16>, vector<22x128xf32> -> vector<22x128xf32>
    %363 = arith.addf %357, %362 : vector<22x128xf32>
    %364 = vector.shape_cast %363 : vector<22x128xf32> to vector<1x22x128xf32>
    %c7_167 = arith.constant 7 : index
    %c0_168 = arith.constant 0 : index
    %365 = vector.load %arg5[%c7_167, %c0_168] : memref<9x128xf32, #tpu.memory_space<vmem>>, vector<1x128xf32>
    %366 = vector.shape_cast %365 : vector<1x128xf32> to vector<1x1x128xf32>
    %367 = vector.broadcast %366 : vector<1x1x128xf32> to vector<1x22x128xf32>
    %368 = arith.addf %364, %367 : vector<1x22x128xf32>
    %cst_169 = arith.constant 0.000000e+00 : f32
    %369 = vector.broadcast %cst_169 : f32 to vector<1x22x128xf32>
    %370 = arith.maximumf %368, %369 : vector<1x22x128xf32>
    %371 = arith.truncf %370 : vector<1x22x128xf32> to vector<1x22x128xbf16>
    %372 = vector.extract_strided_slice %371 {offsets = [0, 0, 0], sizes = [1, 18, 128], strides = [1, 1, 1]} : vector<1x22x128xbf16> to vector<1x18x128xbf16>
    %373 = vector.shape_cast %372 : vector<1x18x128xbf16> to vector<18x128xbf16>
    %c38 = arith.constant 38 : index
    %c0_170 = arith.constant 0 : index
    %c0_171 = arith.constant 0 : index
    %374 = vector.load %arg4[%c38, %c0_170, %c0_171] : memref<43x128x128xbf16, #tpu.memory_space<vmem>>, vector<1x128x128xbf16>
    %375 = vector.shape_cast %374 : vector<1x128x128xbf16> to vector<128x128xbf16>
    %cst_172 = arith.constant dense<0.000000e+00> : vector<18x128xf32>
    %376 = tpu.matmul %373, %375, %cst_172 {dimension_numbers = #tpu.dot_dimension_numbers<[1], [0], [0], [1], [0, 0, 1, 1], [], []>} : vector<18x128xbf16>, vector<128x128xbf16>, vector<18x128xf32> -> vector<18x128xf32>
    %377 = vector.extract_strided_slice %371 {offsets = [0, 1, 0], sizes = [1, 18, 128], strides = [1, 1, 1]} : vector<1x22x128xbf16> to vector<1x18x128xbf16>
    %378 = vector.shape_cast %377 : vector<1x18x128xbf16> to vector<18x128xbf16>
    %c39 = arith.constant 39 : index
    %c0_173 = arith.constant 0 : index
    %c0_174 = arith.constant 0 : index
    %379 = vector.load %arg4[%c39, %c0_173, %c0_174] : memref<43x128x128xbf16, #tpu.memory_space<vmem>>, vector<1x128x128xbf16>
    %380 = vector.shape_cast %379 : vector<1x128x128xbf16> to vector<128x128xbf16>
    %cst_175 = arith.constant dense<0.000000e+00> : vector<18x128xf32>
    %381 = tpu.matmul %378, %380, %cst_175 {dimension_numbers = #tpu.dot_dimension_numbers<[1], [0], [0], [1], [0, 0, 1, 1], [], []>} : vector<18x128xbf16>, vector<128x128xbf16>, vector<18x128xf32> -> vector<18x128xf32>
    %382 = arith.addf %376, %381 : vector<18x128xf32>
    %383 = vector.extract_strided_slice %371 {offsets = [0, 2, 0], sizes = [1, 18, 128], strides = [1, 1, 1]} : vector<1x22x128xbf16> to vector<1x18x128xbf16>
    %384 = vector.shape_cast %383 : vector<1x18x128xbf16> to vector<18x128xbf16>
    %c40 = arith.constant 40 : index
    %c0_176 = arith.constant 0 : index
    %c0_177 = arith.constant 0 : index
    %385 = vector.load %arg4[%c40, %c0_176, %c0_177] : memref<43x128x128xbf16, #tpu.memory_space<vmem>>, vector<1x128x128xbf16>
    %386 = vector.shape_cast %385 : vector<1x128x128xbf16> to vector<128x128xbf16>
    %cst_178 = arith.constant dense<0.000000e+00> : vector<18x128xf32>
    %387 = tpu.matmul %384, %386, %cst_178 {dimension_numbers = #tpu.dot_dimension_numbers<[1], [0], [0], [1], [0, 0, 1, 1], [], []>} : vector<18x128xbf16>, vector<128x128xbf16>, vector<18x128xf32> -> vector<18x128xf32>
    %388 = arith.addf %382, %387 : vector<18x128xf32>
    %389 = vector.extract_strided_slice %371 {offsets = [0, 3, 0], sizes = [1, 18, 128], strides = [1, 1, 1]} : vector<1x22x128xbf16> to vector<1x18x128xbf16>
    %390 = vector.shape_cast %389 : vector<1x18x128xbf16> to vector<18x128xbf16>
    %c41 = arith.constant 41 : index
    %c0_179 = arith.constant 0 : index
    %c0_180 = arith.constant 0 : index
    %391 = vector.load %arg4[%c41, %c0_179, %c0_180] : memref<43x128x128xbf16, #tpu.memory_space<vmem>>, vector<1x128x128xbf16>
    %392 = vector.shape_cast %391 : vector<1x128x128xbf16> to vector<128x128xbf16>
    %cst_181 = arith.constant dense<0.000000e+00> : vector<18x128xf32>
    %393 = tpu.matmul %390, %392, %cst_181 {dimension_numbers = #tpu.dot_dimension_numbers<[1], [0], [0], [1], [0, 0, 1, 1], [], []>} : vector<18x128xbf16>, vector<128x128xbf16>, vector<18x128xf32> -> vector<18x128xf32>
    %394 = arith.addf %388, %393 : vector<18x128xf32>
    %395 = vector.extract_strided_slice %371 {offsets = [0, 4, 0], sizes = [1, 18, 128], strides = [1, 1, 1]} : vector<1x22x128xbf16> to vector<1x18x128xbf16>
    %396 = vector.shape_cast %395 : vector<1x18x128xbf16> to vector<18x128xbf16>
    %c42 = arith.constant 42 : index
    %c0_182 = arith.constant 0 : index
    %c0_183 = arith.constant 0 : index
    %397 = vector.load %arg4[%c42, %c0_182, %c0_183] : memref<43x128x128xbf16, #tpu.memory_space<vmem>>, vector<1x128x128xbf16>
    %398 = vector.shape_cast %397 : vector<1x128x128xbf16> to vector<128x128xbf16>
    %cst_184 = arith.constant dense<0.000000e+00> : vector<18x128xf32>
    %399 = tpu.matmul %396, %398, %cst_184 {dimension_numbers = #tpu.dot_dimension_numbers<[1], [0], [0], [1], [0, 0, 1, 1], [], []>} : vector<18x128xbf16>, vector<128x128xbf16>, vector<18x128xf32> -> vector<18x128xf32>
    %400 = arith.addf %394, %399 : vector<18x128xf32>
    %401 = vector.shape_cast %400 : vector<18x128xf32> to vector<1x18x128xf32>
    %c8_185 = arith.constant 8 : index
    %c0_186 = arith.constant 0 : index
    %402 = vector.load %arg5[%c8_185, %c0_186] : memref<9x128xf32, #tpu.memory_space<vmem>>, vector<1x128xf32>
    %403 = vector.shape_cast %402 : vector<1x128xf32> to vector<1x1x128xf32>
    %404 = vector.broadcast %403 : vector<1x1x128xf32> to vector<1x18x128xf32>
    %405 = arith.addf %401, %404 : vector<1x18x128xf32>
    %cst_187 = arith.constant 0.000000e+00 : f32
    %406 = vector.broadcast %cst_187 : f32 to vector<1x18x128xf32>
    %407 = arith.maximumf %405, %406 : vector<1x18x128xf32>
    %408 = arith.addf %333, %407 : vector<1x18x128xf32>
    %409 = vector.shape_cast %408 : vector<1x18x128xf32> to vector<1x9x2x128xf32>
    %cst_188 = arith.constant dense<0xFF800000> : vector<1x9x128xf32>
    %410 = vector.multi_reduction <maximumf>, %409, %cst_188 [2] : vector<1x9x2x128xf32> to vector<1x9x128xf32>
    %c0_189 = arith.constant 0 : index
    %c0_190 = arith.constant 0 : index
    %c0_191 = arith.constant 0 : index
    %411 = vector.load %arg6[%c0_189, %c0_190, %c0_191] : memref<1x9x128xf32, #tpu.memory_space<vmem>>, vector<1x9x128xf32>
    tpu.vector_store %arg6[%c0_189, %c0_190, %c0_191], %410 {strides = array<i32>} : memref<1x9x128xf32, #tpu.memory_space<vmem>>, vector<1x9x128xf32>,
    return
  }
  func.func @transform_0(%arg0: i32) -> (i32, i32, i32) {
    %c0_i32 = arith.constant 0 : i32
    %c0_i32_0 = arith.constant 0 : i32
    %c0_i32_1 = arith.constant 0 : i32
    return %arg0, %c0_i32, %c0_i32_0 : i32, i32, i32
  }
  func.func @transform_1(%arg0: i32) -> (i32, i32) {
    %c0_i32 = arith.constant 0 : i32
    %c0_i32_0 = arith.constant 0 : i32
    %c0_i32_1 = arith.constant 0 : i32
    return %c0_i32, %c0_i32_0 : i32, i32
  }
  func.func @transform_2(%arg0: i32) -> (i32, i32) {
    %c0_i32 = arith.constant 0 : i32
    %c0_i32_0 = arith.constant 0 : i32
    %c0_i32_1 = arith.constant 0 : i32
    return %c0_i32, %c0_i32_0 : i32, i32
  }
  func.func @transform_3(%arg0: i32) -> (i32, i32, i32) {
    %c0_i32 = arith.constant 0 : i32
    %c0_i32_0 = arith.constant 0 : i32
    %c0_i32_1 = arith.constant 0 : i32
    %c0_i32_2 = arith.constant 0 : i32
    return %c0_i32, %c0_i32_0, %c0_i32_1 : i32, i32, i32
  }
  func.func @transform_4(%arg0: i32) -> (i32, i32) {
    %c0_i32 = arith.constant 0 : i32
    %c0_i32_0 = arith.constant 0 : i32
    %c0_i32_1 = arith.constant 0 : i32
    return %c0_i32, %c0_i32_0 : i32, i32
  }
  func.func @transform_5(%arg0: i32) -> (i32, i32, i32) {
    %c0_i32 = arith.constant 0 : i32
    %c0_i32_0 = arith.constant 0 : i32
    %c0_i32_1 = arith.constant 0 : i32
    return %arg0, %c0_i32, %c0_i32_0 : i32, i32, i32
  }
}

</mosaic_0001>

<bundles_post_ra>
// kernel: tpu_custom_call.1
= control target key start
LH: loop header
LB: loop body
LE: loop exit
PB: predicated region body
PF: predicated region fallthrough
CT: control target
= control target key end

     0   :  { %10 = vsyncpa [#allocation3], 0  ;;  %s16553_s0 = inlined_call_operand.hbm [shape: f32[2,128,128], index: 0, kind: input, shape index: {}]   ;;  %s16554_s1 = inlined_call_operand.hbm [shape: f32[9,128], index: 1, kind: input, shape index: {}]   ;;  %s16555_s2 = inlined_call_operand.hbm [shape: f32[5,128], index: 2, kind: input, shape index: {}]   ;;  %s16556_s3 = inlined_call_operand.hbm [shape: bf16[43,128,128], index: 3, kind: input, shape index: {}]   ;;  %s16557_s4 = inlined_call_operand.hbm [shape: f32[9,128], index: 4, kind: input, shape index: {}]   ;;  %s16558_s5 = inlined_call_operand.vmem [shape: f32[2,9,128], index: 5, kind: output, shape index: {}]  }
   0x1   :  { %12 = vsyncpa [#allocation3 + $0x1], 0 }
   0x2   :  { %13 = vsyncpa [#allocation5], 0 }
   0x3   :  { %14 = vsyncpa [#allocation8], 0  ;;  %s12496_s18 = smov 0   ;;  %s12498_s19 = smov 0  }
   0x4   :  { %s12500_s20 = smov 0   ;;  %s12502_s21 = smov 0  }
   0x5 LB: > { %s12515_s22 = sadd.s32 4294967295, %s12454_s21   ;;  %p40_p0 = scmp.ne.s32.totalorder %s12446_s19, %s12442_s18  ;;  %s12454_s21 = sphi %s12502_s21, %s17010_s21   ;;  %s12450_s20 = sphi %s12500_s20, %s17009_s20   ;;  %s12446_s19 = sphi %s12498_s19, %s17008_s19   ;;  %s12442_s18 = sphi %s12496_s18, %s17007_s18  }
   0x6   : > { %p16559_p1 = scmp.eq.s32.totalorder %s12515_s22, 0  ;;  %p9822_p2 = scmp.ge.s32.totalorder %s12454_s21, 1 }
   0x7   : > { %p161_p3 = scmp.lt.s32.totalorder %s12454_s21, 3  ;;  %s12456_s25 = smov [#allocation4]  }
   0x8   : > { %p12523_p4 = por %p16559_p1, %p40_p0  ;;  %s173_s26 = sshll.u32 %s12456_s25, 4  ;;  %s174_s26 = int_to_ptr.vmem [resolvable:$true] %s173_s26 }
   0x9   : > { %p12527_p5 = pnand %p9822_p2, %p161_p3  ;;  %s12457_s28 = smov [#allocation7]  }
   0xa   : > { %s16718_s23 = scalar_select %p12523_p4, 1, 0 }
   0xb   : > { %s16719_s24 = scalar_select %p12527_p5, 1, 0 }
   0xc   : > { %p11834_p6 = pneg %p12527_p5  ;;  %s197_s29 = sshll.u32 %s12457_s28, 4  ;;  %s12539_s29 = int_to_ptr.vmem [resolvable:$true] %s197_s29 }
   0xd   : > { %s12270_s7 = scalar_lea.hbm %s16554_s1, 256 }
   0xe   : > { %p12535_p7 = pnand %p11834_p6, %p16559_p1  ;;  %p12271_p8 = scmp.ne.s32.totalorder %s16554_s1, %s12270_s7 }
   0xf   : > { %p12277_p12 = scmp.lt.u32.totalorder %s12270_s7, %s16554_s1 }
  0x10   : > { %p12549_p9 = pneg %p12535_p7 }
  0x12   : > { %p12273_p10 = pnand %p12549_p9, %p12271_p8 }
  0x14   : > { %p12274_p11 = pneg %p12273_p10 }
  0x16   : > { %p12279_p13 = pnand %p12277_p12, %p12274_p11 }
  0x18   : > { %12282 = shalt.err (!%p12279_p13)
}
  0x19   : > { %s12283_s13 = scalar_lea.vmem %s174_s26, 256  ;;  %p12291_p6 = scmp.lt.s32.totalorder %s174_s26, %s174_s26 }
  0x1a   : > { %p12284_p0 = scmp.ne.s32.totalorder %s174_s26, %s12283_s13  ;;  %p12292_p1 = scmp.lt.s32.totalorder %s12283_s13, %s12283_s13 }
  0x1c   : > { %p12286_p2 = pnand %p12284_p0, %p12549_p9  ;;  %p12293_p4 = por %p12292_p1, %p12291_p6 }
  0x1e   : > { %p12287_p3 = pneg %p12286_p2 }
  0x20   : > { %p12294_p5 = pnand %p12293_p4, %p12287_p3 }
  0x22   : > { %12297 = shalt.err (!%p12294_p5)
}
  0x23   : > { %s12458_s14 = smov 128   ;;  %s12459_s15 = smov 8  }
  0x24   : > { %11837 = dma.hbm_to_vmem [thread:$0]  (!%p12535_p7), %s16554_s1, 256, %s174_s26, [#allocation5], %s12458_s14, %s12458_s14, %s12459_s15  }
  0x25   : > { %s12298_s28 = scalar_lea.hbm %s16556_s3, 44032 }
  0x26   : > { %p12299_p1 = scmp.ne.s32.totalorder %s16556_s3, %s12298_s28  ;;  %p12305_p8 = scmp.lt.u32.totalorder %s12298_s28, %s16556_s3 }
  0x28   : > { %p12301_p4 = pnand %p12299_p1, %p12549_p9 }
  0x2a   : > { %p12302_p5 = pneg %p12301_p4 }
  0x2c   : > { %p12307_p10 = pnand %p12305_p8, %p12302_p5 }
  0x2e   : > { %12310 = shalt.err (!%p12307_p10)
}
  0x2f   : > { %s12311_s26 = scalar_lea.vmem %s12539_s29, 44032  ;;  %p12319_p0 = scmp.lt.s32.totalorder %s12539_s29, %s12539_s29 }
  0x30   : > { %p12312_p11 = scmp.ne.s32.totalorder %s12539_s29, %s12311_s26  ;;  %p12320_p2 = scmp.lt.s32.totalorder %s12311_s26, %s12311_s26 }
  0x32   : > { %p12314_p12 = pnand %p12312_p11, %p12549_p9  ;;  %p12321_p3 = por %p12320_p2, %p12319_p0 }
  0x34   : > { %p12315_p13 = pneg %p12314_p12 }
  0x36   : > { %p12322_p6 = pnand %p12321_p3, %p12315_p13 }
  0x38   : > { %12325 = shalt.err (!%p12322_p6)
}
  0x39   : > { %s12460_s9 = smov 64   ;;  %s12461_s11 = smov 4  }
  0x3a   : > { %11843 = dma.hbm_to_vmem [thread:$0]  (!%p12535_p7), %s16556_s3, 44032, %s12539_s29, [#allocation8], %s12460_s9, %s12460_s9, %s12461_s11  }
  0x3b   : > { %s12462_s16 = smov [#allocation6]   ;;  %s12463_s18 = smov [#allocation9]  }
  0x3c   : > { %s187_s17 = sshll.u32 %s12462_s16, 4  ;;  %s210_s25 = sshll.u32 %s12463_s18, 4  ;;  %s188_s17 = int_to_ptr.vmem [resolvable:$true] %s187_s17  ;;  %s12591_s25 = int_to_ptr.vmem [resolvable:$true] %s210_s25 }
  0x3d   : > { %s12326_s6 = scalar_lea.hbm %s16555_s2, 128 }
  0x3e   : > { %p12327_p1 = scmp.ne.s32.totalorder %s16555_s2, %s12326_s6  ;;  %p12333_p8 = scmp.lt.u32.totalorder %s12326_s6, %s16555_s2 }
  0x40   : > { %p12329_p4 = pnand %p12327_p1, %p12549_p9 }
  0x42   : > { %p12330_p5 = pneg %p12329_p4 }
  0x44   : > { %p12335_p10 = pnand %p12333_p8, %p12330_p5 }
  0x46   : > { %12338 = shalt.err (!%p12335_p10)
}
  0x47   : > { %s12339_s9 = scalar_lea.vmem %s188_s17, 128  ;;  %p12347_p0 = scmp.lt.s32.totalorder %s188_s17, %s188_s17 }
  0x48   : > { %p12340_p11 = scmp.ne.s32.totalorder %s188_s17, %s12339_s9  ;;  %p12348_p2 = scmp.lt.s32.totalorder %s12339_s9, %s12339_s9 }
  0x4a   : > { %p12342_p12 = pnand %p12340_p11, %p12549_p9  ;;  %p12349_p3 = por %p12348_p2, %p12347_p0 }
  0x4c   : > { %p12343_p13 = pneg %p12342_p12 }
  0x4e   : > { %p12350_p6 = pnand %p12349_p3, %p12343_p13 }
  0x50   : > { %12353 = shalt.err (!%p12350_p6)
}
  0x51   : > { %11840 = dma.hbm_to_vmem [thread:$0]  (!%p12535_p7), %s16555_s2, 128, %s188_s17, [#allocation5]  }
  0x52   : > { %s12354_s18 = scalar_lea.hbm %s16557_s4, 256 }
  0x53   : > { %p12355_p1 = scmp.ne.s32.totalorder %s16557_s4, %s12354_s18  ;;  %p12361_p8 = scmp.lt.u32.totalorder %s12354_s18, %s16557_s4 }
  0x55   : > { %p12357_p4 = pnand %p12355_p1, %p12549_p9 }
  0x57   : > { %p12358_p5 = pneg %p12357_p4 }
  0x59   : > { %p12363_p10 = pnand %p12361_p8, %p12358_p5 }
  0x5b   : > { %12366 = shalt.err (!%p12363_p10)
}
  0x5c   : > { %s12367_s17 = scalar_lea.vmem %s12591_s25, 256  ;;  %p12375_p0 = scmp.lt.s32.totalorder %s12591_s25, %s12591_s25 }
  0x5d   : > { %p12368_p11 = scmp.ne.s32.totalorder %s12591_s25, %s12367_s17  ;;  %p12376_p2 = scmp.lt.s32.totalorder %s12367_s17, %s12367_s17 }
  0x5f   : > { %p12370_p12 = pnand %p12368_p11, %p12549_p9  ;;  %p12377_p3 = por %p12376_p2, %p12375_p0 }
  0x61   : > { %p12371_p13 = pneg %p12370_p12 }
  0x63   : > { %p12378_p6 = pnand %p12377_p3, %p12371_p13 }
  0x65   : > { %12381 = shalt.err (!%p12378_p6)
}
  0x66   : > { %11846 = dma.hbm_to_vmem [thread:$0]  (!%p12535_p7), %s16557_s4, 256, %s12591_s25, [#allocation8], %s12458_s14, %s12458_s14, %s12459_s15  }
  0x67   : > { %s12638_s10 = sadd.s32 1, %s12454_s21   ;;  %s27_s29 = sadd.s32 1, %s12450_s20 }
  0x68   : > { %s24_s27 = ssub.s32 %s12454_s21, %s12638_s10  ;;  %p34_p1 = scmp.ne.s32.totalorder %s12450_s20, %s12446_s19 }
  0x69   : > { %p25_p9 = scmp.eq.s32.totalorder %s24_s27, 0  ;;  %p35_p4 = scmp.eq.s32.totalorder %s12454_s21, 0 }
  0x6a   : > { %p11855_p8 = scmp.lt.s32.totalorder %s12454_s21, 2  ;;  %s224_s11 = sand.u32 1, %s12450_s20  }
  0x6b   : > { %s12647_s9 = scalar_select %p25_p9, %s12450_s20, %s27_s29  }
  0x6c   : > { %p36_p5 = por %p35_p4, %p34_p1  ;;  %s10208_s12 = sshll.u32 %s12454_s21, 11 }
  0x6d   : > { %s9828_s13 = sshll.u32 %s224_s11, 7  ;;  %s12655_s28 = scalar_lea.hbm %s16553_s0, %s10208_s12 }
  0x6e   : > { %s228_s25 = scalar_lea.vmem [#allocation2], %s9828_s13  ;;  %p12657_p7 = pnand %p11855_p8, %p36_p5 }
  0x6f   : > { %s235_s30 = sshll.u32 %s228_s25, 4  ;;  %s12663_s21 = scalar_lea.sflag [#allocation3], %s224_s11  ;;  %s12661_s30 = int_to_ptr.vmem [resolvable:$true] %s235_s30 }
  0x70   : > { %s12382_s7 = scalar_lea.hbm %s12655_s28, 2048  ;;  %p12384_p11 = pneg %p12657_p7 }
  0x71   : > { %p12383_p10 = scmp.ne.s32.totalorder %s12655_s28, %s12382_s7  ;;  %s12387_s26 = scalar_lea.hbm %s16553_s0, 4096 }
  0x72   : > { %p12388_p0 = scmp.lt.u32.totalorder %s12655_s28, %s16553_s0  ;;  %p12389_p2 = scmp.lt.u32.totalorder %s12387_s26, %s12382_s7 }
  0x73   : > { %p12385_p12 = pnand %p12384_p11, %p12383_p10  ;;  %p12391_p6 = scmp.lt.u32.totalorder %s12382_s7, %s12655_s28 }
  0x74   : > { %p12390_p3 = por %p12389_p2, %p12388_p0 }
  0x75   : > { %p12386_p13 = pneg %p12385_p12 }
  0x76   : > { %p12392_p9 = por %p12391_p6, %p12390_p3 }
  0x78   : > { %p12393_p1 = pnand %p12392_p9, %p12386_p13 }
  0x7a   : > { %12396 = shalt.err (!%p12393_p1)
}
  0x7b   : > { %s12397_s11 = scalar_lea.vmem %s12661_s30, 2048  ;;  %s12464_s12 = smov [#allocation2]  }
  0x7c   : > { %p12398_p4 = scmp.ne.s32.totalorder %s12661_s30, %s12397_s11  ;;  %s12402_s13 = sshll.u32 %s12464_s12, 4  ;;  %s12403_s13 = int_to_ptr.vmem [resolvable:$false] %s12402_s13 }
  0x7d   : > { %s12404_s16 = scalar_lea.vmem %s12403_s13, 4096  ;;  %p12405_p10 = scmp.lt.s32.totalorder %s12661_s30, %s12403_s13 }
  0x7e   : > { %p12400_p5 = pnand %p12398_p4, %p12384_p11  ;;  %p12406_p12 = scmp.lt.s32.totalorder %s12404_s16, %s12397_s11 }
  0x80   : > { %p12401_p8 = pneg %p12400_p5  ;;  %p12407_p0 = por %p12406_p12, %p12405_p10 }
  0x82   : > { %p12408_p2 = pnand %p12407_p0, %p12401_p8 }
  0x84   : > { %12411 = shalt.err (!%p12408_p2)
}
  0x85   : > { %11850 = dma.hbm_to_vmem [thread:$0]  (!%p12657_p7), %s12655_s28, 2048, %s12661_s30, %s12663_s21, %s12458_s14, %s12458_s14, %s12459_s15  }
  0x86   : > { %p16723_p11 = scmp.ne.s32.totalorder %s16719_s24, 0 }
  0x88   : > { %247 = sbr.rel (%p16723_p11) target bundleno = 2358 (0x936), region = 40 }
  0x8f   : > { %s249_s18 = sand.u32 1, %s12446_s19   ;;  %p16724_p13 = scmp.ne.s32.totalorder %s16718_s23, 0 }
  0x90   : > { %s9832_s25 = sshll.u32 %s249_s18, 7  ;;  %s250_s7 = scalar_lea.sflag [#allocation3], %s249_s18 }
  0x91   : > { %s12697_s17 = scalar_lea.vmem [#allocation2], %s9832_s25 }
  0x92   : > { %12429 = dma.done.wait (%p16724_p13), %s250_s7, 2048  }
  0x93   : > { %12431 = vsyncadd (%p16724_p13), %s250_s7, 4294965248  ;;  %p16725_p3 = scmp.eq.s32.totalorder %s12515_s22, 0 }
  0x95   : > { %12433 = dma.done.wait (%p16725_p3), [#allocation5], 384   ;;  %p16726_p7 = pmov %p16725_p3 }
  0x96   : > { %p16727_p6 = pmov %p16725_p3 }
  0x97   : > { %12435 = vsyncadd (%p16726_p7), [#allocation5], 4294966912 }
  0x98   : > { %12437 = dma.done.wait (%p16727_p6), [#allocation8], 44288   ;;  %p16728_p9 = pmov %p16725_p3 }
  0x99   : > { %v11901_v0 = vld [vmem:[#allocation7 + $0x40] sm:$0xff]   ;;  %v11902_v1 = vld [vmem:[#allocation7 + $0x48] sm:$0xff]   ;;  %v11903_v2 = vld [vmem:[#allocation7 + $0x50] sm:$0xff]   ;;  %vm375_vm0 = vcmask 1046528   ;;  %vm474_vm1 = vcmask 1045504   ;;  %vm573_vm2 = vcmask 1044480  }
  0x9a   : > { %12439 = vsyncadd (%p16728_p9), [#allocation8], 4294923008  ;;  %10708 = vmatprep.subr.bf16.mxu0 %v11901_v0  ;;  %v11904_v3 = vld [vmem:[#allocation7 + $0x58] sm:$0xff]   ;;  %v12712_v4 = vld [vmem:[%s12697_s17] sm:$0xff]  ;;  %vm672_vm3 = vcmask 1043456   ;;  %vm771_vm6 = vcmask 1042432  }
  0x9b   : > { %10709 = vmatpush3.bf16.msra.mxu0 %v11901_v0  ;;  %v12715_v5 = vld [vmem:[%s12697_s17 + $0x8] sm:$0xff]  ;;  %v12718_v6 = vld [vmem:[%s12697_s17 + $0x10] sm:$0xff]  ;;  %v12721_v7 = vld [vmem:[%s12697_s17 + $0x18] sm:$0xff]  ;;  %vm1600_vm4 = vsmask.f32 7424  ;;  %vm870_vm7 = vcmask 1041408  }
  0x9c   : > { %10710 = vmatprep.subr.bf16.mxu0 %v11902_v1  ;;  %v12724_v8 = vld [vmem:[%s12697_s17 + $0x20] sm:$0xff]  ;;  %v12726_v9 = vld [vmem:[#allocation6] ss:$0 sm:$0xff]  ;;  %v12736_v14 = vld [vmem:[#allocation6 + $0x1] ss:$0 sm:$0xff]  ;;  %vm969_vm8 = vcmask 1040384  }
  0x9d   : > { %v1106_v10 = vmul.f32 %v12726_v9, %v12712_v4  ;;  %v1107_v11 = vmul.f32 %v12726_v9, %v12715_v5  ;;  %v1108_v12 = vmul.f32 %v12726_v9, %v12718_v6  ;;  %v1109_v13 = vmul.f32 %v12726_v9, %v12721_v7  ;;  %v12738_v15 = vld [vmem:[#allocation6 + $0x2] ss:$0 sm:$0xff]  ;;  %v11905_v20 = vld [vmem:[#allocation7 + $0x60] sm:$0xff]   ;;  %v12768_v37 = vld [vmem:[#allocation6 + $0x3] ss:$0 sm:$0xff]  ;;  %p296_p1 = scmp.lt.s32.totalorder %s12515_s22, 1 }
  0x9e   : > { %v1127_v16 = vmul.f32 %v12736_v14, %v12712_v4  ;;  %v1128_v17 = vmul.f32 %v12736_v14, %v12715_v5  ;;  %v1129_v18 = vmul.f32 %v12736_v14, %v12718_v6  ;;  %v1130_v19 = vmul.f32 %v12736_v14, %v12721_v7  ;;  %v11906_v38 = vld [vmem:[#allocation7 + $0x68] sm:$0xff]   ;;  %v12785_v55 = vld [vmem:[#allocation6 + $0x4] ss:$0 sm:$0xff]  ;;  %v11907_v56 = vld [vmem:[#allocation7 + $0x70] sm:$0xff]  }
  0x9f   : > { %10711 = vmatpush3.bf16.msra.mxu0 %v11902_v1  ;;  %v12750_v21 = vmul.f32 %v12736_v14, %v12724_v8  ;;  %v1227_v22 = vmul.f32 %v12738_v15, %v12712_v4  ;;  %v1228_v23 = vmul.f32 %v12738_v15, %v12715_v5  ;;  %v1229_v24 = vmul.f32 %v12738_v15, %v12718_v6  ;;  %v11908_v1 = vld [vmem:[#allocation7 + $0x78] sm:$0xff]   ;;  %s17012_s22 = smov (!%p296_p1, %s12515_s22), 1 }
  0xa0   : > { %10712 = vmatprep.subr.bf16.mxu0 %v11903_v2  ;;  %v1159_v25 = vrot.slane %v1127_v16, 1  ;;  %v1160_v26 = vrot.slane %v1128_v17, 1  ;;  %v1162_v27 = vrot.slane %v1129_v18, 1  ;;  %v1164_v28 = vrot.slane %v1130_v19, 1  ;;  %s10209_s23 = sshll.u32 %s17012_s22, 4 }
  0xa1   : > { %v1166_v29 = vrot.slane %v12750_v21, 1  ;;  %v1230_v30 = vmul.f32 %v12738_v15, %v12721_v7  ;;  %v12763_v31 = vmul.f32 %v12738_v15, %v12724_v8  ;;  %v1259_v32 = vrot.slane %v1227_v22, 2  ;;  %v12813_v22 = vld [vmem:[%s12697_s17 + $0x30] sm:$0xff]  ;;  %s16528_s15 = scalar_lea.vmem %s16558_s5, %s10209_s23 }
  0xa2   : > { %v1161_v33 = vsel %vm375_vm0, %v1159_v25, %v1160_v26  ;;  %v1163_v34 = vsel %vm375_vm0, %v1160_v26, %v1162_v27  ;;  %v1165_v35 = vsel %vm375_vm0, %v1162_v27, %v1164_v28  ;;  %v1260_v36 = vrot.slane %v1228_v23, 2 }
  0xa3   : > { %10713 = vmatpush3.bf16.msra.mxu0 %v11903_v2  ;;  %v1167_v39 = vsel %vm375_vm0, %v1164_v28, %v1166_v29  ;;  %v1206_v40 = vadd.f32 %v1161_v33, %v1106_v10  ;;  %v1207_v41 = vadd.f32 %v1163_v34, %v1107_v11  ;;  %v1208_v42 = vadd.f32 %v1165_v35, %v1108_v12  ;;  %v12800_v12 = vld [vmem:[%s12697_s17 + $0x28] sm:$0xff]  ;;  %v12819_v28 = vld [vmem:[#allocation9 + $0x1] ss:$0 sm:$0xff] }
  0xa4   : > { %10714 = vmatprep.subr.bf16.mxu0 %v11904_v3  ;;  %v1209_v43 = vadd.f32 %v1167_v39, %v1109_v13  ;;  %v1261_v44 = vsel %vm474_vm1, %v1259_v32, %v1260_v36  ;;  %v1262_v45 = vrot.slane %v1229_v24, 2  ;;  %v1264_v46 = vrot.slane %v1230_v30, 2 }
  0xa5   : > { %v1266_v47 = vrot.slane %v12763_v31, 2  ;;  %v1306_v48 = vadd.f32 %v1261_v44, %v1206_v40  ;;  %v1327_v49 = vmul.f32 %v12768_v37, %v12712_v4  ;;  %v1328_v50 = vmul.f32 %v12768_v37, %v12715_v5  ;;  %v12837_v40 = vld [vmem:[#allocation7] sm:$0xff]  }
  0xa6   : > { %v1263_v51 = vsel %vm474_vm1, %v1260_v36, %v1262_v45  ;;  %v1265_v52 = vsel %vm474_vm1, %v1262_v45, %v1264_v46  ;;  %v1329_v53 = vmul.f32 %v12768_v37, %v12718_v6  ;;  %v1330_v54 = vmul.f32 %v12768_v37, %v12721_v7 }
  0xa7   : > { %10715 = vmatpush3.bf16.msra.mxu0 %v11904_v3  ;;  %v1267_v57 = vsel %vm474_vm1, %v1264_v46, %v1266_v47  ;;  %v1307_v58 = vadd.f32 %v1263_v51, %v1207_v41  ;;  %v1308_v59 = vadd.f32 %v1265_v52, %v1208_v42  ;;  %v12792_v60 = vmul.f32 %v12768_v37, %v12724_v8 }
  0xa8   : > { %10716 = vmatprep.subr.bf16.mxu0 %v11905_v20  ;;  %v1309_v61 = vadd.f32 %v1267_v57, %v1209_v43  ;;  %v1359_v62 = vrot.slane %v1327_v49, 3  ;;  %v1360_v63 = vrot.slane %v1328_v50, 3  ;;  %v1362_v0 = vrot.slane %v1329_v53, 3 }
  0xa9   : > { %v1364_v2 = vrot.slane %v1330_v54, 3  ;;  %v1366_v3 = vrot.slane %v12792_v60, 3  ;;  %v1427_v10 = vmul.f32 %v12785_v55, %v12712_v4  ;;  %v1428_v11 = vmul.f32 %v12785_v55, %v12715_v5 }
  0xaa   : > { %v1361_v13 = vsel %vm573_vm2, %v1359_v62, %v1360_v63  ;;  %v1363_v16 = vsel %vm573_vm2, %v1360_v63, %v1362_v0  ;;  %v1429_v17 = vmul.f32 %v12785_v55, %v12718_v6  ;;  %v1430_v18 = vmul.f32 %v12785_v55, %v12721_v7 }
  0xab   : > { %10717 = vmatpush3.bf16.msra.mxu0 %v11905_v20  ;;  %v1365_v19 = vsel %vm573_vm2, %v1362_v0, %v1364_v2  ;;  %v1367_v4 = vsel %vm573_vm2, %v1364_v2, %v1366_v3  ;;  %v1406_v5 = vadd.f32 %v1361_v13, %v1306_v48  ;;  %v1407_v20 = vadd.f32 %v1363_v16, %v1307_v58 }
  0xac   : > { %10718 = vmatprep.subr.bf16.mxu0 %v11906_v38  ;;  %v1408_v23 = vadd.f32 %v1365_v19, %v1308_v59  ;;  %v1409_v24 = vadd.f32 %v1367_v4, %v1309_v61  ;;  %v12817_v25 = vmul.f32 %v12785_v55, %v12724_v8  ;;  %v1459_v6 = vrot.slane %v1427_v10, 4 }
  0xad   : > { %v1460_v26 = vrot.slane %v1428_v11, 4  ;;  %v1462_v7 = vrot.slane %v1429_v17, 4  ;;  %v1464_v27 = vrot.slane %v1430_v18, 4  ;;  %v1110_v30 = vmul.f32 %v12726_v9, %v12724_v8  ;;  %v309_v18 = vld [vmem:[%s12697_s17 + $0x38] sm:$0xff] }
  0xae   : > { %v1466_v32 = vrot.slane %v12817_v25, 4  ;;  %v1111_v33 = vmul.f32 %v12726_v9, %v12800_v12  ;;  %v1132_v34 = vmul.f32 %v12736_v14, %v12800_v12  ;;  %v12830_v35 = vmul.f32 %v12736_v14, %v12813_v22 }
  0xaf   : > { %10719 = vmatpush3.bf16.msra.mxu0 %v11906_v38  ;;  %v1461_v36 = vsel %vm672_vm3, %v1459_v6, %v1460_v26  ;;  %v1463_v38 = vsel %vm672_vm3, %v1460_v26, %v1462_v7  ;;  %v1465_v8 = vsel %vm672_vm3, %v1462_v7, %v1464_v27  ;;  %v1232_v39 = vmul.f32 %v12738_v15, %v12800_v12  ;;  %v310_v6 = vld [vmem:[%s12697_s17 + $0x40] sm:$0xff] }
  0xb0   : > { %10720 = vmatprep.subr.bf16.mxu0 %v11907_v56  ;;  %v1467_v41 = vsel %vm672_vm3, %v1464_v27, %v1466_v32  ;;  %v1506_v42 = vadd.f32 %v1461_v36, %v1406_v5  ;;  %v1507_v43 = vadd.f32 %v1463_v38, %v1407_v20  ;;  %v1508_v44 = vadd.f32 %v1465_v8, %v1408_v23 }
  0xb1   : > { %v1509_v45 = vadd.f32 %v1467_v41, %v1409_v24  ;;  %v1168_v46 = vrot.slane %v1132_v34, 1  ;;  %v1170_v48 = vrot.slane %v12830_v35, 1  ;;  %v12843_v49 = vmul.f32 %v12738_v15, %v12813_v22 }
  0xb2   : > { %v1527_v50 = vadd.f32 %v12819_v28, %v1506_v42  ;;  %v1528_v51 = vadd.f32 %v12819_v28, %v1507_v43  ;;  %v1529_v52 = vadd.f32 %v12819_v28, %v1508_v44  ;;  %v1268_v53 = vrot.slane %v1232_v39, 2 }
  0xb3   : > { %10721 = vmatpush3.bf16.msra.mxu0 %v11907_v56  ;;  %v1530_v54 = vadd.f32 %v12819_v28, %v1509_v45  ;;  %v1169_v56 = vsel %vm375_vm0, %v1166_v29, %v1168_v46  ;;  %v1171_v57 = vsel %vm375_vm0, %v1168_v46, %v1170_v48  ;;  %v1270_v58 = vrot.slane %v12843_v49, 2 }
  0xb4   : > { %10722 = vmatprep.subr.bf16.mxu0 %v11908_v1  ;;  %v1543_v59 = vmax.f32 %v1527_v50, 0.0  ;;  %v1544_v61 = vmax.f32 %v1528_v51, 0.0  ;;  %v1545_v62 = vmax.f32 %v1529_v52, 0.0  ;;  %v1210_v63 = vadd.f32 %v1169_v56, %v1110_v30 }
  0xb5   : > { %v1546_v0 = vmax.f32 %v1530_v54, 0.0  ;;  %v1269_v21 = vsel %vm474_vm1, %v1266_v47, %v1268_v53  ;;  %v1271_v29 = vsel %vm474_vm1, %v1268_v53, %v1270_v58  ;;  %v1332_v11 = vmul.f32 %v12768_v37, %v12800_v12 }
  0xb6   : > { %v12861_v2 = vpack.c.bf16 %v1544_v61, %v1543_v59  ;;  %v1310_v10 = vadd.f32 %v1269_v21, %v1210_v63  ;;  %v1333_v13 = vmul.f32 %v12768_v37, %v12813_v22  ;;  %v1432_v31 = vmul.f32 %v12785_v55, %v12800_v12  ;;  %v311_v21 = vld [vmem:[%s12697_s17 + $0x48] sm:$0xff] }
  0xb7   : > { %10723 = vmatpush3.bf16.msra.mxu0 %v11908_v1  ;;  %v1211_v1 = vadd.f32 %v1171_v57, %v1111_v33  ;;  %v12867_v16 = vpack.c.bf16 %v1546_v0, %v1545_v62  ;;  %v12873_v47 = vmul.f32 %v12785_v55, %v12813_v22  ;;  %v1368_v5 = vrot.slane %v1332_v11, 3 }
  0xb8   : > { %10740 = vmatprep.subr.bf16.mxu0 %v12837_v40  ;;  %v1602_v19 = vshrl.u32 %v12861_v2, 16  ;;  %v1604_v4 = vshll.u32 %v12861_v2, 16  ;;  %v1370_v20 = vrot.slane %v1333_v13, 3  ;;  %v1468_v24 = vrot.slane %v1432_v31, 4  ;;  %v12923_v13 = vld [vmem:[%s12697_s17 + $0x50] sm:$0xff] }
  0xb9   : > { %v1311_v17 = vadd.f32 %v1271_v29, %v1211_v1  ;;  %v1609_v23 = vshll.u32 %v12867_v16, 16  ;;  %v1470_v25 = vrot.slane %v12873_v47, 4  ;;  %v1369_v26 = vsel %vm573_vm2, %v1366_v3, %v1368_v5 }
  0xba   : > { %v1606_v12 = vrot.slane %v1604_v4, 1  ;;  %v1371_v7 = vsel %vm573_vm2, %v1368_v5, %v1370_v20  ;;  %v1613_v27 = vshrl.u32 %v12867_v16, 16  ;;  %v1410_v33 = vadd.f32 %v1369_v26, %v1310_v10 }
  0xbb   : > { %v1611_v30 = vrot.slane %v1609_v23, 1  ;;  %v1411_v34 = vadd.f32 %v1371_v7, %v1311_v17  ;;  %v1469_v36 = vsel %vm672_vm3, %v1466_v32, %v1468_v24  ;;  %v1471_v8 = vsel %vm672_vm3, %v1468_v24, %v1470_v25 }
  0xbc   : > { %v1607_v38 = vor.u32 %v1606_v12, %v1602_v19  ;;  %v1112_v60 = vmul.f32 %v12726_v9, %v12813_v22  ;;  %v1134_v3 = vmul.f32 %v12736_v14, %v309_v18  ;;  %v1510_v39 = vadd.f32 %v1469_v36, %v1410_v33  ;;  %v11910_v36 = vld [vmem:[#allocation7 + $0x8] sm:$0xff]  }
  0xbd   : > { %v1511_v41 = vadd.f32 %v1471_v8, %v1411_v34  ;;  %v1113_v42 = vmul.f32 %v12726_v9, %v309_v18  ;;  %v1135_v43 = vmul.f32 %v12736_v14, %v310_v6  ;;  %v1234_v32 = vmul.f32 %v12738_v15, %v309_v18 }
  0xbe   : > { %v1612_v44 = vsel %vm1600_vm4, %v1607_v38, %v1611_v30  ;;  %v1172_v45 = vrot.slane %v1134_v3, 1  ;;  %v12902_v46 = vmul.f32 %v12738_v15, %v310_v6  ;;  %v1531_v49 = vadd.f32 %v12819_v28, %v1510_v39 }
  0xbf   : > { %10724 = vmatprep.mubr.bf16.mxu0 %v1612_v44  ;;  %v1532_v22 = vadd.f32 %v12819_v28, %v1511_v41  ;;  %v1174_v50 = vrot.slane %v1135_v43, 1  ;;  %v1334_v51 = vmul.f32 %v12768_v37, %v309_v18  ;;  %v1272_v53 = vrot.slane %v1234_v32, 2 }
  0xc0   : > { %v1173_v52 = vsel %vm375_vm0, %v1170_v48, %v1172_v45  ;;  %v1274_v54 = vrot.slane %v12902_v46, 2  ;;  %v12912_v56 = vmul.f32 %v12768_v37, %v310_v6  ;;  %v1547_v57 = vmax.f32 %v1531_v49, 0.0 }
  0xc1   : > { %v1548_v59 = vmax.f32 %v1532_v22, 0.0  ;;  %v1175_v61 = vsel %vm375_vm0, %v1172_v45, %v1174_v50  ;;  %v1212_v62 = vadd.f32 %v1173_v52, %v1112_v60  ;;  %v1273_v0 = vsel %vm474_vm1, %v1270_v58, %v1272_v53 }
  0xc2   : > { %v1213_v63 = vadd.f32 %v1175_v61, %v1113_v42  ;;  %v1275_v1 = vsel %vm474_vm1, %v1272_v53, %v1274_v54  ;;  %v1372_v35 = vrot.slane %v1334_v51, 3  ;;  %v1374_v10 = vrot.slane %v12912_v56, 3  ;;  %v11911_v51 = vld [vmem:[#allocation7 + $0x10] sm:$0xff]  }
  0xc3   : > { %v12918_v48 = vpack.c.bf16 %v1548_v59, %v1547_v57  ;;  %v1312_v29 = vadd.f32 %v1273_v0, %v1212_v62  ;;  %v1434_v11 = vmul.f32 %v12785_v55, %v309_v18  ;;  %v1615_v17 = vor.u32 %v1613_v27, %v1611_v30 }
  0xc4   : > { %v1313_v31 = vadd.f32 %v1275_v1, %v1213_v63  ;;  %v1373_v47 = vsel %vm573_vm2, %v1370_v20, %v1372_v35  ;;  %v12929_v58 = vmul.f32 %v12785_v55, %v310_v6  ;;  %v1375_v24 = vsel %vm573_vm2, %v1372_v35, %v1374_v10  ;;  %v11912_v35 = vld [vmem:[#allocation7 + $0x18] sm:$0xff]  }
  0xc5   : > { %v1617_v5 = vshll.u32 %v12918_v48, 16  ;;  %v1412_v12 = vadd.f32 %v1373_v47, %v1312_v29  ;;  %v1472_v26 = vrot.slane %v1434_v11, 4  ;;  %v1114_v34 = vmul.f32 %v12726_v9, %v310_v6 }
  0xc6   : > { %v1413_v7 = vadd.f32 %v1375_v24, %v1313_v31  ;;  %v1474_v18 = vrot.slane %v12929_v58, 4  ;;  %v1136_v20 = vmul.f32 %v12736_v14, %v311_v21  ;;  %v1621_v60 = vshrl.u32 %v12918_v48, 16 }
  0xc7   : > { %v1619_v33 = vrot.slane %v1617_v5, 1  ;;  %v1473_v30 = vsel %vm672_vm3, %v1470_v25, %v1472_v26  ;;  %v12943_v3 = vmul.f32 %v12736_v14, %v12923_v13  ;;  %v1115_v42 = vmul.f32 %v12726_v9, %v311_v21 }
  0xc8   : > { %v1475_v38 = vsel %vm672_vm3, %v1472_v26, %v1474_v18  ;;  %v1512_v8 = vadd.f32 %v1473_v30, %v1412_v12  ;;  %v1176_v25 = vrot.slane %v1136_v20, 1  ;;  %v1236_v44 = vmul.f32 %v12738_v15, %v311_v21  ;;  %v314_v12 = vld [vmem:[%s12697_s17 + $0x60] sm:$0xff] }
  0xc9   : > { %v1620_v39 = vsel %vm1600_vm4, %v1615_v17, %v1619_v33  ;;  %v1513_v41 = vadd.f32 %v1475_v38, %v1413_v7  ;;  %v1178_v43 = vrot.slane %v12943_v3, 1  ;;  %v12952_v45 = vmul.f32 %v12738_v15, %v12923_v13 }
  0xca   : > { %10725 = vmatmul.mubr.bf16.vlgmr.msra.gmra.mrb[0].mxu0 %v1620_v39  ;;  %v1533_v6 = vadd.f32 %v12819_v28, %v1512_v8  ;;  %v1177_v46 = vsel %vm375_vm0, %v1174_v50, %v1176_v25  ;;  %v1336_v49 = vmul.f32 %v12768_v37, %v311_v21  ;;  %v12960_v22 = vmul.f32 %v12768_v37, %v12923_v13 }
  0xcb   : > { %10741 = vmatpush3.bf16.msra.mxu0 %v12837_v40  ;;  %v1534_v32 = vadd.f32 %v12819_v28, %v1513_v41  ;;  %v1179_v53 = vsel %vm375_vm0, %v1176_v25, %v1178_v43  ;;  %v1214_v56 = vadd.f32 %v1177_v46, %v1114_v34  ;;  %v1276_v57 = vrot.slane %v1236_v44, 2 }
  0xcc   : > { %10742 = vmatprep.subr.bf16.mxu0 %v11910_v36  ;;  %v1549_v52 = vmax.f32 %v1533_v6, 0.0  ;;  %v1215_v59 = vadd.f32 %v1179_v53, %v1115_v42  ;;  %v1278_v61 = vrot.slane %v12952_v45, 2  ;;  %v1376_v50 = vrot.slane %v1336_v49, 3  ;;  %v11913_v42 = vld [vmem:[#allocation7 + $0x20] sm:$0xff]  }
  0xcd   : > { %v1550_v40 = vmax.f32 %v1534_v32, 0.0  ;;  %v1277_v62 = vsel %vm474_vm1, %v1274_v54, %v1276_v57  ;;  %v1378_v63 = vrot.slane %v12960_v22, 3  ;;  %v1436_v0 = vmul.f32 %v12785_v55, %v311_v21  ;;  %v313_v21 = vld [vmem:[%s12697_s17 + $0x58] sm:$0xff] }
  0xce   : > { %v12971_v1 = vmul.f32 %v12785_v55, %v12923_v13  ;;  %v1279_v11 = vsel %vm474_vm1, %v1276_v57, %v1278_v61  ;;  %v1314_v17 = vadd.f32 %v1277_v62, %v1214_v56  ;;  %v1377_v31 = vsel %vm573_vm2, %v1374_v10, %v1376_v50 }
  0xcf   : > { %10743 = vmatpush3.bf16.msra.mxu0 %v11910_v36  ;;  %v12973_v29 = vpack.c.bf16 %v1550_v40, %v1549_v52  ;;  %v1315_v47 = vadd.f32 %v1279_v11, %v1215_v59  ;;  %v1379_v54 = vsel %vm573_vm2, %v1376_v50, %v1378_v63  ;;  %v1476_v58 = vrot.slane %v1436_v0, 4  ;;  %v315_v11 = vld [vmem:[%s12697_s17 + $0x68] sm:$0xff] }
  0xd0   : > { %v1478_v24 = vrot.slane %v12971_v1, 4  ;;  %10744 = vmatprep.subr.bf16.mxu0 %v11911_v51  ;;  %v1623_v26 = vor.u32 %v1621_v60, %v1619_v33  ;;  %v1414_v30 = vadd.f32 %v1377_v31, %v1314_v17  ;;  %v1116_v38 = vmul.f32 %v12726_v9, %v12923_v13  ;;  %v11914_v17 = vld [vmem:[#allocation7 + $0x28] sm:$0xff]  }
  0xd1   : > { %v1625_v7 = vshll.u32 %v12973_v29, 16  ;;  %v1629_v34 = vshrl.u32 %v12973_v29, 16  ;;  %v1415_v20 = vadd.f32 %v1379_v54, %v1315_v47  ;;  %v1477_v10 = vsel %vm672_vm3, %v1474_v18, %v1476_v58  ;;  %v13021_v47 = vld [vmem:[%s12697_s17 + $0x70] sm:$0xff] }
  0xd2   : > { %v1479_v36 = vsel %vm672_vm3, %v1476_v58, %v1478_v24  ;;  %v1514_v39 = vadd.f32 %v1477_v10, %v1414_v30  ;;  %v1138_v33 = vmul.f32 %v12736_v14, %v313_v21  ;;  %v12995_v41 = vmul.f32 %v12736_v14, %v314_v12 }
  0xd3   : > { %v1627_v8 = vrot.slane %v1625_v7, 1  ;;  %10745 = vmatpush3.bf16.msra.mxu0 %v11911_v51  ;;  %v1515_v25 = vadd.f32 %v1479_v36, %v1415_v20  ;;  %v1238_v18 = vmul.f32 %v12738_v15, %v313_v21  ;;  %v12999_v6 = vmul.f32 %v12738_v15, %v314_v12 }
  0xd4   : > { %10746 = vmatprep.subr.bf16.mxu0 %v11912_v35  ;;  %v1338_v13 = vmul.f32 %v12768_v37, %v313_v21  ;;  %v1535_v45 = vadd.f32 %v12819_v28, %v1514_v39  ;;  %v1117_v32 = vmul.f32 %v12726_v9, %v313_v21  ;;  %v1180_v46 = vrot.slane %v1138_v33, 1  ;;  %v11915_v33 = vld [vmem:[#allocation7 + $0x30] sm:$0xff]  }
  0xd5   : > { %v1628_v44 = vsel %vm1600_vm4, %v1623_v26, %v1627_v8  ;;  %v1536_v49 = vadd.f32 %v12819_v28, %v1515_v25  ;;  %v1182_v22 = vrot.slane %v12995_v41, 1  ;;  %v1280_v51 = vrot.slane %v1238_v18, 2 }
  0xd6   : > { %10728 = vmatprep.mubr.bf16.mxu0 %v1628_v44  ;;  %v1282_v52 = vrot.slane %v12999_v6, 2  ;;  %v1551_v53 = vmax.f32 %v1535_v45, 0.0  ;;  %v1181_v56 = vsel %vm375_vm0, %v1178_v43, %v1180_v46  ;;  %v13012_v57 = vmul.f32 %v12768_v37, %v314_v12  ;;  %v11916_v44 = vld [vmem:[#allocation7 + $0x38] sm:$0xff]  }
  0xd7   : > { %10747 = vmatpush3.bf16.msra.mxu0 %v11912_v35  ;;  %v1380_v40 = vrot.slane %v1338_v13, 3  ;;  %v1552_v59 = vmax.f32 %v1536_v49, 0.0  ;;  %v1183_v50 = vsel %vm375_vm0, %v1180_v46, %v1182_v22  ;;  %v1216_v62 = vadd.f32 %v1181_v56, %v1116_v38 }
  0xd8   : > { %v1281_v0 = vsel %vm474_vm1, %v1278_v61, %v1280_v51  ;;  %10748 = vmatprep.subr.bf16.mxu0 %v11913_v42  ;;  %v1217_v31 = vadd.f32 %v1183_v50, %v1117_v32  ;;  %v1283_v35 = vsel %vm474_vm1, %v1280_v51, %v1282_v52  ;;  %v1382_v43 = vrot.slane %v13012_v57, 3 }
  0xd9   : > { %v1381_v3 = vsel %vm573_vm2, %v1378_v63, %v1380_v40  ;;  %v13023_v54 = vpack.c.bf16 %v1552_v59, %v1551_v53  ;;  %v1316_v58 = vadd.f32 %v1281_v0, %v1216_v62  ;;  %v1438_v26 = vmul.f32 %v12785_v55, %v313_v21 }
  0xda   : > { %v13027_v30 = vmul.f32 %v12785_v55, %v314_v12  ;;  %v1631_v61 = vor.u32 %v1629_v34, %v1627_v8  ;;  %v1317_v20 = vadd.f32 %v1283_v35, %v1217_v31  ;;  %v1383_v63 = vsel %vm573_vm2, %v1380_v40, %v1382_v43 }
  0xdb   : > { %v1118_v10 = vmul.f32 %v12726_v9, %v314_v12  ;;  %10749 = vmatpush3.bf16.msra.mxu0 %v11913_v42  ;;  %v1633_v36 = vshll.u32 %v13023_v54, 16  ;;  %v1416_v38 = vadd.f32 %v1381_v3, %v1316_v58  ;;  %v1480_v39 = vrot.slane %v1438_v26, 4 }
  0xdc   : > { %v1482_v21 = vrot.slane %v13027_v30, 4  ;;  %10750 = vmatprep.subr.bf16.mxu0 %v11914_v17  ;;  %v1417_v41 = vadd.f32 %v1383_v63, %v1317_v20  ;;  %v1119_v25 = vmul.f32 %v12726_v9, %v315_v11  ;;  %v1140_v8 = vmul.f32 %v12736_v14, %v315_v11  ;;  %v317_v63 = vld [vmem:[%s12697_s17 + $0x78] sm:$0xff] }
  0xdd   : > { %v13041_v18 = vmul.f32 %v12736_v14, %v13021_v47  ;;  %v1635_v12 = vrot.slane %v1633_v36, 1  ;;  %v1481_v42 = vsel %vm672_vm3, %v1478_v24, %v1480_v39  ;;  %v1240_v13 = vmul.f32 %v12738_v15, %v315_v11 }
  0xde   : > { %v1483_v6 = vsel %vm672_vm3, %v1480_v39, %v1482_v21  ;;  %v1516_v45 = vadd.f32 %v1481_v42, %v1416_v38  ;;  %v1184_v46 = vrot.slane %v1140_v8, 1  ;;  %v1637_v53 = vshrl.u32 %v13023_v54, 16 }
  0xdf   : > { %v1517_v32 = vadd.f32 %v1483_v6, %v1417_v41  ;;  %v1186_v49 = vrot.slane %v13041_v18, 1  ;;  %10751 = vmatpush3.bf16.msra.mxu0 %v11914_v17  ;;  %v1636_v51 = vsel %vm1600_vm4, %v1631_v61, %v1635_v12  ;;  %v13055_v1 = vmul.f32 %v12738_v15, %v13021_v47 }
  0xe0   : > { %v1284_v24 = vrot.slane %v1240_v13, 2  ;;  %10752 = vmatprep.subr.bf16.mxu0 %v11915_v33  ;;  %10729 = vmatmul.mubr.bf16.gmra.mrb[4].mxu0 %v1636_v51  ;;  %v1537_v56 = vadd.f32 %v12819_v28, %v1516_v45  ;;  %v1185_v59 = vsel %vm375_vm0, %v1182_v22, %v1184_v46  ;;  %v1340_v58 = vmul.f32 %v12768_v37, %v315_v11  ;;  %v13068_v22 = vld [vmem:[#allocation7 + $0x80] sm:$0xff]  }
  0xe1   : > { %v1538_v40 = vadd.f32 %v12819_v28, %v1517_v32  ;;  %v1187_v50 = vsel %vm375_vm0, %v1184_v46, %v1186_v49  ;;  %v1218_v62 = vadd.f32 %v1185_v59, %v1118_v10  ;;  %v1286_v31 = vrot.slane %v13055_v1, 2 }
  0xe2   : > { %v1219_v0 = vadd.f32 %v1187_v50, %v1119_v25  ;;  %v1285_v17 = vsel %vm474_vm1, %v1282_v52, %v1284_v24  ;;  %v1553_v35 = vmax.f32 %v1537_v56, 0.0  ;;  %v1341_v26 = vmul.f32 %v12768_v37, %v13021_v47 }
  0xe3   : > { %v1554_v3 = vmax.f32 %v1538_v40, 0.0  ;;  %10753 = vmatpush3.bf16.msra.mxu0 %v11915_v33  ;;  %v1287_v30 = vsel %vm474_vm1, %v1284_v24, %v1286_v31  ;;  %v1318_v61 = vadd.f32 %v1285_v17, %v1218_v62  ;;  %v1440_v20 = vmul.f32 %v12785_v55, %v315_v11 }
  0xe4   : > { %v1441_v52 = vmul.f32 %v12785_v55, %v13021_v47  ;;  %10754 = vmatprep.subr.bf16.mxu0 %v11916_v44  ;;  %v1319_v38 = vadd.f32 %v1287_v30, %v1219_v0  ;;  %v1384_v39 = vrot.slane %v1340_v58, 3  ;;  %v1386_v41 = vrot.slane %v1341_v26, 3 }
  0xe5   : > { %v13075_v10 = vpack.c.bf16 %v1554_v3, %v1553_v35  ;;  %v1639_v33 = vor.u32 %v1637_v53, %v1635_v12  ;;  %v1484_v25 = vrot.slane %v1440_v20, 4  ;;  %v1121_v13 = vmul.f32 %v12726_v9, %v317_v63 }
  0xe6   : > { %v1486_v8 = vrot.slane %v1441_v52, 4  ;;  %v1385_v11 = vsel %vm573_vm2, %v1382_v43, %v1384_v39  ;;  %v1387_v6 = vsel %vm573_vm2, %v1384_v39, %v1386_v41  ;;  %v1142_v57 = vmul.f32 %v12736_v14, %v317_v63 }
  0xe7   : > { %v1641_v42 = vshll.u32 %v13075_v10, 16  ;;  %10755 = vmatpush3.bf16.msra.mxu0 %v11916_v44  ;;  %v1418_v45 = vadd.f32 %v1385_v11, %v1318_v61  ;;  %v1419_v32 = vadd.f32 %v1387_v6, %v1319_v38  ;;  %v1485_v46 = vsel %vm672_vm3, %v1482_v21, %v1484_v25  ;;  %v12245_v44 = vld [vmem:[#allocation6] ss:$0 sm:$0xff] }
  0xe8   : > { %v1487_v51 = vsel %vm672_vm3, %v1484_v25, %v1486_v8  ;;  %10772 = vmatprep.subr.bf16.mxu0 %v13068_v22  ;;  %v1242_v43 = vmul.f32 %v12738_v15, %v317_v63  ;;  %v1342_v1 = vmul.f32 %v12768_v37, %v317_v63  ;;  %v1120_v56 = vmul.f32 %v12245_v44, %v13021_v47 }
  0xe9   : > { %v1643_v12 = vrot.slane %v1641_v42, 1  ;;  %v1518_v24 = vadd.f32 %v1485_v46, %v1418_v45  ;;  %v1519_v9 = vadd.f32 %v1487_v51, %v1419_v32  ;;  %v1442_v21 = vmul.f32 %v12785_v55, %v317_v63 }
  0xea   : > { %v1188_v59 = vrot.slane %v1142_v57, 1  ;;  %v1288_v50 = vrot.slane %v1242_v43, 2  ;;  %v1388_v0 = vrot.slane %v1342_v1, 3  ;;  %v1645_v37 = vshrl.u32 %v13075_v10, 16 }
  0xeb   : > { %v1644_v40 = vsel %vm1600_vm4, %v1639_v33, %v1643_v12  ;;  %v1539_v62 = vadd.f32 %v12819_v28, %v1518_v24  ;;  %v1540_v14 = vadd.f32 %v12819_v28, %v1519_v9  ;;  %v1488_v15 = vrot.slane %v1442_v21, 4 }
  0xec   : > { %10732 = vmatprep.mubr.bf16.mxu0 %v1644_v40  ;;  %v1189_v17 = vsel %vm375_vm0, %v1186_v49, %v1188_v59  ;;  %v1221_v47 = vadd.f32 %v1188_v59, %v1121_v13  ;;  %v1289_v55 = vsel %vm474_vm1, %v1286_v31, %v1288_v50  ;;  %v2194_v26 = vrot.slane %v1617_v5, 2 }
  0xed   : > { %v1555_v35 = vmax.f32 %v1539_v62, 0.0  ;;  %v1556_v3 = vmax.f32 %v1540_v14, 0.0  ;;  %v1220_v58 = vadd.f32 %v1189_v17, %v1120_v56  ;;  %v2193_v30 = vrot.slane %v1621_v60, 1 }
  0xee   : > { %v1321_v61 = vadd.f32 %v1288_v50, %v1221_v47  ;;  %v1389_v20 = vsel %vm573_vm2, %v1386_v41, %v1388_v0  ;;  %v1489_v49 = vsel %vm672_vm3, %v1486_v8, %v1488_v15  ;;  %v1986_v63 = vrot.slane %v12861_v2, 1 }
  0xef   : > { %v13108_v52 = vpack.c.bf16 %v1556_v3, %v1555_v35  ;;  %v1320_v18 = vadd.f32 %v1289_v55, %v1220_v58  ;;  %v1993_v38 = vrot.slane %v13023_v54, 1  ;;  %v1995_v39 = vrot.slane %v13075_v10, 1 }
  0xf0   : > { %v1421_v31 = vadd.f32 %v1388_v0, %v1321_v61  ;;  %vm2185_vm5 = vsmask.f32 6400  ;;  %v1647_v5 = vor.u32 %v1645_v37, %v1643_v12  ;;  %v1987_v25 = vrot.slane %v12867_v16, 1 }
  0xf1   : > { %v1649_v33 = vshll.u32 %v13108_v52, 16  ;;  %v1420_v60 = vadd.f32 %v1389_v20, %v1320_v18  ;;  %v1653_v11 = vshrl.u32 %v13108_v52, 16  ;;  %v13120_v8 = vsel %vm375_vm0, %v1993_v38, %v1995_v39 }
  0xf2   : > { %v1521_v41 = vadd.f32 %v1488_v15, %v1421_v31  ;;  %v1997_v6 = vrot.slane %v13108_v52, 1  ;;  %v2186_v32 = vrot.slane %v1602_v19, 1  ;;  %v2187_v46 = vrot.slane %v1604_v4, 2 }
  0xf3   : > { %v1651_v13 = vrot.slane %v1649_v33, 1  ;;  %v1520_v45 = vadd.f32 %v1489_v49, %v1420_v60  ;;  %v2189_v57 = vrot.slane %v1613_v27, 1  ;;  %v2190_v43 = vrot.slane %v1609_v23, 2 }
  0xf4   : > { %v1542_v51 = vadd.f32 %v12819_v28, %v1521_v41  ;;  %v13131_v12 = vsel %vm375_vm0, %v1995_v39, %v1997_v6  ;;  %v2188_v24 = vor.u32 %v2187_v46, %v2186_v32  ;;  %v2195_v44 = vor.u32 %v2194_v26, %v2193_v30 }
  0xf5   : > { %v1652_v1 = vsel %vm1600_vm4, %v1647_v5, %v1651_v13  ;;  %v1541_v19 = vadd.f32 %v12819_v28, %v1520_v45  ;;  %v2191_v9 = vor.u32 %v2190_v43, %v2189_v57  ;;  %v2197_v56 = vrot.slane %v1629_v34, 1 }
  0xf6   : > { %10733 = vmatmul.mubr.bf16.gmra.mrb[8].mxu0 %v1652_v1  ;;  %v1558_v4 = vmax.f32 %v1542_v51, 0.0  ;;  %v2198_v40 = vrot.slane %v1625_v7, 2  ;;  %v2201_v27 = vrot.slane %v1637_v53, 1  ;;  %v2202_v23 = vrot.slane %v1633_v36, 2  ;;  %v11918_v1 = vld [vmem:[#allocation7 + $0x88] sm:$0xff]  }
  0xf7   : > { %v1557_v21 = vmax.f32 %v1541_v19, 0.0  ;;  %v13148_v28 = vsel %vm2185_vm5, %v2188_v24, %v2191_v9  ;;  %v13151_v59 = vsel %vm2185_vm5, %v2191_v9, %v2195_v44  ;;  %v2205_v50 = vrot.slane %v1645_v37, 1  ;;  %v11919_v19 = vld [vmem:[#allocation7 + $0x90] sm:$0xff]   ;;  %v11920_v24 = vld [vmem:[#allocation7 + $0x98] sm:$0xff]   ;;  %v11922_v9 = vld [vmem:[#allocation7 + $0xa8] sm:$0xff]  }
  0xf8   : > { %v2206_v34 = vrot.slane %v1641_v42, 2  ;;  %v2199_v14 = vor.u32 %v2198_v40, %v2197_v56  ;;  %v2203_v7 = vor.u32 %v2202_v23, %v2201_v27  ;;  %v2209_v0 = vrot.slane %v1653_v11, 1  ;;  %v11927_v27 = vld [vmem:[#allocation7 + $0xd0] sm:$0xff]   ;;  %v11928_v23 = vld [vmem:[#allocation7 + $0xd8] sm:$0xff]  }
  0xf9   : > { %v13155_v62 = vpack.c.bf16 %v1558_v4, %v1557_v21  ;;  %v1989_v53 = vrot.slane %v12918_v48, 1  ;;  %v1991_v15 = vrot.slane %v12973_v29, 1  ;;  %v2210_v17 = vrot.slane %v1649_v33, 2  ;;  %v11921_v4 = vld [vmem:[#allocation7 + $0xa0] sm:$0xff]  }
  0xfa   : > { %v2207_v36 = vor.u32 %v2206_v34, %v2205_v50  ;;  %v1655_v47 = vor.u32 %v1653_v11, %v1651_v13  ;;  %v13162_v37 = vsel %vm2185_vm5, %v2195_v44, %v2199_v14  ;;  %v13165_v42 = vsel %vm2185_vm5, %v2199_v14, %v2203_v7  ;;  %v11923_v44 = vld [vmem:[#allocation7 + $0xb0] sm:$0xff]   ;;  %v11925_v21 = vld [vmem:[#allocation7 + $0xc0] sm:$0xff]   ;;  %v11930_v34 = vld [vmem:[#allocation7 + $0xe8] sm:$0xff]  }
  0xfb   : > { %v1657_v55 = vshll.u32 %v13155_v62, 16  ;;  %v1661_v35 = vshrl.u32 %v13155_v62, 16  ;;  %v2211_v58 = vor.u32 %v2210_v17, %v2209_v0  ;;  %v2402_v20 = vrot.slane %v12861_v2, 2  ;;  %v11929_v50 = vld [vmem:[#allocation7 + $0xe0] sm:$0xff]  }
  0xfc   : > { %v13168_v3 = vsel %vm2185_vm5, %v2203_v7, %v2207_v36  ;;  %v1999_v18 = vrot.slane %v13155_v62, 1  ;;  %v2403_v31 = vrot.slane %v12867_v16, 2  ;;  %v2409_v39 = vrot.slane %v13023_v54, 2  ;;  %v11931_v7 = vld [vmem:[#allocation7 + $0xf0] sm:$0xff]   ;;  %v11937_v0 = vld [vmem:[#allocation7 + $0x120] sm:$0xff]  }
  0xfd   : > { %v1659_v26 = vrot.slane %v1657_v55, 1  ;;  %v2213_v30 = vrot.slane %v1661_v35, 1  ;;  %v2214_v61 = vrot.slane %v1657_v55, 2  ;;  %v13173_v49 = vsel %vm2185_vm5, %v2207_v36, %v2211_v58  ;;  %v13289_v55 = vld [vmem:[#allocation4 + $0x2] ss:$0 sm:$0xff] }
  0xfe   : > { %v2411_v41 = vrot.slane %v13075_v10, 2  ;;  %v2405_v11 = vrot.slane %v12918_v48, 2  ;;  %v2413_v13 = vrot.slane %v13108_v52, 2  ;;  %v2407_v32 = vrot.slane %v12973_v29, 2 }
  0xff   : > { %v1660_v5 = vsel %vm1600_vm4, %v1655_v47, %v1659_v26  ;;  %v1663_v33 = vor.u32 %v1661_v35, %v1659_v26  ;;  %v13178_v60 = vor.u32 %v2214_v61, %v2213_v30  ;;  %v2415_v51 = vrot.slane %v13155_v62, 2  ;;  %v13292_v35 = vld [vmem:[%s12697_s17] sm:$0xff] }
 0x100   : > { %10736 = vmatprep.mubr.bf16.mxu0 %v1660_v5  ;;  %v13191_v46 = vsel %vm474_vm1, %v2409_v39, %v2411_v41  ;;  %v13196_v57 = vsel %vm474_vm1, %v2411_v41, %v2413_v13  ;;  %v1988_v56 = vsel %vm375_vm0, %v1986_v63, %v1987_v25  ;;  %v1990_v40 = vsel %vm375_vm0, %v1987_v25, %v1989_v53  ;;  %v13311_v26 = vld [vmem:[#allocation4] ss:$0 sm:$0xff] }
 0x101   : > { %10737 = vmatmul.mubr.bf16.gmra.mrb[12].mxu0 %v1663_v33  ;;  %v13185_v45 = vsel %vm2185_vm5, %v2211_v58, %v13178_v60  ;;  %v13201_v43 = vsel %vm474_vm1, %v2413_v13, %v2415_v51  ;;  %v1992_v63 = vsel %vm375_vm0, %v1989_v53, %v1991_v15  ;;  %v1994_v25 = vsel %vm375_vm0, %v1991_v15, %v1993_v38  ;;  %v11932_v38 = vld [vmem:[#allocation7 + $0xf8] sm:$0xff]  }
 0x102   : > { %10756 = vmatprep.mubr.bf16.mxu0 %v12861_v2  ;;  %v2000_v14 = vsel %vm375_vm0, %v1997_v6, %v1999_v18  ;;  %v11935_v6 = vld [vmem:[#allocation7 + $0x110] sm:$0xff]   ;;  %v11940_v53 = vld [vmem:[#allocation7 + $0x138] sm:$0xff]   ;;  %v2404_v15 = vsel %vm474_vm1, %v2402_v20, %v2403_v31  ;;  %v2406_v36 = vsel %vm474_vm1, %v2403_v31, %v2405_v11  ;;  %v2408_v2 = vsel %vm474_vm1, %v2405_v11, %v2407_v32  ;;  %v13315_v20 = vld [vmem:[#allocation4 + $0x3] ss:$0 sm:$0xff] }
 0x103   : > { %v2410_v17 = vsel %vm474_vm1, %v2407_v32, %v2409_v39  ;;  %v323_v32 = vmul.f32 %v13292_v35, %v13311_v26  ;;  %vm3582_vm9 = vcmask 1041409   ;;  %vm3584_vm10 = vcmask 1042434  }
 0x104   : > { %vm3586_vm11 = vcmask 1043459   ;;  %vm3588_vm12 = vcmask 1044484   ;;  %vm3590_vm13 = vcmask 1045509   ;;  %vm3592_vm14 = vcmask 1046534  }
 0x105   : > { %vm3594_vm15 = vcmask 1047559  }
 0x109   : > { %10757 = vmatmul.mubr.bf16.vlgmr.msra.gmra.mrb[0].mxu0 %v12867_v16  ;;  %v13273_v16 = vld [vmem:[#allocation4 + $0x1] ss:$0 sm:$0xff] }
 0x10a   : > { %10773 = vmatpush3.bf16.msra.mxu0 %v13068_v22  ;;  %10760 = vmatprep.mubr.bf16.mxu0 %v12918_v48  ;;  %v11924_v22 = vld [vmem:[#allocation7 + $0xb8] sm:$0xff]  }
 0x10b   : > { %10774 = vmatprep.subr.bf16.mxu0 %v11918_v1  ;;  %v13276_v48 = vld [vmem:[%s12697_s17 + $0x10] sm:$0xff] }
 0x10c   : > { %v325_v5 = vmul.f32 %v13276_v48, %v13311_v26  ;;  %v13335_v11 = vmul.f32 %v13276_v48, %v13315_v20 }
 0x10e   : > { %10775 = vmatpush3.bf16.msra.mxu0 %v11918_v1 }
 0x10f   : > { %10776 = vmatprep.subr.bf16.mxu0 %v11919_v19 }
 0x111   : > { %10761 = vmatmul.mubr.bf16.gmra.mrb[4].mxu0 %v12973_v29  ;;  %v13283_v29 = vld [vmem:[%s12697_s17 + $0x18] sm:$0xff] }
 0x112   : > { %10777 = vmatpush3.bf16.msra.mxu0 %v11919_v19  ;;  %10764 = vmatprep.mubr.bf16.mxu0 %v13023_v54  ;;  %v13280_v54 = vmul.f32 %v13276_v48, %v13273_v16  ;;  %v13287_v47 = vmul.f32 %v13283_v29, %v13273_v16  ;;  %v13309_v58 = vmul.f32 %v13283_v29, %v13289_v55 }
 0x113   : > { %10778 = vmatprep.subr.bf16.mxu0 %v11920_v24  ;;  %v13339_v13 = vmul.f32 %v13283_v29, %v13315_v20 }
 0x114   : > { %v379_v30 = vrot.slane %v13280_v54, 1  ;;  %v381_v61 = vrot.slane %v13287_v47, 1 }
 0x116   : > { %10779 = vmatpush3.bf16.msra.mxu0 %v11920_v24  ;;  %v382_v41 = vsel %vm375_vm0, %v379_v30, %v381_v61 }
 0x117   : > { %10780 = vmatprep.subr.bf16.mxu0 %v11921_v4  ;;  %v424_v19 = vadd.f32 %v382_v41, %v325_v5  ;;  %v13431_v5 = vld [vmem:[#allocation4 + $0x7] ss:$0 sm:$0xff] }
 0x119   : > { %10765 = vmatmul.mubr.bf16.gmra.mrb[8].mxu0 %v13075_v10  ;;  %v11926_v10 = vld [vmem:[#allocation7 + $0xc8] sm:$0xff]  }
 0x11a   : > { %10781 = vmatpush3.bf16.msra.mxu0 %v11921_v4  ;;  %10768 = vmatprep.mubr.bf16.mxu0 %v13108_v52  ;;  %v11934_v52 = vld [vmem:[#allocation7 + $0x108] sm:$0xff]   ;;  %v16567_v4 = vrot.slane %v13335_v11, 3 }
 0x11b   : > { %10782 = vmatprep.subr.bf16.mxu0 %v11922_v9 }
 0x11e   : > { %10783 = vmatpush3.bf16.msra.mxu0 %v11922_v9  ;;  %v579_v9 = vrot.slane %v13339_v13, 3 }
 0x11f   : > { %10784 = vmatprep.subr.bf16.mxu0 %v11923_v44 }
 0x121   : > { %10769 = vmatmul.mubr.bf16.gmra.mrb[16].mxu0 %v13155_v62  ;;  %v343_v62 = vmul.f32 %v13292_v35, %v13273_v16 }
 0x122   : > { %10785 = vmatpush3.bf16.msra.mxu0 %v11923_v44  ;;  %10788 = vmatprep.mubr.bf16.mxu0 %v1988_v56  ;;  %v13370_v56 = vld [vmem:[#allocation4 + $0x5] ss:$0 sm:$0xff] }
 0x123   : > { %10786 = vmatprep.subr.bf16.mxu0 %v11924_v22  ;;  %v376_v31 = vrot.slane %v343_v62, 1 }
 0x126   : > { %10787 = vmatpush3.bf16.msra.mxu0 %v11924_v22 }
 0x127   : > { %10804 = vmatprep.subr.bf16.mxu0 %v11925_v21 }
 0x129   : > { %10789 = vmatmul.mubr.bf16.vlgmr.msra.gmra.mrb[0].mxu0 %v1990_v40 }
 0x12a   : > { %10805 = vmatpush3.bf16.msra.mxu0 %v11925_v21  ;;  %10792 = vmatprep.mubr.bf16.mxu0 %v1992_v63 }
 0x12b   : > { %10806 = vmatprep.subr.bf16.mxu0 %v11926_v10 }
 0x12e   : > { %10807 = vmatpush3.bf16.msra.mxu0 %v11926_v10 }
 0x12f   : > { %10808 = vmatprep.subr.bf16.mxu0 %v11927_v27 }
 0x131   : > { %10793 = vmatmul.mubr.bf16.gmra.mrb[4].mxu0 %v1994_v25 }
 0x132   : > { %10809 = vmatpush3.bf16.msra.mxu0 %v11927_v27  ;;  %10796 = vmatprep.mubr.bf16.mxu0 %v13120_v8  ;;  %v11933_v8 = vld [vmem:[#allocation7 + $0x100] sm:$0xff]  }
 0x133   : > { %10810 = vmatprep.subr.bf16.mxu0 %v11928_v23 }
 0x136   : > { %10811 = vmatpush3.bf16.msra.mxu0 %v11928_v23 }
 0x137   : > { %10812 = vmatprep.subr.bf16.mxu0 %v11929_v50 }
 0x139   : > { %10797 = vmatmul.mubr.bf16.gmra.mrb[8].mxu0 %v13131_v12  ;;  %v11936_v12 = vld [vmem:[#allocation7 + $0x118] sm:$0xff]  }
 0x13a   : > { %10813 = vmatpush3.bf16.msra.mxu0 %v11929_v50  ;;  %10800 = vmatprep.mubr.bf16.mxu0 %v2000_v14  ;;  %v13384_v50 = vmul.f32 %v13276_v48, %v13370_v56  ;;  %v580_v14 = vsel %vm573_vm2, %v16567_v4, %v579_v9 }
 0x13b   : > { %10814 = vmatprep.subr.bf16.mxu0 %v11930_v34 }
 0x13e   : > { %10815 = vmatpush3.bf16.msra.mxu0 %v11930_v34  ;;  %v13388_v34 = vmul.f32 %v13283_v29, %v13370_v56 }
 0x13f   : > { %10816 = vmatprep.subr.bf16.mxu0 %v11931_v7 }
 0x141   : > { %10801 = vmatmul.mubr.bf16.gmra.mrb[20].mxu0 %v1999_v18  ;;  %v442_v18 = vmul.f32 %v13292_v35, %v13289_v55 }
 0x142   : > { %10817 = vmatpush3.bf16.msra.mxu0 %v11931_v7  ;;  %10820 = vmatprep.mubr.bf16.mxu0 %v13148_v28  ;;  %v11938_v28 = vld [vmem:[#allocation7 + $0x128] sm:$0xff]  }
 0x143   : > { %10818 = vmatprep.subr.bf16.mxu0 %v11932_v38 }
 0x146   : > { %10819 = vmatpush3.bf16.msra.mxu0 %v11932_v38 }
 0x147   : > { %10836 = vmatprep.subr.bf16.mxu0 %v11933_v8 }
 0x149   : > { %10821 = vmatmul.mubr.bf16.vlgmr.msra.gmra.mrb[0].mxu0 %v13151_v59  ;;  %v11939_v59 = vld [vmem:[#allocation7 + $0x130] sm:$0xff]  }
 0x14a   : > { %10837 = vmatpush3.bf16.msra.mxu0 %v11933_v8  ;;  %10824 = vmatprep.mubr.bf16.mxu0 %v13162_v37  ;;  %v13297_v37 = vld [vmem:[%s12697_s17 + $0x8] sm:$0xff]  ;;  %v13397_v8 = vld [vmem:[#allocation4 + $0x6] ss:$0 sm:$0xff] }
 0x14b   : > { %10838 = vmatprep.subr.bf16.mxu0 %v11934_v52  ;;  %v13353_v1 = vmul.f32 %v13297_v37, %v13315_v20 }
 0x14d   : > { %v16566_v63 = vrot.slane %v13353_v1, 3 }
 0x14e   : > { %10839 = vmatpush3.bf16.msra.mxu0 %v11934_v52 }
 0x14f   : > { %10840 = vmatprep.subr.bf16.mxu0 %v11935_v6 }
 0x151   : > { %10825 = vmatmul.mubr.bf16.gmra.mrb[4].mxu0 %v13165_v42  ;;  %v13301_v42 = vmul.f32 %v13297_v37, %v13273_v16 }
 0x152   : > { %10841 = vmatpush3.bf16.msra.mxu0 %v11935_v6  ;;  %10828 = vmatprep.mubr.bf16.mxu0 %v13168_v3  ;;  %v13305_v3 = vmul.f32 %v13276_v48, %v13289_v55  ;;  %v739_v6 = vmul.f32 %v13292_v35, %v13370_v56 }
 0x153   : > { %10842 = vmatprep.subr.bf16.mxu0 %v11936_v12  ;;  %v377_v39 = vrot.slane %v13301_v42, 1 }
 0x154   : > { %v478_v33 = vrot.slane %v13305_v3, 2  ;;  %v2653_v3 = vlaneseq }
 0x156   : > { %10843 = vmatpush3.bf16.msra.mxu0 %v11936_v12  ;;  %v13403_v12 = vmul.f32 %v13297_v37, %v13370_v56 }
 0x157   : > { %10844 = vmatprep.subr.bf16.mxu0 %v11937_v0 }
 0x159   : > { %10829 = vmatmul.mubr.bf16.gmra.mrb[8].mxu0 %v13173_v49  ;;  %v13321_v49 = vmul.f32 %v13297_v37, %v13289_v55 }
 0x15a   : > { %10845 = vmatpush3.bf16.msra.mxu0 %v11937_v0  ;;  %10832 = vmatprep.mubr.bf16.mxu0 %v13185_v45  ;;  %v13341_v45 = vld [vmem:[#allocation4 + $0x4] ss:$0 sm:$0xff] }
 0x15b   : > { %10846 = vmatprep.subr.bf16.mxu0 %v11938_v28  ;;  %v13364_v44 = vmul.f32 %v13276_v48, %v13341_v45  ;;  %v13368_v22 = vmul.f32 %v13283_v29, %v13341_v45  ;;  %v640_v27 = vmul.f32 %v13292_v35, %v13341_v45  ;;  %v13380_v23 = vmul.f32 %v13297_v37, %v13341_v45 }
 0x15d   : > { %v16564_v7 = vrot.slane %v13364_v44, 4  ;;  %v678_v38 = vrot.slane %v13368_v22, 4 }
 0x15e   : > { %10847 = vmatpush3.bf16.msra.mxu0 %v11938_v28  ;;  %v673_v28 = vrot.slane %v640_v27, 4 }
 0x15f   : > { %10848 = vmatprep.subr.bf16.mxu0 %v11939_v59  ;;  %v679_v62 = vsel %vm672_vm3, %v16564_v7, %v678_v38  ;;  %v326_v7 = vmul.f32 %v13283_v29, %v13311_v26 }
 0x161   : > { %10833 = vmatmul.mubr.bf16.gmra.mrb[24].mxu0 %v13178_v60  ;;  %v480_v60 = vrot.slane %v13309_v58, 2 }
 0x162   : > { %10849 = vmatpush3.bf16.msra.mxu0 %v11939_v59  ;;  %10852 = vmatprep.mubr.bf16.mxu0 %v2404_v15  ;;  %v16563_v59 = vrot.slane %v13380_v23, 4  ;;  %v16562_v15 = vrot.slane %v13384_v50, 5 }
 0x163   : > { %10850 = vmatprep.subr.bf16.mxu0 %v11940_v53  ;;  %v481_v24 = vsel %vm474_vm1, %v478_v33, %v480_v60 }
 0x164   : > { %v523_v25 = vadd.f32 %v481_v24, %v424_v19  ;;  %v13441_v19 = vmul.f32 %v13297_v37, %v13397_v8 }
 0x166   : > { %10851 = vmatpush3.bf16.msra.mxu0 %v11940_v53  ;;  %v622_v53 = vadd.f32 %v580_v14, %v523_v25  ;;  %v13456_v25 = vmul.f32 %v13276_v48, %v13431_v5  ;;  %v13460_v14 = vmul.f32 %v13283_v29, %v13431_v5 }
 0x168   : > { %v721_v24 = vadd.f32 %v679_v62, %v622_v53  ;;  %v872_v62 = vrot.slane %v13441_v19, 6 }
 0x169   : > { %10853 = vmatmul.mubr.bf16.vlgmr.msra.gmra.mrb[0].mxu0 %v2406_v36  ;;  %v16569_v36 = vrot.slane %v13388_v34, 5 }
 0x16a   : > { %10856 = vmatprep.mubr.bf16.mxu0 %v2408_v2  ;;  %v13412_v2 = vld [vmem:[%s12697_s17 + $0x20] sm:$0xff] }
 0x16b   : > { %v13545_v13 = vmul.f32 %v13412_v2, %v13397_v8 }
 0x171   : > { %10857 = vmatmul.mubr.bf16.gmra.mrb[4].mxu0 %v2410_v17  ;;  %v13416_v17 = vmul.f32 %v13412_v2, %v13273_v16 }
 0x172   : > { %10860 = vmatprep.mubr.bf16.mxu0 %v13191_v46  ;;  %v475_v46 = vrot.slane %v442_v18, 2  ;;  %v13425_v18 = vmul.f32 %v13276_v48, %v13397_v8 }
 0x174   : > { %v16571_v27 = vrot.slane %v13425_v18, 6 }
 0x179   : > { %10861 = vmatmul.mubr.bf16.gmra.mrb[8].mxu0 %v13196_v57  ;;  %v378_v57 = vsel %vm375_vm0, %v376_v31, %v377_v39  ;;  %v13429_v31 = vmul.f32 %v13283_v29, %v13397_v8 }
 0x17a   : > { %10864 = vmatprep.mubr.bf16.mxu0 %v13201_v43  ;;  %v541_v43 = vmul.f32 %v13292_v35, %v13315_v20  ;;  %v422_v21 = vadd.f32 %v378_v57, %v323_v32  ;;  %v772_v32 = vrot.slane %v739_v6, 5  ;;  %v838_v57 = vmul.f32 %v13292_v35, %v13397_v8 }
 0x17c   : > { %v574_v40 = vrot.slane %v541_v43, 3  ;;  %v675_v43 = vsel %vm672_vm3, %v673_v28, %v16563_v59  ;;  %v871_v28 = vrot.slane %v838_v57, 6  ;;  %v13473_v59 = vmul.f32 %v13297_v37, %v13431_v5 }
 0x17e   : > { %v576_v0 = vsel %vm573_vm2, %v574_v40, %v16566_v63  ;;  %v13451_v40 = vmul.f32 %v13412_v2, %v13289_v55  ;;  %v973_v63 = vrot.slane %v13456_v25, 7 }
 0x180   : > { %v16578_v57 = vrot.slane %v13451_v40, 2 }
 0x181   : > { %10865 = vmatmul.mubr.bf16.gmra.mrb[28].mxu0 %v2415_v51  ;;  %v16570_v51 = vrot.slane %v13321_v49, 2 }
 0x183   : > { %v477_v10 = vsel %vm474_vm1, %v475_v46, %v16570_v51  ;;  %v16565_v46 = vrot.slane %v13403_v12, 5  ;;  %v483_v51 = vsel %vm474_vm1, %v480_v60, %v16578_v57 }
 0x184   : > { %v521_v52 = vadd.f32 %v477_v10, %v422_v21  ;;  %v778_v21 = vsel %vm771_vm6, %v16562_v15, %v16569_v36  ;;  %v16568_v10 = vrot.slane %v13416_v17, 1  ;;  %v937_v15 = vmul.f32 %v13292_v35, %v13431_v5 }
 0x185   : > { %v13487_v35 = vmul.f32 %v13412_v2, %v13315_v20  ;;  %v873_v36 = vsel %vm870_vm7, %v871_v28, %v872_v62  ;;  %v13524_v28 = vmul.f32 %v13412_v2, %v13370_v56 }
 0x186   : > { %v620_v41 = vadd.f32 %v576_v0, %v521_v52  ;;  %v16572_v52 = vrot.slane %v13429_v31, 6  ;;  %v774_v0 = vsel %vm771_vm6, %v772_v32, %v16565_v46  ;;  %v384_v32 = vsel %vm375_vm0, %v381_v61, %v16568_v10 }
 0x187   : > { %v820_v46 = vadd.f32 %v778_v21, %v721_v24  ;;  %v975_v61 = vrot.slane %v13460_v14, 7  ;;  %v971_v24 = vrot.slane %v13473_v59, 7  ;;  %v425_v21 = vadd.f32 %v384_v32, %v326_v7  ;;  %v13517_v7 = vld [vmem:[#allocation4 + $0x8] ss:$0 sm:$0xff] }
 0x188   : > { %v719_v6 = vadd.f32 %v675_v43, %v620_v41  ;;  %v877_v47 = vsel %vm870_vm7, %v16571_v27, %v16572_v52  ;;  %v16573_v27 = vrot.slane %v13487_v35, 3  ;;  %v13510_v52 = vmul.f32 %v13412_v2, %v13341_v45 }
 0x189   : > { %v524_v60 = vadd.f32 %v483_v51, %v425_v21  ;;  %v380_v51 = vsel %vm375_vm0, %v377_v39, %v379_v30  ;;  %v1036_v21 = vmul.f32 %v13297_v37, %v13517_v7  ;;  %v13559_v30 = vld [vmem:[%s12697_s17 + $0x30] sm:$0xff] }
 0x18a   : > { %v818_v10 = vadd.f32 %v774_v0, %v719_v6  ;;  %v919_v6 = vadd.f32 %v877_v47, %v820_v46  ;;  %v324_v46 = vmul.f32 %v13297_v37, %v13311_v26  ;;  %v1038_v47 = vmul.f32 %v13283_v29, %v13517_v7 }
 0x18b   : > { %v16729_v29 = vrot.slane %v13321_v49, 2  ;;  %v13563_v39 = vmul.f32 %v13559_v30, %v13273_v16  ;;  %v13663_v14 = vmul.f32 %v13559_v30, %v13341_v45  ;;  %v13697_v19 = vmul.f32 %v13559_v30, %v13370_v56 }
 0x18c   : > { %v917_v0 = vadd.f32 %v873_v36, %v818_v10  ;;  %v582_v36 = vsel %vm573_vm2, %v579_v9, %v16573_v27  ;;  %v16576_v10 = vrot.slane %v13510_v52, 4  ;;  %v16574_v27 = vrot.slane %v13524_v28, 5 }
 0x18d   : > { %v623_v9 = vadd.f32 %v582_v36, %v524_v60  ;;  %v423_v54 = vadd.f32 %v380_v51, %v324_v46  ;;  %v479_v37 = vsel %vm474_vm1, %v16729_v29, %v478_v33  ;;  %v16575_v33 = vrot.slane %v13545_v13, 6 }
 0x18e   : > { %v681_v42 = vsel %vm672_vm3, %v678_v38, %v16576_v10  ;;  %v12465_v38 = vmov 1983009808   ;;  %v13577_v60 = vmul.f32 %v13412_v2, %v13431_v5  ;;  %v16731_v36 = vrot.slane %v13388_v34, 5 }
 0x18f   : > { %v722_v46 = vadd.f32 %v681_v42, %v623_v9  ;;  %v16733_v29 = vrot.slane %v13353_v1, 3  ;;  %v13593_v9 = vmul.f32 %v13559_v30, %v13289_v55  ;;  %v2654_v42 = vshrl.u32 %v2653_v3, 7 }
 0x190   : > { %v780_v51 = vsel %vm771_vm6, %v16731_v36, %v16574_v27  ;;  %v16579_v36 = vrot.slane %v13577_v60, 7  ;;  %v13620_v27 = vmul.f32 %v13559_v30, %v13315_v20 }
 0x1d4   : > { %v13466_v53 = vpop.f32.mrb[12].mxu0 }
 0x1d5   : > { %v13477_v41 = vpop.f32.mrb[13].mxu0 }
 0x1d6   : > { %v10739_v43 = vpop.f32.mrb[14].mxu0 }
 0x1d7   : > { %v13490_v4 = vpop.f32.mrb[15].mxu0  ;;  %v970_v43 = vrot.slane %v937_v15, 7  ;;  %v976_v15 = vsel %vm969_vm8, %v973_v63, %v975_v61 }
 0x1d8   : > { %v1018_v32 = vadd.f32 %v976_v15, %v919_v6  ;;  %v13566_v6 = vld [vmem:[%s12697_s17 + $0x38] sm:$0xff] }
 0x1d9   : > { %v972_v58 = vsel %vm969_vm8, %v970_v43, %v971_v24  ;;  %v13570_v15 = vmul.f32 %v13566_v6, %v13273_v16  ;;  %v13597_v34 = vmul.f32 %v13566_v6, %v13289_v55 }
 0x1da   : > { %v1016_v43 = vadd.f32 %v972_v58, %v917_v0  ;;  %v1053_v22 = vadd.f32 %v1038_v47, %v1018_v32  ;;  %v2651_v0 = vunpack.c.l.s4 %v12465_v38  ;;  %v13572_v58 = vld [vmem:[#allocation9] ss:$0 sm:$0xff]  ;;  %v522_v32 = vadd.f32 %v479_v37, %v423_v54 }
 0x1db   : > { %16730 = vst [vmem:[#allocation13_spill] sm:$0xff] %v13572_v58  ;;  %v16732_v47 = vrot.slane %v13335_v11, 3  ;;  %v389_v38 = vrot.slane %v13570_v15, 1  ;;  %v16736_v37 = vrot.slane %v13429_v31, 6 }
 0x1dc   : > { %v1051_v49 = vadd.f32 %v1036_v21, %v1016_v43  ;;  %v16577_v21 = vrot.slane %v13563_v39, 1  ;;  %v13600_v54 = vadd.f32 %v13572_v58, %v1053_v22  ;;  %v2652_v11 = vunpack.c.0.s8 %v2651_v0 }
 0x1dd   : > { %v578_v43 = vsel %vm573_vm2, %v16733_v29, %v16732_v47  ;;  %v879_v15 = vsel %vm870_vm7, %v16736_v37, %v16575_v33  ;;  %v16737_v47 = vrot.slane %v13364_v44, 4  ;;  %v16738_v29 = vrot.slane %v13380_v23, 4  ;;  %v13637_v37 = vld [vmem:[%s12697_s17 + $0x28] sm:$0xff]  ;;  %v13655_v33 = vld [vmem:[%s12697_s17 + $0x40] sm:$0xff] }
 0x1de   : > { %16734 = vst [vmem:[#allocation14_spill] sm:$0xff] %v13600_v54  ;;  %v13603_v1 = vadd.f32 %v13572_v58, %v1051_v49  ;;  %v821_v0 = vadd.f32 %v780_v51, %v722_v46  ;;  %v621_v3 = vadd.f32 %v578_v43, %v522_v32  ;;  %v329_v49 = vmul.f32 %v13559_v30, %v13311_v26 }
 0x1df   : > { %v677_v22 = vsel %vm672_vm3, %v16738_v29, %v16737_v47  ;;  %v390_v31 = vsel %vm375_vm0, %v16577_v21, %v389_v38  ;;  %v16581_v44 = vrot.slane %v13593_v9, 2  ;;  %v488_v23 = vrot.slane %v13597_v34, 2 }
 0x1e0   : > { %16735 = vst [vmem:[#allocation15_spill] sm:$0xff] %v13603_v1  ;;  %v13629_v46 = vmul.f32 %v13566_v6, %v13315_v20  ;;  %v13632_v32 = vsub.s32 %v2652_v11, %v2654_v42  ;;  %v1039_v43 = vmul.f32 %v13412_v2, %v13517_v7  ;;  %v13641_v47 = vmul.f32 %v13637_v37, %v13273_v16 }
 0x1e1   : > { %v978_v34 = vsel %vm969_vm8, %v975_v61, %v16579_v36  ;;  %v16740_v11 = vrot.slane %v13384_v50, 5  ;;  %v16741_v42 = vrot.slane %v13403_v12, 5  ;;  %v13659_v10 = vmul.f32 %v13655_v33, %v13273_v16 }
 0x1e2   : > { %16739 = vst [vmem:[#allocation16_spill] sm:$0xff] %v13632_v32  ;;  %v920_v21 = vadd.f32 %v879_v15, %v821_v0  ;;  %v720_v29 = vadd.f32 %v677_v22, %v621_v3  ;;  %v428_v57 = vadd.f32 %v390_v31, %v329_v49  ;;  %v489_v50 = vsel %vm474_vm1, %v16581_v44, %v488_v23 }
 0x1e3   : > { %v776_v51 = vsel %vm771_vm6, %v16741_v42, %v16740_v11  ;;  %v16580_v12 = vrot.slane %v13620_v27, 3  ;;  %v587_v61 = vrot.slane %v13629_v46, 3  ;;  %v13672_v11 = vmul.f32 %v13566_v6, %v13341_v45 }
 0x1e4   : > { %v16742_v15 = vrot.slane %v13425_v18, 6  ;;  %v13684_v0 = vsel %vm969_vm8, %v971_v24, %v973_v63  ;;  %v385_v3 = vrot.slane %v13641_v47, 1  ;;  %v13689_v49 = vmul.f32 %v13637_v37, %v13289_v55 }
 0x1e5   : > { %v13693_v18 = vmul.f32 %v13276_v48, %v13517_v7  ;;  %v16582_v25 = vrot.slane %v13659_v10, 1  ;;  %v13702_v63 = vmul.f32 %v13655_v33, %v13289_v55  ;;  %v1019_v59 = vadd.f32 %v978_v34, %v920_v21 }
 0x1e6   : > { %v875_v22 = vsel %vm870_vm7, %v872_v62, %v16742_v15  ;;  %v819_v62 = vadd.f32 %v776_v51, %v720_v29  ;;  %v527_v24 = vadd.f32 %v489_v50, %v428_v57  ;;  %v16583_v31 = vrot.slane %v13663_v14, 4 }
 0x1e7   : > { %v588_v48 = vsel %vm573_vm2, %v16580_v12, %v587_v61  ;;  %v686_v46 = vrot.slane %v13672_v11, 4  ;;  %v13711_v47 = vmul.f32 %v13566_v6, %v13370_v56  ;;  %v327_v42 = vmul.f32 %v13412_v2, %v13311_v26 }
 0x1e8   : > { %v16743_v15 = vrot.slane %v13416_v17, 1  ;;  %v484_v57 = vrot.slane %v13689_v49, 2  ;;  %v13721_v51 = vmul.f32 %v13637_v37, %v13315_v20  ;;  %v330_v29 = vmul.f32 %v13566_v6, %v13311_v26 }
 0x1e9   : > { %v392_v50 = vsel %vm375_vm0, %v389_v38, %v16582_v25  ;;  %v13732_v17 = vmul.f32 %v13655_v33, %v13315_v20  ;;  %v13734_v49 = vadd.f32 %v1039_v43, %v1019_v59  ;;  %v626_v36 = vadd.f32 %v588_v48, %v527_v24 }
 0x1ea   : > { %v386_v21 = vsel %vm375_vm0, %v16743_v15, %v385_v3  ;;  %v13736_v15 = vadd.f32 %v875_v22, %v819_v62  ;;  %v13740_v12 = vmul.f32 %v13559_v30, %v13397_v8  ;;  %v687_v25 = vsel %vm672_vm3, %v16583_v31, %v686_v46 }
 0x1eb   : > { %v426_v34 = vadd.f32 %v386_v21, %v327_v42  ;;  %v13750_v43 = vmul.f32 %v13637_v37, %v13341_v45  ;;  %v16744_v62 = vrot.slane %v13451_v40, 2  ;;  %v429_v48 = vadd.f32 %v392_v50, %v330_v29 }
 0x1ec   : > { %v785_v2 = vrot.slane %v13711_v47, 5  ;;  %v16745_v42 = vrot.slane %v13702_v63, 2  ;;  %v13777_v47 = vmul.f32 %v13559_v30, %v13431_v5  ;;  %v725_v29 = vadd.f32 %v687_v25, %v626_v36 }
 0x1ed   : > { %v485_v24 = vsel %vm474_vm1, %v16744_v62, %v484_v57  ;;  %v16749_v31 = vrot.slane %v13563_v39, 1  ;;  %v16750_v36 = vrot.slane %v13697_v19, 5  ;;  %v13807_v39 = vmul.f32 %v13566_v6, %v13431_v5 }
 0x1ee   : > { %v491_v21 = vsel %vm474_vm1, %v488_v23, %v16745_v42  ;;  %v13781_v23 = vmul.f32 %v13637_v37, %v13370_v56  ;;  %v525_v50 = vadd.f32 %v485_v24, %v426_v34  ;;  %v13791_v42 = vmul.f32 %v13655_v33, %v13370_v56 }
 0x1ef   : > { %v388_v32 = vsel %vm375_vm0, %v385_v3, %v16749_v31  ;;  %v786_v25 = vsel %vm771_vm6, %v16750_v36, %v785_v2  ;;  %v13812_v31 = vmul.f32 %v13637_v37, %v13397_v8  ;;  %v13821_v24 = vmul.f32 %v13655_v33, %v13397_v8 }
 0x1f0   : > { %16748 = vst [vmem:[#allocation18_spill] sm:$0xff] %v13791_v42  ;;  %v16753_v3 = vrot.slane %v13593_v9, 2  ;;  %v824_v54 = vadd.f32 %v786_v25, %v725_v29  ;;  %v16756_v9 = vrot.slane %v13740_v12, 6  ;;  %v983_v29 = vrot.slane %v13807_v39, 7 }
 0x1f1   : > { %v16759_v39 = vrot.slane %v13791_v42, 5 }
 0x1f2   : > { %v487_v1 = vsel %vm474_vm1, %v484_v57, %v16753_v3 }
 0x1f4   : > { %v10770_v11 = vpop.f32.mrb[16].mxu0 }
 0x1f5   : > { %v13743_v44 = vadd.f32 %v10770_v11, %v13466_v53  ;;  %v1946_v38 = vpop.f32.mrb[17].mxu0  ;;  %v583_v53 = vrot.slane %v13721_v51, 3  ;;  %v13773_v51 = vmul.f32 %v13566_v6, %v13397_v8 }
 0x1f6   : > { %v13753_v22 = vadd.f32 %v1946_v38, %v13477_v41  ;;  %v10771_v59 = vpop.f32.mrb[18].mxu0  ;;  %v13766_v41 = vmul.f32 %v13655_v33, %v13341_v45  ;;  %v682_v38 = vrot.slane %v13750_v43, 4  ;;  %v16751_v43 = vrot.slane %v13732_v17, 3 }
 0x1f7   : > { %v1949_v11 = vpop.f32.mrb[19].mxu0  ;;  %v16747_v59 = vrot.slane %v13487_v35, 3 }
 0x1f8   : > { %16746 = vst [vmem:[#allocation17_spill] sm:$0xff] %v13766_v41  ;;  %v13769_v40 = vadd.f32 %v1949_v11, %v13490_v4  ;;  %v328_v4 = vmul.f32 %v13637_v37, %v13311_v26  ;;  %v528_v11 = vadd.f32 %v491_v21, %v429_v48  ;;  %v590_v35 = vsel %vm573_vm2, %v587_v61, %v16751_v43 }
 0x1f9   : > { %v584_v62 = vsel %vm573_vm2, %v16747_v59, %v583_v53  ;;  %v884_v48 = vrot.slane %v13773_v51, 6  ;;  %v16752_v61 = vrot.slane %v13510_v52, 4  ;;  %v16754_v21 = vrot.slane %v13766_v41, 4  ;;  %v13830_v52 = vld [vmem:[%s12697_s17 + $0x50] sm:$0xff] }
 0x1fa   : > { %v624_v59 = vadd.f32 %v584_v62, %v525_v50  ;;  %v427_v43 = vadd.f32 %v388_v32, %v328_v4  ;;  %v627_v51 = vadd.f32 %v590_v35, %v528_v11  ;;  %16755 = vst [vmem:[#allocation19_spill] sm:$0xff] %v13830_v52  ;;  %v13834_v32 = vmul.f32 %v13830_v52, %v13273_v16  ;;  %v13837_v4 = vld [vmem:[%s12697_s17 + $0x58] sm:$0xff] }
 0x1fb   : > { %v683_v36 = vsel %vm672_vm3, %v16752_v61, %v682_v38  ;;  %v689_v50 = vsel %vm672_vm3, %v686_v46, %v16754_v21  ;;  %v13841_v62 = vmul.f32 %v13837_v4, %v13273_v16  ;;  %v885_v57 = vsel %vm870_vm7, %v16756_v9, %v884_v48 }
 0x1fc   : > { %v16757_v46 = vrot.slane %v13781_v23, 5  ;;  %v16758_v11 = vrot.slane %v13524_v28, 5  ;;  %v880_v35 = vrot.slane %v13812_v31, 6  ;;  %v723_v3 = vadd.f32 %v683_v36, %v624_v59 }
 0x1fd   : > { %v13855_v21 = vmul.f32 %v13637_v37, %v13431_v5  ;;  %v13859_v61 = vmul.f32 %v13655_v33, %v13431_v5  ;;  %v526_v9 = vadd.f32 %v487_v1, %v427_v43  ;;  %v726_v34 = vadd.f32 %v689_v50, %v627_v51  ;;  %v11941_v50 = vld [vmem:[#allocation7 + $0x180] sm:$0xff]  }
 0x1fe   : > { %v782_v25 = vsel %vm771_vm6, %v16758_v11, %v16757_v46  ;;  %v788_v41 = vsel %vm771_vm6, %v785_v2, %v16759_v39  ;;  %v16760_v46 = vrot.slane %v13620_v27, 3  ;;  %v13872_v11 = vmul.f32 %v13830_v52, %v13289_v55  ;;  %v11942_v39 = vld [vmem:[#allocation7 + $0x3c0] sm:$0xff]   ;;  %10868 = vmatprep.subr.bf16.mxu1 %v11941_v50 }
 0x1ff   : > { %v13876_v1 = vmul.f32 %v13837_v4, %v13289_v55  ;;  %v13880_v2 = vadd.f32 %v13572_v58, %v13734_v49  ;;  %v1017_v27 = vadd.f32 %v13684_v0, %v13736_v15  ;;  %v16762_v43 = vrot.slane %v13777_v47, 7  ;;  %11084 = vmatprep.subr.bf16.mxu0 %v11942_v39  ;;  %10869 = vmatpush3.bf16.msra.mxu1 %v11941_v50 }
 0x200   : > { %v586_v31 = vsel %vm573_vm2, %v583_v53, %v16760_v46  ;;  %v923_v53 = vadd.f32 %v885_v57, %v824_v54  ;;  %v822_v46 = vadd.f32 %v782_v25, %v723_v3  ;;  %v16763_v59 = vrot.slane %v13545_v13, 6  ;;  %11085 = vmatpush3.bf16.msra.mxu0 %v11942_v39 }
 0x201   : > { %16761 = vst [vmem:[#allocation20_spill] sm:$0xff] %v13880_v2  ;;  %v984_v51 = vsel %vm969_vm8, %v16762_v43, %v983_v29  ;;  %v979_v28 = vrot.slane %v13855_v21, 7  ;;  %v625_v42 = vadd.f32 %v586_v31, %v526_v9  ;;  %v825_v49 = vadd.f32 %v788_v41, %v726_v34  ;;  %v13917_v9 = vld [vmem:[%s12697_s17 + $0x48] sm:$0xff] }
 0x202   : > { %v881_v36 = vsel %vm870_vm7, %v16763_v59, %v880_v35  ;;  %v16592_v58 = vrot.slane %v13859_v61, 7  ;;  %v16764_v54 = vrot.slane %v13663_v14, 4  ;;  %v333_v15 = vmul.f32 %v13830_v52, %v13311_v26 }
 0x203   : > { %v16765_v13 = vrot.slane %v13821_v24, 6  ;;  %v16766_v25 = vrot.slane %v13841_v62, 1  ;;  %v16767_v41 = vrot.slane %v13834_v32, 1  ;;  %v13910_v21 = vmul.f32 %v13830_v52, %v13315_v20 }
 0x204   : > { %v685_v0 = vsel %vm672_vm3, %v682_v38, %v16764_v54  ;;  %v13921_v31 = vmul.f32 %v13917_v9, %v13273_v16  ;;  %v1022_v59 = vadd.f32 %v984_v51, %v923_v53  ;;  %v1042_v43 = vmul.f32 %v13566_v6, %v13517_v7 }
 0x205   : > { %v887_v57 = vsel %vm870_vm7, %v884_v48, %v16765_v13  ;;  %v398_v34 = vsel %vm375_vm0, %v16767_v41, %v16766_v25  ;;  %v13914_v48 = vmul.f32 %v13837_v4, %v13315_v20  ;;  %v921_v50 = vadd.f32 %v881_v36, %v822_v46 }
 0x206   : > { %v724_v39 = vadd.f32 %v685_v0, %v625_v42  ;;  %v16768_v54 = vrot.slane %v13577_v60, 7  ;;  %v924_v25 = vadd.f32 %v887_v57, %v825_v49  ;;  %v16769_v41 = vrot.slane %v13697_v19, 5 }
 0x207   : > { %v16770_v3 = vrot.slane %v13781_v23, 5  ;;  %v432_v38 = vadd.f32 %v398_v34, %v333_v15  ;;  %v986_v53 = vsel %vm969_vm8, %v983_v29, %v16592_v58  ;;  %v16771_v6 = vrot.slane %v13876_v1, 2 }
 0x208   : > { %v980_v13 = vsel %vm969_vm8, %v16768_v54, %v979_v28  ;;  %v16772_v42 = vrot.slane %v13872_v11, 2  ;;  %v13943_v36 = vmul.f32 %v13830_v52, %v13341_v45  ;;  %v13947_v19 = vmul.f32 %v13837_v4, %v13341_v45 }
 0x209   : > { %v784_v14 = vsel %vm771_vm6, %v16770_v3, %v16769_v41  ;;  %v16591_v23 = vrot.slane %v13910_v21, 3  ;;  %v16593_v51 = vrot.slane %v13914_v48, 3  ;;  %v16594_v29 = vrot.slane %v13921_v31, 1 }
 0x20a   : > { %v497_v60 = vsel %vm474_vm1, %v16772_v42, %v16771_v6  ;;  %v13954_v46 = vmul.f32 %v13917_v9, %v13289_v55  ;;  %v1020_v49 = vadd.f32 %v980_v13, %v921_v50  ;;  %v1040_v0 = vmul.f32 %v13637_v37, %v13517_v7 }
 0x20b   : > { %v1043_v15 = vmul.f32 %v13655_v33, %v13517_v7  ;;  %v823_v57 = vadd.f32 %v784_v14, %v724_v39  ;;  %v1023_v34 = vadd.f32 %v986_v53, %v924_v25  ;;  %v16773_v3 = vrot.slane %v13740_v12, 6 }
 0x20c   : > { %v531_v41 = vadd.f32 %v497_v60, %v432_v38  ;;  %v13965_v6 = vmul.f32 %v13830_v52, %v13370_v56  ;;  %v16595_v42 = vrot.slane %v13943_v36, 4  ;;  %v16599_v50 = vrot.slane %v13947_v19, 4 }
 0x20d   : > { %v883_v54 = vsel %vm870_vm7, %v880_v35, %v16773_v3  ;;  %v13971_v37 = vmul.f32 %v13837_v4, %v13370_v56  ;;  %v331_v14 = vmul.f32 %v13655_v33, %v13311_v26  ;;  %v596_v12 = vsel %vm573_vm2, %v16591_v23, %v16593_v51 }
 0x20e   : > { %v16774_v35 = vrot.slane %v13659_v10, 1  ;;  %v16600_v39 = vrot.slane %v13954_v46, 2  ;;  %v13988_v13 = vmul.f32 %v13917_v9, %v13315_v20  ;;  %v1052_v33 = vadd.f32 %v13693_v18, %v1017_v27 }
 0x20f   : > { %v1057_v25 = vadd.f32 %v1042_v43, %v1022_v59  ;;  %v922_v53 = vadd.f32 %v883_v54, %v823_v57  ;;  %v13993_v60 = vmul.f32 %v13830_v52, %v13397_v8  ;;  %v1055_v3 = vadd.f32 %v1040_v0, %v1020_v49 }
 0x210   : > { %v394_v38 = vsel %vm375_vm0, %v16774_v35, %v16594_v29  ;;  %v1058_v23 = vadd.f32 %v1043_v15, %v1023_v34  ;;  %v16775_v10 = vrot.slane %v13777_v47, 7  ;;  %v16596_v58 = vrot.slane %v13965_v6, 5 }
 0x211   : > { %v630_v51 = vadd.f32 %v596_v12, %v531_v41  ;;  %v16597_v29 = vrot.slane %v13971_v37, 5  ;;  %v14002_v18 = vmul.f32 %v13837_v4, %v13397_v8  ;;  %v430_v27 = vadd.f32 %v394_v38, %v331_v14 }
 0x212   : > { %v982_v35 = vsel %vm969_vm8, %v979_v28, %v16775_v10  ;;  %v695_v47 = vsel %vm672_vm3, %v16595_v42, %v16599_v50  ;;  %v16776_v28 = vrot.slane %v13702_v63, 2  ;;  %v16598_v49 = vrot.slane %v13988_v13, 3  ;;  %v16779_v42 = vld [vmem:[#allocation13_spill] sm:$0xff] }
 0x213   : > { %v14017_v0 = vmul.f32 %v13917_v9, %v13341_v45  ;;  %v1021_v34 = vadd.f32 %v982_v35, %v922_v53  ;;  %v1041_v54 = vmul.f32 %v13559_v30, %v13517_v7  ;;  %v16601_v41 = vrot.slane %v13993_v60, 6 }
 0x214   : > { %v10802_v59 = vpop.f32.mrb[20].mxu0  ;;  %v493_v43 = vsel %vm474_vm1, %v16776_v28, %v16600_v39  ;;  %v14030_v12 = vmul.f32 %v13830_v52, %v13431_v5  ;;  %v14034_v38 = vmul.f32 %v13837_v4, %v13431_v5  ;;  %v729_v10 = vadd.f32 %v695_v47, %v630_v51 }
 0x215   : > { %v14020_v15 = vadd.f32 %v10802_v59, %v13743_v44  ;;  %v2139_v57 = vpop.f32.mrb[21].mxu0  ;;  %v14037_v44 = vld [vmem:[%s12697_s17 + $0x60] sm:$0xff]  ;;  %v16603_v35 = vrot.slane %v14002_v18, 6  ;;  %v529_v59 = vadd.f32 %v493_v43, %v430_v27  ;;  %v16602_v51 = vrot.slane %v14017_v0, 4 }
 0x216   : > { %v14026_v63 = vadd.f32 %v2139_v57, %v13753_v22  ;;  %v10803_v14 = vpop.f32.mrb[22].mxu0  ;;  %16777 = vst [vmem:[#allocation21_spill] sm:$0xff] %v14030_v12  ;;  %v14041_v53 = vmul.f32 %v14037_v44, %v13273_v16  ;;  %v794_v22 = vsel %vm771_vm6, %v16596_v58, %v16597_v29  ;;  %v16778_v57 = vrot.slane %v13732_v17, 3 }
 0x217   : > { %v2142_v30 = vpop.f32.mrb[23].mxu0  ;;  %v14060_v47 = vmul.f32 %v13917_v9, %v13370_v56  ;;  %v14063_v58 = vadd.f32 %v16779_v42, %v1052_v33  ;;  %v14066_v27 = vadd.f32 %v16779_v42, %v1057_v25  ;;  %v14072_v43 = vadd.f32 %v16779_v42, %v1058_v23 }
 0x218   : > { %v14050_v28 = vadd.f32 %v2142_v30, %v13769_v40  ;;  %v592_v14 = vsel %vm573_vm2, %v16778_v57, %v16598_v49  ;;  %v14069_v40 = vadd.f32 %v16779_v42, %v1055_v3  ;;  %v1056_v17 = vadd.f32 %v1041_v54, %v1021_v34  ;;  %v16784_v34 = vld [vmem:[#allocation17_spill] sm:$0xff] }
 0x219   : > { %16780 = vst [vmem:[#allocation13_spill] sm:$0xff] %v14063_v58  ;;  %16781 = vst [vmem:[#allocation22_spill] sm:$0xff] %v14066_v27  ;;  %v16605_v57 = vrot.slane %v14041_v53, 1  ;;  %v14078_v29 = vmul.f32 %v14037_v44, %v13289_v55  ;;  %v828_v33 = vadd.f32 %v794_v22, %v729_v10  ;;  %v628_v25 = vadd.f32 %v592_v14, %v529_v59 }
 0x21a   : > { %16782 = vst [vmem:[#allocation23_spill] sm:$0xff] %v14069_v40  ;;  %16783 = vst [vmem:[#allocation24_spill] sm:$0xff] %v14072_v43  ;;  %v14083_v3 = vmul.f32 %v13917_v9, %v13397_v8  ;;  %v893_v23 = vsel %vm870_vm7, %v16601_v41, %v16603_v35  ;;  %v16785_v54 = vrot.slane %v16784_v34, 4  ;;  %v14098_v22 = vmul.f32 %v14037_v44, %v13315_v20 }
 0x21b   : > { %v14104_v39 = vmul.f32 %v13917_v9, %v13431_v5  ;;  %v334_v41 = vmul.f32 %v13837_v4, %v13311_v26  ;;  %v14117_v59 = vadd.f32 %v16779_v42, %v1056_v17  ;;  %v927_v10 = vadd.f32 %v893_v23, %v828_v33 }
 0x21c   : > { %v691_v50 = vsel %vm672_vm3, %v16785_v54, %v16602_v51  ;;  %v16786_v51 = vrot.slane %v13841_v62, 1  ;;  %v16787_v34 = vrot.slane %v14034_v38, 7  ;;  %v16788_v54 = vrot.slane %v14030_v12, 7 }
 0x21d   : > { %v727_v30 = vadd.f32 %v691_v50, %v628_v25  ;;  %v1046_v62 = vmul.f32 %v13837_v4, %v13517_v7  ;;  %v14136_v23 = vmul.f32 %v14037_v44, %v13341_v45  ;;  %v16792_v4 = vrot.slane %v14078_v29, 2 }
 0x21e   : > { %v400_v35 = vsel %vm375_vm0, %v16786_v51, %v16605_v57  ;;  %v992_v43 = vsel %vm969_vm8, %v16788_v54, %v16787_v34  ;;  %v16789_v51 = vrot.slane %v14060_v47, 5  ;;  %v16790_v57 = vld [vmem:[#allocation18_spill] sm:$0xff]  ;;  %v14140_v34 = vmul.f32 %v14037_v44, %v13370_v56 }
 0x21f   : > { %v16791_v14 = vrot.slane %v16790_v57, 5  ;;  %v433_v25 = vadd.f32 %v400_v35, %v334_v41  ;;  %v16793_v54 = vrot.slane %v13876_v1, 2  ;;  %v14157_v35 = vld [vmem:[%s12697_s17 + $0x78] sm:$0xff]  ;;  %v1026_v33 = vadd.f32 %v992_v43, %v927_v10 }
 0x220   : > { %v358_v50 = vmul.f32 %v14157_v35, %v13273_v16  ;;  %v16795_v1 = vrot.slane %v14083_v3, 6  ;;  %v16797_v40 = vrot.slane %v13834_v32, 1  ;;  %v16798_v27 = vrot.slane %v13921_v31, 1 }
 0x221   : > { %v790_v17 = vsel %vm771_vm6, %v16791_v14, %v16789_v51  ;;  %v499_v57 = vsel %vm474_vm1, %v16793_v54, %v16792_v4  ;;  %v332_v14 = vmul.f32 %v13917_v9, %v13311_v26  ;;  %v14150_v51 = vld [vmem:[%s12697_s17 + $0x70] sm:$0xff]  ;;  %v16796_v4 = vrot.slane %v13821_v24, 6 }
 0x222   : > { %v14154_v41 = vmul.f32 %v14150_v51, %v13273_v16  ;;  %v826_v49 = vadd.f32 %v790_v17, %v727_v30  ;;  %v396_v58 = vsel %vm375_vm0, %v16798_v27, %v16797_v40  ;;  %v16799_v2 = vrot.slane %v14098_v22, 3 }
 0x223   : > { %v889_v54 = vsel %vm870_vm7, %v16796_v4, %v16795_v1  ;;  %v16800_v52 = vrot.slane %v13914_v48, 3  ;;  %v405_v30 = vrot.slane %v358_v50, 1  ;;  %v14179_v24 = vmul.f32 %v14150_v51, %v13289_v55  ;;  %v11944_v1 = vld [vmem:[#allocation7 + $0x3c8] sm:$0xff]  }
 0x224   : > { %16794 = vst [vmem:[#allocation17_spill] sm:$0xff] %v14154_v41  ;;  %v532_v10 = vadd.f32 %v499_v57, %v433_v25  ;;  %v14184_v31 = vmul.f32 %v14037_v44, %v13397_v8  ;;  %v457_v27 = vmul.f32 %v14157_v35, %v13289_v55  ;;  %v16801_v48 = vrot.slane %v14104_v39, 7  ;;  %v11943_v57 = vld [vmem:[#allocation7 + $0x188] sm:$0xff]   ;;  %11086 = vmatprep.subr.bf16.mxu0 %v11944_v1 }
 0x225   : > { %v598_v12 = vsel %vm573_vm2, %v16800_v52, %v16799_v2  ;;  %v16802_v52 = vrot.slane %v13859_v61, 7  ;;  %v14196_v17 = vmul.f32 %v14037_v44, %v13431_v5  ;;  %v431_v50 = vadd.f32 %v396_v58, %v332_v14  ;;  %10870 = vmatprep.subr.bf16.mxu1 %v11943_v57  ;;  %11087 = vmatpush3.bf16.msra.mxu0 %v11944_v1 }
 0x226   : > { %v925_v25 = vadd.f32 %v889_v54, %v826_v49  ;;  %v16803_v4 = vrot.slane %v13872_v11, 2  ;;  %v16804_v32 = vrot.slane %v13954_v46, 2  ;;  %v337_v61 = vmul.f32 %v14150_v51, %v13311_v26  ;;  %10871 = vmatpush3.bf16.msra.mxu1 %v11943_v57 }
 0x227   : > { %v988_v2 = vsel %vm969_vm8, %v16802_v52, %v16801_v48  ;;  %v16805_v48 = vrot.slane %v14154_v41, 1  ;;  %v504_v58 = vrot.slane %v457_v27, 2  ;;  %v14211_v49 = vmul.f32 %v14150_v51, %v13315_v20 }
 0x228   : > { %v495_v43 = vsel %vm474_vm1, %v16804_v32, %v16803_v4  ;;  %v556_v11 = vmul.f32 %v14157_v35, %v13315_v20  ;;  %v631_v46 = vadd.f32 %v598_v12, %v532_v10  ;;  %v16806_v14 = vrot.slane %v14136_v23, 4 }
 0x229   : > { %v406_v52 = vsel %vm375_vm0, %v16805_v48, %v405_v30  ;;  %v16807_v54 = vrot.slane %v13947_v19, 4  ;;  %v14222_v30 = vld [vmem:[%s12697_s17 + $0x68] sm:$0xff]  ;;  %v530_v40 = vadd.f32 %v495_v43, %v431_v50  ;;  %v14231_v19 = vmul.f32 %v14150_v51, %v13341_v45 }
 0x22a   : > { %v14226_v27 = vmul.f32 %v14222_v30, %v13273_v16  ;;  %v655_v12 = vmul.f32 %v14157_v35, %v13341_v45  ;;  %v14235_v10 = vadd.f32 %v1046_v62, %v1026_v33  ;;  %v436_v4 = vadd.f32 %v406_v52, %v337_v61 }
 0x22b   : > { %v697_v32 = vsel %vm672_vm3, %v16807_v54, %v16806_v14  ;;  %v16808_v14 = vrot.slane %v13910_v21, 3  ;;  %v16809_v54 = vrot.slane %v13988_v13, 3  ;;  %v1044_v50 = vmul.f32 %v13917_v9, %v13517_v7 }
 0x22c   : > { %v401_v43 = vrot.slane %v14226_v27, 1  ;;  %v16810_v57 = vrot.slane %v14179_v24, 2  ;;  %v601_v48 = vrot.slane %v14211_v49, 3  ;;  %v603_v62 = vrot.slane %v556_v11, 3 }
 0x22d   : > { %v594_v16 = vsel %vm573_vm2, %v16809_v54, %v16808_v14  ;;  %v1024_v33 = vadd.f32 %v988_v2, %v925_v25  ;;  %v730_v41 = vadd.f32 %v697_v32, %v631_v46  ;;  %v16811_v21 = vrot.slane %v14140_v34, 5 }
 0x22e   : > { %v505_v1 = vsel %vm474_vm1, %v16810_v57, %v504_v58  ;;  %v16812_v13 = vrot.slane %v13971_v37, 5  ;;  %v16813_v52 = vrot.slane %v14184_v31, 6  ;;  %v16814_v14 = vrot.slane %v14002_v18, 6 }
 0x22f   : > { %v16815_v54 = vrot.slane %v14196_v17, 7  ;;  %v16816_v58 = vrot.slane %v14034_v38, 7  ;;  %v629_v2 = vadd.f32 %v594_v16, %v530_v40  ;;  %v16620_v25 = vrot.slane %v14231_v19, 4  ;;  %v11945_v40 = vld [vmem:[#allocation7 + $0x190] sm:$0xff]  }
 0x230   : > { %v796_v61 = vsel %vm771_vm6, %v16812_v13, %v16811_v21  ;;  %v895_v9 = vsel %vm870_vm7, %v16814_v14, %v16813_v52  ;;  %v702_v46 = vrot.slane %v655_v12, 4  ;;  %v16817_v37 = vrot.slane %v13943_v36, 4  ;;  %v11946_v16 = vld [vmem:[#allocation7 + $0x3d0] sm:$0xff]   ;;  %10872 = vmatprep.subr.bf16.mxu1 %v11945_v40 }
 0x231   : > { %v994_v11 = vsel %vm969_vm8, %v16816_v58, %v16815_v54  ;;  %v16818_v32 = vrot.slane %v14017_v0, 4  ;;  %v535_v21 = vadd.f32 %v505_v1, %v436_v4  ;;  %v335_v18 = vmul.f32 %v14037_v44, %v13311_v26  ;;  %11088 = vmatprep.subr.bf16.mxu0 %v11946_v16  ;;  %10873 = vmatpush3.bf16.msra.mxu1 %v11945_v40 }
 0x232   : > { %v16819_v38 = vrot.slane %v14041_v53, 1  ;;  %v604_v36 = vsel %vm573_vm2, %v601_v48, %v603_v62  ;;  %v14282_v0 = vmul.f32 %v14150_v51, %v13370_v56  ;;  %v754_v4 = vmul.f32 %v14157_v35, %v13370_v56  ;;  %11089 = vmatpush3.bf16.msra.mxu0 %v11946_v16 }
 0x233   : > { %v693_v57 = vsel %vm672_vm3, %v16818_v32, %v16817_v37  ;;  %v14288_v26 = vmul.f32 %v14222_v30, %v13289_v55  ;;  %v829_v53 = vadd.f32 %v796_v61, %v730_v41  ;;  %v14292_v1 = vmul.f32 %v14222_v30, %v13315_v20 }
 0x234   : > { %v402_v13 = vsel %vm375_vm0, %v16819_v38, %v401_v43  ;;  %v14296_v62 = vmul.f32 %v14222_v30, %v13341_v45  ;;  %v728_v52 = vadd.f32 %v693_v57, %v629_v2  ;;  %v16820_v14 = vrot.slane %v13965_v6, 5  ;;  %v10834_v61 = vpop.f32.mrb[24].mxu0 }
 0x235   : > { %v434_v12 = vadd.f32 %v402_v13, %v335_v18  ;;  %v16821_v54 = vrot.slane %v14060_v47, 5  ;;  %v703_v55 = vsel %vm672_vm3, %v16620_v25, %v702_v46  ;;  %v500_v20 = vrot.slane %v14288_v26, 2  ;;  %v2355_v18 = vpop.f32.mrb[25].mxu0 }
 0x236   : > { %v634_v41 = vadd.f32 %v604_v36, %v535_v21  ;;  %v14309_v45 = vmul.f32 %v14150_v51, %v13397_v8  ;;  %v853_v6 = vmul.f32 %v14157_v35, %v13397_v8  ;;  %v599_v47 = vrot.slane %v14292_v1, 3  ;;  %v10835_v36 = vpop.f32.mrb[26].mxu0 }
 0x237   : > { %v792_v58 = vsel %vm771_vm6, %v16821_v54, %v16820_v14  ;;  %v16618_v2 = vrot.slane %v14282_v0, 5  ;;  %v801_v37 = vrot.slane %v754_v4, 5  ;;  %v16822_v46 = vrot.slane %v14078_v29, 2  ;;  %v2358_v54 = vpop.f32.mrb[27].mxu0 }
 0x238   : > { %v14322_v57 = vmul.f32 %v14222_v30, %v13370_v56  ;;  %v14325_v21 = vadd.f32 %v10834_v61, %v14020_v15  ;;  %v16823_v13 = vrot.slane %v14098_v22, 3  ;;  %v16619_v16 = vrot.slane %v14296_v62, 4 }
 0x239   : > { %v501_v32 = vsel %vm474_vm1, %v16822_v46, %v500_v20  ;;  %v14334_v29 = vadd.f32 %v2355_v18, %v14026_v63  ;;  %v928_v4 = vadd.f32 %v895_v9, %v829_v53  ;;  %v827_v56 = vadd.f32 %v792_v58, %v728_v52 }
 0x23a   : > { %v533_v38 = vadd.f32 %v501_v32, %v434_v12  ;;  %v600_v40 = vsel %vm573_vm2, %v16823_v13, %v599_v47  ;;  %v16824_v14 = vrot.slane %v13993_v60, 6  ;;  %v16825_v15 = vrot.slane %v14083_v3, 6 }
 0x23b   : > { %v733_v61 = vadd.f32 %v703_v55, %v634_v41  ;;  %v16616_v22 = vrot.slane %v14309_v45, 6  ;;  %v900_v46 = vrot.slane %v853_v6, 6  ;;  %v14344_v32 = vmul.f32 %v14150_v51, %v13431_v5  ;;  %v14364_v55 = vld [vmem:[#allocation9 + $0x2] ss:$0 sm:$0xff] }
 0x23c   : > { %v891_v12 = vsel %vm870_vm7, %v16825_v15, %v16824_v14  ;;  %v14347_v63 = vadd.f32 %v2358_v54, %v14050_v28  ;;  %v802_v60 = vsel %vm771_vm6, %v16618_v2, %v801_v37  ;;  %v952_v3 = vmul.f32 %v14157_v35, %v13431_v5  ;;  %v16830_v37 = vld [vmem:[#allocation21_spill] sm:$0xff] }
 0x23d   : > { %16826 = vst [vmem:[#allocation18_spill] sm:$0xff] %v14344_v32  ;;  %v632_v9 = vadd.f32 %v600_v40, %v533_v38  ;;  %v1059_v53 = vadd.f32 %v1044_v50, %v1024_v33  ;;  %v16828_v52 = vrot.slane %v14136_v23, 4  ;;  %v16617_v51 = vrot.slane %v14322_v57, 5 }
 0x23e   : > { %16827 = vst [vmem:[#allocation25_spill] sm:$0xff] %v14347_v63  ;;  %v14362_v28 = vmul.f32 %v14222_v30, %v13397_v8  ;;  %v1027_v6 = vadd.f32 %v994_v11, %v928_v4  ;;  %v1047_v50 = vmul.f32 %v14037_v44, %v13517_v7  ;;  %v926_v33 = vadd.f32 %v891_v12, %v827_v56  ;;  %v10854_v11 = vpop.f32.mrb[0].mxu0 }
 0x23f   : > { %v699_v58 = vsel %vm672_vm3, %v16828_v52, %v16619_v16  ;;  %v14371_v23 = vadd.f32 %v16779_v42, %v14235_v10  ;;  %v16831_v18 = vrot.slane %v16830_v37, 7  ;;  %v16832_v38 = vrot.slane %v14104_v39, 7  ;;  %v2507_v14 = vpop.f32.mrb[1].mxu0 }
 0x240   : > { %16829 = vst [vmem:[#allocation26_spill] sm:$0xff] %v14362_v28  ;;  %v832_v13 = vadd.f32 %v802_v60, %v733_v61  ;;  %v14380_v40 = vmul.f32 %v14222_v30, %v13431_v5  ;;  %v901_v44 = vsel %vm870_vm7, %v16616_v22, %v900_v46  ;;  %v16613_v36 = vrot.slane %v14344_v32, 7  ;;  %v10855_v61 = vpop.f32.mrb[2].mxu0 }
 0x241   : > { %v990_v8 = vsel %vm969_vm8, %v16832_v38, %v16831_v18  ;;  %v999_v10 = vrot.slane %v952_v3, 7  ;;  %v731_v4 = vadd.f32 %v699_v58, %v632_v9  ;;  %v2591_v56 = vadd.f32 %v10854_v11, %v14364_v55  ;;  %v16835_v3 = vld [vmem:[#allocation19_spill] sm:$0xff]  ;;  %v14399_v58 = vpop.f32.mrb[3].mxu0 }
 0x242   : > { %16833 = vst [vmem:[#allocation21_spill] sm:$0xff] %v14380_v40  ;;  %v14388_v39 = vadd.f32 %v16779_v42, %v1059_v53  ;;  %v16834_v5 = vrot.slane %v14140_v34, 5  ;;  %v16615_v12 = vrot.slane %v14362_v28, 6  ;;  %v2589_v54 = vadd.f32 %v14364_v55, %v2507_v14  ;;  %v12262_v14 = vld [vmem:[#allocation4] ss:$0 sm:$0xff] }
 0x243   : > { %v1062_v46 = vadd.f32 %v1047_v50, %v1027_v6  ;;  %v1025_v60 = vadd.f32 %v990_v8, %v926_v33  ;;  %v1045_v9 = vmul.f32 %v16835_v3, %v13517_v7  ;;  %v2606_v52 = vmax.f32 %v2591_v56, 0.0  ;;  %v16836_v50 = vld [vmem:[#allocation14_spill] sm:$0xff] }
 0x244   : > { %v798_v15 = vsel %vm771_vm6, %v16834_v5, %v16617_v51  ;;  %v931_v37 = vadd.f32 %v901_v44, %v832_v13  ;;  %v16614_v34 = vrot.slane %v14380_v40, 7  ;;  %v2604_v18 = vmax.f32 %v2589_v54, 0.0  ;;  %v16839_v5 = vld [vmem:[#allocation17_spill] sm:$0xff] }
 0x245   : > { %v1000_v38 = vsel %vm969_vm8, %v16613_v36, %v999_v10  ;;  %v830_v11 = vadd.f32 %v798_v15, %v731_v4  ;;  %v336_v6 = vmul.f32 %v12262_v14, %v14222_v30  ;;  %v16837_v33 = vmax.f32 %v16836_v50, 0.0  ;;  %v16841_v4 = vld [vmem:[#allocation15_spill] sm:$0xff] }
 0x246   : > { %v16838_v13 = vrot.slane %v14184_v31, 6  ;;  %v16840_v54 = vrot.slane %v16839_v5, 1  ;;  %v16842_v15 = vmax.f32 %v16841_v4, 0.0  ;;  %v14423_v14 = vadd.f32 %v16779_v42, %v1062_v46  ;;  %v14436_v46 = vpop.f32.mrb[4].mxu0 }
 0x247   : > { %v2621_v8 = vadd.f32 %v2606_v52, %v16837_v33  ;;  %v14425_v52 = vadd.f32 %v1045_v9, %v1025_v60  ;;  %v1050_v50 = vmul.f32 %v14157_v35, %v13517_v7  ;;  %v16843_v33 = vld [vmem:[#allocation16_spill] sm:$0xff]  ;;  %v1030_v36 = vadd.f32 %v1000_v38, %v931_v37  ;;  %v14441_v38 = vpop.f32.mrb[5].mxu0 }
 0x248   : > { %v897_v44 = vsel %vm870_vm7, %v16838_v13, %v16615_v12  ;;  %v404_v10 = vsel %vm375_vm0, %v401_v43, %v16840_v54  ;;  %v2619_v3 = vadd.f32 %v2604_v18, %v16842_v15  ;;  %v16844_v27 = vrot.slane %v14196_v17, 7 }
 0x249   : > { %v2683_v31 = vcombine.high %v2621_v8, %v2621_v8  ;;  %v2690_v13 = vrot.slane %v2621_v8, %v16843_v33  ;;  %v929_v60 = vadd.f32 %v897_v44, %v830_v11  ;;  %v435_v9 = vadd.f32 %v404_v10, %v336_v6  ;;  %v11948_v11 = vld [vmem:[#allocation7 + $0x3d8] sm:$0xff]  }
 0x24a   : > { %v996_v43 = vsel %vm969_vm8, %v16844_v27, %v16614_v34  ;;  %v2649_v5 = vcombine.high %v2619_v3, %v2619_v3  ;;  %v2656_v18 = vrot.slane %v2619_v3, %v16843_v33  ;;  %v2592_v37 = vadd.f32 %v10855_v61, %v14364_v55  ;;  %v14445_v3 = vpop.f32.mrb[6].mxu0  ;;  %v11947_v34 = vld [vmem:[#allocation7 + $0x198] sm:$0xff]   ;;  %11090 = vmatprep.subr.bf16.mxu0 %v11948_v11 }
 0x24b   : > { %v2697_v54 = vrot.slane %v2683_v31, %v16843_v33  ;;  %v2698_v35 = vcombine.high %v2690_v13, %v2690_v13  ;;  %v3020_v4 = vsel %vm870_vm7, %v2690_v13, -inf  ;;  %v14449_v13 = vpop.f32.mrb[7].mxu0  ;;  %10874 = vmatprep.subr.bf16.mxu1 %v11947_v34  ;;  %11091 = vmatpush3.bf16.msra.mxu0 %v11948_v11  ;;  %v16845_v2 = vrot.slane %v14179_v24, 2 }
 0x24c   : > { %v3021_v8 = vrot.slane %v3020_v4, 4  ;;  %v2663_v17 = vrot.slane %v2649_v5, %v16843_v33  ;;  %v2664_v15 = vcombine.high %v2656_v18, %v2656_v18  ;;  %v2964_v27 = vsel %vm870_vm7, %v2656_v18, -inf  ;;  %10875 = vmatpush3.bf16.msra.mxu1 %v11947_v34 }
 0x24d   : > { %v2699_v6 = vcombine.high %v2697_v54, %v2697_v54  ;;  %v3027_v44 = vsel %vm870_vm7, %v2698_v35, -inf  ;;  %v3034_v10 = vsel %vm870_vm7, %v2697_v54, -inf  ;;  %v2965_v31 = vrot.slane %v2964_v27, 4 }
 0x24e   : > { %v3022_v61 = vmax.f32 %v3020_v4, %v3021_v8  ;;  %v3028_v12 = vrot.slane %v3027_v44, 4  ;;  %v3035_v22 = vrot.slane %v3034_v10, 4  ;;  %v2665_v56 = vcombine.high %v2663_v17, %v2663_v17 }
 0x24f   : > { %v3041_v5 = vsel %vm870_vm7, %v2699_v6, -inf  ;;  %v2966_v18 = vmax.f32 %v2964_v27, %v2965_v31  ;;  %v2971_v53 = vsel %vm870_vm7, %v2664_v15, -inf  ;;  %v2978_v41 = vsel %vm870_vm7, %v2663_v17, -inf  ;;  %v14462_v17 = vpop.f32.mrb[8].mxu0 }
 0x250   : > { %v3023_v35 = vrot.slane %v3022_v61, 2  ;;  %v3029_v54 = vmax.f32 %v3027_v44, %v3028_v12  ;;  %v3042_v51 = vrot.slane %v3041_v5, 4  ;;  %v503_v4 = vsel %vm474_vm1, %v500_v20, %v16845_v2  ;;  %v14464_v31 = vpop.f32.mrb[9].mxu0 }
 0x251   : > { %v3036_v8 = vmax.f32 %v3034_v10, %v3035_v22  ;;  %v2972_v16 = vrot.slane %v2971_v53, 4  ;;  %v2979_v25 = vrot.slane %v2978_v41, 4  ;;  %v2607_v6 = vmax.f32 %v2592_v37, 0.0  ;;  %v14466_v2 = vpop.f32.mrb[10].mxu0 }
 0x252   : > { %v2967_v27 = vrot.slane %v2966_v18, 2  ;;  %v2985_v15 = vsel %vm870_vm7, %v2665_v56, -inf  ;;  %v2590_v34 = vadd.f32 %v14364_v55, %v14399_v58  ;;  %v1065_v12 = vadd.f32 %v1050_v50, %v1030_v36 }
 0x253   : > { %v3030_v11 = vrot.slane %v3029_v54, 2  ;;  %v3043_v44 = vmax.f32 %v3041_v5, %v3042_v51  ;;  %v2973_v24 = vmax.f32 %v2971_v53, %v2972_v16  ;;  %v534_v26 = vadd.f32 %v503_v4, %v435_v9  ;;  %v16846_v16 = vld [vmem:[#allocation20_spill] sm:$0xff]  ;;  %v14477_v9 = vpop.f32.mrb[11].mxu0 }
 0x254   : > { %v3024_v20 = vmax.f32 %v3022_v61, %v3023_v35  ;;  %v1028_v22 = vadd.f32 %v996_v43, %v929_v60  ;;  %v1048_v37 = vmul.f32 %v14222_v30, %v13517_v7  ;;  %v602_v58 = vsel %vm573_vm2, %v599_v47, %v601_v48  ;;  %v11949_v35 = vld [vmem:[#allocation7 + $0x1a0] sm:$0xff]  }
 0x255   : > { %v3037_v36 = vrot.slane %v3036_v8, 2  ;;  %v2980_v56 = vmax.f32 %v2978_v41, %v2979_v25  ;;  %v2986_v51 = vrot.slane %v2985_v15, 4  ;;  %v16847_v53 = vmax.f32 %v16846_v16, 0.0  ;;  %10876 = vmatprep.subr.bf16.mxu1 %v11949_v35  ;;  %v12263_v16 = vld [vmem:[#allocation9] ss:$0 sm:$0xff] }
 0x256   : > { %v2968_v10 = vmax.f32 %v2966_v18, %v2967_v27  ;;  %v2605_v61 = vmax.f32 %v2590_v34, 0.0  ;;  %v14481_v43 = vadd.f32 %v16779_v42, %v14425_v52  ;;  %v14484_v7 = vadd.f32 %v16779_v42, %v1065_v12  ;;  %v11950_v52 = vld [vmem:[#allocation7 + $0x3e0] sm:$0xff]   ;;  %v16850_v34 = vld [vmem:[#allocation13_spill] sm:$0xff]  ;;  %10877 = vmatpush3.bf16.msra.mxu1 %v11949_v35 }
 0x257   : > { %v2622_v50 = vadd.f32 %v2607_v6, %v16847_v53  ;;  %v3031_v49 = vmax.f32 %v3029_v54, %v3030_v11  ;;  %v3044_v30 = vrot.slane %v3043_v44, 2  ;;  %v2974_v48 = vrot.slane %v2973_v24, 2  ;;  %11092 = vmatprep.subr.bf16.mxu0 %v11950_v52 }
 0x258   : > { %v633_v1 = vadd.f32 %v602_v58, %v534_v26  ;;  %v3025_v25 = vrot.slane %v3024_v20, 1  ;;  %v1063_v41 = vadd.f32 %v1048_v37, %v1028_v22  ;;  %v16848_v60 = vrot.slane %v14231_v19, 4  ;;  %v14498_v19 = vpop.f32.mrb[28].mxu0  ;;  %11093 = vmatpush3.bf16.msra.mxu0 %v11950_v52 }
 0x259   : > { %v16849_v5 = vrot.slane %v14296_v62, 4  ;;  %v14492_v4 = vmax.f32 %v3036_v8, %v3037_v36  ;;  %v2981_v42 = vrot.slane %v2980_v56, 2  ;;  %v2987_v6 = vmax.f32 %v2985_v15, %v2986_v51  ;;  %v14504_v58 = vpop.f32.mrb[29].mxu0 }
 0x25a   : > { %v2700_v54 = vcombine.high %v2622_v50, %v2622_v50  ;;  %v2969_v27 = vrot.slane %v2968_v10, 1  ;;  %v16851_v12 = vmax.f32 %v16850_v34, 0.0  ;;  %v3032_v62 = vrot.slane %v3031_v49, 1 }
 0x25b   : > { %v701_v18 = vsel %vm672_vm3, %v16849_v5, %v16848_v60  ;;  %v14500_v37 = vmax.f32 %v3043_v44, %v3044_v30  ;;  %v14502_v8 = vmax.f32 %v2973_v24, %v2974_v48  ;;  %v14508_v36 = vmax.f32 %v3024_v20, %v3025_v25  ;;  %v11951_v30 = vld [vmem:[#allocation7 + $0x1a8] sm:$0xff]  }
 0x25c   : > { %v2620_v11 = vadd.f32 %v2605_v61, %v16851_v12  ;;  %v14506_v15 = vadd.f32 %v701_v18, %v633_v1  ;;  %v2707_v51 = vrot.slane %v2622_v50, %v16843_v33  ;;  %v14511_v53 = vadd.f32 %v12263_v16, %v1063_v41  ;;  %v10867_v61 = vpop.f32.mrb[30].mxu0  ;;  %v11952_v48 = vld [vmem:[#allocation7 + $0x3e8] sm:$0xff]   ;;  %10878 = vmatprep.subr.bf16.mxu1 %v11951_v30  ;;  %v11953_v12 = vld [vmem:[#allocation7 + $0x1b0] sm:$0xff]  }
 0x25d   : > { %v16852_v60 = vrot.slane %v14282_v0, 5  ;;  %v16853_v44 = vrot.slane %v14322_v57, 5  ;;  %v3039_v1 = vrot.slane %v14492_v4, 1  ;;  %v14521_v5 = vmax.f32 %v2980_v56, %v2981_v42  ;;  %v14524_v25 = vpop.f32.mrb[31].mxu0  ;;  %11094 = vmatprep.subr.bf16.mxu0 %v11952_v48  ;;  %10879 = vmatpush3.bf16.msra.mxu1 %v11951_v30 }
 0x25e   : > { %v2988_v20 = vrot.slane %v2987_v6, 2  ;;  %v2714_v50 = vrot.slane %v2700_v54, %v16843_v33  ;;  %16854 = vst [vmem:[#allocation19_spill] sm:$0xff] %v14524_v25  ;;  %v14526_v41 = vmax.f32 %v2968_v10, %v2969_v27  ;;  %v2715_v18 = vcombine.high %v2707_v51, %v2707_v51  ;;  %11095 = vmatpush3.bf16.msra.mxu0 %v11952_v48 }
 0x25f   : > { %v14518_v24 = vsel %vm771_vm6, %v16853_v44, %v16852_v60  ;;  %v3048_v0 = vsel %vm870_vm7, %v2707_v51, -inf  ;;  %v2666_v57 = vcombine.high %v2620_v11, %v2620_v11  ;;  %v14529_v35 = vmax.f32 %v3031_v49, %v3032_v62  ;;  %v11954_v51 = vld [vmem:[#allocation7 + $0x3f0] sm:$0xff]   ;;  %10880 = vmatprep.subr.bf16.mxu1 %v11953_v12 }
 0x260   : > { %v3046_v52 = vrot.slane %v14500_v37, 1  ;;  %v2976_v56 = vrot.slane %v14502_v8, 1  ;;  %v2716_v42 = vcombine.high %v2714_v50, %v2714_v50  ;;  %v3049_v54 = vrot.slane %v3048_v0, 4  ;;  %11096 = vmatprep.subr.bf16.mxu0 %v11954_v51 }
 0x261   : > { %v3055_v34 = vsel %vm870_vm7, %v2715_v18, -inf  ;;  %v3062_v10 = vsel %vm870_vm7, %v2714_v50, -inf  ;;  %v2673_v27 = vrot.slane %v2620_v11, %v16843_v33  ;;  %v2983_v16 = vrot.slane %v14521_v5, 1  ;;  %10881 = vmatpush3.bf16.msra.mxu1 %v11953_v12 }
 0x262   : > { %v2989_v49 = vmax.f32 %v2987_v6, %v2988_v20  ;;  %v3056_v62 = vrot.slane %v3055_v34, 4  ;;  %v3063_v61 = vrot.slane %v3062_v10, 4  ;;  %v3050_v60 = vmax.f32 %v3048_v0, %v3049_v54  ;;  %11097 = vmatpush3.bf16.msra.mxu0 %v11954_v51 }
 0x263   : > { %v3069_v44 = vsel %vm870_vm7, %v2716_v42, -inf  ;;  %v2680_v30 = vrot.slane %v2666_v57, %v16843_v33  ;;  %v2681_v48 = vcombine.high %v2673_v27, %v2673_v27  ;;  %v2992_v11 = vsel %vm870_vm7, %v2673_v27, -inf }
 0x264   : > { %v3057_v18 = vmax.f32 %v3055_v34, %v3056_v62  ;;  %v3064_v22 = vmax.f32 %v3062_v10, %v3063_v61  ;;  %v3070_v50 = vrot.slane %v3069_v44, 4  ;;  %v3051_v26 = vrot.slane %v3050_v60, 2 }
 0x265   : > { %v2682_v47 = vcombine.high %v2680_v30, %v2680_v30  ;;  %v2993_v6 = vrot.slane %v2992_v11, 4  ;;  %v2999_v20 = vsel %vm870_vm7, %v2681_v48, -inf  ;;  %v3006_v40 = vsel %vm870_vm7, %v2680_v30, -inf }
 0x266   : > { %v3058_v0 = vrot.slane %v3057_v18, 2  ;;  %v3065_v54 = vrot.slane %v3064_v22, 2  ;;  %v3071_v42 = vmax.f32 %v3069_v44, %v3070_v50  ;;  %v3000_v25 = vrot.slane %v2999_v20, 4 }
 0x267   : > { %v3052_v57 = vmax.f32 %v3050_v60, %v3051_v26  ;;  %v2994_v63 = vmax.f32 %v2992_v11, %v2993_v6  ;;  %v3013_v34 = vsel %vm870_vm7, %v2682_v47, -inf  ;;  %v3040_v10 = vmax.f32 %v14492_v4, %v3039_v1 }
 0x268   : > { %v3047_v27 = vmax.f32 %v14500_v37, %v3046_v52  ;;  %v3392_v12 = vpack.c.bf16 %v14508_v36, %v14508_v36  ;;  %v2990_v51 = vrot.slane %v2989_v49, 1  ;;  %v2977_v62 = vmax.f32 %v14502_v8, %v2976_v56 }
 0x269   : > { %v3072_v61 = vrot.slane %v3071_v42, 2  ;;  %v3007_v48 = vrot.slane %v3006_v40, 4  ;;  %v3014_v44 = vrot.slane %v3013_v34, 4  ;;  %v3384_v26 = vpack.c.bf16 %v14526_v41, %v14526_v41 }
 0x26a   : > { %v3059_v60 = vmax.f32 %v3057_v18, %v3058_v0  ;;  %v3066_v30 = vmax.f32 %v3064_v22, %v3065_v54  ;;  %v3001_v47 = vmax.f32 %v2999_v20, %v3000_v25  ;;  %v3393_v4 = vpack.c.bf16 %v14529_v35, %v14529_v35 }
 0x26b   : > { %v2984_v37 = vmax.f32 %v14521_v5, %v2983_v16  ;;  %v3053_v1 = vrot.slane %v3052_v57, 1  ;;  %v2995_v36 = vrot.slane %v2994_v63, 2  ;;  %v3394_v52 = vpack.c.bf16 %v3040_v10, %v3040_v10 }
 0x26c   : > { %v2991_v50 = vmax.f32 %v2989_v49, %v2990_v51  ;;  %v3008_v8 = vmax.f32 %v3006_v40, %v3007_v48  ;;  %v3015_v56 = vmax.f32 %v3013_v34, %v3014_v44  ;;  %v3395_v11 = vpack.c.bf16 %v3047_v27, %v3047_v27 }
 0x26d   : > { %v14553_v6 = vunpack.c.l.b16 %v3392_v12  ;;  %v3385_v32 = vpack.c.bf16 %v2977_v62, %v2977_v62  ;;  %v3073_v41 = vmax.f32 %v3071_v42, %v3072_v61  ;;  %v3755_v28 = vunpack.c.l.b16 %v3384_v26 }
 0x26e   : > { %v3060_v18 = vrot.slane %v3059_v60, 1  ;;  %v3067_v22 = vrot.slane %v3066_v30, 1  ;;  %v3002_v25 = vrot.slane %v3001_v47, 2  ;;  %v14555_v20 = vunpack.c.l.b16 %v3393_v4 }
 0x26f   : > { %16855 = vst [vmem:[#allocation14_spill] sm:$0xff] %v14553_v6  ;;  %v3386_v35 = vpack.c.bf16 %v2984_v37, %v2984_v37  ;;  %v3054_v0 = vmax.f32 %v3052_v57, %v3053_v1  ;;  %v2996_v5 = vmax.f32 %v2994_v63, %v2995_v36  ;;  %v14557_v16 = vunpack.c.l.b16 %v3394_v52 }
 0x270   : > { %16856 = vst [vmem:[#allocation17_spill] sm:$0xff] %v14555_v20  ;;  %v3387_v54 = vpack.c.bf16 %v2991_v50, %v2991_v50  ;;  %v3009_v49 = vrot.slane %v3008_v8, 2  ;;  %v3016_v40 = vrot.slane %v3015_v56, 2  ;;  %v14559_v34 = vunpack.c.l.b16 %v3395_v11  ;;  %v11955_v11 = vld [vmem:[#allocation7 + $0x1b8] sm:$0xff]  }
 0x271   : > { %16857 = vst [vmem:[#allocation15_spill] sm:$0xff] %v14557_v16  ;;  %v14561_v10 = vunpack.c.l.b16 %v3385_v32  ;;  %v3074_v27 = vrot.slane %v3073_v41, 1  ;;  %v2595_v42 = vadd.f32 %v14436_v46, %v14364_v55  ;;  %v14565_v12 = vmax.f32 %v3059_v60, %v3060_v18  ;;  %v11957_v18 = vld [vmem:[#allocation7 + $0x140] sm:$0xff]   ;;  %10882 = vmatprep.subr.bf16.mxu1 %v11955_v11 }
 0x272   : > { %16858 = vst [vmem:[#allocation20_spill] sm:$0xff] %v14559_v34  ;;  %v14567_v51 = vmax.f32 %v3066_v30, %v3067_v22  ;;  %v14569_v62 = vmax.f32 %v3001_v47, %v3002_v25  ;;  %v2593_v63 = vadd.f32 %v14364_v55, %v14441_v38  ;;  %v14573_v57 = vunpack.c.l.b16 %v3386_v35  ;;  %v16860_v47 = vld [vmem:[#allocation22_spill] sm:$0xff]  ;;  %10883 = vmatpush3.bf16.msra.mxu1 %v11955_v11 }
 0x273   : > { %v3396_v61 = vpack.c.bf16 %v3054_v0, %v3054_v0  ;;  %v2997_v48 = vrot.slane %v2996_v5, 1  ;;  %v2610_v44 = vmax.f32 %v2595_v42, 0.0  ;;  %v14575_v32 = vunpack.c.l.b16 %v3387_v54  ;;  %v11958_v0 = vld [vmem:[#allocation7 + $0x380] sm:$0xff]   ;;  %10892 = vmatprep.subr.bf16.mxu1 %v11957_v18 }
 0x274   : > { %v3010_v26 = vmax.f32 %v3008_v8, %v3009_v49  ;;  %v14577_v4 = vmax.f32 %v3015_v56, %v3016_v40  ;;  %v2608_v46 = vmax.f32 %v2593_v63, 0.0  ;;  %v14581_v60 = vsel %vm3582_vm9, %v14561_v10, %v3755_v28  ;;  %v16862_v8 = vld [vmem:[#allocation23_spill] sm:$0xff] }
 0x275   : > { %16859 = vst [vmem:[#allocation13_spill] sm:$0xff] %v14581_v60  ;;  %v14583_v30 = vmax.f32 %v3073_v41, %v3074_v27  ;;  %v16861_v37 = vmax.f32 %v16860_v47, 0.0  ;;  %v2596_v1 = vadd.f32 %v14445_v3, %v14364_v55  ;;  %v3397_v36 = vpack.c.bf16 %v14565_v12, %v14565_v12  ;;  %v11956_v41 = vld [vmem:[#allocation7 + $0x3f8] sm:$0xff]  }
 0x276   : > { %v3398_v52 = vpack.c.bf16 %v14567_v51, %v14567_v51  ;;  %v3004_v50 = vrot.slane %v14569_v62, 1  ;;  %v16863_v56 = vmax.f32 %v16862_v8, 0.0  ;;  %v14596_v22 = vunpack.c.l.b16 %v3396_v61  ;;  %11098 = vmatprep.subr.bf16.mxu0 %v11956_v41 }
 0x277   : > { %v2625_v38 = vadd.f32 %v2610_v44, %v16861_v37  ;;  %v2998_v25 = vmax.f32 %v2996_v5, %v2997_v48  ;;  %v3011_v54 = vrot.slane %v3010_v26, 1  ;;  %v3018_v49 = vrot.slane %v14577_v4, 1  ;;  %11099 = vmatpush3.bf16.msra.mxu0 %v11956_v41 }
 0x278   : > { %v2623_v28 = vadd.f32 %v2608_v46, %v16863_v56  ;;  %16864 = vst [vmem:[#allocation22_spill] sm:$0xff] %v14596_v22  ;;  %v2611_v63 = vmax.f32 %v2596_v1, 0.0  ;;  %11108 = vmatprep.subr.bf16.mxu0 %v11958_v0 }
 0x279   : > { %v2751_v35 = vcombine.high %v2625_v38, %v2625_v38  ;;  %v2758_v3 = vrot.slane %v2625_v38, %v16843_v33  ;;  %v3388_v6 = vpack.c.bf16 %v2998_v25, %v2998_v25 }
 0x27a   : > { %v2717_v40 = vcombine.high %v2623_v28, %v2623_v28  ;;  %v2724_v27 = vrot.slane %v2623_v28, %v16843_v33 }
 0x27b   : > { %v2765_v42 = vrot.slane %v2751_v35, %v16843_v33  ;;  %v2766_v12 = vcombine.high %v2758_v3, %v2758_v3  ;;  %v3132_v51 = vsel %vm870_vm7, %v2758_v3, -inf }
 0x27c   : > { %v3133_v5 = vrot.slane %v3132_v51, 4  ;;  %v2731_v61 = vrot.slane %v2717_v40, %v16843_v33  ;;  %v2732_v48 = vcombine.high %v2724_v27, %v2724_v27  ;;  %v3076_v44 = vsel %vm870_vm7, %v2724_v27, -inf }
 0x27d   : > { %v2767_v46 = vcombine.high %v2765_v42, %v2765_v42  ;;  %v3139_v47 = vsel %vm870_vm7, %v2766_v12, -inf  ;;  %v3146_v37 = vsel %vm870_vm7, %v2765_v42, -inf  ;;  %v3077_v38 = vrot.slane %v3076_v44, 4 }
 0x27e   : > { %v3134_v8 = vmax.f32 %v3132_v51, %v3133_v5  ;;  %v3140_v56 = vrot.slane %v3139_v47, 4  ;;  %v3147_v1 = vrot.slane %v3146_v37, 4  ;;  %v2733_v28 = vcombine.high %v2731_v61, %v2731_v61 }
 0x27f   : > { %v3153_v11 = vsel %vm870_vm7, %v2767_v46, -inf  ;;  %v3078_v35 = vmax.f32 %v3076_v44, %v3077_v38  ;;  %v3083_v3 = vsel %vm870_vm7, %v2732_v48, -inf  ;;  %v3090_v40 = vsel %vm870_vm7, %v2731_v61, -inf }
 0x280   : > { %v3135_v41 = vrot.slane %v3134_v8, 2  ;;  %v3141_v18 = vmax.f32 %v3139_v47, %v3140_v56  ;;  %v3148_v27 = vmax.f32 %v3146_v37, %v3147_v1  ;;  %v3154_v60 = vrot.slane %v3153_v11, 4  ;;  %v16866_v56 = vld [vmem:[#allocation24_spill] sm:$0xff] }
 0x281   : > { %v3399_v42 = vpack.c.bf16 %v14583_v30, %v14583_v30  ;;  %v14612_v12 = vunpack.c.l.b16 %v3397_v36  ;;  %v3079_v0 = vrot.slane %v3078_v35, 2  ;;  %v3084_v51 = vrot.slane %v3083_v3, 4 }
 0x282   : > { %v3005_v5 = vmax.f32 %v14569_v62, %v3004_v50  ;;  %v3091_v46 = vrot.slane %v3090_v40, 4  ;;  %v3097_v44 = vsel %vm870_vm7, %v2733_v28, -inf  ;;  %v3012_v48 = vmax.f32 %v3010_v26, %v3011_v54 }
 0x283   : > { %16865 = vst [vmem:[#allocation23_spill] sm:$0xff] %v14612_v12  ;;  %v3142_v38 = vrot.slane %v3141_v18, 2  ;;  %v3149_v61 = vrot.slane %v3148_v27, 2  ;;  %v3155_v22 = vmax.f32 %v3153_v11, %v3154_v60  ;;  %v3019_v47 = vmax.f32 %v14577_v4, %v3018_v49 }
 0x284   : > { %v3136_v37 = vmax.f32 %v3134_v8, %v3135_v41  ;;  %v16867_v1 = vmax.f32 %v16866_v56, 0.0  ;;  %v2594_v36 = vadd.f32 %v14364_v55, %v14449_v13  ;;  %v14621_v12 = vunpack.c.l.b16 %v3398_v52 }
 0x285   : > { %v3080_v62 = vmax.f32 %v3078_v35, %v3079_v0  ;;  %v3085_v50 = vmax.f32 %v3083_v3, %v3084_v51  ;;  %v3098_v25 = vrot.slane %v3097_v44, 4  ;;  %v14623_v34 = vunpack.c.l.b16 %v3399_v42 }
 0x286   : > { %v2626_v30 = vadd.f32 %v2611_v63, %v16867_v1  ;;  %16868 = vst [vmem:[#allocation24_spill] sm:$0xff] %v14621_v12  ;;  %v3389_v26 = vpack.c.bf16 %v3005_v5, %v3005_v5  ;;  %v14625_v54 = vunpack.c.l.b16 %v3388_v6  ;;  %v3092_v60 = vmax.f32 %v3090_v40, %v3091_v46 }
 0x287   : > { %16869 = vst [vmem:[#allocation27_spill] sm:$0xff] %v14623_v34  ;;  %v3390_v28 = vpack.c.bf16 %v3012_v48, %v3012_v48  ;;  %v3143_v4 = vmax.f32 %v3141_v18, %v3142_v38  ;;  %v3150_v49 = vmax.f32 %v3148_v27, %v3149_v61  ;;  %v3156_v8 = vrot.slane %v3155_v22, 2 }
 0x288   : > { %v3391_v11 = vpack.c.bf16 %v3019_v47, %v3019_v47  ;;  %v3137_v63 = vrot.slane %v3136_v37, 1  ;;  %v2768_v41 = vcombine.high %v2626_v30, %v2626_v30  ;;  %v2609_v56 = vmax.f32 %v2594_v36, 0.0 }
 0x289   : > { %v3081_v13 = vrot.slane %v3080_v62, 1  ;;  %v3086_v52 = vrot.slane %v3085_v50, 2  ;;  %v3099_v1 = vmax.f32 %v3097_v44, %v3098_v25  ;;  %v2775_v35 = vrot.slane %v2626_v30, %v16843_v33 }
 0x28a   : > { %v14628_v3 = vunpack.c.l.b16 %v3389_v26  ;;  %v3093_v42 = vrot.slane %v3092_v60, 2  ;;  %v14632_v6 = vadd.f32 %v14462_v17, %v14364_v55  ;;  %v14636_v40 = vadd.f32 %v14364_v55, %v14464_v31 }
 0x28b   : > { %v14638_v18 = vunpack.c.l.b16 %v3390_v28  ;;  %v3144_v27 = vrot.slane %v3143_v4, 1  ;;  %v3151_v0 = vrot.slane %v3150_v49, 1  ;;  %v3157_v51 = vmax.f32 %v3155_v22, %v3156_v8 }
 0x28c   : > { %v14640_v5 = vunpack.c.l.b16 %v3391_v11  ;;  %v3138_v46 = vmax.f32 %v3136_v37, %v3137_v63  ;;  %v2782_v44 = vrot.slane %v2768_v41, %v16843_v33  ;;  %v16872_v48 = vmax.f32 %v14117_v59, 0.0 }
 0x28d   : > { %16870 = vst [vmem:[#allocation28_spill] sm:$0xff] %v14638_v18  ;;  %v3082_v61 = vmax.f32 %v3080_v62, %v3081_v13  ;;  %v3087_v17 = vmax.f32 %v3085_v50, %v3086_v52  ;;  %v3100_v47 = vrot.slane %v3099_v1, 2  ;;  %v2783_v30 = vcombine.high %v2775_v35, %v2775_v35 }
 0x28e   : > { %16871 = vst [vmem:[#allocation29_spill] sm:$0xff] %v14640_v5  ;;  %v2624_v38 = vadd.f32 %v2609_v56, %v16872_v48  ;;  %v3094_v36 = vmax.f32 %v3092_v60, %v3093_v42  ;;  %v2784_v31 = vcombine.high %v2782_v44, %v2782_v44  ;;  %v3160_v25 = vsel %vm870_vm7, %v2775_v35, -inf }
 0x28f   : > { %v3174_v26 = vsel %vm870_vm7, %v2782_v44, -inf  ;;  %v3145_v28 = vmax.f32 %v3143_v4, %v3144_v27  ;;  %v3152_v22 = vmax.f32 %v3150_v49, %v3151_v0  ;;  %v3158_v8 = vrot.slane %v3157_v51, 1 }
 0x290   : > { %v3161_v11 = vrot.slane %v3160_v25, 4  ;;  %v3167_v37 = vsel %vm870_vm7, %v2783_v30, -inf  ;;  %v3175_v63 = vrot.slane %v3174_v26, 4  ;;  %v3181_v59 = vsel %vm870_vm7, %v2784_v31, -inf }
 0x291   : > { %v2734_v41 = vcombine.high %v2624_v38, %v2624_v38  ;;  %v3101_v62 = vmax.f32 %v3099_v1, %v3100_v47  ;;  %v3168_v56 = vrot.slane %v3167_v37, 4  ;;  %v3182_v13 = vrot.slane %v3181_v59, 4 }
 0x292   : > { %v3162_v50 = vmax.f32 %v3160_v25, %v3161_v11  ;;  %v3408_v60 = vpack.c.bf16 %v3138_v46, %v3138_v46  ;;  %v3176_v52 = vmax.f32 %v3174_v26, %v3175_v63  ;;  %v2741_v35 = vrot.slane %v2624_v38, %v16843_v33 }
 0x293   : > { %v2748_v42 = vrot.slane %v2734_v41, %v16843_v33  ;;  %v3088_v4 = vrot.slane %v3087_v17, 1  ;;  %v3095_v49 = vrot.slane %v3094_v36, 1  ;;  %v3169_v0 = vmax.f32 %v3167_v37, %v3168_v56 }
 0x294   : > { %v3163_v27 = vrot.slane %v3162_v50, 2  ;;  %v3183_v44 = vmax.f32 %v3181_v59, %v3182_v13  ;;  %v2749_v48 = vcombine.high %v2741_v35, %v2741_v35  ;;  %v3104_v31 = vsel %vm870_vm7, %v2741_v35, -inf }
 0x295   : > { %v2750_v30 = vcombine.high %v2748_v42, %v2748_v42  ;;  %v3159_v34 = vmax.f32 %v3157_v51, %v3158_v8  ;;  %v3102_v1 = vrot.slane %v3101_v62, 1  ;;  %v3400_v47 = vpack.c.bf16 %v3082_v61, %v3082_v61 }
 0x296   : > { %v3177_v25 = vrot.slane %v3176_v52, 2  ;;  %v3409_v11 = vpack.c.bf16 %v3145_v28, %v3145_v28  ;;  %v3170_v46 = vrot.slane %v3169_v0, 2  ;;  %v3105_v26 = vrot.slane %v3104_v31, 4 }
 0x297   : > { %v3111_v38 = vsel %vm870_vm7, %v2749_v48, -inf  ;;  %v3089_v63 = vmax.f32 %v3087_v17, %v3088_v4  ;;  %v3096_v41 = vmax.f32 %v3094_v36, %v3095_v49  ;;  %v3118_v12 = vsel %vm870_vm7, %v2748_v42, -inf }
 0x298   : > { %v3125_v37 = vsel %vm870_vm7, %v2750_v30, -inf  ;;  %v3410_v59 = vpack.c.bf16 %v3152_v22, %v3152_v22  ;;  %v3164_v56 = vmax.f32 %v3162_v50, %v3163_v27  ;;  %v3184_v13 = vrot.slane %v3183_v44, 2 }
 0x299   : > { %v3112_v16 = vrot.slane %v3111_v38, 4  ;;  %v14655_v35 = vunpack.c.l.b16 %v3408_v60  ;;  %v3103_v51 = vmax.f32 %v3101_v62, %v3102_v1  ;;  %v14657_v61 = vunpack.c.l.b16 %v3400_v47 }
 0x29a   : > { %v3178_v28 = vmax.f32 %v3176_v52, %v3177_v25  ;;  %v3171_v8 = vmax.f32 %v3169_v0, %v3170_v46  ;;  %v3106_v20 = vmax.f32 %v3104_v31, %v3105_v26  ;;  %v3119_v5 = vrot.slane %v3118_v12, 4 }
 0x29b   : > { %16873 = vst [vmem:[#allocation30_spill] sm:$0xff] %v14655_v35  ;;  %16874 = vst [vmem:[#allocation31_spill] sm:$0xff] %v14657_v61  ;;  %v3126_v48 = vrot.slane %v3125_v37, 4  ;;  %v3411_v17 = vpack.c.bf16 %v3159_v34, %v3159_v34  ;;  %v3401_v36 = vpack.c.bf16 %v3089_v63, %v3089_v63  ;;  %v3402_v4 = vpack.c.bf16 %v3096_v41, %v3096_v41 }
 0x29c   : > { %v2614_v42 = vmax.f32 %v14632_v6, 0.0  ;;  %v3165_v49 = vrot.slane %v3164_v56, 1  ;;  %v3185_v22 = vmax.f32 %v3183_v44, %v3184_v13  ;;  %v3113_v50 = vmax.f32 %v3111_v38, %v3112_v16 }
 0x29d   : > { %v2612_v27 = vmax.f32 %v14636_v40, 0.0  ;;  %v14661_v60 = vunpack.c.l.b16 %v3409_v11  ;;  %v14663_v62 = vunpack.c.l.b16 %v3410_v59  ;;  %v3403_v30 = vpack.c.bf16 %v3103_v51, %v3103_v51 }
 0x29e   : > { %v3179_v52 = vrot.slane %v3178_v28, 1  ;;  %v3172_v0 = vrot.slane %v3171_v8, 1  ;;  %v3107_v31 = vrot.slane %v3106_v20, 2  ;;  %v3120_v1 = vmax.f32 %v3118_v12, %v3119_v5 }
 0x29f   : > { %16875 = vst [vmem:[#allocation32_spill] sm:$0xff] %v14661_v60  ;;  %16876 = vst [vmem:[#allocation33_spill] sm:$0xff] %v14663_v62  ;;  %v3127_v47 = vmax.f32 %v3125_v37, %v3126_v48  ;;  %v14665_v34 = vunpack.c.l.b16 %v3411_v17  ;;  %v14667_v25 = vunpack.c.l.b16 %v3401_v36  ;;  %v14669_v6 = vunpack.c.l.b16 %v3402_v4 }
 0x2a0   : > { %v16878_v16 = vmax.f32 %v14371_v23, 0.0  ;;  %v3166_v40 = vmax.f32 %v3164_v56, %v3165_v49  ;;  %v3186_v11 = vrot.slane %v3185_v22, 1  ;;  %v3114_v46 = vrot.slane %v3113_v50, 2 }
 0x2a1   : > { %16877 = vst [vmem:[#allocation34_spill] sm:$0xff] %v14665_v34  ;;  %v16879_v26 = vmax.f32 %v14388_v39, 0.0  ;;  %v14675_v63 = vunpack.c.l.b16 %v3403_v30  ;;  %v14677_v41 = vmax.f32 %v3178_v28, %v3179_v52  ;;  %v14680_v37 = vmax.f32 %v3171_v8, %v3172_v0 }
 0x2a2   : > { %v2629_v44 = vadd.f32 %v2614_v42, %v16878_v16  ;;  %v3108_v59 = vmax.f32 %v3106_v20, %v3107_v31  ;;  %v3121_v13 = vrot.slane %v3120_v1, 2  ;;  %v3128_v51 = vrot.slane %v3127_v47, 2 }
 0x2a3   : > { %v2627_v38 = vadd.f32 %v2612_v27, %v16879_v26  ;;  %16880 = vst [vmem:[#allocation35_spill] sm:$0xff] %v14675_v63  ;;  %v3187_v39 = vmax.f32 %v3185_v22, %v3186_v11  ;;  %v3412_v36 = vpack.c.bf16 %v3166_v40, %v3166_v40  ;;  %v3115_v4 = vmax.f32 %v3113_v50, %v3114_v46 }
 0x2a4   : > { %v2819_v12 = vcombine.high %v2629_v44, %v2629_v44  ;;  %v2826_v5 = vrot.slane %v2629_v44, %v16843_v33  ;;  %v3109_v20 = vrot.slane %v3108_v59, 1  ;;  %v3122_v30 = vmax.f32 %v3120_v1, %v3121_v13 }
 0x2a5   : > { %v2785_v17 = vcombine.high %v2627_v38, %v2627_v38  ;;  %v2792_v8 = vrot.slane %v2627_v38, %v16843_v33  ;;  %v3129_v52 = vmax.f32 %v3127_v47, %v3128_v51  ;;  %v3116_v26 = vrot.slane %v3115_v4, 1 }
 0x2a6   : > { %v2833_v23 = vrot.slane %v2819_v12, %v16843_v33  ;;  %v2834_v56 = vcombine.high %v2826_v5, %v2826_v5  ;;  %v3244_v48 = vsel %vm870_vm7, %v2826_v5, -inf  ;;  %v3123_v38 = vrot.slane %v3122_v30, 1 }
 0x2a7   : > { %v3245_v42 = vrot.slane %v3244_v48, 4  ;;  %v2799_v22 = vrot.slane %v2785_v17, %v16843_v33  ;;  %v2800_v11 = vcombine.high %v2792_v8, %v2792_v8  ;;  %v3188_v46 = vsel %vm870_vm7, %v2792_v8, -inf }
 0x2a8   : > { %v2835_v28 = vcombine.high %v2833_v23, %v2833_v23  ;;  %v3251_v49 = vsel %vm870_vm7, %v2834_v56, -inf  ;;  %v3258_v27 = vsel %vm870_vm7, %v2833_v23, -inf  ;;  %v3189_v23 = vrot.slane %v3188_v46, 4 }
 0x2a9   : > { %v3246_v0 = vmax.f32 %v3244_v48, %v3245_v42  ;;  %v3252_v31 = vrot.slane %v3251_v49, 4  ;;  %v3259_v16 = vrot.slane %v3258_v27, 4  ;;  %v3195_v47 = vsel %vm870_vm7, %v2800_v11, -inf }
 0x2aa   : > { %v3265_v44 = vsel %vm870_vm7, %v2835_v28, -inf  ;;  %v3130_v13 = vrot.slane %v3129_v52, 1  ;;  %v2801_v48 = vcombine.high %v2799_v22, %v2799_v22  ;;  %v3202_v42 = vsel %vm870_vm7, %v2799_v22, -inf }
 0x2ab   : > { %v3247_v40 = vrot.slane %v3246_v0, 2  ;;  %v3266_v50 = vrot.slane %v3265_v44, 4  ;;  %v3253_v12 = vmax.f32 %v3251_v49, %v3252_v31  ;;  %v3260_v5 = vmax.f32 %v3258_v27, %v3259_v16 }
 0x2ac   : > { %v3414_v17 = vpack.c.bf16 %v14677_v41, %v14677_v41  ;;  %v3110_v28 = vmax.f32 %v3108_v59, %v3109_v20  ;;  %v3190_v8 = vmax.f32 %v3188_v46, %v3189_v23  ;;  %v3117_v61 = vmax.f32 %v3115_v4, %v3116_v26 }
 0x2ad   : > { %v3248_v56 = vmax.f32 %v3246_v0, %v3247_v40  ;;  %v3267_v1 = vmax.f32 %v3265_v44, %v3266_v50  ;;  %v3254_v51 = vrot.slane %v3253_v12, 2  ;;  %v3261_v35 = vrot.slane %v3260_v5, 2 }
 0x2ae   : > { %v3196_v31 = vrot.slane %v3195_v47, 4  ;;  %v3413_v0 = vpack.c.bf16 %v14680_v37, %v14680_v37  ;;  %v3415_v16 = vpack.c.bf16 %v3187_v39, %v3187_v39  ;;  %v3124_v44 = vmax.f32 %v3122_v30, %v3123_v38 }
 0x2af   : > { %v3249_v49 = vrot.slane %v3248_v56, 1  ;;  %v3268_v27 = vrot.slane %v3267_v1, 2  ;;  %v3203_v40 = vrot.slane %v3202_v42, 4  ;;  %v14696_v50 = vunpack.c.l.b16 %v3412_v36 }
 0x2b0   : > { %v3131_v11 = vmax.f32 %v3129_v52, %v3130_v13  ;;  %v3255_v22 = vmax.f32 %v3253_v12, %v3254_v51  ;;  %v3209_v34 = vsel %vm870_vm7, %v2801_v48, -inf  ;;  %v3404_v41 = vpack.c.bf16 %v3110_v28, %v3110_v28 }
 0x2b1   : > { %16881 = vst [vmem:[#allocation36_spill] sm:$0xff] %v14696_v50  ;;  %v3262_v59 = vmax.f32 %v3260_v5, %v3261_v35  ;;  %v3191_v20 = vrot.slane %v3190_v8, 2  ;;  %v2600_v4 = vadd.f32 %v14466_v2, %v14364_v55  ;;  %v3405_v46 = vpack.c.bf16 %v3117_v61, %v3117_v61 }
 0x2b2   : > { %v3250_v26 = vmax.f32 %v3248_v56, %v3249_v49  ;;  %v3269_v23 = vmax.f32 %v3267_v1, %v3268_v27  ;;  %v3197_v63 = vmax.f32 %v3195_v47, %v3196_v31  ;;  %v14701_v37 = vunpack.c.l.b16 %v3414_v17  ;;  %v14721_v31 = vld [vmem:[#allocation9 + $0x2] ss:$0 sm:$0xff] }
 0x2b3   : > { %v3406_v39 = vpack.c.bf16 %v3124_v44, %v3124_v44  ;;  %v3204_v30 = vmax.f32 %v3202_v42, %v3203_v40  ;;  %v3210_v36 = vrot.slane %v3209_v34, 4  ;;  %v14703_v38 = vunpack.c.l.b16 %v3413_v0 }
 0x2b4   : > { %16882 = vst [vmem:[#allocation37_spill] sm:$0xff] %v14701_v37  ;;  %v14705_v52 = vunpack.c.l.b16 %v3415_v16  ;;  %v3407_v12 = vpack.c.bf16 %v3131_v11, %v3131_v11  ;;  %v3256_v13 = vrot.slane %v3255_v22, 1  ;;  %v14707_v35 = vunpack.c.l.b16 %v3404_v41 }
 0x2b5   : > { %v3263_v5 = vrot.slane %v3262_v59, 1  ;;  %v14709_v51 = vmax.f32 %v3190_v8, %v3191_v20  ;;  %v2615_v55 = vmax.f32 %v2600_v4, 0.0  ;;  %v14711_v2 = vunpack.c.l.b16 %v3405_v46 }
 0x2b6   : > { %16883 = vst [vmem:[#allocation38_spill] sm:$0xff] %v14705_v52  ;;  %v3270_v61 = vrot.slane %v3269_v23, 1  ;;  %v3424_v56 = vpack.c.bf16 %v3250_v26, %v3250_v26  ;;  %v3198_v1 = vrot.slane %v3197_v63, 2  ;;  %v14713_v47 = vunpack.c.l.b16 %v3406_v39 }
 0x2b7   : > { %16884 = vst [vmem:[#allocation39_spill] sm:$0xff] %v14711_v2  ;;  %v3205_v48 = vrot.slane %v3204_v30, 2  ;;  %v3211_v42 = vmax.f32 %v3209_v34, %v3210_v36  ;;  %v16886_v17 = vmax.f32 %v14423_v14, 0.0  ;;  %v14717_v49 = vunpack.c.l.b16 %v3407_v12 }
 0x2b8   : > { %16885 = vst [vmem:[#allocation40_spill] sm:$0xff] %v14713_v47  ;;  %v14719_v27 = vmax.f32 %v3255_v22, %v3256_v13  ;;  %v2598_v8 = vadd.f32 %v14721_v31, %v14477_v9  ;;  %v2583_v0 = vadd.f32 %v14498_v19, %v14325_v21  ;;  %v14727_v16 = vmax.f32 %v3262_v59, %v3263_v5 }
 0x2b9   : > { %v2630_v28 = vadd.f32 %v2615_v55, %v16886_v17  ;;  %16887 = vst [vmem:[#allocation41_spill] sm:$0xff] %v14717_v49  ;;  %v3193_v44 = vrot.slane %v14709_v51, 1  ;;  %v14731_v40 = vmax.f32 %v3269_v23, %v3270_v61  ;;  %v14733_v11 = vunpack.c.l.b16 %v3424_v56 }
 0x2ba   : > { %v3199_v22 = vmax.f32 %v3197_v63, %v3198_v1  ;;  %v2613_v41 = vmax.f32 %v2598_v8, 0.0  ;;  %v3206_v20 = vmax.f32 %v3204_v30, %v3205_v48  ;;  %v3212_v4 = vrot.slane %v3211_v42, 2 }
 0x2bb   : > { %v2836_v34 = vcombine.high %v2630_v28, %v2630_v28  ;;  %v2843_v14 = vrot.slane %v2630_v28, %v16843_v33  ;;  %16888 = vst [vmem:[#allocation42_spill] sm:$0xff] %v14733_v11  ;;  %v3425_v21 = vpack.c.bf16 %v14719_v27, %v14719_v27  ;;  %v16889_v59 = vmax.f32 %v14481_v43, 0.0 }
 0x2bc   : > { %v14743_v23 = vadd.f32 %v14504_v58, %v14334_v29  ;;  %v3426_v63 = vpack.c.bf16 %v14727_v16, %v14727_v16  ;;  %v3200_v61 = vrot.slane %v3199_v22, 1  ;;  %v2603_v16 = vadd.f32 %v14721_v31, %v2583_v0 }
 0x2bd   : > { %v2850_v9 = vrot.slane %v2836_v34, %v16843_v33  ;;  %v2851_v46 = vcombine.high %v2843_v14, %v2843_v14  ;;  %v3272_v19 = vsel %vm870_vm7, %v2843_v14, -inf  ;;  %v2628_v26 = vadd.f32 %v2613_v41, %v16889_v59 }
 0x2be   : > { %v3273_v30 = vrot.slane %v3272_v19, 4  ;;  %v3213_v34 = vmax.f32 %v3211_v42, %v3212_v4  ;;  %v2618_v0 = vmax.f32 %v2603_v16, 0.0  ;;  %v3201_v42 = vmax.f32 %v3199_v22, %v3200_v61 }
 0x2bf   : > { %v2852_v39 = vcombine.high %v2850_v9, %v2850_v9  ;;  %v3279_v36 = vsel %vm870_vm7, %v2851_v46, -inf  ;;  %v3286_v13 = vsel %vm870_vm7, %v2850_v9, -inf  ;;  %v2802_v5 = vcombine.high %v2628_v26, %v2628_v26 }
 0x2c0   : > { %v3280_v12 = vrot.slane %v3279_v36, 4  ;;  %v2809_v55 = vrot.slane %v2628_v26, %v16843_v33  ;;  %v3274_v43 = vmax.f32 %v3272_v19, %v3273_v30  ;;  %v3287_v56 = vrot.slane %v3286_v13, 4 }
 0x2c1   : > { %v3293_v1 = vsel %vm870_vm7, %v2852_v39, -inf  ;;  %v2816_v48 = vrot.slane %v2802_v5, %v16843_v33  ;;  %v3207_v4 = vrot.slane %v3206_v20, 1  ;;  %v3427_v22 = vpack.c.bf16 %v14731_v40, %v14731_v40 }
 0x2c2   : > { %v3281_v29 = vmax.f32 %v3279_v36, %v3280_v12  ;;  %v3294_v58 = vrot.slane %v3293_v1, 4  ;;  %v2817_v17 = vcombine.high %v2809_v55, %v2809_v55  ;;  %v3275_v28 = vrot.slane %v3274_v43, 2 }
 0x2c3   : > { %v3288_v27 = vmax.f32 %v3286_v13, %v3287_v56  ;;  %v3216_v8 = vsel %vm870_vm7, %v2809_v55, -inf  ;;  %v2818_v41 = vcombine.high %v2816_v48, %v2816_v48  ;;  %v3230_v26 = vsel %vm870_vm7, %v2816_v48, -inf }
 0x2c4   : > { %v3295_v14 = vmax.f32 %v3293_v1, %v3294_v58  ;;  %v3217_v9 = vrot.slane %v3216_v8, 4  ;;  %v3276_v46 = vmax.f32 %v3274_v43, %v3275_v28  ;;  %v3282_v19 = vrot.slane %v3281_v29, 2 }
 0x2c5   : > { %v3223_v59 = vsel %vm870_vm7, %v2817_v17, -inf  ;;  %v3289_v39 = vrot.slane %v3288_v27, 2  ;;  %v3194_v13 = vmax.f32 %v14709_v51, %v3193_v44  ;;  %v3231_v5 = vrot.slane %v3230_v26, 4 }
 0x2c6   : > { %v3296_v30 = vrot.slane %v3295_v14, 2  ;;  %v3218_v36 = vmax.f32 %v3216_v8, %v3217_v9  ;;  %v3224_v12 = vrot.slane %v3223_v59, 4  ;;  %v3237_v55 = vsel %vm870_vm7, %v2818_v41, -inf }
 0x2c7   : > { %v3214_v43 = vrot.slane %v3213_v34, 1  ;;  %v3283_v58 = vmax.f32 %v3281_v29, %v3282_v19  ;;  %v3232_v28 = vmax.f32 %v3230_v26, %v3231_v5  ;;  %v3238_v17 = vrot.slane %v3237_v55, 4 }
 0x2c8   : > { %v3219_v56 = vrot.slane %v3218_v36, 2  ;;  %v3225_v1 = vmax.f32 %v3223_v59, %v3224_v12  ;;  %v3277_v11 = vrot.slane %v3276_v46, 1  ;;  %v3290_v48 = vmax.f32 %v3288_v27, %v3289_v39 }
 0x2c9   : > { %v3297_v52 = vmax.f32 %v3295_v14, %v3296_v30  ;;  %v3233_v9 = vrot.slane %v3232_v28, 2  ;;  %v3239_v37 = vmax.f32 %v3237_v55, %v3238_v17  ;;  %v16890_v51 = vmax.f32 %v14484_v7, 0.0 }
 0x2ca   : > { %v3226_v49 = vrot.slane %v3225_v1, 2  ;;  %v3220_v8 = vmax.f32 %v3218_v36, %v3219_v56  ;;  %v14764_v61 = vunpack.c.l.b16 %v3425_v21  ;;  %v3208_v16 = vmax.f32 %v3206_v20, %v3207_v4 }
 0x2cb   : > { %v14760_v44 = vadd.f32 %v2618_v0, %v16890_v51  ;;  %v3215_v41 = vmax.f32 %v3213_v34, %v3214_v43  ;;  %v3284_v19 = vrot.slane %v3283_v58, 1  ;;  %v3234_v59 = vmax.f32 %v3232_v28, %v3233_v9 }
 0x2cc   : > { %16892 = vst [vmem:[#allocation44_spill] sm:$0xff] %v14764_v61  ;;  %v3227_v29 = vmax.f32 %v3225_v1, %v3226_v49  ;;  %v3240_v27 = vrot.slane %v3239_v37, 2  ;;  %v14766_v14 = vunpack.c.l.b16 %v3426_v63  ;;  %v3278_v26 = vmax.f32 %v3276_v46, %v3277_v11 }
 0x2cd   : > { %16891 = vst [vmem:[#allocation43_spill] sm:$0xff] %v14760_v44  ;;  %v3291_v39 = vrot.slane %v3290_v48, 1  ;;  %v3298_v30 = vrot.slane %v3297_v52, 1  ;;  %v3416_v36 = vpack.c.bf16 %v3194_v13, %v3194_v13  ;;  %v3417_v7 = vpack.c.bf16 %v3201_v42, %v3201_v42 }
 0x2ce   : > { %16893 = vst [vmem:[#allocation45_spill] sm:$0xff] %v14766_v14  ;;  %v3221_v12 = vrot.slane %v3220_v8, 1  ;;  %v14770_v5 = vrot.slane %v14760_v44, %v16843_v33  ;;  %v14772_v40 = vunpack.c.l.b16 %v3427_v22  ;;  %v3228_v20 = vrot.slane %v3227_v29, 1 }
 0x2cf   : > { %v3235_v49 = vrot.slane %v3234_v59, 1  ;;  %v3241_v21 = vmax.f32 %v3239_v37, %v3240_v27  ;;  %v3418_v34 = vpack.c.bf16 %v3208_v16, %v3208_v16  ;;  %v3419_v55 = vpack.c.bf16 %v3215_v41, %v3215_v41  ;;  %v16901_v27 = vld [vmem:[#allocation26_spill] sm:$0xff] }
 0x2d0   : > { %16894 = vst [vmem:[#allocation46_spill] sm:$0xff] %v14770_v5  ;;  %16895 = vst [vmem:[#allocation47_spill] sm:$0xff] %v14772_v40  ;;  %v3285_v0 = vmax.f32 %v3283_v58, %v3284_v19  ;;  %v3356_v11 = vsel %vm870_vm7, %v14770_v5, -inf  ;;  %v3292_v63 = vmax.f32 %v3290_v48, %v3291_v39  ;;  %v3299_v46 = vmax.f32 %v3297_v52, %v3298_v30 }
 0x2d1   : > { %v3428_v13 = vpack.c.bf16 %v3278_v26, %v3278_v26  ;;  %v3357_v42 = vrot.slane %v3356_v11, 4  ;;  %v14776_v4 = vunpack.c.l.b16 %v3416_v36  ;;  %v14778_v56 = vunpack.c.l.b16 %v3417_v7 }
 0x2d2   : > { %v3222_v1 = vmax.f32 %v3220_v8, %v3221_v12  ;;  %v1098_v43 = vmax.f32 %v14511_v53, 0.0  ;;  %v3229_v28 = vmax.f32 %v3227_v29, %v3228_v20  ;;  %v3236_v17 = vmax.f32 %v3234_v59, %v3235_v49  ;;  %v16905_v20 = vld [vmem:[#allocation21_spill] sm:$0xff] }
 0x2d3   : > { %16896 = vst [vmem:[#allocation48_spill] sm:$0xff] %v14778_v56  ;;  %v3242_v37 = vrot.slane %v3241_v21, 1  ;;  %v3358_v9 = vmax.f32 %v3356_v11, %v3357_v42  ;;  %v14781_v51 = vunpack.c.l.b16 %v3418_v34  ;;  %v14783_v58 = vunpack.c.l.b16 %v3419_v55  ;;  %v12265_v11 = vld [vmem:[%s12697_s17 + $0x70] sm:$0xff] }
 0x2d4   : > { %v3429_v22 = vpack.c.bf16 %v3285_v0, %v3285_v0  ;;  %v2601_v52 = vadd.f32 %v14721_v31, %v14743_v23  ;;  %v3430_v48 = vpack.c.bf16 %v3292_v63, %v3292_v63  ;;  %v3431_v16 = vpack.c.bf16 %v3299_v46, %v3299_v46  ;;  %v16903_v23 = vld [vmem:[#allocation18_spill] sm:$0xff]  ;;  %v12266_v63 = vld [vmem:[#allocation4 + $0x8] ss:$0 sm:$0xff] }
 0x2d5   : > { %16897 = vst [vmem:[#allocation49_spill] sm:$0xff] %v14781_v51  ;;  %16898 = vst [vmem:[#allocation50_spill] sm:$0xff] %v14783_v58  ;;  %v14787_v41 = vunpack.c.l.b16 %v3428_v13  ;;  %v3359_v8 = vrot.slane %v3358_v9, 2  ;;  %v3420_v19 = vpack.c.bf16 %v3222_v1, %v3222_v1  ;;  %v831_v29 = vadd.f32 %v14518_v24, %v14506_v15  ;;  %v16907_v24 = vld [vmem:[#allocation25_spill] sm:$0xff] }
 0x2d6   : > { %v2616_v53 = vmax.f32 %v2601_v52, 0.0  ;;  %v16900_v59 = vrot.slane %v14309_v45, 6  ;;  %v16902_v26 = vrot.slane %v16901_v27, 6  ;;  %v3243_v30 = vmax.f32 %v3241_v21, %v3242_v37  ;;  %v16908_v45 = vld [vmem:[#allocation19_spill] sm:$0xff] }
 0x2d7   : > { %16899 = vst [vmem:[#allocation51_spill] sm:$0xff] %v14787_v41  ;;  %v3421_v36 = vpack.c.bf16 %v3229_v28, %v3229_v28  ;;  %v3422_v7 = vpack.c.bf16 %v3236_v17, %v3236_v17  ;;  %v16904_v12 = vrot.slane %v16903_v23, 7  ;;  %v16906_v49 = vrot.slane %v16905_v20, 7 }
 0x2d8   : > { %v899_v39 = vsel %vm870_vm7, %v16902_v26, %v16900_v59  ;;  %v2631_v55 = vadd.f32 %v2616_v53, %v1098_v43  ;;  %v1049_v15 = vmul.f32 %v12266_v63, %v12265_v11  ;;  %v2582_v46 = vadd.f32 %v16908_v45, %v16907_v24 }
 0x2d9   : > { %v998_v34 = vsel %vm969_vm8, %v16906_v49, %v16904_v12  ;;  %v930_v0 = vadd.f32 %v899_v39, %v831_v29  ;;  %v14804_v13 = vunpack.c.l.b16 %v3429_v22  ;;  %v14806_v42 = vunpack.c.l.b16 %v3430_v48 }
 0x2da   : > { %v14808_v21 = vunpack.c.l.b16 %v3431_v16  ;;  %v3360_v1 = vmax.f32 %v3358_v9, %v3359_v8  ;;  %v2853_v28 = vcombine.high %v2631_v55, %v2631_v55  ;;  %v2860_v17 = vrot.slane %v2631_v55, %v16843_v33 }
 0x2db   : > { %16909 = vst [vmem:[#allocation26_spill] sm:$0xff] %v14804_v13  ;;  %v1029_v37 = vadd.f32 %v998_v34, %v930_v0  ;;  %v2602_v43 = vadd.f32 %v14721_v31, %v2582_v46  ;;  %v3423_v52 = vpack.c.bf16 %v3243_v30, %v3243_v30  ;;  %v14812_v53 = vunpack.c.l.b16 %v3420_v19 }
 0x2dc   : > { %16910 = vst [vmem:[#allocation18_spill] sm:$0xff] %v14808_v21  ;;  %v14814_v29 = vunpack.c.l.b16 %v3421_v36  ;;  %v14816_v59 = vunpack.c.l.b16 %v3422_v7  ;;  %v2867_v22 = vrot.slane %v2853_v28, %v16843_v33  ;;  %v2868_v48 = vcombine.high %v2860_v17, %v2860_v17  ;;  %v12267_v36 = vld [vmem:[#allocation9] ss:$0 sm:$0xff] }
 0x2dd   : > { %v3300_v16 = vsel %vm870_vm7, %v2860_v17, -inf  ;;  %v1064_v27 = vadd.f32 %v1049_v15, %v1029_v37  ;;  %v3361_v9 = vrot.slane %v3360_v1, 1  ;;  %v2617_v26 = vmax.f32 %v2602_v43, 0.0 }
 0x2de   : > { %v3301_v8 = vrot.slane %v3300_v16, 4  ;;  %v3583_v31 = vsel %vm3582_vm9, %v14573_v57, %v14561_v10  ;;  %v2869_v39 = vcombine.high %v2867_v22, %v2867_v22  ;;  %v3307_v19 = vsel %vm870_vm7, %v2868_v48, -inf }
 0x2df   : > { %v3314_v30 = vsel %vm870_vm7, %v2867_v22, -inf  ;;  %v1084_v7 = vadd.f32 %v12267_v36, %v1064_v27  ;;  %v14825_v23 = vunpack.c.l.b16 %v3423_v52  ;;  %v3308_v20 = vrot.slane %v3307_v19, 4 }
 0x2e0   : > { %v3302_v12 = vmax.f32 %v3300_v16, %v3301_v8  ;;  %v3315_v49 = vrot.slane %v3314_v30, 4  ;;  %v3321_v34 = vsel %vm870_vm7, %v2869_v39, -inf  ;;  %v3585_v0 = vsel %vm3584_vm10, %v14575_v32, %v3583_v31 }
 0x2e1   : > { %v1099_v55 = vmax.f32 %v1084_v7, 0.0  ;;  %v3309_v11 = vmax.f32 %v3307_v19, %v3308_v20  ;;  %v3322_v63 = vrot.slane %v3321_v34, 4  ;;  %v14830_v15 = vmax.f32 %v3360_v1, %v3361_v9 }
 0x2e2   : > { %v3303_v10 = vrot.slane %v3302_v12, 2  ;;  %v3316_v24 = vmax.f32 %v3314_v30, %v3315_v49  ;;  %v3587_v46 = vsel %vm3586_vm11, %v14625_v54, %v3585_v0 }
 0x2e3   : > { %v2632_v45 = vadd.f32 %v2617_v26, %v1099_v55  ;;  %v3310_v17 = vrot.slane %v3309_v11, 2  ;;  %v3323_v37 = vmax.f32 %v3321_v34, %v3322_v63  ;;  %v3589_v48 = vsel %vm3588_vm12, %v14628_v3, %v3587_v46 }
 0x2e4   : > { %v3304_v28 = vmax.f32 %v3302_v12, %v3303_v10  ;;  %v3317_v43 = vrot.slane %v3316_v24, 2 }
 0x2e5   : > { %v2870_v52 = vcombine.high %v2632_v45, %v2632_v45  ;;  %v2877_v22 = vrot.slane %v2632_v45, %v16843_v33  ;;  %v3311_v27 = vmax.f32 %v3309_v11, %v3310_v17  ;;  %v3324_v1 = vrot.slane %v3323_v37, 2 }
 0x2e6   : > { %v3305_v16 = vrot.slane %v3304_v28, 1  ;;  %v3318_v9 = vmax.f32 %v3316_v24, %v3317_v43 }
 0x2e7   : > { %v2884_v8 = vrot.slane %v2870_v52, %v16843_v33  ;;  %v2885_v26 = vcombine.high %v2877_v22, %v2877_v22  ;;  %v3328_v31 = vsel %vm870_vm7, %v2877_v22, -inf  ;;  %v3312_v19 = vrot.slane %v3311_v27, 1  ;;  %v16921_v33 = vld [vmem:[#allocation23_spill] sm:$0xff] }
 0x2e8   : > { %v3306_v39 = vmax.f32 %v3304_v28, %v3305_v16  ;;  %v3325_v30 = vmax.f32 %v3323_v37, %v3324_v1  ;;  %v3329_v36 = vrot.slane %v3328_v31, 4  ;;  %v3319_v7 = vrot.slane %v3318_v9, 1 }
 0x2e9   : > { %v2886_v12 = vcombine.high %v2884_v8, %v2884_v8  ;;  %v3335_v20 = vsel %vm870_vm7, %v2885_v26, -inf  ;;  %v3342_v49 = vsel %vm870_vm7, %v2884_v8, -inf  ;;  %v3313_v34 = vmax.f32 %v3311_v27, %v3312_v19 }
 0x2ea   : > { %v3326_v55 = vrot.slane %v3325_v30, 1  ;;  %v3432_v0 = vpack.c.bf16 %v3306_v39, %v3306_v39  ;;  %v3330_v10 = vmax.f32 %v3328_v31, %v3329_v36  ;;  %v3320_v11 = vmax.f32 %v3318_v9, %v3319_v7  ;;  %v16914_v36 = vld [vmem:[#allocation29_spill] sm:$0xff] }
 0x2eb   : > { %v3336_v63 = vrot.slane %v3335_v20, 4  ;;  %v3343_v24 = vrot.slane %v3342_v49, 4  ;;  %v3349_v45 = vsel %vm870_vm7, %v2886_v12, -inf  ;;  %v3433_v28 = vpack.c.bf16 %v3313_v34, %v3313_v34 }
 0x2ec   : > { %v3327_v46 = vmax.f32 %v3325_v30, %v3326_v55  ;;  %v3331_v17 = vrot.slane %v3330_v10, 2  ;;  %v3591_v37 = vsel %vm3590_vm13, %v14638_v18, %v3589_v48  ;;  %v3434_v43 = vpack.c.bf16 %v3320_v11, %v3320_v11  ;;  %v16915_v55 = vld [vmem:[#allocation17_spill] sm:$0xff] }
 0x2ed   : > { %v3337_v52 = vmax.f32 %v3335_v20, %v3336_v63  ;;  %v3344_v22 = vmax.f32 %v3342_v49, %v3343_v24  ;;  %v3350_v16 = vrot.slane %v3349_v45, 4  ;;  %v14846_v8 = vunpack.c.l.b16 %v3432_v0  ;;  %v16916_v0 = vld [vmem:[#allocation15_spill] sm:$0xff] }
 0x2ee   : > { %v3435_v1 = vpack.c.bf16 %v3327_v46, %v3327_v46  ;;  %v3332_v9 = vmax.f32 %v3330_v10, %v3331_v17  ;;  %v14848_v19 = vunpack.c.l.b16 %v3433_v28  ;;  %v14850_v30 = vunpack.c.l.b16 %v3434_v43  ;;  %v16917_v28 = vld [vmem:[#allocation20_spill] sm:$0xff]  ;;  %v16918_v43 = vld [vmem:[#allocation22_spill] sm:$0xff] }
 0x2ef   : > { %16911 = vst [vmem:[#allocation21_spill] sm:$0xff] %v14846_v8  ;;  %v3338_v26 = vrot.slane %v3337_v52, 2  ;;  %v3345_v31 = vrot.slane %v3344_v22, 2  ;;  %v3351_v39 = vmax.f32 %v3349_v45, %v3350_v16  ;;  %v3593_v7 = vsel %vm3592_vm14, %v16914_v36, %v3591_v37 }
 0x2f0   : > { %16912 = vst [vmem:[#allocation25_spill] sm:$0xff] %v14848_v19  ;;  %16913 = vst [vmem:[#allocation19_spill] sm:$0xff] %v14850_v30  ;;  %v3333_v48 = vrot.slane %v3332_v9, 1  ;;  %v3596_v10 = vsel %vm3582_vm9, %v16916_v0, %v16915_v55  ;;  %v3603_v11 = vsel %vm3582_vm9, %v14669_v6, %v14667_v25  ;;  %v3610_v63 = vsel %vm3582_vm9, %v14663_v62, %v14661_v60 }
 0x2f1   : > { %v3339_v12 = vmax.f32 %v3337_v52, %v3338_v26  ;;  %v3346_v20 = vmax.f32 %v3344_v22, %v3345_v31  ;;  %v3352_v49 = vrot.slane %v3351_v39, 2  ;;  %v3597_v17 = vsel %vm3584_vm10, %v16917_v28, %v3596_v10  ;;  %v16919_v22 = vld [vmem:[#allocation35_spill] sm:$0xff]  ;;  %v16923_v10 = vld [vmem:[#allocation24_spill] sm:$0xff] }
 0x2f2   : > { %v3334_v34 = vmax.f32 %v3332_v9, %v3333_v48  ;;  %v3598_v52 = vsel %vm3586_vm11, %v16918_v43, %v3597_v17  ;;  %v3604_v16 = vsel %vm3584_vm10, %v16919_v22, %v3603_v11  ;;  %v16920_v9 = vld [vmem:[#allocation34_spill] sm:$0xff]  ;;  %v14881_v5 = vunpack.c.l.b16 %v3435_v1 }
 0x2f3   : > { %v3340_v24 = vrot.slane %v3339_v12, 1  ;;  %v3347_v45 = vrot.slane %v3346_v20, 1  ;;  %v3353_v46 = vmax.f32 %v3351_v39, %v3352_v49  ;;  %v3611_v26 = vsel %vm3584_vm10, %v16920_v9, %v3610_v63  ;;  %v16922_v39 = vld [vmem:[#allocation14_spill] sm:$0xff]  ;;  %v16925_v63 = vld [vmem:[#allocation27_spill] sm:$0xff] }
 0x2f4   : > { %v3436_v37 = vpack.c.bf16 %v3334_v34, %v3334_v34  ;;  %v3599_v44 = vsel %vm3588_vm12, %v16921_v33, %v3598_v52  ;;  %v3595_v49 = vsel %vm3594_vm15, %v16922_v39, %v3593_v7  ;;  %v3605_v17 = vsel %vm3586_vm11, %v14707_v35, %v3604_v16  ;;  %16924 = vst [vmem:[#allocation35_spill] sm:$0xff] %v14881_v5 }
 0x2f5   : > { %v3341_v31 = vmax.f32 %v3339_v12, %v3340_v24  ;;  %v3348_v48 = vmax.f32 %v3346_v20, %v3347_v45  ;;  %v3354_v27 = vrot.slane %v3353_v46, 1  ;;  %v3600_v34 = vsel %vm3590_vm13, %v16923_v10, %v3599_v44  ;;  %v16926_v45 = vld [vmem:[#allocation31_spill] sm:$0xff] }
 0x2f6   : > { %v3612_v11 = vsel %vm3586_vm11, %v14696_v50, %v3611_v26  ;;  %v3601_v24 = vsel %vm3592_vm14, %v16925_v63, %v3600_v34  ;;  %v3606_v7 = vsel %vm3588_vm12, %v14711_v2, %v3605_v17  ;;  %v3617_v16 = vsel %vm3582_vm9, %v14781_v51, %v14778_v56  ;;  %v16928_v34 = vld [vmem:[#allocation37_spill] sm:$0xff] }
 0x2f7   : > { %v3355_v12 = vmax.f32 %v3353_v46, %v3354_v27  ;;  %v3437_v20 = vpack.c.bf16 %v3341_v31, %v3341_v31  ;;  %v3602_v52 = vsel %vm3594_vm15, %v16926_v45, %v3601_v24  ;;  %v3613_v44 = vsel %vm3588_vm12, %v14703_v38, %v3612_v11 }
 0x2f8   : > { %v3438_v1 = vpack.c.bf16 %v3348_v48, %v3348_v48  ;;  %v14894_v27 = vunpack.c.l.b16 %v3436_v37  ;;  %v3634_v46 = vpack.c.b16 %v3602_v52, %v3595_v49  ;;  %v3607_v31 = vsel %vm3590_vm13, %v14713_v47, %v3606_v7  ;;  %v16930_v37 = vld [vmem:[#allocation41_spill] sm:$0xff]  ;;  %v16931_v49 = vld [vmem:[#allocation38_spill] sm:$0xff] }
 0x2f9   : > { %v3439_v26 = vpack.c.bf16 %v3355_v12, %v3355_v12  ;;  %v3614_v24 = vsel %vm3590_vm13, %v16928_v34, %v3613_v44  ;;  %v3618_v17 = vsel %vm3584_vm10, %v14783_v58, %v3617_v16  ;;  %v3624_v11 = vsel %vm3582_vm9, %v14766_v14, %v14764_v61  ;;  %v16932_v7 = vld [vmem:[#allocation30_spill] sm:$0xff] }
 0x2fa   : > { %16927 = vst [vmem:[#allocation14_spill] sm:$0xff] %v14894_v27  ;;  %v14905_v2 = vunpack.c.l.b16 %v3437_v20  ;;  %10884 = vmatprep.mubr.bf16.mxu1 %v3634_v46  ;;  %11100 = vmatprep.mubr.bf16.mxu0 %v3634_v46  ;;  %v3608_v48 = vsel %vm3592_vm14, %v16930_v37, %v3607_v31  ;;  %v3615_v12 = vsel %vm3592_vm14, %v16931_v49, %v3614_v24  ;;  %v11959_v31 = vld [vmem:[#allocation7 + $0x148] sm:$0xff]  }
 0x2fb   : > { %v3619_v52 = vsel %vm3586_vm11, %v14812_v53, %v3618_v17  ;;  %v3609_v44 = vsel %vm3594_vm15, %v16932_v7, %v3608_v48  ;;  %v3616_v16 = vsel %vm3594_vm15, %v14776_v4, %v3615_v12  ;;  %v3625_v46 = vsel %vm3584_vm10, %v14772_v40, %v3624_v11  ;;  %v11960_v37 = vld [vmem:[#allocation7 + $0x388] sm:$0xff]  }
 0x2fc   : > { %16929 = vst [vmem:[#allocation37_spill] sm:$0xff] %v14905_v2  ;;  %v3620_v20 = vsel %vm3588_vm12, %v14814_v29, %v3619_v52  ;;  %v3635_v47 = vpack.c.b16 %v3616_v16, %v3609_v44  ;;  %v3626_v17 = vsel %vm3586_vm11, %v14787_v41, %v3625_v46  ;;  %v3631_v48 = vsel %vm3582_vm9, %v14850_v30, %v14848_v19  ;;  %v16933_v44 = vld [vmem:[#allocation13_spill] sm:$0xff] }
 0x2fd   : > { %v3621_v24 = vsel %vm3590_vm13, %v14816_v59, %v3620_v20  ;;  %v3627_v52 = vsel %vm3588_vm12, %v14804_v13, %v3626_v17  ;;  %v3632_v11 = vsel %vm3584_vm10, %v14881_v5, %v3631_v48  ;;  %v3757_v16 = vsel %vm3584_vm10, %v14573_v57, %v16933_v44  ;;  %v16934_v20 = vld [vmem:[#allocation42_spill] sm:$0xff]  ;;  %v12268_v5 = vld [vmem:[#allocation7 + $0x140] sm:$0xff]  }
 0x2fe   : > { %v3622_v12 = vsel %vm3592_vm14, %v14825_v23, %v3621_v24  ;;  %10885 = vmatmul.mubr.bf16.vlgmr.msra.gmra.mrb[0].mxu1 %v3635_v47  ;;  %11101 = vmatmul.mubr.bf16.vlgmr.msra.gmra.mrb[32].mxu0 %v3635_v47  ;;  %v3628_v30 = vsel %vm3590_vm13, %v14806_v42, %v3627_v52  ;;  %v3633_v24 = vsel %vm3586_vm11, %v14894_v27, %v3632_v11  ;;  %v14948_v48 = vunpack.c.l.b16 %v3438_v1  ;;  %v12269_v44 = vld [vmem:[#allocation7 + $0x380] sm:$0xff]   ;;  %v11961_v11 = vld [vmem:[#allocation7 + $0x150] sm:$0xff]  }
 0x2ff   : > { %v3623_v46 = vsel %vm3594_vm15, %v16934_v20, %v3622_v12  ;;  %v16935_v17 = vpack.c.bf16 %v14830_v15, %v14830_v15  ;;  %10893 = vmatpush3.bf16.msra.mxu1 %v12268_v5  ;;  %11109 = vmatpush3.bf16.msra.mxu0 %v12269_v44  ;;  %v3629_v47 = vsel %vm3592_vm14, %v14808_v21, %v3628_v30  ;;  %v14954_v52 = vunpack.c.l.b16 %v3439_v26  ;;  %v11962_v15 = vld [vmem:[#allocation7 + $0x390] sm:$0xff]  }
 0x300   : > { %16937 = vst [vmem:[#allocation30_spill] sm:$0xff] %v14948_v48  ;;  %v5273_v12 = vsel %vm3588_vm12, %v14905_v2, %v3633_v24  ;;  %10894 = vmatprep.subr.bf16.mxu1 %v11959_v31  ;;  %11110 = vmatprep.subr.bf16.mxu0 %v11960_v37  ;;  %v3630_v1 = vsel %vm3594_vm15, %v14846_v8, %v3629_v47 }
 0x301   : > { %v14946_v13 = vunpack.c.l.b16 %v16935_v17  ;;  %16938 = vst [vmem:[#allocation13_spill] sm:$0xff] %v14954_v52  ;;  %v3758_v5 = vsel %vm3586_vm11, %v14575_v32, %v3757_v16  ;;  %v3763_v17 = vsel %vm3582_vm9, %v16915_v55, %v16922_v39  ;;  %v3636_v30 = vpack.c.b16 %v3630_v1, %v3623_v46 }
 0x302   : > { %v3759_v44 = vsel %vm3588_vm12, %v14625_v54, %v3758_v5  ;;  %v3764_v26 = vsel %vm3584_vm10, %v16916_v0, %v3763_v17  ;;  %v5274_v2 = vsel %vm3590_vm13, %v14948_v48, %v5273_v12  ;;  %v3637_v21 = vpack.c.b16 %v3633_v24, %v3633_v24  ;;  %v11963_v12 = vld [vmem:[#allocation7 + $0x158] sm:$0xff]  }
 0x303   : > { %16936 = vst [vmem:[#allocation38_spill] sm:$0xff] %v14946_v13  ;;  %v3760_v47 = vsel %vm3590_vm13, %v14628_v3, %v3759_v44  ;;  %v3765_v16 = vsel %vm3586_vm11, %v16917_v28, %v3764_v26  ;;  %v5275_v55 = vsel %vm3592_vm14, %v14954_v52, %v5274_v2  ;;  %10895 = vmatpush3.bf16.msra.mxu1 %v11959_v31  ;;  %v11964_v5 = vld [vmem:[#allocation7 + $0x398] sm:$0xff]  }
 0x304   : > { %11111 = vmatpush3.bf16.msra.mxu0 %v11960_v37  ;;  %v3761_v46 = vsel %vm3592_vm14, %v14638_v18, %v3760_v47  ;;  %v3766_v1 = vsel %vm3588_vm12, %v16918_v43, %v3765_v16  ;;  %v5276_v24 = vsel %vm3594_vm15, %v14946_v13, %v5275_v55  ;;  %10896 = vmatprep.subr.bf16.mxu1 %v11961_v11  ;;  %v16944_v13 = vld [vmem:[#allocation26_spill] sm:$0xff] }
 0x305   : > { %11112 = vmatprep.subr.bf16.mxu0 %v11962_v15  ;;  %v3762_v17 = vsel %vm3594_vm15, %v16914_v36, %v3761_v46  ;;  %v3767_v2 = vsel %vm3590_vm13, %v16921_v33, %v3766_v1  ;;  %v5277_v37 = vpack.c.b16 %v5276_v24, %v5276_v24  ;;  %10888 = vmatprep.mubr.bf16.mxu1 %v3636_v30  ;;  %v11966_v46 = vld [vmem:[#allocation7 + $0x3a0] sm:$0xff]  }
 0x306   : > { %11104 = vmatprep.mubr.bf16.mxu0 %v3636_v30  ;;  %v3768_v31 = vsel %vm3592_vm14, %v16923_v10, %v3767_v2  ;;  %v3777_v55 = vsel %vm3582_vm9, %v14661_v60, %v16932_v7  ;;  %10889 = vmatmul.mubr.bf16.gmra.mrb[4].mxu1 %v3637_v21  ;;  %v3770_v47 = vsel %vm3582_vm9, %v14667_v25, %v16926_v45  ;;  %v11965_v21 = vld [vmem:[#allocation7 + $0x160] sm:$0xff]   ;;  %v16952_v60 = vld [vmem:[#allocation37_spill] sm:$0xff] }
 0x307   : > { %v14992_v44 = vsel %vm3594_vm15, %v16925_v63, %v3768_v31  ;;  %11105 = vmatmul.mubr.bf16.gmra.mrb[36].mxu0 %v5277_v37  ;;  %v3778_v26 = vsel %vm3584_vm10, %v14663_v62, %v3777_v55  ;;  %10897 = vmatpush3.bf16.msra.mxu1 %v11961_v11  ;;  %v3784_v11 = vsel %vm3582_vm9, %v14778_v56, %v14776_v4 }
 0x308   : > { %16939 = vst [vmem:[#allocation52_spill] sm:$0xff] %v14992_v44  ;;  %11113 = vmatpush3.bf16.msra.mxu0 %v11962_v15  ;;  %v3801_v30 = vpack.c.b16 %v14992_v44, %v3762_v17  ;;  %v3779_v16 = vsel %vm3586_vm11, %v16920_v9, %v3778_v26  ;;  %10898 = vmatprep.subr.bf16.mxu1 %v11963_v12  ;;  %v11972_v44 = vld [vmem:[#allocation7 + $0x3b8] sm:$0xff]  }
 0x309   : > { %11114 = vmatprep.subr.bf16.mxu0 %v11964_v5  ;;  %v3780_v1 = vsel %vm3588_vm12, %v14696_v50, %v3779_v16  ;;  %v3785_v24 = vsel %vm3584_vm10, %v14781_v51, %v3784_v11  ;;  %v3771_v17 = vsel %vm3584_vm10, %v14669_v6, %v3770_v47  ;;  %v3791_v37 = vsel %vm3582_vm9, %v14764_v61, %v16934_v20  ;;  %v11968_v47 = vld [vmem:[#allocation7 + $0x3a8] sm:$0xff]   ;;  %v16945_v61 = vld [vmem:[#allocation35_spill] sm:$0xff]  ;;  %v16947_v20 = vld [vmem:[#allocation41_spill] sm:$0xff] }
 0x30a   : > { %10908 = vmatprep.mubr.bf16.mxu1 %v3801_v30  ;;  %11124 = vmatprep.mubr.bf16.mxu0 %v3801_v30  ;;  %v3781_v15 = vsel %vm3590_vm13, %v14703_v38, %v3780_v1  ;;  %v3786_v2 = vsel %vm3586_vm11, %v14783_v58, %v3785_v24  ;;  %v3792_v26 = vsel %vm3584_vm10, %v14766_v14, %v3791_v37  ;;  %v11967_v30 = vld [vmem:[#allocation7 + $0x168] sm:$0xff]   ;;  %v11970_v37 = vld [vmem:[#allocation7 + $0x3b0] sm:$0xff]  }
 0x30b   : > { %10899 = vmatpush3.bf16.msra.mxu1 %v11963_v12  ;;  %v3782_v31 = vsel %vm3592_vm14, %v16928_v34, %v3781_v15  ;;  %v3787_v55 = vsel %vm3588_vm12, %v14812_v53, %v3786_v2  ;;  %v3772_v12 = vsel %vm3586_vm11, %v16919_v22, %v3771_v17  ;;  %v3793_v15 = vsel %vm3586_vm11, %v14772_v40, %v3792_v26  ;;  %v11969_v2 = vld [vmem:[#allocation7 + $0x170] sm:$0xff]   ;;  %v16942_v26 = vld [vmem:[#allocation19_spill] sm:$0xff] }
 0x30c   : > { %11115 = vmatpush3.bf16.msra.mxu0 %v11964_v5  ;;  %10900 = vmatprep.subr.bf16.mxu1 %v11965_v21  ;;  %v3788_v16 = vsel %vm3590_vm13, %v14814_v29, %v3787_v55  ;;  %v15032_v1 = vsel %vm3594_vm15, %v16931_v49, %v3782_v31  ;;  %v3798_v17 = vsel %vm3582_vm9, %v14848_v19, %v14846_v8  ;;  %v11974_v19 = vld [vmem:[#allocation7 + $0x400] sm:$0xff]  }
 0x30d   : > { %11116 = vmatprep.subr.bf16.mxu0 %v11966_v46  ;;  %v3789_v5 = vsel %vm3592_vm14, %v14816_v59, %v3788_v16  ;;  %16940 = vst [vmem:[#allocation53_spill] sm:$0xff] %v15032_v1  ;;  %v3773_v31 = vsel %vm3588_vm12, %v14707_v35, %v3772_v12  ;;  %v3940_v55 = vsel %vm3582_vm9, %v14575_v32, %v14573_v57 }
 0x30e   : > { %v15036_v11 = vsel %vm3594_vm15, %v14825_v23, %v3789_v5  ;;  %v3799_v16 = vsel %vm3584_vm10, %v16942_v26, %v3798_v17  ;;  %v16943_v5 = vld [vmem:[#allocation39_spill] sm:$0xff]  ;;  %v3941_v12 = vsel %vm3584_vm10, %v14625_v54, %v3940_v55 }
 0x30f   : > { %16941 = vst [vmem:[#allocation54_spill] sm:$0xff] %v15036_v11  ;;  %10901 = vmatpush3.bf16.msra.mxu1 %v11965_v21  ;;  %v3794_v21 = vsel %vm3588_vm12, %v14787_v41, %v3793_v15  ;;  %v3774_v24 = vsel %vm3590_vm13, %v16943_v5, %v3773_v31  ;;  %v11971_v15 = vld [vmem:[#allocation7 + $0x178] sm:$0xff]   ;;  %v3942_v31 = vsel %vm3586_vm11, %v14628_v3, %v3941_v12 }
 0x310   : > { %11117 = vmatpush3.bf16.msra.mxu0 %v11966_v46  ;;  %10902 = vmatprep.subr.bf16.mxu1 %v11967_v30  ;;  %v3947_v46 = vsel %vm3582_vm9, %v16917_v28, %v16916_v0  ;;  %v3795_v0 = vsel %vm3590_vm13, %v16944_v13, %v3794_v21  ;;  %v11973_v21 = vld [vmem:[#allocation7 + $0x1c0] sm:$0xff]   ;;  %v3943_v12 = vsel %vm3588_vm12, %v14638_v18, %v3942_v31 }
 0x311   : > { %11118 = vmatprep.subr.bf16.mxu0 %v11968_v47  ;;  %v3948_v57 = vsel %vm3584_vm10, %v16918_v43, %v3947_v46  ;;  %v3796_v46 = vsel %vm3592_vm14, %v14806_v42, %v3795_v0  ;;  %v3944_v31 = vsel %vm3590_vm13, %v16914_v36, %v3943_v12 }
 0x312   : > { %v3949_v55 = vsel %vm3586_vm11, %v16921_v33, %v3948_v57  ;;  %v16951_v57 = vld [vmem:[#allocation46_spill] sm:$0xff]  ;;  %v3945_v12 = vsel %vm3592_vm14, %v16922_v39, %v3944_v31 }
 0x313   : > { %10903 = vmatpush3.bf16.msra.mxu1 %v11967_v30  ;;  %v3800_v30 = vsel %vm3586_vm11, %v16945_v61, %v3799_v16  ;;  %v2902_v56 = vcombine.high %v16951_v57, %v16951_v57  ;;  %v11975_v57 = vld [vmem:[#allocation7 + $0x1c8] sm:$0xff]  }
 0x314   : > { %11119 = vmatpush3.bf16.msra.mxu0 %v11968_v47  ;;  %10904 = vmatprep.subr.bf16.mxu1 %v11969_v2  ;;  %v16946_v47 = vld [vmem:[#allocation40_spill] sm:$0xff]  ;;  %v5086_v16 = vsel %vm3588_vm12, %v14894_v27, %v3800_v30 }
 0x315   : > { %11120 = vmatprep.subr.bf16.mxu0 %v11970_v37  ;;  %v3775_v17 = vsel %vm3592_vm14, %v16946_v47, %v3774_v24  ;;  %v5087_v8 = vsel %vm3590_vm13, %v16952_v60, %v5086_v16  ;;  %v3363_v16 = vsel %vm870_vm7, %v2902_v56, -inf  ;;  %v16954_v56 = vld [vmem:[#allocation17_spill] sm:$0xff] }
 0x316   : > { %v15079_v24 = vsel %vm3594_vm15, %v16947_v20, %v3775_v17 }
 0x317   : > { %10905 = vmatpush3.bf16.msra.mxu1 %v11969_v2  ;;  %16948 = vst [vmem:[#allocation39_spill] sm:$0xff] %v15079_v24  ;;  %v3950_v2 = vsel %vm3588_vm12, %v16923_v10, %v3949_v55  ;;  %v3802_v17 = vpack.c.b16 %v15032_v1, %v15079_v24  ;;  %v11977_v1 = vld [vmem:[#allocation7 + $0x1d0] sm:$0xff]   ;;  %v3954_v24 = vsel %vm3582_vm9, %v16919_v22, %v14669_v6 }
 0x318   : > { %11121 = vmatpush3.bf16.msra.mxu0 %v11970_v37  ;;  %10906 = vmatprep.subr.bf16.mxu1 %v11971_v15  ;;  %v16949_v37 = vld [vmem:[#allocation18_spill] sm:$0xff]  ;;  %v3951_v55 = vsel %vm3590_vm13, %v16925_v63, %v3950_v2 }
 0x319   : > { %11122 = vmatprep.subr.bf16.mxu0 %v11972_v44  ;;  %v15087_v0 = vsel %vm3594_vm15, %v16949_v37, %v3796_v46  ;;  %v3952_v2 = vsel %vm3592_vm14, %v16926_v45, %v3951_v55  ;;  %v3804_v55 = vpack.c.b16 %v3800_v30, %v3800_v30  ;;  %v11981_v30 = vld [vmem:[#allocation7 + $0x1e0] sm:$0xff]  }
 0x31a   : > { %16950 = vst [vmem:[#allocation26_spill] sm:$0xff] %v15087_v0  ;;  %v3803_v46 = vpack.c.b16 %v15087_v0, %v15036_v11  ;;  %v3364_v11 = vrot.slane %v3363_v16, 4  ;;  %v3953_v31 = vsel %vm3594_vm15, %v14667_v25, %v3952_v2  ;;  %v11979_v0 = vld [vmem:[#allocation7 + $0x1d8] sm:$0xff]  }
 0x31b   : > { %10907 = vmatpush3.bf16.msra.mxu1 %v11971_v15  ;;  %v11976_v15 = vld [vmem:[#allocation7 + $0x408] sm:$0xff]  }
 0x31c   : > { %11123 = vmatpush3.bf16.msra.mxu0 %v11972_v44  ;;  %10916 = vmatprep.subr.bf16.mxu1 %v11973_v21  ;;  %v5088_v44 = vsel %vm3592_vm14, %v14948_v48, %v5087_v8  ;;  %v11978_v8 = vld [vmem:[#allocation7 + $0x410] sm:$0xff]   ;;  %v3365_v45 = vmax.f32 %v3363_v16, %v3364_v11  ;;  %v3968_v16 = vsel %vm3582_vm9, %v14783_v58, %v14781_v51  ;;  %v16958_v51 = vld [vmem:[#allocation42_spill] sm:$0xff] }
 0x31d   : > { %11132 = vmatprep.subr.bf16.mxu0 %v11974_v19 }
 0x31e   : > { %10909 = vmatmul.mubr.bf16.vlgmr.msra.gmra.mrb[0].mxu1 %v3802_v17  ;;  %v3366_v2 = vrot.slane %v3365_v45, 2 }
 0x31f   : > { %11125 = vmatmul.mubr.bf16.vlgmr.msra.gmra.mrb[32].mxu0 %v3802_v17  ;;  %10912 = vmatprep.mubr.bf16.mxu1 %v3803_v46  ;;  %v15110_v17 = vsel %vm3594_vm15, %v14954_v52, %v5088_v44  ;;  %v11980_v44 = vld [vmem:[#allocation7 + $0x418] sm:$0xff]  }
 0x320   : > { %10917 = vmatpush3.bf16.msra.mxu1 %v11973_v21  ;;  %11128 = vmatprep.mubr.bf16.mxu0 %v3803_v46  ;;  %16953 = vst [vmem:[#allocation40_spill] sm:$0xff] %v15110_v17  ;;  %v3946_v21 = vsel %vm3594_vm15, %v16954_v56, %v3945_v12  ;;  %v11982_v12 = vld [vmem:[#allocation7 + $0x420] sm:$0xff]  }
 0x321   : > { %11133 = vmatpush3.bf16.msra.mxu0 %v11974_v19  ;;  %10918 = vmatprep.subr.bf16.mxu1 %v11975_v57  ;;  %v5391_v19 = vpack.c.b16 %v15110_v17, %v15110_v17  ;;  %v3985_v46 = vpack.c.b16 %v3953_v31, %v3946_v21  ;;  %v3969_v31 = vsel %vm3584_vm10, %v14812_v53, %v3968_v16 }
 0x322   : > { %11134 = vmatprep.subr.bf16.mxu0 %v11976_v15  ;;  %v4138_v16 = vsel %vm3582_vm9, %v16918_v43, %v16917_v28 }
 0x323   : > { %v4139_v17 = vsel %vm3584_vm10, %v16921_v33, %v4138_v16 }
 0x324   : > { %10919 = vmatpush3.bf16.msra.mxu1 %v11975_v57  ;;  %v3961_v57 = vsel %vm3582_vm9, %v16920_v9, %v14663_v62  ;;  %v4140_v16 = vsel %vm3586_vm11, %v16923_v10, %v4139_v17  ;;  %v16959_v62 = vld [vmem:[#allocation43_spill] sm:$0xff]  ;;  %v16961_v10 = vld [vmem:[#allocation44_spill] sm:$0xff] }
 0x325   : > { %11135 = vmatpush3.bf16.msra.mxu0 %v11976_v15  ;;  %10920 = vmatprep.subr.bf16.mxu1 %v11977_v1  ;;  %v3955_v15 = vsel %vm3584_vm10, %v14707_v35, %v3954_v24  ;;  %v3962_v11 = vsel %vm3584_vm10, %v14696_v50, %v3961_v57  ;;  %v11983_v24 = vld [vmem:[#allocation7 + $0x1e8] sm:$0xff]   ;;  %v3970_v57 = vsel %vm3586_vm11, %v14814_v29, %v3969_v31 }
 0x326   : > { %11136 = vmatprep.subr.bf16.mxu0 %v11978_v8  ;;  %10913 = vmatmul.mubr.bf16.gmra.mrb[8].mxu1 %v3804_v55  ;;  %v3963_v21 = vsel %vm3586_vm11, %v14703_v38, %v3962_v11  ;;  %v11985_v11 = vld [vmem:[#allocation7 + $0x1f0] sm:$0xff]   ;;  %v2887_v17 = vcombine.high %v16959_v62, %v16959_v62 }
 0x327   : > { %11129 = vmatmul.mubr.bf16.gmra.mrb[40].mxu0 %v5391_v19  ;;  %10932 = vmatprep.mubr.bf16.mxu1 %v3985_v46  ;;  %v11984_v19 = vld [vmem:[#allocation7 + $0x428] sm:$0xff]  }
 0x328   : > { %10921 = vmatpush3.bf16.msra.mxu1 %v11977_v1  ;;  %11148 = vmatprep.mubr.bf16.mxu0 %v3985_v46  ;;  %v3975_v1 = vsel %vm3582_vm9, %v14772_v40, %v14766_v14  ;;  %v3367_v46 = vmax.f32 %v3365_v45, %v3366_v2  ;;  %v3982_v45 = vsel %vm3582_vm9, %v16945_v61, %v16942_v26 }
 0x329   : > { %11137 = vmatpush3.bf16.msra.mxu0 %v11978_v8  ;;  %10922 = vmatprep.subr.bf16.mxu1 %v11979_v0  ;;  %v3956_v8 = vsel %vm3586_vm11, %v16943_v5, %v3955_v15  ;;  %v3976_v55 = vsel %vm3584_vm10, %v14787_v41, %v3975_v1  ;;  %v11986_v1 = vld [vmem:[#allocation7 + $0x430] sm:$0xff]   ;;  %v3983_v31 = vsel %vm3584_vm10, %v14894_v27, %v3982_v45 }
 0x32a   : > { %11138 = vmatprep.subr.bf16.mxu0 %v11980_v44  ;;  %v3977_v15 = vsel %vm3586_vm11, %v16944_v13, %v3976_v55  ;;  %v3368_v2 = vrot.slane %v3367_v46, 1 }
 0x32c   : > { %10923 = vmatpush3.bf16.msra.mxu1 %v11979_v0  ;;  %v3957_v0 = vsel %vm3588_vm12, %v16946_v47, %v3956_v8  ;;  %v3369_v28 = vmax.f32 %v3367_v46, %v3368_v2  ;;  %v11990_v46 = vld [vmem:[#allocation7 + $0x440] sm:$0xff]   ;;  %v4141_v2 = vsel %vm3588_vm12, %v16925_v63, %v4140_v16  ;;  %v16963_v63 = vld [vmem:[#allocation16_spill] sm:$0xff] }
 0x32d   : > { %11139 = vmatpush3.bf16.msra.mxu0 %v11980_v44  ;;  %10924 = vmatprep.subr.bf16.mxu1 %v11981_v30  ;;  %v3964_v44 = vsel %vm3588_vm12, %v16928_v34, %v3963_v21  ;;  %v3971_v21 = vsel %vm3588_vm12, %v14816_v59, %v3970_v57 }
 0x32e   : > { %11140 = vmatprep.subr.bf16.mxu0 %v11982_v12  ;;  %v3965_v8 = vsel %vm3590_vm13, %v16931_v49, %v3964_v44  ;;  %v11988_v44 = vld [vmem:[#allocation7 + $0x438] sm:$0xff]  }
 0x32f   : > { %v3966_v57 = vsel %vm3592_vm14, %v14776_v4, %v3965_v8 }
 0x330   : > { %10925 = vmatpush3.bf16.msra.mxu1 %v11981_v30  ;;  %v4131_v30 = vsel %vm3582_vm9, %v14625_v54, %v14575_v32  ;;  %v3978_v32 = vsel %vm3588_vm12, %v14806_v42, %v3977_v15  ;;  %v3972_v15 = vsel %vm3590_vm13, %v14825_v23, %v3971_v21  ;;  %v16956_v21 = vld [vmem:[#allocation32_spill] sm:$0xff] }
 0x331   : > { %11141 = vmatpush3.bf16.msra.mxu0 %v11982_v12  ;;  %10926 = vmatprep.subr.bf16.mxu1 %v11983_v24  ;;  %v3958_v12 = vsel %vm3590_vm13, %v16947_v20, %v3957_v0  ;;  %v4132_v55 = vsel %vm3584_vm10, %v14628_v3, %v4131_v30  ;;  %v11987_v0 = vld [vmem:[#allocation7 + $0x1f8] sm:$0xff]   ;;  %v3979_v45 = vsel %vm3590_vm13, %v16949_v37, %v3978_v32  ;;  %v16957_v32 = vld [vmem:[#allocation48_spill] sm:$0xff] }
 0x332   : > { %11142 = vmatprep.subr.bf16.mxu0 %v11984_v19  ;;  %v3984_v30 = vsel %vm3586_vm11, %v16952_v60, %v3983_v31  ;;  %v3967_v26 = vsel %vm3594_vm15, %v16957_v32, %v3966_v57  ;;  %v11989_v31 = vld [vmem:[#allocation7 + $0x200] sm:$0xff]  }
 0x334   : > { %10927 = vmatpush3.bf16.msra.mxu1 %v11983_v24  ;;  %v3959_v24 = vsel %vm3592_vm14, %v16932_v7, %v3958_v12  ;;  %v16955_v12 = vld [vmem:[#allocation21_spill] sm:$0xff] }
 0x335   : > { %11143 = vmatpush3.bf16.msra.mxu0 %v11984_v19  ;;  %10928 = vmatprep.subr.bf16.mxu1 %v11985_v11  ;;  %v4133_v19 = vsel %vm3586_vm11, %v14638_v18, %v4132_v55  ;;  %v3980_v8 = vsel %vm3592_vm14, %v16955_v12, %v3979_v45  ;;  %v3960_v14 = vsel %vm3594_vm15, %v16956_v21, %v3959_v24  ;;  %v16960_v24 = vld [vmem:[#allocation25_spill] sm:$0xff] }
 0x336   : > { %11144 = vmatprep.subr.bf16.mxu0 %v11986_v1  ;;  %v3973_v55 = vsel %vm3592_vm14, %v16958_v51, %v3972_v15  ;;  %v3981_v57 = vsel %vm3594_vm15, %v16960_v24, %v3980_v8  ;;  %v3441_v45 = vpack.c.bf16 %v3369_v28, %v3369_v28  ;;  %v3986_v15 = vpack.c.b16 %v3967_v26, %v3960_v14  ;;  %v11992_v14 = vld [vmem:[#allocation7 + $0x448] sm:$0xff]   ;;  %v16964_v26 = vld [vmem:[#allocation38_spill] sm:$0xff] }
 0x337   : > { %v3974_v62 = vsel %vm3594_vm15, %v16961_v10, %v3973_v55  ;;  %v2901_v18 = vrot.slane %v2887_v17, %v16963_v63  ;;  %v11996_v63 = vld [vmem:[#allocation7 + $0x458] sm:$0xff]  }
 0x338   : > { %10929 = vmatpush3.bf16.msra.mxu1 %v11985_v11  ;;  %v5522_v11 = vsel %vm3588_vm12, %v14948_v48, %v3984_v30  ;;  %v3987_v28 = vpack.c.b16 %v3981_v57, %v3974_v62  ;;  %v16965_v57 = vld [vmem:[#allocation15_spill] sm:$0xff] }
 0x339   : > { %11145 = vmatpush3.bf16.msra.mxu0 %v11986_v1  ;;  %10930 = vmatprep.subr.bf16.mxu1 %v11987_v0  ;;  %v4134_v1 = vsel %vm3588_vm12, %v16914_v36, %v4133_v19  ;;  %v5523_v48 = vsel %vm3590_vm13, %v14954_v52, %v5522_v11  ;;  %v16962_v36 = vld [vmem:[#allocation31_spill] sm:$0xff]  ;;  %v15220_v11 = vunpack.c.l.b16 %v3441_v45  ;;  %v3370_v17 = vsel %vm870_vm7, %v2901_v18, -inf }
 0x33a   : > { %11146 = vmatprep.subr.bf16.mxu0 %v11988_v44  ;;  %v4135_v19 = vsel %vm3590_vm13, %v16922_v39, %v4134_v1  ;;  %v4142_v16 = vsel %vm3590_vm13, %v16962_v36, %v4141_v2  ;;  %v11993_v1 = vld [vmem:[#allocation7 + $0x210] sm:$0xff]   ;;  %v3371_v45 = vrot.slane %v3370_v17, 4 }
 0x33b   : > { %v4136_v8 = vsel %vm3592_vm14, %v16954_v56, %v4135_v19  ;;  %v4143_v55 = vsel %vm3592_vm14, %v14667_v25, %v4142_v16 }
 0x33c   : > { %10931 = vmatpush3.bf16.msra.mxu1 %v11987_v0  ;;  %v11991_v0 = vld [vmem:[#allocation7 + $0x208] sm:$0xff]   ;;  %v4144_v62 = vsel %vm3594_vm15, %v14669_v6, %v4143_v55  ;;  %v4159_v55 = vsel %vm3582_vm9, %v14812_v53, %v14783_v58 }
 0x33d   : > { %11147 = vmatpush3.bf16.msra.mxu0 %v11988_v44  ;;  %10940 = vmatprep.subr.bf16.mxu1 %v11989_v31  ;;  %v5524_v44 = vsel %vm3592_vm14, %v16964_v26, %v5523_v48  ;;  %v11994_v48 = vld [vmem:[#allocation7 + $0x450] sm:$0xff]  }
 0x33e   : > { %11156 = vmatprep.subr.bf16.mxu0 %v11990_v46  ;;  %v5525_v2 = vsel %vm3594_vm15, %v15220_v11, %v5524_v44  ;;  %v2903_v44 = vcombine.high %v2901_v18, %v2901_v18 }
 0x33f   : > { %10933 = vmatmul.mubr.bf16.vlgmr.msra.gmra.mrb[0].mxu1 %v3986_v15  ;;  %v5526_v19 = vpack.c.b16 %v5525_v2, %v5525_v2 }
 0x340   : > { %11149 = vmatmul.mubr.bf16.vlgmr.msra.gmra.mrb[32].mxu0 %v3986_v15  ;;  %10936 = vmatprep.mubr.bf16.mxu1 %v3987_v28  ;;  %v4137_v15 = vsel %vm3594_vm15, %v16965_v57, %v4136_v8  ;;  %v4152_v8 = vsel %vm3582_vm9, %v14696_v50, %v16920_v9  ;;  %v3377_v2 = vsel %vm870_vm7, %v2903_v44, -inf  ;;  %v16969_v9 = vld [vmem:[#allocation30_spill] sm:$0xff] }
 0x341   : > { %10941 = vmatpush3.bf16.msra.mxu1 %v11989_v31  ;;  %11152 = vmatprep.mubr.bf16.mxu0 %v3987_v28  ;;  %v3988_v31 = vpack.c.b16 %v3984_v30, %v3984_v30  ;;  %v4176_v16 = vpack.c.b16 %v4144_v62, %v4137_v15  ;;  %v11995_v28 = vld [vmem:[#allocation7 + $0x218] sm:$0xff]   ;;  %v4153_v18 = vsel %vm3584_vm10, %v14703_v38, %v4152_v8  ;;  %v11998_v15 = vld [vmem:[#allocation7 + $0x460] sm:$0xff]  }
 0x342   : > { %11157 = vmatpush3.bf16.msra.mxu0 %v11990_v46  ;;  %10942 = vmatprep.subr.bf16.mxu1 %v11991_v0  ;;  %v4145_v46 = vsel %vm3582_vm9, %v14707_v35, %v16919_v22 }
 0x343   : > { %11158 = vmatprep.subr.bf16.mxu0 %v11992_v14  ;;  %v4146_v30 = vsel %vm3584_vm10, %v16943_v5, %v4145_v46  ;;  %v11999_v46 = vld [vmem:[#allocation7 + $0x228] sm:$0xff]  }
 0x344   : > { %v4147_v62 = vsel %vm3586_vm11, %v16946_v47, %v4146_v30 }
 0x345   : > { %10943 = vmatpush3.bf16.msra.mxu1 %v11991_v0  ;;  %v3372_v0 = vmax.f32 %v3370_v17, %v3371_v45  ;;  %v4166_v17 = vsel %vm3582_vm9, %v14787_v41, %v14772_v40  ;;  %v4160_v45 = vsel %vm3584_vm10, %v14814_v29, %v4159_v55  ;;  %v16968_v40 = vld [vmem:[#allocation33_spill] sm:$0xff] }
 0x346   : > { %11159 = vmatpush3.bf16.msra.mxu0 %v11992_v14  ;;  %10944 = vmatprep.subr.bf16.mxu1 %v11993_v1  ;;  %v11997_v14 = vld [vmem:[#allocation7 + $0x220] sm:$0xff]   ;;  %v4167_v44 = vsel %vm3584_vm10, %v16944_v13, %v4166_v17  ;;  %v4161_v8 = vsel %vm3586_vm11, %v14816_v59, %v4160_v45 }
 0x347   : > { %10937 = vmatmul.mubr.bf16.gmra.mrb[12].mxu1 %v3988_v31  ;;  %11160 = vmatprep.subr.bf16.mxu0 %v11994_v48  ;;  %v3378_v31 = vrot.slane %v3377_v2, 4  ;;  %v4168_v55 = vsel %vm3586_vm11, %v14806_v42, %v4167_v44  ;;  %v12003_v44 = vld [vmem:[#allocation7 + $0x238] sm:$0xff]  }
 0x348   : > { %11153 = vmatmul.mubr.bf16.gmra.mrb[44].mxu0 %v5526_v19  ;;  %10956 = vmatprep.mubr.bf16.mxu1 %v4176_v16  ;;  %v4148_v19 = vsel %vm3588_vm12, %v16947_v20, %v4147_v62  ;;  %v4173_v62 = vsel %vm3582_vm9, %v14894_v27, %v16945_v61  ;;  %v4169_v45 = vsel %vm3588_vm12, %v16949_v37, %v4168_v55  ;;  %v16966_v55 = vld [vmem:[#allocation28_spill] sm:$0xff] }
 0x349   : > { %10945 = vmatpush3.bf16.msra.mxu1 %v11993_v1  ;;  %11172 = vmatprep.mubr.bf16.mxu0 %v4176_v16  ;;  %v3373_v1 = vrot.slane %v3372_v0, 2  ;;  %v12000_v16 = vld [vmem:[#allocation7 + $0x468] sm:$0xff]   ;;  %v3379_v17 = vmax.f32 %v3377_v2, %v3378_v31  ;;  %v4174_v31 = vsel %vm3584_vm10, %v16952_v60, %v4173_v62 }
 0x34a   : > { %11161 = vmatpush3.bf16.msra.mxu0 %v11994_v48  ;;  %10946 = vmatprep.subr.bf16.mxu1 %v11995_v28  ;;  %v4154_v48 = vsel %vm3586_vm11, %v16928_v34, %v4153_v18  ;;  %v12001_v18 = vld [vmem:[#allocation7 + $0x230] sm:$0xff]   ;;  %v16967_v62 = vld [vmem:[#allocation24_spill] sm:$0xff] }
 0x34b   : > { %11162 = vmatprep.subr.bf16.mxu0 %v11996_v63  ;;  %v3374_v30 = vmax.f32 %v3372_v0, %v3373_v1  ;;  %v4329_v1 = vsel %vm3582_vm9, %v16921_v33, %v16918_v43 }
 0x34d   : > { %10947 = vmatpush3.bf16.msra.mxu1 %v11995_v28  ;;  %v4155_v28 = vsel %vm3588_vm12, %v16931_v49, %v4154_v48  ;;  %v12002_v48 = vld [vmem:[#allocation7 + $0x470] sm:$0xff]  }
 0x34e   : > { %11163 = vmatpush3.bf16.msra.mxu0 %v11996_v63  ;;  %10948 = vmatprep.subr.bf16.mxu1 %v11997_v14  ;;  %v4149_v63 = vsel %vm3590_vm13, %v16932_v7, %v4148_v19  ;;  %v4156_v0 = vsel %vm3590_vm13, %v14776_v4, %v4155_v28  ;;  %v3375_v19 = vrot.slane %v3374_v30, 1 }
 0x34f   : > { %11164 = vmatprep.subr.bf16.mxu0 %v11998_v15  ;;  %v4150_v2 = vsel %vm3592_vm14, %v16956_v21, %v4149_v63  ;;  %v12004_v63 = vld [vmem:[#allocation7 + $0x478] sm:$0xff]  }
 0x350   : > { %v4151_v61 = vsel %vm3594_vm15, %v16968_v40, %v4150_v2  ;;  %v16972_v40 = vld [vmem:[#allocation27_spill] sm:$0xff] }
 0x351   : > { %10949 = vmatpush3.bf16.msra.mxu1 %v11997_v14  ;;  %v4162_v14 = vsel %vm3588_vm12, %v14825_v23, %v4161_v8  ;;  %v3380_v8 = vrot.slane %v3379_v17, 2 }
 0x352   : > { %11165 = vmatpush3.bf16.msra.mxu0 %v11998_v15  ;;  %10950 = vmatprep.subr.bf16.mxu1 %v11999_v46  ;;  %v4322_v15 = vsel %vm3582_vm9, %v14628_v3, %v14625_v54  ;;  %v4157_v54 = vsel %vm3592_vm14, %v16957_v32, %v4156_v0  ;;  %v4163_v28 = vsel %vm3590_vm13, %v16958_v51, %v4162_v14  ;;  %v16970_v14 = vld [vmem:[#allocation49_spill] sm:$0xff] }
 0x353   : > { %11166 = vmatprep.subr.bf16.mxu0 %v12000_v16  ;;  %v4323_v43 = vsel %vm3584_vm10, %v16966_v55, %v4322_v15  ;;  %v4175_v0 = vsel %vm3586_vm11, %v16969_v9, %v4174_v31  ;;  %v4158_v58 = vsel %vm3594_vm15, %v16970_v14, %v4157_v54  ;;  %v3376_v15 = vmax.f32 %v3374_v30, %v3375_v19  ;;  %v16971_v51 = vld [vmem:[#allocation29_spill] sm:$0xff]  ;;  %v12006_v9 = vld [vmem:[#allocation7 + $0x480] sm:$0xff]  }
 0x354   : > { %v4324_v2 = vsel %vm3586_vm11, %v16971_v51, %v4323_v43  ;;  %v5664_v54 = vsel %vm3588_vm12, %v14954_v52, %v4175_v0  ;;  %v16974_v19 = vld [vmem:[#allocation45_spill] sm:$0xff] }
 0x355   : > { %10951 = vmatpush3.bf16.msra.mxu1 %v11999_v46  ;;  %v4170_v46 = vsel %vm3590_vm13, %v16955_v12, %v4169_v45  ;;  %v4164_v45 = vsel %vm3592_vm14, %v16961_v10, %v4163_v28 }
 0x356   : > { %11167 = vmatpush3.bf16.msra.mxu0 %v12000_v16  ;;  %10952 = vmatprep.subr.bf16.mxu1 %v12001_v18  ;;  %v4330_v16 = vsel %vm3584_vm10, %v16967_v62, %v4329_v1  ;;  %v4171_v21 = vsel %vm3592_vm14, %v16960_v24, %v4170_v46  ;;  %v12005_v1 = vld [vmem:[#allocation7 + $0x240] sm:$0xff]   ;;  %v4165_v43 = vsel %vm3594_vm15, %v16974_v19, %v4164_v45 }
 0x357   : > { %11168 = vmatprep.subr.bf16.mxu0 %v12002_v48  ;;  %v4331_v31 = vsel %vm3586_vm11, %v16972_v40, %v4330_v16  ;;  %v16973_v46 = vld [vmem:[#allocation19_spill] sm:$0xff]  ;;  %v4325_v16 = vsel %vm3588_vm12, %v16922_v39, %v4324_v2 }
 0x358   : > { %v4332_v28 = vsel %vm3588_vm12, %v16962_v36, %v4331_v31  ;;  %v4172_v30 = vsel %vm3594_vm15, %v16973_v46, %v4171_v21 }
 0x359   : > { %10953 = vmatpush3.bf16.msra.mxu1 %v12001_v18  ;;  %v3381_v18 = vmax.f32 %v3379_v17, %v3380_v8  ;;  %v3442_v17 = vpack.c.bf16 %v3376_v15, %v3376_v15  ;;  %v5665_v8 = vsel %vm3590_vm13, %v16964_v26, %v5664_v54  ;;  %v4333_v31 = vsel %vm3590_vm13, %v14667_v25, %v4332_v28  ;;  %v12009_v54 = vld [vmem:[#allocation7 + $0x250] sm:$0xff]  }
 0x35a   : > { %11169 = vmatpush3.bf16.msra.mxu0 %v12002_v48  ;;  %10954 = vmatprep.subr.bf16.mxu1 %v12003_v44  ;;  %v4177_v48 = vpack.c.b16 %v4158_v58, %v4151_v61  ;;  %v4178_v21 = vpack.c.b16 %v4172_v30, %v4165_v43  ;;  %v12008_v61 = vld [vmem:[#allocation7 + $0x488] sm:$0xff]   ;;  %v4326_v58 = vsel %vm3590_vm13, %v16954_v56, %v4325_v16 }
 0x35b   : > { %11170 = vmatprep.subr.bf16.mxu0 %v12004_v63  ;;  %v3382_v36 = vrot.slane %v3381_v18, 1  ;;  %v4334_v45 = vsel %vm3592_vm14, %v14669_v6, %v4333_v31  ;;  %v15327_v15 = vunpack.c.l.b16 %v3442_v17  ;;  %v4327_v28 = vsel %vm3592_vm14, %v16965_v57, %v4326_v58  ;;  %v16976_v16 = vld [vmem:[#allocation20_spill] sm:$0xff]  ;;  %v12012_v31 = vld [vmem:[#allocation7 + $0x498] sm:$0xff]   ;;  %v12014_v58 = vld [vmem:[#allocation7 + $0x4a0] sm:$0xff]  }
 0x35c   : > { %v4335_v43 = vsel %vm3594_vm15, %v16919_v22, %v4334_v45  ;;  %v4328_v17 = vsel %vm3594_vm15, %v16976_v16, %v4327_v28  ;;  %v4350_v45 = vsel %vm3582_vm9, %v14814_v29, %v14812_v53 }
 0x35d   : > { %10955 = vmatpush3.bf16.msra.mxu1 %v12003_v44  ;;  %v12007_v44 = vld [vmem:[#allocation7 + $0x248] sm:$0xff]   ;;  %16975 = vst [vmem:[#allocation41_spill] sm:$0xff] %v15327_v15  ;;  %v3383_v2 = vmax.f32 %v3381_v18, %v3382_v36  ;;  %v4367_v18 = vpack.c.b16 %v4335_v43, %v4328_v17  ;;  %v4351_v17 = vsel %vm3584_vm10, %v14816_v59, %v4350_v45  ;;  %v12018_v45 = vld [vmem:[#allocation7 + $0x4b0] sm:$0xff]  }
 0x35e   : > { %11171 = vmatpush3.bf16.msra.mxu0 %v12004_v63  ;;  %10964 = vmatprep.subr.bf16.mxu1 %v12005_v1  ;;  %v5666_v63 = vsel %vm3592_vm14, %v15220_v11, %v5665_v8  ;;  %v12011_v8 = vld [vmem:[#allocation7 + $0x258] sm:$0xff]   ;;  %v12015_v43 = vld [vmem:[#allocation7 + $0x268] sm:$0xff]  }
 0x35f   : > { %11180 = vmatprep.subr.bf16.mxu0 %v12006_v9  ;;  %v5667_v30 = vsel %vm3594_vm15, %v15327_v15, %v5666_v63  ;;  %v3443_v36 = vpack.c.bf16 %v3383_v2, %v3383_v2  ;;  %v5090_v63 = vsel %vm3582_vm9, %v15220_v11, %v16964_v26  ;;  %v4357_v2 = vsel %vm3582_vm9, %v16944_v13, %v14787_v41  ;;  %v16982_v41 = vld [vmem:[#allocation33_spill] sm:$0xff] }
 0x360   : > { %10957 = vmatmul.mubr.bf16.vlgmr.msra.gmra.mrb[0].mxu1 %v4177_v48 }
 0x361   : > { %11173 = vmatmul.mubr.bf16.vlgmr.msra.gmra.mrb[32].mxu0 %v4177_v48  ;;  %10960 = vmatprep.mubr.bf16.mxu1 %v4178_v21  ;;  %v12010_v48 = vld [vmem:[#allocation7 + $0x490] sm:$0xff]  }
 0x362   : > { %10965 = vmatpush3.bf16.msra.mxu1 %v12005_v1  ;;  %11176 = vmatprep.mubr.bf16.mxu0 %v4178_v21  ;;  %v4179_v1 = vpack.c.b16 %v4175_v0, %v4175_v0  ;;  %v15337_v21 = vunpack.c.l.b16 %v3443_v36  ;;  %v12013_v0 = vld [vmem:[#allocation7 + $0x260] sm:$0xff]   ;;  %v4358_v36 = vsel %vm3584_vm10, %v14806_v42, %v4357_v2 }
 0x363   : > { %11181 = vmatpush3.bf16.msra.mxu0 %v12006_v9  ;;  %10966 = vmatprep.subr.bf16.mxu1 %v12007_v44  ;;  %v5668_v9 = vpack.c.b16 %v5667_v30, %v5667_v30 }
 0x364   : > { %11182 = vmatprep.subr.bf16.mxu0 %v12008_v61 }
 0x366   : > { %10967 = vmatpush3.bf16.msra.mxu1 %v12007_v44  ;;  %v4336_v44 = vsel %vm3582_vm9, %v16943_v5, %v14707_v35 }
 0x367   : > { %11183 = vmatpush3.bf16.msra.mxu0 %v12008_v61  ;;  %10968 = vmatprep.subr.bf16.mxu1 %v12009_v54  ;;  %v4343_v61 = vsel %vm3582_vm9, %v14703_v38, %v14696_v50  ;;  %v4337_v28 = vsel %vm3584_vm10, %v16946_v47, %v4336_v44  ;;  %v4352_v44 = vsel %vm3586_vm11, %v14825_v23, %v4351_v17 }
 0x368   : > { %10961 = vmatmul.mubr.bf16.gmra.mrb[16].mxu1 %v4179_v1  ;;  %11184 = vmatprep.subr.bf16.mxu0 %v12010_v48  ;;  %v4344_v30 = vsel %vm3584_vm10, %v16928_v34, %v4343_v61  ;;  %v12016_v1 = vld [vmem:[#allocation7 + $0x4a8] sm:$0xff]   ;;  %v4359_v61 = vsel %vm3586_vm11, %v16949_v37, %v4358_v36  ;;  %v16979_v36 = vld [vmem:[#allocation30_spill] sm:$0xff] }
 0x369   : > { %11177 = vmatmul.mubr.bf16.gmra.mrb[48].mxu0 %v5668_v9  ;;  %10980 = vmatprep.mubr.bf16.mxu1 %v4367_v18  ;;  %v4338_v9 = vsel %vm3586_vm11, %v16947_v20, %v4337_v28  ;;  %v4520_v28 = vsel %vm3582_vm9, %v16967_v62, %v16921_v33  ;;  %v16981_v33 = vld [vmem:[#allocation31_spill] sm:$0xff] }
 0x36a   : > { %10969 = vmatpush3.bf16.msra.mxu1 %v12009_v54  ;;  %11196 = vmatprep.mubr.bf16.mxu0 %v4367_v18  ;;  %v5091_v54 = vsel %vm3584_vm10, %v15327_v15, %v5090_v63  ;;  %v4345_v18 = vsel %vm3586_vm11, %v16931_v49, %v4344_v30  ;;  %v4364_v63 = vsel %vm3582_vm9, %v16952_v60, %v14894_v27  ;;  %v16978_v30 = vld [vmem:[#allocation42_spill] sm:$0xff]  ;;  %v12021_v60 = vld [vmem:[#allocation7 + $0x280] sm:$0xff]   ;;  %v12022_v27 = vld [vmem:[#allocation7 + $0x288] sm:$0xff]  }
 0x36b   : > { %11185 = vmatpush3.bf16.msra.mxu0 %v12010_v48  ;;  %10970 = vmatprep.subr.bf16.mxu1 %v12011_v8  ;;  %v15362_v48 = vsel %vm3586_vm11, %v15337_v21, %v5091_v54  ;;  %v4513_v54 = vsel %vm3582_vm9, %v16966_v55, %v14628_v3  ;;  %v4353_v17 = vsel %vm3588_vm12, %v16978_v30, %v4352_v44 }
 0x36c   : > { %11186 = vmatprep.subr.bf16.mxu0 %v12012_v31  ;;  %16977 = vst [vmem:[#allocation18_spill] sm:$0xff] %v15362_v48  ;;  %v12020_v48 = vld [vmem:[#allocation7 + $0x4b8] sm:$0xff]   ;;  %v4514_v44 = vsel %vm3584_vm10, %v16971_v51, %v4513_v54 }
 0x36d   : > { %v16983_v54 = vld [vmem:[#allocation50_spill] sm:$0xff] }
 0x36e   : > { %10971 = vmatpush3.bf16.msra.mxu1 %v12011_v8  ;;  %v4346_v8 = vsel %vm3588_vm12, %v14776_v4, %v4345_v18  ;;  %v12019_v18 = vld [vmem:[#allocation7 + $0x278] sm:$0xff]  }
 0x36f   : > { %11187 = vmatpush3.bf16.msra.mxu0 %v12012_v31  ;;  %10972 = vmatprep.subr.bf16.mxu1 %v12013_v0  ;;  %v12017_v31 = vld [vmem:[#allocation7 + $0x270] sm:$0xff]   ;;  %v4347_v2 = vsel %vm3590_vm13, %v16957_v32, %v4346_v8 }
 0x370   : > { %11188 = vmatprep.subr.bf16.mxu0 %v12014_v58 }
 0x372   : > { %10973 = vmatpush3.bf16.msra.mxu1 %v12013_v0  ;;  %v4339_v0 = vsel %vm3588_vm12, %v16932_v7, %v4338_v9  ;;  %v4365_v9 = vsel %vm3584_vm10, %v16979_v36, %v4364_v63  ;;  %v4521_v63 = vsel %vm3584_vm10, %v16972_v40, %v4520_v28 }
 0x373   : > { %11189 = vmatpush3.bf16.msra.mxu0 %v12014_v58  ;;  %10974 = vmatprep.subr.bf16.mxu1 %v12015_v43  ;;  %v4360_v58 = vsel %vm3588_vm12, %v16955_v12, %v4359_v61  ;;  %v16980_v61 = vld [vmem:[#allocation32_spill] sm:$0xff] }
 0x374   : > { %11190 = vmatprep.subr.bf16.mxu0 %v12016_v1  ;;  %v4340_v8 = vsel %vm3590_vm13, %v16980_v61, %v4339_v0  ;;  %v4361_v3 = vsel %vm3590_vm13, %v16960_v24, %v4360_v58  ;;  %v4366_v0 = vsel %vm3586_vm11, %v14954_v52, %v4365_v9  ;;  %v4522_v58 = vsel %vm3586_vm11, %v16981_v33, %v4521_v63  ;;  %v16985_v63 = vld [vmem:[#allocation35_spill] sm:$0xff] }
 0x375   : > { %v4341_v36 = vsel %vm3592_vm14, %v16982_v41, %v4340_v8  ;;  %v4523_v8 = vsel %vm3588_vm12, %v14667_v25, %v4522_v58 }
 0x376   : > { %10975 = vmatpush3.bf16.msra.mxu1 %v12015_v43  ;;  %v4348_v43 = vsel %vm3592_vm14, %v16970_v14, %v4347_v2  ;;  %v4362_v2 = vsel %vm3592_vm14, %v16973_v46, %v4361_v3  ;;  %v16984_v3 = vld [vmem:[#allocation34_spill] sm:$0xff]  ;;  %v4524_v58 = vsel %vm3590_vm13, %v14669_v6, %v4523_v8 }
 0x377   : > { %11191 = vmatpush3.bf16.msra.mxu0 %v12016_v1  ;;  %10976 = vmatprep.subr.bf16.mxu1 %v12017_v31  ;;  %v4354_v1 = vsel %vm3590_vm13, %v16961_v10, %v4353_v17  ;;  %v4349_v28 = vsel %vm3594_vm15, %v16983_v54, %v4348_v43  ;;  %v4515_v17 = vsel %vm3586_vm11, %v16922_v39, %v4514_v44 }
 0x378   : > { %11192 = vmatprep.subr.bf16.mxu0 %v12018_v45  ;;  %v4355_v9 = vsel %vm3592_vm14, %v16974_v19, %v4354_v1  ;;  %v4363_v43 = vsel %vm3594_vm15, %v16985_v63, %v4362_v2  ;;  %v4516_v44 = vsel %vm3588_vm12, %v16954_v56, %v4515_v17  ;;  %v16986_v1 = vld [vmem:[#allocation47_spill] sm:$0xff]  ;;  %v4525_v2 = vsel %vm3592_vm14, %v16919_v22, %v4524_v58  ;;  %v12026_v58 = vld [vmem:[#allocation7 + $0x2a8] sm:$0xff]  }
 0x379   : > { %v4356_v50 = vsel %vm3594_vm15, %v16986_v1, %v4355_v9  ;;  %v4370_v9 = vpack.c.b16 %v4366_v0, %v4366_v0 }
 0x37a   : > { %10977 = vmatpush3.bf16.msra.mxu1 %v12017_v31  ;;  %v5806_v31 = vsel %vm3588_vm12, %v16964_v26, %v4366_v0  ;;  %v4541_v0 = vsel %vm3582_vm9, %v14816_v59, %v14814_v29 }
 0x37b   : > { %11193 = vmatpush3.bf16.msra.mxu0 %v12018_v45  ;;  %10978 = vmatprep.subr.bf16.mxu1 %v12019_v18  ;;  %v4342_v45 = vsel %vm3594_vm15, %v16984_v3, %v4341_v36  ;;  %v5807_v26 = vsel %vm3590_vm13, %v15220_v11, %v5806_v31  ;;  %v4369_v36 = vpack.c.b16 %v4363_v43, %v4356_v50  ;;  %v16987_v31 = vld [vmem:[#allocation22_spill] sm:$0xff]  ;;  %v12025_v43 = vld [vmem:[#allocation7 + $0x2a0] sm:$0xff]  }
 0x37c   : > { %11194 = vmatprep.subr.bf16.mxu0 %v12020_v48  ;;  %v4368_v52 = vpack.c.b16 %v4349_v28, %v4342_v45  ;;  %v12023_v28 = vld [vmem:[#allocation7 + $0x290] sm:$0xff]   ;;  %v12024_v45 = vld [vmem:[#allocation7 + $0x298] sm:$0xff]  }
 0x37e   : > { %10979 = vmatpush3.bf16.msra.mxu1 %v12019_v18  ;;  %v4517_v18 = vsel %vm3590_vm13, %v16965_v57, %v4516_v44  ;;  %v4548_v44 = vsel %vm3582_vm9, %v14806_v42, %v16944_v13 }
 0x37f   : > { %11195 = vmatpush3.bf16.msra.mxu0 %v12020_v48  ;;  %10988 = vmatprep.subr.bf16.mxu1 %v12021_v60  ;;  %v5808_v48 = vsel %vm3592_vm14, %v15327_v15, %v5807_v26  ;;  %v4518_v50 = vsel %vm3592_vm14, %v16976_v16, %v4517_v18  ;;  %v16993_v15 = vld [vmem:[#allocation13_spill] sm:$0xff] }
 0x380   : > { %v5809_v17 = vsel %vm3594_vm15, %v15337_v21, %v5808_v48  ;;  %v4519_v26 = vsel %vm3594_vm15, %v16987_v31, %v4518_v50  ;;  %v4527_v21 = vsel %vm3582_vm9, %v16946_v47, %v16943_v5 }
 0x381   : > { %10981 = vmatmul.mubr.bf16.vlgmr.msra.gmra.mrb[0].mxu1 %v4368_v52  ;;  %v5810_v8 = vpack.c.b16 %v5809_v17, %v5809_v17 }
 0x382   : > { %11197 = vmatmul.mubr.bf16.vlgmr.msra.gmra.mrb[32].mxu0 %v4368_v52  ;;  %10984 = vmatprep.mubr.bf16.mxu1 %v4369_v36  ;;  %v4526_v52 = vsel %vm3594_vm15, %v14707_v35, %v4525_v2  ;;  %v4542_v2 = vsel %vm3584_vm10, %v14825_v23, %v4541_v0 }
 0x383   : > { %10989 = vmatpush3.bf16.msra.mxu1 %v12021_v60  ;;  %11200 = vmatprep.mubr.bf16.mxu0 %v4369_v36  ;;  %v4558_v60 = vpack.c.b16 %v4526_v52, %v4519_v26  ;;  %v4528_v36 = vsel %vm3584_vm10, %v16947_v20, %v4527_v21  ;;  %v12027_v52 = vld [vmem:[#allocation7 + $0x2b0] sm:$0xff]   ;;  %v4543_v26 = vsel %vm3586_vm11, %v16978_v30, %v4542_v2 }
 0x384   : > { %10990 = vmatprep.subr.bf16.mxu1 %v12022_v27  ;;  %v4529_v17 = vsel %vm3586_vm11, %v16932_v7, %v4528_v36 }
 0x387   : > { %10991 = vmatpush3.bf16.msra.mxu1 %v12022_v27  ;;  %v4534_v27 = vsel %vm3582_vm9, %v16928_v34, %v14703_v38 }
 0x388   : > { %10992 = vmatprep.subr.bf16.mxu1 %v12023_v28  ;;  %v4535_v18 = vsel %vm3584_vm10, %v16931_v49, %v4534_v27  ;;  %v4544_v27 = vsel %vm3588_vm12, %v16961_v10, %v4543_v26 }
 0x389   : > { %10985 = vmatmul.mubr.bf16.gmra.mrb[20].mxu1 %v4370_v9  ;;  %v4536_v48 = vsel %vm3586_vm11, %v14776_v4, %v4535_v18 }
 0x38a   : > { %11201 = vmatmul.mubr.bf16.gmra.mrb[52].mxu0 %v5810_v8  ;;  %11004 = vmatprep.mubr.bf16.mxu1 %v4558_v60  ;;  %v4537_v9 = vsel %vm3588_vm12, %v16957_v32, %v4536_v48  ;;  %v4530_v60 = vsel %vm3588_vm12, %v16980_v61, %v4529_v17  ;;  %v4545_v48 = vsel %vm3590_vm13, %v16974_v19, %v4544_v27  ;;  %v12029_v17 = vld [vmem:[#allocation7 + $0x2c0] sm:$0xff]   ;;  %v16990_v27 = vld [vmem:[#allocation37_spill] sm:$0xff] }
 0x38b   : > { %10993 = vmatpush3.bf16.msra.mxu1 %v12023_v28  ;;  %v4549_v28 = vsel %vm3584_vm10, %v16949_v37, %v4548_v44  ;;  %v4538_v21 = vsel %vm3590_vm13, %v16970_v14, %v4537_v9  ;;  %v12028_v44 = vld [vmem:[#allocation7 + $0x2b8] sm:$0xff]  }
 0x38c   : > { %10994 = vmatprep.subr.bf16.mxu1 %v12024_v45  ;;  %v4550_v50 = vsel %vm3586_vm11, %v16955_v12, %v4549_v28  ;;  %v4539_v18 = vsel %vm3592_vm14, %v16983_v54, %v4538_v21 }
 0x38d   : > { %v4551_v8 = vsel %vm3588_vm12, %v16960_v24, %v4550_v50  ;;  %v4540_v26 = vsel %vm3594_vm15, %v14812_v53, %v4539_v18  ;;  %v16992_v18 = vld [vmem:[#allocation51_spill] sm:$0xff] }
 0x38e   : > { %v4552_v36 = vsel %vm3590_vm13, %v16973_v46, %v4551_v8  ;;  %v4546_v8 = vsel %vm3592_vm14, %v16986_v1, %v4545_v48 }
 0x38f   : > { %10995 = vmatpush3.bf16.msra.mxu1 %v12024_v45  ;;  %v4704_v45 = vsel %vm3582_vm9, %v16971_v51, %v16966_v55  ;;  %v4531_v55 = vsel %vm3590_vm13, %v16982_v41, %v4530_v60  ;;  %v4553_v28 = vsel %vm3592_vm14, %v16985_v63, %v4552_v36  ;;  %v16988_v60 = vld [vmem:[#allocation14_spill] sm:$0xff]  ;;  %v4547_v48 = vsel %vm3594_vm15, %v16992_v18, %v4546_v8 }
 0x390   : > { %10996 = vmatprep.subr.bf16.mxu1 %v12025_v43  ;;  %v4532_v50 = vsel %vm3592_vm14, %v16984_v3, %v4531_v55  ;;  %v16994_v8 = vld [vmem:[#allocation38_spill] sm:$0xff] }
 0x393   : > { %10997 = vmatpush3.bf16.msra.mxu1 %v12025_v43  ;;  %v4711_v43 = vsel %vm3582_vm9, %v16972_v40, %v16967_v62 }
 0x394   : > { %10998 = vmatprep.subr.bf16.mxu1 %v12026_v58  ;;  %v4712_v0 = vsel %vm3584_vm10, %v16981_v33, %v4711_v43  ;;  %v16989_v43 = vld [vmem:[#allocation36_spill] sm:$0xff] }
 0x395   : > { %v4713_v2 = vsel %vm3586_vm11, %v14667_v25, %v4712_v0  ;;  %v4533_v21 = vsel %vm3594_vm15, %v16989_v43, %v4532_v50  ;;  %v16991_v0 = vld [vmem:[#allocation30_spill] sm:$0xff] }
 0x396   : > { %v4555_v36 = vsel %vm3582_vm9, %v16991_v0, %v16990_v27 }
 0x397   : > { %10999 = vmatpush3.bf16.msra.mxu1 %v12026_v58  ;;  %v4705_v58 = vsel %vm3584_vm10, %v16922_v39, %v4704_v45  ;;  %v4554_v45 = vsel %vm3594_vm15, %v16988_v60, %v4553_v28  ;;  %v4556_v50 = vsel %vm3584_vm10, %v16993_v15, %v4555_v36 }
 0x398   : > { %11000 = vmatprep.subr.bf16.mxu1 %v12027_v52  ;;  %v4706_v9 = vsel %vm3586_vm11, %v16954_v56, %v4705_v58  ;;  %v4559_v58 = vpack.c.b16 %v4540_v26, %v4533_v21  ;;  %v12031_v26 = vld [vmem:[#allocation7 + $0x2d0] sm:$0xff]   ;;  %v4557_v21 = vsel %vm3586_vm11, %v16994_v8, %v4556_v50  ;;  %v4732_v50 = vsel %vm3582_vm9, %v14825_v23, %v14816_v59 }
 0x399   : > { %v4707_v55 = vsel %vm3588_vm12, %v16965_v57, %v4706_v9  ;;  %v4561_v36 = vpack.c.b16 %v4557_v21, %v4557_v21  ;;  %v12034_v21 = vld [vmem:[#allocation7 + $0x2e8] sm:$0xff]  }
 0x39a   : > { %v4708_v62 = vsel %vm3590_vm13, %v16976_v16, %v4707_v55  ;;  %v16995_v55 = vld [vmem:[#allocation23_spill] sm:$0xff] }
 0x39b   : > { %11001 = vmatpush3.bf16.msra.mxu1 %v12027_v52  ;;  %v4714_v52 = vsel %vm3588_vm12, %v14669_v6, %v4713_v2  ;;  %v12030_v2 = vld [vmem:[#allocation7 + $0x2c8] sm:$0xff]  }
 0x39c   : > { %11002 = vmatprep.subr.bf16.mxu1 %v12028_v44  ;;  %v4715_v28 = vsel %vm3590_vm13, %v16919_v22, %v4714_v52  ;;  %v4709_v52 = vsel %vm3592_vm14, %v16987_v31, %v4708_v62  ;;  %v4718_v62 = vsel %vm3582_vm9, %v16947_v20, %v16946_v47 }
 0x39d   : > { %v4716_v9 = vsel %vm3592_vm14, %v14707_v35, %v4715_v28  ;;  %v12033_v28 = vld [vmem:[#allocation7 + $0x2e0] sm:$0xff]  }
 0x39f   : > { %11003 = vmatpush3.bf16.msra.mxu1 %v12028_v44  ;;  %v4560_v44 = vpack.c.b16 %v4554_v45, %v4547_v48  ;;  %v4717_v45 = vsel %vm3594_vm15, %v16943_v5, %v4716_v9  ;;  %v4739_v9 = vsel %vm3582_vm9, %v16949_v37, %v14806_v42 }
 0x3a0   : > { %11012 = vmatprep.subr.bf16.mxu1 %v12029_v17 }
 0x3a2   : > { %11005 = vmatmul.mubr.bf16.vlgmr.msra.gmra.mrb[0].mxu1 %v4559_v58  ;;  %v12032_v58 = vld [vmem:[#allocation7 + $0x2d8] sm:$0xff]  }
 0x3a3   : > { %11008 = vmatprep.mubr.bf16.mxu1 %v4560_v44  ;;  %11013 = vmatpush3.bf16.msra.mxu1 %v12029_v17  ;;  %v4710_v17 = vsel %vm3594_vm15, %v16995_v55, %v4709_v52  ;;  %v4719_v52 = vsel %vm3584_vm10, %v16932_v7, %v4718_v62 }
 0x3a4   : > { %11014 = vmatprep.subr.bf16.mxu1 %v12030_v2  ;;  %v4749_v48 = vpack.c.b16 %v4717_v45, %v4710_v17 }
 0x3a7   : > { %11015 = vmatpush3.bf16.msra.mxu1 %v12030_v2  ;;  %v4725_v2 = vsel %vm3582_vm9, %v16931_v49, %v16928_v34 }
 0x3a8   : > { %11016 = vmatprep.subr.bf16.mxu1 %v12031_v26  ;;  %v4726_v44 = vsel %vm3584_vm10, %v14776_v4, %v4725_v2 }
 0x3a9   : > { %v4727_v45 = vsel %vm3586_vm11, %v16957_v32, %v4726_v44  ;;  %v4902_v44 = vsel %vm3582_vm9, %v16981_v33, %v16972_v40  ;;  %v12036_v40 = vld [vmem:[#allocation7 + $0x2f8] sm:$0xff]  }
 0x3aa   : > { %11009 = vmatmul.mubr.bf16.gmra.mrb[24].mxu1 %v4561_v36  ;;  %v4733_v36 = vsel %vm3584_vm10, %v16978_v30, %v4732_v50  ;;  %v4728_v2 = vsel %vm3588_vm12, %v16970_v14, %v4727_v45  ;;  %v4903_v33 = vsel %vm3584_vm10, %v14667_v25, %v4902_v44 }
 0x3ab   : > { %11017 = vmatpush3.bf16.msra.mxu1 %v12031_v26  ;;  %11028 = vmatprep.mubr.bf16.mxu1 %v4749_v48  ;;  %v4740_v26 = vsel %vm3584_vm10, %v16955_v12, %v4739_v9  ;;  %v12035_v48 = vld [vmem:[#allocation7 + $0x2f0] sm:$0xff]   ;;  %v4734_v62 = vsel %vm3586_vm11, %v16961_v10, %v4733_v36  ;;  %v4895_v9 = vsel %vm3582_vm9, %v16922_v39, %v16971_v51 }
 0x3ac   : > { %11018 = vmatprep.subr.bf16.mxu1 %v12032_v58  ;;  %v4741_v17 = vsel %vm3586_vm11, %v16960_v24, %v4740_v26  ;;  %v4729_v26 = vsel %vm3590_vm13, %v16983_v54, %v4728_v2  ;;  %v4896_v51 = vsel %vm3584_vm10, %v16954_v56, %v4895_v9  ;;  %v4904_v25 = vsel %vm3586_vm11, %v14669_v6, %v4903_v33  ;;  %v12037_v2 = vld [vmem:[#allocation7 + $0x300] sm:$0xff]  }
 0x3ad   : > { %v4742_v50 = vsel %vm3588_vm12, %v16973_v46, %v4741_v17  ;;  %v4730_v39 = vsel %vm3592_vm14, %v14812_v53, %v4729_v26  ;;  %v4897_v56 = vsel %vm3586_vm11, %v16965_v57, %v4896_v51  ;;  %v4905_v6 = vsel %vm3588_vm12, %v16919_v22, %v4904_v25  ;;  %v12038_v22 = vld [vmem:[#allocation7 + $0x308] sm:$0xff]  }
 0x3ae   : > { %v4743_v45 = vsel %vm3590_vm13, %v16985_v63, %v4742_v50  ;;  %v4746_v57 = vsel %vm3582_vm9, %v16993_v15, %v16991_v0 }
 0x3af   : > { %11019 = vmatpush3.bf16.msra.mxu1 %v12032_v58  ;;  %v4720_v58 = vsel %vm3586_vm11, %v16980_v61, %v4719_v52  ;;  %v4735_v52 = vsel %vm3588_vm12, %v16974_v19, %v4734_v62  ;;  %v4744_v17 = vsel %vm3592_vm14, %v16988_v60, %v4743_v45  ;;  %v4731_v62 = vsel %vm3594_vm15, %v14814_v29, %v4730_v39 }
 0x3b0   : > { %11020 = vmatprep.subr.bf16.mxu1 %v12033_v28 }
 0x3b3   : > { %11021 = vmatpush3.bf16.msra.mxu1 %v12033_v28  ;;  %v4721_v28 = vsel %vm3588_vm12, %v16982_v41, %v4720_v58 }
 0x3b4   : > { %11022 = vmatprep.subr.bf16.mxu1 %v12034_v21  ;;  %v4722_v36 = vsel %vm3590_vm13, %v16984_v3, %v4721_v28  ;;  %v4898_v28 = vsel %vm3588_vm12, %v16976_v16, %v4897_v56 }
 0x3b5   : > { %v4723_v58 = vsel %vm3592_vm14, %v16989_v43, %v4722_v36  ;;  %v4899_v45 = vsel %vm3590_vm13, %v16987_v31, %v4898_v28  ;;  %v12039_v36 = vld [vmem:[#allocation7 + $0x310] sm:$0xff]   ;;  %v16996_v31 = vld [vmem:[#allocation24_spill] sm:$0xff] }
 0x3b6   : > { %v4724_v50 = vsel %vm3594_vm15, %v14703_v38, %v4723_v58 }
 0x3b7   : > { %11023 = vmatpush3.bf16.msra.mxu1 %v12034_v21  ;;  %v4736_v21 = vsel %vm3590_vm13, %v16986_v1, %v4735_v52  ;;  %v4750_v9 = vpack.c.b16 %v4731_v62, %v4724_v50  ;;  %v4906_v52 = vsel %vm3590_vm13, %v14707_v35, %v4905_v6  ;;  %v4900_v35 = vsel %vm3592_vm14, %v16995_v55, %v4899_v45  ;;  %v12041_v55 = vld [vmem:[#allocation7 + $0x320] sm:$0xff]   ;;  %v16998_v45 = vld [vmem:[#allocation52_spill] sm:$0xff] }
 0x3b8   : > { %11024 = vmatprep.subr.bf16.mxu1 %v12035_v48  ;;  %v4737_v44 = vsel %vm3592_vm14, %v16992_v18, %v4736_v21  ;;  %v4907_v16 = vsel %vm3592_vm14, %v16943_v5, %v4906_v52  ;;  %v4901_v25 = vsel %vm3594_vm15, %v16996_v31, %v4900_v35  ;;  %v4916_v5 = vsel %vm3582_vm9, %v14776_v4, %v16931_v49  ;;  %v12042_v49 = vld [vmem:[#allocation7 + $0x328] sm:$0xff]   ;;  %v12045_v50 = vld [vmem:[#allocation7 + $0x340] sm:$0xff]   ;;  %v12052_v35 = vld [vmem:[#allocation7 + $0x378] sm:$0xff]  }
 0x3b9   : > { %v4738_v26 = vsel %vm3594_vm15, %v16944_v13, %v4737_v44  ;;  %v4908_v39 = vsel %vm3594_vm15, %v16946_v47, %v4907_v16  ;;  %v4930_v47 = vsel %vm3582_vm9, %v16955_v12, %v16949_v37  ;;  %v4917_v56 = vsel %vm3584_vm10, %v16957_v32, %v4916_v5  ;;  %v12043_v32 = vld [vmem:[#allocation7 + $0x330] sm:$0xff]   ;;  %v12046_v52 = vld [vmem:[#allocation7 + $0x348] sm:$0xff]   ;;  %v16999_v16 = vld [vmem:[#allocation39_spill] sm:$0xff] }
 0x3ba   : > { %v4940_v58 = vpack.c.b16 %v4908_v39, %v4901_v25  ;;  %v4923_v62 = vsel %vm3582_vm9, %v16978_v30, %v14825_v23  ;;  %v4931_v4 = vsel %vm3584_vm10, %v16960_v24, %v4930_v47  ;;  %v4918_v12 = vsel %vm3586_vm11, %v16970_v14, %v4917_v56  ;;  %v12053_v56 = vld [vmem:[#allocation7 + $0x500] sm:$0xff]  }
 0x3bb   : > { %11025 = vmatpush3.bf16.msra.mxu1 %v12035_v48  ;;  %v4745_v48 = vsel %vm3594_vm15, %v16990_v27, %v4744_v17  ;;  %v12040_v17 = vld [vmem:[#allocation7 + $0x318] sm:$0xff]   ;;  %v4919_v24 = vsel %vm3588_vm12, %v16983_v54, %v4918_v12  ;;  %v12054_v12 = vld [vmem:[#allocation7 + $0x508] sm:$0xff]  }
 0x3bc   : > { %11026 = vmatprep.subr.bf16.mxu1 %v12036_v40  ;;  %v4751_v33 = vpack.c.b16 %v4745_v48, %v4738_v26 }
 0x3bf   : > { %11027 = vmatpush3.bf16.msra.mxu1 %v12036_v40  ;;  %v4747_v40 = vsel %vm3584_vm10, %v16994_v8, %v4746_v57 }
 0x3c0   : > { %11036 = vmatprep.subr.bf16.mxu1 %v12037_v2  ;;  %v4748_v51 = vsel %vm3586_vm11, %v15220_v11, %v4747_v40 }
 0x3c1   : > { %v4752_v21 = vpack.c.b16 %v4748_v51, %v4748_v51  ;;  %v12051_v51 = vld [vmem:[#allocation7 + $0x370] sm:$0xff]  }
 0x3c2   : > { %11029 = vmatmul.mubr.bf16.vlgmr.msra.gmra.mrb[0].mxu1 %v4750_v9 }
 0x3c3   : > { %11032 = vmatprep.mubr.bf16.mxu1 %v4751_v33  ;;  %11037 = vmatpush3.bf16.msra.mxu1 %v12037_v2  ;;  %v4909_v2 = vsel %vm3582_vm9, %v16932_v7, %v16947_v20  ;;  %v4924_v7 = vsel %vm3584_vm10, %v16961_v10, %v4923_v62  ;;  %v4932_v20 = vsel %vm3586_vm11, %v16973_v46, %v4931_v4 }
 0x3c4   : > { %11038 = vmatprep.subr.bf16.mxu1 %v12038_v22  ;;  %v4910_v37 = vsel %vm3584_vm10, %v16980_v61, %v4909_v2  ;;  %v4925_v30 = vsel %vm3586_vm11, %v16974_v19, %v4924_v7  ;;  %v4933_v14 = vsel %vm3588_vm12, %v16985_v63, %v4932_v20  ;;  %v4920_v46 = vsel %vm3590_vm13, %v14812_v53, %v4919_v24  ;;  %v12044_v61 = vld [vmem:[#allocation7 + $0x338] sm:$0xff]   ;;  %v17001_v20 = vld [vmem:[#allocation40_spill] sm:$0xff]  ;;  %v17003_v24 = vld [vmem:[#allocation53_spill] sm:$0xff] }
 0x3c5   : > { %v4911_v23 = vsel %vm3586_vm11, %v16982_v41, %v4910_v37  ;;  %v4926_v41 = vsel %vm3588_vm12, %v16986_v1, %v4925_v30  ;;  %v4934_v54 = vsel %vm3590_vm13, %v16988_v60, %v4933_v14  ;;  %v4921_v63 = vsel %vm3592_vm14, %v14814_v29, %v4920_v46  ;;  %v17000_v7 = vld [vmem:[#allocation26_spill] sm:$0xff]  ;;  %v12055_v14 = vld [vmem:[#allocation7 + $0x510] sm:$0xff]  }
 0x3c6   : > { %v4912_v10 = vsel %vm3588_vm12, %v16984_v3, %v4911_v23  ;;  %v4927_v3 = vsel %vm3590_vm13, %v16992_v18, %v4926_v41  ;;  %v4935_v53 = vsel %vm3592_vm14, %v16990_v27, %v4934_v54  ;;  %v4922_v29 = vsel %vm3594_vm15, %v14816_v59, %v4921_v63  ;;  %v12056_v41 = vld [vmem:[#allocation7 + $0x518] sm:$0xff]   ;;  %v12058_v54 = vld [vmem:[#allocation7 + $0x528] sm:$0xff]  }
 0x3c7   : > { %11039 = vmatpush3.bf16.msra.mxu1 %v12038_v22  ;;  %v4913_v19 = vsel %vm3590_vm13, %v16989_v43, %v4912_v10  ;;  %v4928_v18 = vsel %vm3592_vm14, %v16944_v13, %v4927_v3  ;;  %v4936_v27 = vsel %vm3594_vm15, %v16991_v0, %v4935_v53  ;;  %v12047_v0 = vld [vmem:[#allocation7 + $0x350] sm:$0xff]   ;;  %v5095_v23 = vpack.c.b16 %v17001_v20, %v17000_v7  ;;  %v17005_v10 = vld [vmem:[#allocation18_spill] sm:$0xff] }
 0x3c8   : > { %11040 = vmatprep.subr.bf16.mxu1 %v12039_v36  ;;  %v4914_v60 = vsel %vm3592_vm14, %v14703_v38, %v4913_v19  ;;  %v4937_v38 = vsel %vm3582_vm9, %v16994_v8, %v16993_v15  ;;  %v4929_v59 = vsel %vm3594_vm15, %v14806_v42, %v4928_v18  ;;  %v12048_v8 = vld [vmem:[#allocation7 + $0x358] sm:$0xff]   ;;  %v5093_v42 = vpack.c.b16 %v16999_v16, %v16998_v45  ;;  %v12059_v19 = vld [vmem:[#allocation7 + $0x530] sm:$0xff]  }
 0x3c9   : > { %v4915_v26 = vsel %vm3594_vm15, %v16928_v34, %v4914_v60  ;;  %v4942_v13 = vpack.c.b16 %v4936_v27, %v4929_v59  ;;  %v4938_v33 = vsel %vm3584_vm10, %v15220_v11, %v4937_v38  ;;  %v16997_v34 = vld [vmem:[#allocation41_spill] sm:$0xff]  ;;  %v12050_v11 = vld [vmem:[#allocation7 + $0x368] sm:$0xff]   ;;  %v5096_v46 = vpack.c.b16 %v17005_v10, %v17005_v10  ;;  %v12060_v63 = vld [vmem:[#allocation7 + $0x538] sm:$0xff]  }
 0x3ca   : > { %11033 = vmatmul.mubr.bf16.gmra.mrb[28].mxu1 %v4752_v21  ;;  %v4941_v22 = vpack.c.b16 %v4922_v29, %v4915_v26  ;;  %v4939_v40 = vsel %vm3586_vm11, %v16997_v34, %v4938_v33 }
 0x3cb   : > { %11041 = vmatpush3.bf16.msra.mxu1 %v12039_v36  ;;  %11052 = vmatprep.mubr.bf16.mxu1 %v4940_v58  ;;  %v4943_v15 = vpack.c.b16 %v4939_v40, %v4939_v40  ;;  %v12049_v36 = vld [vmem:[#allocation7 + $0x360] sm:$0xff]  }
 0x3cc   : > { %11042 = vmatprep.subr.bf16.mxu1 %v12040_v17 }
 0x3cf   : > { %11043 = vmatpush3.bf16.msra.mxu1 %v12040_v17 }
 0x3d0   : > { %11044 = vmatprep.subr.bf16.mxu1 %v12041_v55 }
 0x3d3   : > { %11045 = vmatpush3.bf16.msra.mxu1 %v12041_v55 }
 0x3d4   : > { %11046 = vmatprep.subr.bf16.mxu1 %v12042_v49 }
 0x3d7   : > { %11047 = vmatpush3.bf16.msra.mxu1 %v12042_v49 }
 0x3d8   : > { %11048 = vmatprep.subr.bf16.mxu1 %v12043_v32 }
 0x3d9   : > { %v10890_v44 = vpop.f32.mrb[4].mxu1 }
 0x3da   : > { %v11106_v6 = vpop.f32.mrb[36].mxu0  ;;  %v3740_v1 = vpop.f32.mrb[5].mxu1 }
 0x3db   : > { %11049 = vmatpush3.bf16.msra.mxu1 %v12043_v32  ;;  %v5377_v48 = vpop.f32.mrb[37].mxu0  ;;  %v10891_v43 = vpop.f32.mrb[6].mxu1  ;;  %v17002_v32 = vld [vmem:[#allocation54_spill] sm:$0xff] }
 0x3dc   : > { %11050 = vmatprep.subr.bf16.mxu1 %v12044_v61  ;;  %v11107_v57 = vpop.f32.mrb[38].mxu0  ;;  %v3743_v28 = vpop.f32.mrb[7].mxu1  ;;  %v17004_v30 = vpack.c.b16 %v17002_v32, %v17003_v24  ;;  %v15723_v43 = vld [vmem:[#allocation7 + $0x4c0] sm:$0xff]  }
 0x3dd   : > { %v5380_v9 = vpop.f32.mrb[39].mxu0 }
 0x3df   : > { %11051 = vmatpush3.bf16.msra.mxu1 %v12044_v61  ;;  %v12057_v61 = vld [vmem:[#allocation7 + $0x520] sm:$0xff]  }
 0x3e0   : > { %11060 = vmatprep.subr.bf16.mxu1 %v12045_v50 }
 0x3e2   : > { %11053 = vmatmul.mubr.bf16.vlgmr.msra.gmra.mrb[0].mxu1 %v4941_v22 }
 0x3e3   : > { %11056 = vmatprep.mubr.bf16.mxu1 %v4942_v13  ;;  %11061 = vmatpush3.bf16.msra.mxu1 %v12045_v50 }
 0x3e4   : > { %11062 = vmatprep.subr.bf16.mxu1 %v12046_v52 }
 0x3e7   : > { %11063 = vmatpush3.bf16.msra.mxu1 %v12046_v52 }
 0x3e8   : > { %11064 = vmatprep.subr.bf16.mxu1 %v12047_v0 }
 0x3ea   : > { %11057 = vmatmul.mubr.bf16.gmra.mrb[32].mxu1 %v4943_v15 }
 0x3eb   : > { %11065 = vmatpush3.bf16.msra.mxu1 %v12047_v0  ;;  %11076 = vmatprep.mubr.bf16.mxu1 %v5093_v42  ;;  %v10009_v42 = vld [vmem:[#allocation9 + $0x4] ss:$0 sm:$0xff] }
 0x3ec   : > { %11066 = vmatprep.subr.bf16.mxu1 %v12048_v8 }
 0x3ef   : > { %11067 = vmatpush3.bf16.msra.mxu1 %v12048_v8 }
 0x3f0   : > { %11068 = vmatprep.subr.bf16.mxu1 %v12049_v36 }
 0x3f3   : > { %11069 = vmatpush3.bf16.msra.mxu1 %v12049_v36 }
 0x3f4   : > { %11070 = vmatprep.subr.bf16.mxu1 %v12050_v11 }
 0x3f7   : > { %11071 = vmatpush3.bf16.msra.mxu1 %v12050_v11 }
 0x3f8   : > { %11072 = vmatprep.subr.bf16.mxu1 %v12051_v51 }
 0x3f9   : > { %v10914_v39 = vpop.f32.mrb[8].mxu1 }
 0x3fa   : > { %v11130_v21 = vpop.f32.mrb[40].mxu0  ;;  %v3916_v31 = vadd.f32 %v10914_v39, %v10890_v44  ;;  %v3907_v17 = vpop.f32.mrb[9].mxu1 }
 0x3fb   : > { %11073 = vmatpush3.bf16.msra.mxu1 %v12051_v51  ;;  %v5500_v25 = vadd.f32 %v11130_v21, %v11106_v6  ;;  %v5491_v58 = vpop.f32.mrb[41].mxu0  ;;  %v3908_v5 = vadd.f32 %v3907_v17, %v3740_v1  ;;  %v10915_v47 = vpop.f32.mrb[10].mxu1 }
 0x3fc   : > { %11074 = vmatprep.subr.bf16.mxu1 %v12052_v35  ;;  %v5492_v55 = vadd.f32 %v5491_v58, %v5377_v48  ;;  %v11131_v2 = vpop.f32.mrb[42].mxu0  ;;  %v3910_v62 = vpop.f32.mrb[11].mxu1 }
 0x3fd   : > { %v5494_v4 = vpop.f32.mrb[43].mxu0  ;;  %v3911_v49 = vadd.f32 %v3910_v62, %v3743_v28 }
 0x3fe   : > { %v5495_v37 = vadd.f32 %v5494_v4, %v5380_v9 }
 0x3ff   : > { %11075 = vmatpush3.bf16.msra.mxu1 %v12052_v35 }
 0x400   : > { %11204 = vmatprep.subr.bf16.mxu1 %v12053_v56 }
 0x402   : > { %11077 = vmatmul.mubr.bf16.vlgmr.msra.gmra.mrb[0].mxu1 %v17004_v30 }
 0x403   : > { %11080 = vmatprep.mubr.bf16.mxu1 %v5095_v23  ;;  %11205 = vmatpush3.bf16.msra.mxu1 %v12053_v56 }
 0x404   : > { %11206 = vmatprep.subr.bf16.mxu1 %v12054_v12 }
 0x407   : > { %11207 = vmatpush3.bf16.msra.mxu1 %v12054_v12 }
 0x408   : > { %11208 = vmatprep.subr.bf16.mxu1 %v12055_v14 }
 0x40a   : > { %11081 = vmatmul.mubr.bf16.gmra.mrb[36].mxu1 %v5096_v46 }
 0x40b   : > { %11209 = vmatpush3.bf16.msra.mxu1 %v12055_v14 }
 0x40c   : > { %11210 = vmatprep.subr.bf16.mxu1 %v12056_v41 }
 0x40f   : > { %11211 = vmatpush3.bf16.msra.mxu1 %v12056_v41 }
 0x410   : > { %11212 = vmatprep.subr.bf16.mxu1 %v12057_v61 }
 0x413   : > { %11213 = vmatpush3.bf16.msra.mxu1 %v12057_v61 }
 0x414   : > { %11214 = vmatprep.subr.bf16.mxu1 %v12058_v54 }
 0x417   : > { %11215 = vmatpush3.bf16.msra.mxu1 %v12058_v54 }
 0x418   : > { %11216 = vmatprep.subr.bf16.mxu1 %v12059_v19 }
 0x41a   : > { %v10938_v3 = vpop.f32.mrb[12].mxu1 }
 0x41b   : > { %v4111_v44 = vadd.f32 %v10938_v3, %v3916_v31  ;;  %v11154_v6 = vpop.f32.mrb[44].mxu0  ;;  %v4091_v53 = vpop.f32.mrb[13].mxu1  ;;  %11217 = vmatpush3.bf16.msra.mxu1 %v12059_v19 }
 0x41c   : > { %v5646_v1 = vadd.f32 %v11154_v6, %v5500_v25  ;;  %v4109_v48 = vadd.f32 %v4091_v53, %v3908_v5  ;;  %v5626_v60 = vpop.f32.mrb[45].mxu0  ;;  %v10939_v50 = vpop.f32.mrb[14].mxu1  ;;  %11218 = vmatprep.subr.bf16.mxu1 %v12060_v63 }
 0x41d   : > { %v5644_v57 = vadd.f32 %v5626_v60, %v5492_v55  ;;  %v11155_v29 = vpop.f32.mrb[46].mxu0  ;;  %v4094_v18 = vpop.f32.mrb[15].mxu1 }
 0x41e   : > { %v4110_v28 = vadd.f32 %v4094_v18, %v3911_v49  ;;  %v5629_v9 = vpop.f32.mrb[47].mxu0 }
 0x41f   : > { %v5645_v27 = vadd.f32 %v5629_v9, %v5495_v37  ;;  %11219 = vmatpush3.bf16.msra.mxu1 %v12060_v63 }
 0x420   : > { %11228 = vmatprep.subr.bf16.mxu1 %v15723_v43 }
 0x43b   : > { %v10962_v26 = vpop.f32.mrb[16].mxu1 }
 0x43c   : > { %v4302_v38 = vadd.f32 %v10962_v26, %v4111_v44  ;;  %v11178_v22 = vpop.f32.mrb[48].mxu0  ;;  %v4282_v59 = vpop.f32.mrb[17].mxu1 }
 0x43d   : > { %v5788_v52 = vadd.f32 %v11178_v22, %v5646_v1  ;;  %v4300_v13 = vadd.f32 %v4282_v59, %v4109_v48  ;;  %v5768_v33 = vpop.f32.mrb[49].mxu0  ;;  %v10963_v0 = vpop.f32.mrb[18].mxu1 }
 0x43e   : > { %v5786_v34 = vadd.f32 %v5768_v33, %v5644_v57  ;;  %v11179_v40 = vpop.f32.mrb[50].mxu0  ;;  %v4285_v15 = vpop.f32.mrb[19].mxu1 }
 0x43f   : > { %v4301_v8 = vadd.f32 %v4285_v15, %v4110_v28  ;;  %v5771_v45 = vpop.f32.mrb[51].mxu0 }
 0x440   : > { %v5787_v16 = vadd.f32 %v5771_v45, %v5645_v27 }
 0x455   : > { %v11198_v36 = vpop.f32.mrb[32].mxu0 }
 0x456   : > { %v5938_v11 = vadd.f32 %v11198_v36, %v10009_v42  ;;  %v5894_v51 = vpop.f32.mrb[33].mxu0 }
 0x457   : > { %v5936_v35 = vadd.f32 %v10009_v42, %v5894_v51  ;;  %v11199_v39 = vpop.f32.mrb[34].mxu0 }
 0x458   : > { %v5939_v21 = vadd.f32 %v11199_v39, %v10009_v42  ;;  %v5897_v31 = vpop.f32.mrb[35].mxu0  ;;  %v5945_v17 = vmax.f32 %v5938_v11, 0.0 }
 0x459   : > { %v5937_v25 = vadd.f32 %v10009_v42, %v5897_v31  ;;  %v5943_v5 = vmax.f32 %v5936_v35, 0.0 }
 0x45a   : > { %v5946_v58 = vmax.f32 %v5939_v21, 0.0 }
 0x45b   : > { %v5944_v55 = vmax.f32 %v5937_v25, 0.0 }
 0x45c   : > { %v15726_v47 = vpack.c.bf16 %v5946_v58, %v5945_v17  ;;  %v10986_v2 = vpop.f32.mrb[20].mxu1 }
 0x45d   : > { %v15728_v56 = vpack.c.bf16 %v5944_v55, %v5943_v5  ;;  %v15730_v62 = vadd.f32 %v10986_v2, %v4302_v38  ;;  %v11202_v4 = vpop.f32.mrb[52].mxu0  ;;  %v4473_v49 = vpop.f32.mrb[21].mxu1  ;;  %v12062_v5 = vld [vmem:[#allocation7 + $0x4c8] sm:$0xff]  }
 0x45e   : > { %v5930_v37 = vadd.f32 %v11202_v4, %v5788_v52  ;;  %v15732_v12 = vadd.f32 %v4473_v49, %v4300_v13  ;;  %v5910_v7 = vpop.f32.mrb[53].mxu0  ;;  %v10987_v20 = vpop.f32.mrb[22].mxu1  ;;  %v5996_v23 = vshll.u32 %v15726_v47, 16  ;;  %v6000_v32 = vshrl.u32 %v15726_v47, 16 }
 0x45f   : > { %v5928_v24 = vadd.f32 %v5910_v7, %v5786_v34  ;;  %v11203_v30 = vpop.f32.mrb[54].mxu0  ;;  %v4476_v14 = vpop.f32.mrb[23].mxu1  ;;  %v5989_v10 = vshrl.u32 %v15728_v56, 16  ;;  %v5991_v46 = vshll.u32 %v15728_v56, 16  ;;  %v6268_v41 = vrot.slane %v15728_v56, 1 }
 0x460   : > { %v5942_v61 = vadd.f32 %v10009_v42, %v5930_v37  ;;  %v15739_v54 = vadd.f32 %v4476_v14, %v4301_v8  ;;  %v5913_v19 = vpop.f32.mrb[55].mxu0  ;;  %v6269_v63 = vrot.slane %v15726_v47, 1  ;;  %v5998_v29 = vrot.slane %v5996_v23, 1 }
 0x461   : > { %v5940_v3 = vadd.f32 %v10009_v42, %v5928_v24  ;;  %v5929_v44 = vadd.f32 %v5913_v19, %v5787_v16  ;;  %v5993_v6 = vrot.slane %v5991_v46, 1  ;;  %v6415_v53 = vrot.slane %v5989_v10, 1 }
 0x462   : > { %v5949_v1 = vmax.f32 %v5942_v61, 0.0  ;;  %v15743_v48 = vsel %vm375_vm0, %v6268_v41, %v6269_v63  ;;  %v6416_v60 = vrot.slane %v5991_v46, 2  ;;  %v6418_v18 = vrot.slane %v6000_v32, 1  ;;  %v12066_v46 = vld [vmem:[#allocation7 + $0x4e8] sm:$0xff]  }
 0x463   : > { %v5941_v50 = vadd.f32 %v10009_v42, %v5929_v44  ;;  %v5994_v57 = vor.u32 %v5993_v6, %v5989_v10  ;;  %v6419_v27 = vrot.slane %v5996_v23, 2  ;;  %v6570_v26 = vrot.slane %v15728_v56, 2  ;;  %v12064_v10 = vld [vmem:[#allocation7 + $0x4d8] sm:$0xff]   ;;  %v12067_v6 = vld [vmem:[#allocation7 + $0x4f0] sm:$0xff]  }
 0x464   : > { %v15745_v28 = vpack.c.bf16 %v5949_v1, %v5949_v1  ;;  %v6417_v9 = vor.u32 %v6416_v60, %v6415_v53  ;;  %v5947_v38 = vmax.f32 %v5940_v3, 0.0  ;;  %v6571_v52 = vrot.slane %v15726_v47, 2  ;;  %v12069_v1 = vld [vmem:[#allocation7 + $0x540] sm:$0xff]   ;;  %v12070_v60 = vld [vmem:[#allocation7 + $0x548] sm:$0xff]  }
 0x465   : > { %v5948_v22 = vmax.f32 %v5941_v50, 0.0  ;;  %v5999_v59 = vsel %vm1600_vm4, %v5994_v57, %v5998_v29  ;;  %v6420_v0 = vor.u32 %v6419_v27, %v6418_v18  ;;  %v6002_v35 = vor.u32 %v6000_v32, %v5998_v29  ;;  %v12063_v32 = vld [vmem:[#allocation7 + $0x4d0] sm:$0xff]   ;;  %v12074_v50 = vld [vmem:[#allocation7 + $0x568] sm:$0xff]  }
 0x466   : > { %11220 = vmatprep.mubr.bf16.mxu1 %v5999_v59  ;;  %v6012_v13 = vshll.u32 %v15745_v28, 16  ;;  %v6016_v33 = vshrl.u32 %v15745_v28, 16  ;;  %v15755_v40 = vsel %vm474_vm1, %v6570_v26, %v6571_v52  ;;  %v6273_v8 = vrot.slane %v15745_v28, 1  ;;  %v12075_v26 = vld [vmem:[#allocation7 + $0x570] sm:$0xff]   ;;  %v12078_v59 = vld [vmem:[#allocation7 + $0x588] sm:$0xff]  }
 0x467   : > { %v15752_v34 = vpack.c.bf16 %v5948_v22, %v5947_v38  ;;  %v15759_v45 = vsel %vm2185_vm5, %v6417_v9, %v6420_v0  ;;  %v6575_v21 = vrot.slane %v15745_v28, 2  ;;  %v12076_v22 = vld [vmem:[#allocation7 + $0x578] sm:$0xff]  }
 0x468   : > { %v6426_v15 = vrot.slane %v6016_v33, 1  ;;  %v6427_v16 = vrot.slane %v6012_v13, 2  ;;  %v6014_v7 = vrot.slane %v6012_v13, 1  ;;  %v12080_v13 = vld [vmem:[#allocation7 + $0x598] sm:$0xff]  }
 0x469   : > { %v6004_v42 = vshll.u32 %v15752_v34, 16  ;;  %v6008_v36 = vshrl.u32 %v15752_v34, 16  ;;  %v6271_v11 = vrot.slane %v15752_v34, 1  ;;  %v6573_v51 = vrot.slane %v15752_v34, 2 }
 0x46a   : > { %v15765_v39 = vor.u32 %v6427_v16, %v6426_v15  ;;  %v6018_v14 = vor.u32 %v6016_v33, %v6014_v7  ;;  %v12081_v33 = vld [vmem:[#allocation7 + $0x5a0] sm:$0xff]  }
 0x46b   : > { %v6006_v31 = vrot.slane %v6004_v42, 1  ;;  %v6422_v25 = vrot.slane %v6008_v36, 1  ;;  %v15769_v17 = vsel %vm375_vm0, %v6269_v63, %v6271_v11  ;;  %v15774_v58 = vsel %vm375_vm0, %v6271_v11, %v6273_v8 }
 0x46c   : > { %v6423_v55 = vrot.slane %v6004_v42, 2  ;;  %v15777_v2 = vsel %vm474_vm1, %v6571_v52, %v6573_v51  ;;  %v15782_v4 = vsel %vm474_vm1, %v6573_v51, %v6575_v21  ;;  %v12079_v52 = vld [vmem:[#allocation7 + $0x590] sm:$0xff]  }
 0x46d   : > { %v6007_v49 = vsel %vm1600_vm4, %v6002_v35, %v6006_v31  ;;  %v6010_v37 = vor.u32 %v6008_v36, %v6006_v31  ;;  %v12083_v51 = vld [vmem:[#allocation7 + $0x5b0] sm:$0xff]   ;;  %v12086_v31 = vld [vmem:[#allocation7 + $0x5c8] sm:$0xff]  }
 0x46e   : > { %11221 = vmatmul.mubr.bf16.vlgmr.msra.gmra.mrb[40].mxu1 %v6007_v49  ;;  %v6424_v20 = vor.u32 %v6423_v55, %v6422_v25  ;;  %v12087_v25 = vld [vmem:[#allocation7 + $0x5d0] sm:$0xff]  }
 0x46f   : > { %11229 = vmatpush3.bf16.msra.mxu1 %v15723_v43  ;;  %v6015_v23 = vsel %vm1600_vm4, %v6010_v37, %v6014_v7  ;;  %v12065_v43 = vld [vmem:[#allocation7 + $0x4e0] sm:$0xff]   ;;  %v12090_v7 = vld [vmem:[#allocation7 + $0x5e8] sm:$0xff]  }
 0x470   : > { %11224 = vmatprep.mubr.bf16.mxu1 %v6015_v23  ;;  %11230 = vmatprep.subr.bf16.mxu1 %v12062_v5  ;;  %v15788_v24 = vsel %vm2185_vm5, %v6420_v0, %v6424_v20  ;;  %v15792_v30 = vsel %vm2185_vm5, %v6424_v20, %v15765_v39  ;;  %v12082_v0 = vld [vmem:[#allocation7 + $0x5a8] sm:$0xff]   ;;  %v12089_v37 = vld [vmem:[#allocation7 + $0x5e0] sm:$0xff]  }
 0x473   : > { %11231 = vmatpush3.bf16.msra.mxu1 %v12062_v5 }
 0x474   : > { %11232 = vmatprep.subr.bf16.mxu1 %v12063_v32 }
 0x476   : > { %11225 = vmatmul.mubr.bf16.gmra.mrb[44].mxu1 %v6018_v14 }
 0x477   : > { %11233 = vmatpush3.bf16.msra.mxu1 %v12063_v32  ;;  %11244 = vmatprep.mubr.bf16.mxu1 %v15728_v56  ;;  %v12068_v56 = vld [vmem:[#allocation7 + $0x4f8] sm:$0xff]  }
 0x478   : > { %11234 = vmatprep.subr.bf16.mxu1 %v12064_v10 }
 0x47b   : > { %11235 = vmatpush3.bf16.msra.mxu1 %v12064_v10  ;;  %v12092_v10 = vld [vmem:[#allocation7 + $0x5f8] sm:$0xff]  }
 0x47c   : > { %11236 = vmatprep.subr.bf16.mxu1 %v12065_v43 }
 0x47d   : > { %v11010_v41 = vpop.f32.mrb[24].mxu1 }
 0x47e   : > { %v4684_v61 = vadd.f32 %v11010_v41, %v15730_v62  ;;  %v4664_v19 = vpop.f32.mrb[25].mxu1  ;;  %v12071_v62 = vld [vmem:[#allocation7 + $0x550] sm:$0xff]  }
 0x47f   : > { %v4682_v63 = vadd.f32 %v4664_v19, %v15732_v12  ;;  %11237 = vmatpush3.bf16.msra.mxu1 %v12065_v43  ;;  %v11011_v3 = vpop.f32.mrb[26].mxu1  ;;  %v12072_v12 = vld [vmem:[#allocation7 + $0x558] sm:$0xff]  }
 0x480   : > { %v4667_v44 = vpop.f32.mrb[27].mxu1  ;;  %11238 = vmatprep.subr.bf16.mxu1 %v12066_v46 }
 0x481   : > { %v4683_v53 = vadd.f32 %v4667_v44, %v15739_v54  ;;  %v12073_v54 = vld [vmem:[#allocation7 + $0x560] sm:$0xff]  }
 0x483   : > { %11239 = vmatpush3.bf16.msra.mxu1 %v12066_v46 }
 0x484   : > { %11240 = vmatprep.subr.bf16.mxu1 %v12067_v6 }
 0x487   : > { %11241 = vmatpush3.bf16.msra.mxu1 %v12067_v6 }
 0x488   : > { %11242 = vmatprep.subr.bf16.mxu1 %v12068_v56 }
 0x48b   : > { %11243 = vmatpush3.bf16.msra.mxu1 %v12068_v56 }
 0x48c   : > { %11252 = vmatprep.subr.bf16.mxu1 %v12069_v1 }
 0x48e   : > { %11245 = vmatmul.mubr.bf16.vlgmr.msra.gmra.mrb[40].mxu1 %v15726_v47 }
 0x48f   : > { %11248 = vmatprep.mubr.bf16.mxu1 %v15752_v34  ;;  %11253 = vmatpush3.bf16.msra.mxu1 %v12069_v1 }
 0x490   : > { %11254 = vmatprep.subr.bf16.mxu1 %v12070_v60 }
 0x493   : > { %11255 = vmatpush3.bf16.msra.mxu1 %v12070_v60 }
 0x494   : > { %11256 = vmatprep.subr.bf16.mxu1 %v12071_v62 }
 0x496   : > { %11249 = vmatmul.mubr.bf16.gmra.mrb[48].mxu1 %v15745_v28  ;;  %v12093_v28 = vld [vmem:[#allocation7 + $0x640] sm:$0xff]  }
 0x497   : > { %11257 = vmatpush3.bf16.msra.mxu1 %v12071_v62  ;;  %11268 = vmatprep.mubr.bf16.mxu1 %v15743_v48  ;;  %v12077_v48 = vld [vmem:[#allocation7 + $0x580] sm:$0xff]  }
 0x498   : > { %11258 = vmatprep.subr.bf16.mxu1 %v12072_v12  ;;  %11324 = vmatprep.subr.bf16.mxu0 %v12093_v28 }
 0x499   : > { %11325 = vmatpush3.bf16.msra.mxu0 %v12093_v28 }
 0x49b   : > { %11259 = vmatpush3.bf16.msra.mxu1 %v12072_v12 }
 0x49c   : > { %11260 = vmatprep.subr.bf16.mxu1 %v12073_v54 }
 0x49d   : > { %v11034_v57 = vpop.f32.mrb[28].mxu1 }
 0x49e   : > { %v4875_v47 = vadd.f32 %v11034_v57, %v4684_v61  ;;  %v4855_v29 = vpop.f32.mrb[29].mxu1  ;;  %v12096_v57 = vld [vmem:[#allocation7 + $0x650] sm:$0xff]  }
 0x49f   : > { %v4873_v18 = vadd.f32 %v4855_v29, %v4682_v63  ;;  %11261 = vmatpush3.bf16.msra.mxu1 %v12073_v54  ;;  %v11035_v9 = vpop.f32.mrb[30].mxu1  ;;  %v12098_v29 = vld [vmem:[#allocation7 + $0x658] sm:$0xff]  }
 0x4a0   : > { %v4858_v27 = vpop.f32.mrb[31].mxu1  ;;  %11262 = vmatprep.subr.bf16.mxu1 %v12074_v50  ;;  %v12100_v9 = vld [vmem:[#allocation7 + $0x660] sm:$0xff]  }
 0x4a1   : > { %v4874_v38 = vadd.f32 %v4858_v27, %v4683_v53  ;;  %v12101_v27 = vld [vmem:[#allocation7 + $0x758] sm:$0xff]  }
 0x4a3   : > { %11263 = vmatpush3.bf16.msra.mxu1 %v12074_v50  ;;  %v12095_v50 = vld [vmem:[#allocation7 + $0x740] sm:$0xff]  }
 0x4a4   : > { %11264 = vmatprep.subr.bf16.mxu1 %v12075_v26 }
 0x4a7   : > { %11265 = vmatpush3.bf16.msra.mxu1 %v12075_v26  ;;  %v12102_v26 = vld [vmem:[#allocation7 + $0x668] sm:$0xff]  }
 0x4a8   : > { %11266 = vmatprep.subr.bf16.mxu1 %v12076_v22 }
 0x4ab   : > { %11267 = vmatpush3.bf16.msra.mxu1 %v12076_v22 }
 0x4ac   : > { %11276 = vmatprep.subr.bf16.mxu1 %v12077_v48 }
 0x4ae   : > { %11269 = vmatmul.mubr.bf16.vlgmr.msra.gmra.mrb[40].mxu1 %v15769_v17  ;;  %v12088_v17 = vld [vmem:[#allocation7 + $0x5d8] sm:$0xff]  }
 0x4af   : > { %11272 = vmatprep.mubr.bf16.mxu1 %v15774_v58  ;;  %11277 = vmatpush3.bf16.msra.mxu1 %v12077_v48  ;;  %v12104_v48 = vld [vmem:[#allocation7 + $0x670] sm:$0xff]  }
 0x4b0   : > { %11278 = vmatprep.subr.bf16.mxu1 %v12078_v59 }
 0x4b3   : > { %11279 = vmatpush3.bf16.msra.mxu1 %v12078_v59  ;;  %v12105_v59 = vld [vmem:[#allocation7 + $0x768] sm:$0xff]  }
 0x4b4   : > { %11280 = vmatprep.subr.bf16.mxu1 %v12079_v52 }
 0x4b6   : > { %11273 = vmatmul.mubr.bf16.gmra.mrb[52].mxu1 %v6273_v8  ;;  %v12084_v8 = vld [vmem:[#allocation7 + $0x5b8] sm:$0xff]  }
 0x4b7   : > { %11281 = vmatpush3.bf16.msra.mxu1 %v12079_v52  ;;  %11292 = vmatprep.mubr.bf16.mxu1 %v15759_v45  ;;  %v12085_v45 = vld [vmem:[#allocation7 + $0x5c0] sm:$0xff]  }
 0x4b8   : > { %11282 = vmatprep.subr.bf16.mxu1 %v12080_v13 }
 0x4bb   : > { %11283 = vmatpush3.bf16.msra.mxu1 %v12080_v13 }
 0x4bc   : > { %11284 = vmatprep.subr.bf16.mxu1 %v12081_v33 }
 0x4bd   : > { %v11058_v34 = vpop.f32.mrb[32].mxu1 }
 0x4be   : > { %v5066_v15 = vadd.f32 %v11058_v34, %v4875_v47  ;;  %v5046_v16 = vpop.f32.mrb[33].mxu1  ;;  %v12097_v47 = vld [vmem:[#allocation7 + $0x748] sm:$0xff]  }
 0x4bf   : > { %v5064_v42 = vadd.f32 %v5046_v16, %v4873_v18  ;;  %11285 = vmatpush3.bf16.msra.mxu1 %v12081_v33  ;;  %v11059_v36 = vpop.f32.mrb[34].mxu1  ;;  %v12099_v18 = vld [vmem:[#allocation7 + $0x750] sm:$0xff]   ;;  %v12106_v16 = vld [vmem:[#allocation7 + $0x678] sm:$0xff]  }
 0x4c0   : > { %v5049_v11 = vpop.f32.mrb[35].mxu1  ;;  %11286 = vmatprep.subr.bf16.mxu1 %v12082_v0  ;;  %v15835_v36 = vld [vmem:[#allocation7 + $0x600] sm:$0xff]  }
 0x4c1   : > { %v5065_v35 = vadd.f32 %v5049_v11, %v4874_v38  ;;  %v12103_v38 = vld [vmem:[#allocation7 + $0x760] sm:$0xff]   ;;  %v12109_v11 = vld [vmem:[#allocation7 + $0x778] sm:$0xff]  }
 0x4c3   : > { %11287 = vmatpush3.bf16.msra.mxu1 %v12082_v0 }
 0x4c4   : > { %11288 = vmatprep.subr.bf16.mxu1 %v12083_v51 }
 0x4c7   : > { %11289 = vmatpush3.bf16.msra.mxu1 %v12083_v51  ;;  %v15838_v51 = vld [vmem:[#allocation7 + $0x7c0] sm:$0xff]  }
 0x4c8   : > { %11290 = vmatprep.subr.bf16.mxu1 %v12084_v8 }
 0x4cb   : > { %11291 = vmatpush3.bf16.msra.mxu1 %v12084_v8  ;;  %v15841_v8 = vld [vmem:[#allocation9 + $0x5] ss:$0 sm:$0xff] }
 0x4cc   : > { %11300 = vmatprep.subr.bf16.mxu1 %v12085_v45 }
 0x4ce   : > { %11293 = vmatmul.mubr.bf16.vlgmr.msra.gmra.mrb[40].mxu1 %v15788_v24 }
 0x4cf   : > { %11296 = vmatprep.mubr.bf16.mxu1 %v15792_v30  ;;  %11301 = vmatpush3.bf16.msra.mxu1 %v12085_v45 }
 0x4d0   : > { %11302 = vmatprep.subr.bf16.mxu1 %v12086_v31 }
 0x4d3   : > { %11303 = vmatpush3.bf16.msra.mxu1 %v12086_v31 }
 0x4d4   : > { %11304 = vmatprep.subr.bf16.mxu1 %v12087_v25 }
 0x4d5   : > { %v15809_v58 = vpop.f32.mrb[0].mxu1 }
 0x4d6   : > { %11297 = vmatmul.mubr.bf16.gmra.mrb[56].mxu1 %v15765_v39  ;;  %v15812_v5 = vpop.f32.mrb[1].mxu1 }
 0x4d7   : > { %11305 = vmatpush3.bf16.msra.mxu1 %v12087_v25  ;;  %11316 = vmatprep.mubr.bf16.mxu1 %v15755_v40  ;;  %v15815_v55 = vpop.f32.mrb[2].mxu1  ;;  %v12091_v40 = vld [vmem:[#allocation7 + $0x5f0] sm:$0xff]  }
 0x4d8   : > { %v15817_v49 = vpop.f32.mrb[3].mxu1  ;;  %11306 = vmatprep.subr.bf16.mxu1 %v12088_v17 }
 0x4db   : > { %11307 = vmatpush3.bf16.msra.mxu1 %v12088_v17 }
 0x4dc   : > { %11308 = vmatprep.subr.bf16.mxu1 %v12089_v37 }
 0x4dd   : > { %v11082_v20 = vpop.f32.mrb[36].mxu1 }
 0x4de   : > { %v15819_v23 = vadd.f32 %v11082_v20, %v5066_v15  ;;  %v5199_v32 = vpop.f32.mrb[37].mxu1 }
 0x4df   : > { %v15821_v24 = vadd.f32 %v5199_v32, %v5064_v42  ;;  %11309 = vmatpush3.bf16.msra.mxu1 %v12089_v37  ;;  %v11083_v39 = vpop.f32.mrb[38].mxu1  ;;  %v12107_v42 = vld [vmem:[#allocation7 + $0x770] sm:$0xff]  }
 0x4e0   : > { %v5202_v30 = vpop.f32.mrb[39].mxu1  ;;  %11310 = vmatprep.subr.bf16.mxu1 %v12090_v7 }
 0x4e1   : > { %v15823_v14 = vadd.f32 %v5202_v30, %v5065_v35  ;;  %v9968_v35 = vld [vmem:[#allocation9 + $0x3] ss:$0 sm:$0xff] }
 0x4e2   : > { %v5227_v45 = vadd.f32 %v15809_v58, %v9968_v35  ;;  %v5225_v31 = vadd.f32 %v9968_v35, %v15812_v5  ;;  %v5228_v17 = vadd.f32 %v15815_v55, %v9968_v35  ;;  %v5226_v20 = vadd.f32 %v9968_v35, %v15817_v49 }
 0x4e3   : > { %11311 = vmatpush3.bf16.msra.mxu1 %v12090_v7 }
 0x4e4   : > { %11312 = vmatprep.subr.bf16.mxu1 %v12091_v40  ;;  %v5234_v30 = vmax.f32 %v5227_v45, 0.0 }
 0x4e7   : > { %11313 = vmatpush3.bf16.msra.mxu1 %v12091_v40 }
 0x4e8   : > { %11314 = vmatprep.subr.bf16.mxu1 %v12092_v10 }
 0x4eb   : > { %11315 = vmatpush3.bf16.msra.mxu1 %v12092_v10 }
 0x4ec   : > { %11424 = vmatprep.subr.bf16.mxu1 %v12095_v50 }
 0x4ee   : > { %11317 = vmatmul.mubr.bf16.vlgmr.msra.gmra.mrb[40].mxu1 %v15777_v2 }
 0x4ef   : > { %11320 = vmatprep.mubr.bf16.mxu1 %v15782_v4  ;;  %11425 = vmatpush3.bf16.msra.mxu1 %v12095_v50 }
 0x4f0   : > { %11426 = vmatprep.subr.bf16.mxu1 %v12097_v47 }
 0x4f3   : > { %11427 = vmatpush3.bf16.msra.mxu1 %v12097_v47 }
 0x4f4   : > { %11428 = vmatprep.subr.bf16.mxu1 %v12099_v18 }
 0x4f6   : > { %11321 = vmatmul.mubr.bf16.gmra.mrb[60].mxu1 %v6575_v21  ;;  %v12094_v21 = vld [vmem:[#allocation7 + $0x648] sm:$0xff]  }
 0x4f7   : > { %11326 = vmatprep.subr.bf16.mxu0 %v12094_v21  ;;  %11429 = vmatpush3.bf16.msra.mxu1 %v12099_v18 }
 0x4f8   : > { %11327 = vmatpush3.bf16.msra.mxu0 %v12094_v21  ;;  %11430 = vmatprep.subr.bf16.mxu1 %v12101_v27 }
 0x4f9   : > { %11328 = vmatprep.subr.bf16.mxu0 %v12096_v57 }
 0x4fb   : > { %11431 = vmatpush3.bf16.msra.mxu1 %v12101_v27 }
 0x4fc   : > { %11329 = vmatpush3.bf16.msra.mxu0 %v12096_v57  ;;  %11432 = vmatprep.subr.bf16.mxu1 %v12103_v38 }
 0x4fd   : > { %11330 = vmatprep.subr.bf16.mxu0 %v12098_v29 }
 0x4ff   : > { %11433 = vmatpush3.bf16.msra.mxu1 %v12103_v38 }
 0x500   : > { %11331 = vmatpush3.bf16.msra.mxu0 %v12098_v29  ;;  %11434 = vmatprep.subr.bf16.mxu1 %v12105_v59 }
 0x501   : > { %11332 = vmatprep.subr.bf16.mxu0 %v12100_v9 }
 0x503   : > { %11435 = vmatpush3.bf16.msra.mxu1 %v12105_v59 }
 0x504   : > { %11333 = vmatpush3.bf16.msra.mxu0 %v12100_v9  ;;  %11436 = vmatprep.subr.bf16.mxu1 %v12107_v42 }
 0x505   : > { %11334 = vmatprep.subr.bf16.mxu0 %v12102_v26 }
 0x507   : > { %11437 = vmatpush3.bf16.msra.mxu1 %v12107_v42 }
 0x508   : > { %11335 = vmatpush3.bf16.msra.mxu0 %v12102_v26  ;;  %11438 = vmatprep.subr.bf16.mxu1 %v12109_v11 }
 0x509   : > { %11336 = vmatprep.subr.bf16.mxu0 %v12104_v48 }
 0x50b   : > { %11439 = vmatpush3.bf16.msra.mxu1 %v12109_v11 }
 0x50c   : > { %11337 = vmatpush3.bf16.msra.mxu0 %v12104_v48  ;;  %11464 = vmatprep.subr.bf16.mxu1 %v15838_v51 }
 0x50d   : > { %11338 = vmatprep.subr.bf16.mxu0 %v12106_v16 }
 0x510   : > { %11339 = vmatpush3.bf16.msra.mxu0 %v12106_v16 }
 0x511   : > { %11344 = vmatprep.subr.bf16.mxu0 %v15835_v36 }
 0x549   : > { %v11226_v43 = vpop.f32.mrb[44].mxu1 }
 0x54a   : > { %v6121_v46 = vpop.f32.mrb[45].mxu1 }
 0x54b   : > { %v11227_v41 = vpop.f32.mrb[46].mxu1 }
 0x54c   : > { %v6124_v61 = vpop.f32.mrb[47].mxu1  ;;  %v5235_v41 = vmax.f32 %v5228_v17, 0.0 }
 0x569   : > { %v11250_v19 = vpop.f32.mrb[48].mxu1 }
 0x56a   : > { %v6242_v63 = vadd.f32 %v11250_v19, %v11226_v43  ;;  %v6233_v3 = vpop.f32.mrb[49].mxu1  ;;  %v5233_v19 = vmax.f32 %v5226_v20, 0.0 }
 0x56b   : > { %v6234_v44 = vadd.f32 %v6233_v3, %v6121_v46  ;;  %v11251_v6 = vpop.f32.mrb[50].mxu1  ;;  %v5232_v46 = vmax.f32 %v5225_v31, 0.0 }
 0x56c   : > { %v6236_v53 = vpop.f32.mrb[51].mxu1 }
 0x56d   : > { %v6237_v56 = vadd.f32 %v6236_v53, %v6124_v61  ;;  %v17006_v53 = vld [vmem:[#allocation16_spill] sm:$0xff] }
 0x589   : > { %v11274_v1 = vpop.f32.mrb[52].mxu1 }
 0x58a   : > { %v6397_v60 = vadd.f32 %v11274_v1, %v6242_v63  ;;  %v6377_v62 = vpop.f32.mrb[53].mxu1  ;;  %v15852_v63 = vadd.f32 %v9968_v35, %v15819_v23 }
 0x58b   : > { %v6395_v2 = vadd.f32 %v6377_v62, %v6234_v44  ;;  %v11275_v12 = vpop.f32.mrb[54].mxu1  ;;  %v15855_v44 = vadd.f32 %v9968_v35, %v15821_v24 }
 0x58c   : > { %v6380_v4 = vpop.f32.mrb[55].mxu1 }
 0x58d   : > { %v6396_v54 = vadd.f32 %v6380_v4, %v6237_v56 }
 0x5a9   : > { %v11298_v22 = vpop.f32.mrb[56].mxu1 }
 0x5aa   : > { %v15829_v52 = vadd.f32 %v11298_v22, %v6397_v60  ;;  %v6532_v13 = vpop.f32.mrb[57].mxu1  ;;  %v15861_v60 = vadd.f32 %v9968_v35, %v15823_v14 }
 0x5ab   : > { %v15831_v33 = vadd.f32 %v6532_v13, %v6395_v2  ;;  %v11299_v0 = vpop.f32.mrb[58].mxu1 }
 0x5ac   : > { %v6535_v34 = vpop.f32.mrb[59].mxu1 }
 0x5ad   : > { %v15833_v15 = vadd.f32 %v6535_v34, %v6396_v54 }
 0x5c1   : > { %v11318_v25 = vpop.f32.mrb[40].mxu1 }
 0x5c2   : > { %v6707_v37 = vadd.f32 %v11318_v25, %v15841_v8  ;;  %v6663_v7 = vpop.f32.mrb[41].mxu1 }
 0x5c3   : > { %v6705_v32 = vadd.f32 %v15841_v8, %v6663_v7  ;;  %v11319_v39 = vpop.f32.mrb[42].mxu1 }
 0x5c4   : > { %v6714_v40 = vmax.f32 %v6707_v37, 0.0  ;;  %v6708_v10 = vadd.f32 %v11319_v39, %v15841_v8  ;;  %v6666_v43 = vpop.f32.mrb[43].mxu1 }
 0x5c5   : > { %v6712_v58 = vmax.f32 %v6705_v32, 0.0  ;;  %v6706_v5 = vadd.f32 %v15841_v8, %v6666_v43 }
 0x5c6   : > { %v6721_v61 = vadd.f32 %v6714_v40, %v5234_v30  ;;  %v6715_v55 = vmax.f32 %v6708_v10, 0.0 }
 0x5c7   : > { %v6719_v49 = vadd.f32 %v6712_v58, %v5232_v46  ;;  %v6713_v3 = vmax.f32 %v6706_v5, 0.0 }
 0x5c8   : > { %v6767_v6 = vcombine.high %v6721_v61, %v6721_v61  ;;  %v6774_v56 = vrot.slane %v6721_v61, %v17006_v53  ;;  %v15858_v1 = vadd.f32 %v6715_v55, %v5235_v41 }
 0x5c9   : > { %v6733_v62 = vcombine.high %v6719_v49, %v6719_v49  ;;  %v6740_v2 = vrot.slane %v6719_v49, %v17006_v53  ;;  %v15864_v12 = vadd.f32 %v6713_v3, %v5233_v19  ;;  %v15866_v23 = vpop.f32.mrb[60].mxu1 }
 0x5ca   : > { %v6781_v4 = vrot.slane %v6767_v6, %v17006_v53  ;;  %v6782_v54 = vcombine.high %v6774_v56, %v6774_v56  ;;  %v6925_v24 = vsel %vm870_vm7, %v6774_v56, -inf  ;;  %v6784_v28 = vcombine.high %v15858_v1, %v15858_v1  ;;  %v15872_v21 = vpop.f32.mrb[61].mxu1 }
 0x5cb   : > { %v6926_v50 = vrot.slane %v6925_v24, 4  ;;  %v6747_v14 = vrot.slane %v6733_v62, %v17006_v53  ;;  %v6748_v57 = vcombine.high %v6740_v2, %v6740_v2  ;;  %v6869_v47 = vsel %vm870_vm7, %v6740_v2, -inf  ;;  %v11323_v29 = vpop.f32.mrb[62].mxu1 }
 0x5cc   : > { %v6783_v18 = vcombine.high %v6781_v4, %v6781_v4  ;;  %v6932_v9 = vsel %vm870_vm7, %v6782_v54, -inf  ;;  %v6939_v27 = vsel %vm870_vm7, %v6781_v4, -inf  ;;  %v6870_v26 = vrot.slane %v6869_v47, 4  ;;  %v15878_v38 = vpop.f32.mrb[63].mxu1 }
 0x5cd   : > { %v6927_v22 = vmax.f32 %v6925_v24, %v6926_v50  ;;  %v6933_v48 = vrot.slane %v6932_v9, 4  ;;  %v6940_v59 = vrot.slane %v6939_v27, 4  ;;  %v6749_v13 = vcombine.high %v6747_v14, %v6747_v14 }
 0x5ce   : > { %v6946_v0 = vsel %vm870_vm7, %v6783_v18, -inf  ;;  %v6871_v34 = vmax.f32 %v6869_v47, %v6870_v26  ;;  %v6876_v16 = vsel %vm870_vm7, %v6748_v57, -inf  ;;  %v6883_v42 = vsel %vm870_vm7, %v6747_v14, -inf }
 0x5cf   : > { %v6928_v11 = vrot.slane %v6927_v22, 2  ;;  %v6934_v35 = vmax.f32 %v6932_v9, %v6933_v48  ;;  %v6941_v45 = vmax.f32 %v6939_v27, %v6940_v59  ;;  %v6947_v31 = vrot.slane %v6946_v0, 4 }
 0x5d0   : > { %v6872_v25 = vrot.slane %v6871_v34, 2  ;;  %v6877_v17 = vrot.slane %v6876_v16, 4  ;;  %v6884_v37 = vrot.slane %v6883_v42, 4  ;;  %v6890_v7 = vsel %vm870_vm7, %v6749_v13, -inf }
 0x5d1   : > { %v6929_v20 = vmax.f32 %v6927_v22, %v6928_v11  ;;  %v6935_v32 = vrot.slane %v6934_v35, 2  ;;  %v6942_v39 = vrot.slane %v6941_v45, 2  ;;  %v6948_v30 = vmax.f32 %v6946_v0, %v6947_v31 }
 0x5d2   : > { %v6873_v40 = vmax.f32 %v6871_v34, %v6872_v25  ;;  %v6878_v10 = vmax.f32 %v6876_v16, %v6877_v17  ;;  %v6885_v43 = vmax.f32 %v6883_v42, %v6884_v37  ;;  %v6891_v46 = vrot.slane %v6890_v7, 4 }
 0x5d3   : > { %v6930_v58 = vrot.slane %v6929_v20, 1  ;;  %v6936_v5 = vmax.f32 %v6934_v35, %v6935_v32  ;;  %v6943_v41 = vmax.f32 %v6941_v45, %v6942_v39  ;;  %v6949_v61 = vrot.slane %v6948_v30, 2 }
 0x5d4   : > { %v6874_v55 = vrot.slane %v6873_v40, 1  ;;  %v6879_v19 = vrot.slane %v6878_v10, 2  ;;  %v6886_v49 = vrot.slane %v6885_v43, 2  ;;  %v6892_v3 = vmax.f32 %v6890_v7, %v6891_v46 }
 0x5d5   : > { %v6931_v6 = vmax.f32 %v6929_v20, %v6930_v58  ;;  %v6937_v56 = vrot.slane %v6936_v5, 1  ;;  %v6944_v62 = vrot.slane %v6943_v41, 1  ;;  %v6950_v2 = vmax.f32 %v6948_v30, %v6949_v61 }
 0x5d6   : > { %v6875_v4 = vmax.f32 %v6873_v40, %v6874_v55  ;;  %v6880_v54 = vmax.f32 %v6878_v10, %v6879_v19  ;;  %v6887_v24 = vmax.f32 %v6885_v43, %v6886_v49  ;;  %v6893_v50 = vrot.slane %v6892_v3, 2 }
 0x5d7   : > { %v6938_v14 = vmax.f32 %v6936_v5, %v6937_v56  ;;  %v6945_v57 = vmax.f32 %v6943_v41, %v6944_v62  ;;  %v6951_v47 = vrot.slane %v6950_v2, 1  ;;  %v7059_v29 = vpack.c.bf16 %v6931_v6, %v6931_v6 }
 0x5d8   : > { %v6881_v18 = vrot.slane %v6880_v54, 1  ;;  %v6888_v9 = vrot.slane %v6887_v24, 1  ;;  %v6894_v27 = vmax.f32 %v6892_v3, %v6893_v50  ;;  %v7051_v26 = vpack.c.bf16 %v6875_v4, %v6875_v4 }
 0x5d9   : > { %v5238_v22 = vmax.f32 %v15852_v63, 0.0  ;;  %v5236_v48 = vmax.f32 %v15855_v44, 0.0  ;;  %v6952_v59 = vmax.f32 %v6950_v2, %v6951_v47  ;;  %v7060_v13 = vpack.c.bf16 %v6938_v14, %v6938_v14 }
 0x5da   : > { %v7061_v0 = vpack.c.bf16 %v6945_v57, %v6945_v57  ;;  %v6882_v34 = vmax.f32 %v6880_v54, %v6881_v18  ;;  %v15886_v16 = vmax.f32 %v6887_v24, %v6888_v9  ;;  %v6895_v42 = vrot.slane %v6894_v27, 1 }
 0x5db   : > { %v5237_v11 = vmax.f32 %v15861_v60, 0.0  ;;  %v7062_v35 = vpack.c.bf16 %v6952_v59, %v6952_v59  ;;  %v15889_v45 = vunpack.c.l.b16 %v7059_v29  ;;  %v6791_v31 = vrot.slane %v15858_v1, %v17006_v53 }
 0x5dc   : > { %v15893_v25 = vmax.f32 %v6894_v27, %v6895_v42  ;;  %v7052_v17 = vpack.c.bf16 %v6882_v34, %v6882_v34  ;;  %v15895_v37 = vunpack.c.l.b16 %v7051_v26  ;;  %v6798_v7 = vrot.slane %v6784_v28, %v17006_v53 }
 0x5dd   : > { %v15901_v20 = vunpack.c.l.b16 %v7060_v13  ;;  %v6799_v32 = vcombine.high %v6791_v31, %v6791_v31  ;;  %v6953_v39 = vsel %vm870_vm7, %v6791_v31, -inf  ;;  %v6750_v30 = vcombine.high %v15864_v12, %v15864_v12 }
 0x5de   : > { %v15906_v40 = vunpack.c.l.b16 %v7061_v0  ;;  %v15908_v10 = vunpack.c.l.b16 %v7062_v35  ;;  %v7053_v43 = vpack.c.bf16 %v15886_v16, %v15886_v16  ;;  %v6800_v46 = vcombine.high %v6798_v7, %v6798_v7 }
 0x5df   : > { %v6954_v58 = vrot.slane %v6953_v39, 4  ;;  %v6960_v1 = vsel %vm870_vm7, %v6799_v32, -inf  ;;  %v6967_v28 = vsel %vm870_vm7, %v6798_v7, -inf  ;;  %v6757_v5 = vrot.slane %v15864_v12, %v17006_v53 }
 0x5e0   : > { %v7054_v41 = vpack.c.bf16 %v15893_v25, %v15893_v25  ;;  %v15918_v61 = vunpack.c.l.b16 %v7052_v17  ;;  %v6961_v55 = vrot.slane %v6960_v1, 4  ;;  %v6968_v19 = vrot.slane %v6967_v28, 4 }
 0x5e1   : > { %v6955_v49 = vmax.f32 %v6953_v39, %v6954_v58  ;;  %v6974_v3 = vsel %vm870_vm7, %v6800_v46, -inf  ;;  %v6764_v6 = vrot.slane %v6750_v30, %v17006_v53  ;;  %v6765_v56 = vcombine.high %v6757_v5, %v6757_v5 }
 0x5e2   : > { %v6962_v62 = vmax.f32 %v6960_v1, %v6961_v55  ;;  %v6969_v2 = vmax.f32 %v6967_v28, %v6968_v19  ;;  %v6975_v4 = vrot.slane %v6974_v3, 4  ;;  %v6897_v54 = vsel %vm870_vm7, %v6757_v5, -inf }
 0x5e3   : > { %v6956_v24 = vrot.slane %v6955_v49, 2  ;;  %v6766_v12 = vcombine.high %v6764_v6, %v6764_v6  ;;  %v6898_v50 = vrot.slane %v6897_v54, 4  ;;  %v6904_v14 = vsel %vm870_vm7, %v6765_v56, -inf }
 0x5e4   : > { %v6963_v57 = vrot.slane %v6962_v62, 2  ;;  %v6970_v47 = vrot.slane %v6969_v2, 2  ;;  %v6976_v29 = vmax.f32 %v6974_v3, %v6975_v4  ;;  %v6905_v18 = vrot.slane %v6904_v14, 4 }
 0x5e5   : > { %v6957_v9 = vmax.f32 %v6955_v49, %v6956_v24  ;;  %v6899_v27 = vmax.f32 %v6897_v54, %v6898_v50  ;;  %v6911_v26 = vsel %vm870_vm7, %v6764_v6, -inf  ;;  %v6918_v59 = vsel %vm870_vm7, %v6766_v12, -inf }
 0x5e6   : > { %v6964_v13 = vmax.f32 %v6962_v62, %v6963_v57  ;;  %v6971_v0 = vmax.f32 %v6969_v2, %v6970_v47  ;;  %v6977_v34 = vrot.slane %v6976_v29, 2  ;;  %v6906_v16 = vmax.f32 %v6904_v14, %v6905_v18 }
 0x5e7   : > { %v6958_v42 = vrot.slane %v6957_v9, 1  ;;  %v6900_v35 = vrot.slane %v6899_v27, 2  ;;  %v6912_v31 = vrot.slane %v6911_v26, 4  ;;  %v6919_v25 = vrot.slane %v6918_v59, 4 }
 0x5e8   : > { %v6965_v17 = vrot.slane %v6964_v13, 1  ;;  %v6972_v7 = vrot.slane %v6971_v0, 1  ;;  %v6978_v32 = vmax.f32 %v6976_v29, %v6977_v34  ;;  %v6907_v39 = vrot.slane %v6906_v16, 2 }
 0x5e9   : > { %v6959_v30 = vmax.f32 %v6957_v9, %v6958_v42  ;;  %v6901_v46 = vmax.f32 %v6899_v27, %v6900_v35  ;;  %v6913_v58 = vmax.f32 %v6911_v26, %v6912_v31  ;;  %v6920_v1 = vmax.f32 %v6918_v59, %v6919_v25 }
 0x5ea   : > { %v6966_v28 = vmax.f32 %v6964_v13, %v6965_v17  ;;  %v15926_v5 = vmax.f32 %v6971_v0, %v6972_v7  ;;  %v6979_v55 = vrot.slane %v6978_v32, 1  ;;  %v6908_v19 = vmax.f32 %v6906_v16, %v6907_v39 }
 0x5eb   : > { %v7063_v49 = vpack.c.bf16 %v6959_v30, %v6959_v30  ;;  %v6902_v3 = vrot.slane %v6901_v46, 1  ;;  %v6914_v6 = vrot.slane %v6913_v58, 2  ;;  %v6921_v56 = vrot.slane %v6920_v1, 2 }
 0x5ec   : > { %v15928_v62 = vunpack.c.l.b16 %v7053_v43  ;;  %v15930_v2 = vunpack.c.l.b16 %v7054_v41  ;;  %v6980_v4 = vmax.f32 %v6978_v32, %v6979_v55  ;;  %v6909_v54 = vrot.slane %v6908_v19, 1 }
 0x5ed   : > { %v7264_v24 = vsel %vm3582_vm9, %v15918_v61, %v15895_v37  ;;  %v6903_v12 = vmax.f32 %v6901_v46, %v6902_v3  ;;  %v6915_v50 = vmax.f32 %v6913_v58, %v6914_v6  ;;  %v6922_v14 = vmax.f32 %v6920_v1, %v6921_v56 }
 0x5ee   : > { %v7064_v57 = vpack.c.bf16 %v6966_v28, %v6966_v28  ;;  %v7065_v47 = vpack.c.bf16 %v15926_v5, %v15926_v5  ;;  %v15937_v29 = vunpack.c.l.b16 %v7063_v49  ;;  %v6910_v18 = vmax.f32 %v6908_v19, %v6909_v54 }
 0x5ef   : > { %v6916_v43 = vrot.slane %v6915_v50, 1  ;;  %v6923_v9 = vrot.slane %v6922_v14, 1  ;;  %v7055_v41 = vpack.c.bf16 %v6903_v12, %v6903_v12  ;;  %v6699_v27 = vadd.f32 %v15866_v23, %v15829_v52 }
 0x5f0   : > { %v7066_v26 = vpack.c.bf16 %v6980_v4, %v6980_v4  ;;  %v7056_v59 = vpack.c.bf16 %v6910_v18, %v6910_v18  ;;  %v6697_v37 = vadd.f32 %v15872_v21, %v15831_v33  ;;  %v6698_v13 = vadd.f32 %v15878_v38, %v15833_v15 }
 0x5f1   : > { %v6917_v0 = vmax.f32 %v6915_v50, %v6916_v43  ;;  %v6924_v34 = vmax.f32 %v6922_v14, %v6923_v9  ;;  %v15945_v16 = vunpack.c.l.b16 %v7055_v41  ;;  %v6711_v42 = vadd.f32 %v15841_v8, %v6699_v27 }
 0x5f2   : > { %v15948_v35 = vunpack.c.l.b16 %v7056_v59  ;;  %v6709_v31 = vadd.f32 %v15841_v8, %v6697_v37  ;;  %v6710_v52 = vadd.f32 %v15841_v8, %v6698_v13  ;;  %v7147_v23 = vsel %vm3582_vm9, %v15928_v62, %v15918_v61 }
 0x5f3   : > { %v7057_v33 = vpack.c.bf16 %v6917_v0, %v6917_v0  ;;  %v7058_v21 = vpack.c.bf16 %v6924_v34, %v6924_v34  ;;  %v6718_v25 = vmax.f32 %v6711_v42, 0.0  ;;  %v7148_v15 = vsel %vm3584_vm10, %v15930_v2, %v7147_v23 }
 0x5f4   : > { %v6716_v38 = vmax.f32 %v6709_v31, 0.0  ;;  %v6717_v17 = vmax.f32 %v6710_v52, 0.0  ;;  %v7149_v7 = vsel %vm3586_vm11, %v15945_v16, %v7148_v15  ;;  %v7154_v32 = vsel %vm3582_vm9, %v15906_v40, %v15901_v20 }
 0x5f5   : > { %v15962_v8 = vunpack.c.l.b16 %v7064_v57  ;;  %v15964_v39 = vunpack.c.l.b16 %v7057_v33  ;;  %v6725_v61 = vadd.f32 %v6718_v25, %v5238_v22  ;;  %v7150_v30 = vsel %vm3588_vm12, %v15948_v35, %v7149_v7 }
 0x5f6   : > { %v15970_v46 = vunpack.c.l.b16 %v7058_v21  ;;  %v6723_v58 = vadd.f32 %v6716_v38, %v5236_v48  ;;  %v6724_v1 = vadd.f32 %v6717_v17, %v5237_v11  ;;  %v7155_v28 = vsel %vm3584_vm10, %v15908_v10, %v7154_v32 }
 0x5f7   : > { %v6841_v5 = vrot.slane %v6725_v61, %v17006_v53  ;;  %v7151_v63 = vsel %vm3590_vm13, %v15964_v39, %v7150_v30  ;;  %v7156_v22 = vsel %vm3586_vm11, %v15937_v29, %v7155_v28  ;;  %v7265_v55 = vsel %vm3584_vm10, %v15928_v62, %v7264_v24 }
 0x5f8   : > { %v6801_v19 = vcombine.high %v6723_v58, %v6723_v58  ;;  %v6808_v44 = vrot.slane %v6723_v58, %v17006_v53  ;;  %v6818_v48 = vcombine.high %v6724_v1, %v6724_v1  ;;  %v6825_v60 = vrot.slane %v6724_v1, %v17006_v53 }
 0x5f9   : > { %v6842_v11 = vcombine.high %v6841_v5, %v6841_v5  ;;  %v7037_v49 = vsel %vm870_vm7, %v6841_v5, -inf  ;;  %v15990_v3 = vsel %vm3592_vm14, %v15970_v46, %v7151_v63  ;;  %v15994_v6 = vsel %vm3588_vm12, %v15962_v8, %v7156_v22 }
 0x5fa   : > { %v7038_v56 = vrot.slane %v7037_v49, 4  ;;  %v6815_v4 = vrot.slane %v6801_v19, %v17006_v53  ;;  %v6816_v54 = vcombine.high %v6808_v44, %v6808_v44  ;;  %v6981_v24 = vsel %vm870_vm7, %v6808_v44, -inf }
 0x5fb   : > { %v15998_v12 = vunpack.c.l.b16 %v7065_v47  ;;  %v16000_v50 = vunpack.c.l.b16 %v7066_v26  ;;  %v6982_v14 = vrot.slane %v6981_v24, 4  ;;  %v16004_v57 = vsel %vm3586_vm11, %v15930_v2, %v7265_v55 }
 0x5fc   : > { %v7039_v18 = vmax.f32 %v7037_v49, %v7038_v56  ;;  %v7044_v43 = vsel %vm870_vm7, %v6842_v11, -inf  ;;  %v6817_v9 = vcombine.high %v6815_v4, %v6815_v4  ;;  %v6988_v41 = vsel %vm870_vm7, %v6816_v54, -inf }
 0x5fd   : > { %v6983_v27 = vmax.f32 %v6981_v24, %v6982_v14  ;;  %v6989_v59 = vrot.slane %v6988_v41, 4  ;;  %v6995_v37 = vsel %vm870_vm7, %v6815_v4, -inf  ;;  %v6833_v13 = vcombine.high %v6825_v60, %v6825_v60 }
 0x5fe   : > { %v7040_v47 = vrot.slane %v7039_v18, 2  ;;  %v6996_v0 = vrot.slane %v6995_v37, 4  ;;  %v7002_v26 = vsel %vm870_vm7, %v6817_v9, -inf  ;;  %v6832_v34 = vrot.slane %v6818_v48, %v17006_v53 }
 0x5ff   : > { %v6984_v42 = vrot.slane %v6983_v27, 2  ;;  %v6990_v31 = vmax.f32 %v6988_v41, %v6989_v59  ;;  %v7003_v52 = vrot.slane %v7002_v26, 4  ;;  %v7009_v23 = vsel %vm870_vm7, %v6825_v60, -inf }
 0x600   : > { %v7041_v33 = vmax.f32 %v7039_v18, %v7040_v47  ;;  %v7045_v21 = vrot.slane %v7044_v43, 4  ;;  %v6997_v25 = vmax.f32 %v6995_v37, %v6996_v0  ;;  %v7010_v15 = vrot.slane %v7009_v23, 4 }
 0x601   : > { %v6985_v38 = vmax.f32 %v6983_v27, %v6984_v42  ;;  %v6991_v17 = vrot.slane %v6990_v31, 2  ;;  %v7004_v7 = vmax.f32 %v7002_v26, %v7003_v52  ;;  %v7016_v32 = vsel %vm870_vm7, %v6833_v13, -inf }
 0x602   : > { %v7042_v61 = vrot.slane %v7041_v33, 1  ;;  %v6998_v30 = vrot.slane %v6997_v25, 2  ;;  %v6834_v58 = vcombine.high %v6832_v34, %v6832_v34  ;;  %v7011_v1 = vmax.f32 %v7009_v23, %v7010_v15 }
 0x603   : > { %v6986_v28 = vrot.slane %v6985_v38, 1  ;;  %v6992_v5 = vmax.f32 %v6990_v31, %v6991_v17  ;;  %v7005_v63 = vrot.slane %v7004_v7, 2  ;;  %v7017_v22 = vrot.slane %v7016_v32, 4 }
 0x604   : > { %v16013_v55 = vmax.f32 %v7041_v33, %v7042_v61  ;;  %v6999_v19 = vmax.f32 %v6997_v25, %v6998_v30  ;;  %v7012_v44 = vrot.slane %v7011_v1, 2  ;;  %v7023_v48 = vsel %vm870_vm7, %v6832_v34, -inf }
 0x605   : > { %v6987_v60 = vmax.f32 %v6985_v38, %v6986_v28  ;;  %v6993_v11 = vrot.slane %v6992_v5, 1  ;;  %v7006_v49 = vmax.f32 %v7004_v7, %v7005_v63  ;;  %v7018_v56 = vmax.f32 %v7016_v32, %v7017_v22 }
 0x606   : > { %v16016_v4 = vmax.f32 %v7044_v43, %v7045_v21  ;;  %v7000_v54 = vrot.slane %v6999_v19, 1  ;;  %v7013_v24 = vmax.f32 %v7011_v1, %v7012_v44  ;;  %v7024_v14 = vrot.slane %v7023_v48, 4 }
 0x607   : > { %v6994_v18 = vmax.f32 %v6992_v5, %v6993_v11  ;;  %v7007_v9 = vrot.slane %v7006_v49, 1  ;;  %v7067_v41 = vpack.c.bf16 %v6987_v60, %v6987_v60  ;;  %v7019_v27 = vrot.slane %v7018_v56, 2 }
 0x608   : > { %v7075_v59 = vpack.c.bf16 %v16013_v55, %v16013_v55  ;;  %v7001_v37 = vmax.f32 %v6999_v19, %v7000_v54  ;;  %v7014_v13 = vrot.slane %v7013_v24, 1  ;;  %v7025_v47 = vmax.f32 %v7023_v48, %v7024_v14 }
 0x609   : > { %v7008_v0 = vmax.f32 %v7006_v49, %v7007_v9  ;;  %v7068_v26 = vpack.c.bf16 %v6994_v18, %v6994_v18  ;;  %v16020_v34 = vunpack.c.l.b16 %v7067_v41  ;;  %v7020_v42 = vmax.f32 %v7018_v56, %v7019_v27  ;;  %v12110_v18 = vld [vmem:[#allocation7 + $0x608] sm:$0xff]  }
 0x60a   : > { %v7069_v43 = vpack.c.bf16 %v7001_v37, %v7001_v37  ;;  %v7015_v31 = vmax.f32 %v7013_v24, %v7014_v13  ;;  %v7026_v52 = vrot.slane %v7025_v47, 2  ;;  %v7030_v23 = vsel %vm870_vm7, %v6834_v58, -inf }
 0x60b   : > { %v7070_v33 = vpack.c.bf16 %v7008_v0, %v7008_v0  ;;  %v16023_v21 = vunpack.c.l.b16 %v7068_v26  ;;  %v7021_v25 = vrot.slane %v7020_v42, 1  ;;  %v7031_v15 = vrot.slane %v7030_v23, 4 }
 0x60c   : > { %v16025_v38 = vunpack.c.l.b16 %v7069_v43  ;;  %v7027_v17 = vmax.f32 %v7025_v47, %v7026_v52  ;;  %v7071_v7 = vpack.c.bf16 %v7015_v31, %v7015_v31  ;;  %v7153_v32 = vsel %vm3594_vm15, %v15889_v45, %v15990_v3 }
 0x60d   : > { %v16030_v61 = vunpack.c.l.b16 %v7070_v33  ;;  %v7022_v30 = vmax.f32 %v7020_v42, %v7021_v25  ;;  %v7032_v1 = vmax.f32 %v7030_v23, %v7031_v15  ;;  %v7158_v58 = vsel %vm3590_vm13, %v15998_v12, %v15994_v6  ;;  %v12112_v25 = vld [vmem:[#allocation7 + $0x610] sm:$0xff]  }
 0x60e   : > { %v7028_v28 = vrot.slane %v7027_v17, 1  ;;  %v16035_v5 = vunpack.c.l.b16 %v7071_v7  ;;  %v7159_v63 = vsel %vm3592_vm14, %v16000_v50, %v7158_v58  ;;  %v16042_v22 = vsel %vm3582_vm9, %v16025_v38, %v16023_v21 }
 0x60f   : > { %v7033_v3 = vrot.slane %v7032_v1, 2  ;;  %v7072_v19 = vpack.c.bf16 %v7022_v30, %v7022_v30  ;;  %v7160_v44 = vsel %vm3594_vm15, %v16020_v34, %v7159_v63  ;;  %v7163_v48 = vpack.c.b16 %v16042_v22, %v16042_v22 }
 0x610   : > { %v7029_v6 = vmax.f32 %v7027_v17, %v7028_v28  ;;  %v16048_v60 = vpack.c.b16 %v7160_v44, %v7153_v32  ;;  %v7267_v11 = vsel %vm3588_vm12, %v15945_v16, %v16004_v57  ;;  %v7271_v49 = vsel %vm3582_vm9, %v15901_v20, %v15889_v45 }
 0x611   : > { %v7034_v56 = vmax.f32 %v7032_v1, %v7033_v3  ;;  %v16056_v54 = vunpack.c.l.b16 %v7072_v19  ;;  %v7268_v24 = vsel %vm3590_vm13, %v15948_v35, %v7267_v11  ;;  %v7272_v14 = vsel %vm3584_vm10, %v15906_v40, %v7271_v49  ;;  %v12114_v49 = vld [vmem:[#allocation7 + $0x618] sm:$0xff]  }
 0x612   : > { %v7073_v9 = vpack.c.bf16 %v7029_v6, %v7029_v6  ;;  %11340 = vmatprep.mubr.bf16.mxu0 %v16048_v60  ;;  %v7269_v57 = vsel %vm3592_vm14, %v15964_v39, %v7268_v24  ;;  %v7273_v41 = vsel %vm3586_vm11, %v15908_v10, %v7272_v14  ;;  %v7809_v27 = vsel %vm3582_vm9, %v15964_v39, %v15948_v35 }
 0x613   : > { %v7035_v37 = vrot.slane %v7034_v56, 1  ;;  %11341 = vmatmul.mubr.bf16.vlgmr.msra.gmra.mrb[56].mxu0 %v7163_v48  ;;  %v7270_v13 = vsel %vm3594_vm15, %v15970_v46, %v7269_v57  ;;  %v7274_v47 = vsel %vm3588_vm12, %v15937_v29, %v7273_v41  ;;  %v7810_v0 = vsel %vm3584_vm10, %v15970_v46, %v7809_v27 }
 0x614   : > { %v16076_v26 = vunpack.c.l.b16 %v7073_v9  ;;  %11345 = vmatpush3.bf16.msra.mxu0 %v15835_v36  ;;  %v7275_v42 = vsel %vm3590_vm13, %v15962_v8, %v7274_v47  ;;  %v7811_v43 = vsel %vm3586_vm11, %v15889_v45, %v7810_v0  ;;  %v7816_v31 = vsel %vm3582_vm9, %v15998_v12, %v15962_v8  ;;  %v12113_v47 = vld [vmem:[#allocation7 + $0x7c8] sm:$0xff]  }
 0x615   : > { %v7036_v52 = vmax.f32 %v7034_v56, %v7035_v37  ;;  %v7276_v23 = vsel %vm3592_vm14, %v15998_v12, %v7275_v42  ;;  %11346 = vmatprep.subr.bf16.mxu0 %v12110_v18  ;;  %v7812_v33 = vsel %vm3588_vm12, %v15901_v20, %v7811_v43  ;;  %v7817_v36 = vsel %vm3584_vm10, %v16000_v50, %v7816_v31 }
 0x616   : > { %v16094_v15 = vsel %vm3594_vm15, %v16000_v50, %v7276_v23  ;;  %v7813_v17 = vsel %vm3590_vm13, %v15906_v40, %v7812_v33  ;;  %v7818_v7 = vsel %vm3586_vm11, %v16020_v34, %v7817_v36  ;;  %v7823_v32 = vsel %vm3582_vm9, %v16076_v26, %v16056_v54  ;;  %v12116_v23 = vld [vmem:[#allocation7 + $0x620] sm:$0xff]  }
 0x617   : > { %v7074_v30 = vpack.c.bf16 %v7036_v52, %v7036_v52  ;;  %v16104_v1 = vpack.c.b16 %v16094_v15, %v7270_v13  ;;  %v7814_v58 = vsel %vm3592_vm14, %v15908_v10, %v7813_v17  ;;  %v7819_v28 = vsel %vm3588_vm12, %v16023_v21, %v7818_v7 }
 0x618   : > { %v7815_v63 = vsel %vm3594_vm15, %v15937_v29, %v7814_v58  ;;  %v7820_v3 = vsel %vm3590_vm13, %v16025_v38, %v7819_v28  ;;  %11347 = vmatpush3.bf16.msra.mxu0 %v12110_v18  ;;  %v7825_v19 = vpack.c.b16 %v7823_v32, %v7823_v32  ;;  %v8083_v44 = vsel %vm3582_vm9, %v15889_v45, %v15970_v46  ;;  %v12115_v58 = vld [vmem:[#allocation7 + $0x7d0] sm:$0xff]  }
 0x619   : > { %11360 = vmatprep.mubr.bf16.mxu0 %v16104_v1  ;;  %v7821_v48 = vsel %vm3592_vm14, %v16030_v61, %v7820_v3  ;;  %v8084_v6 = vsel %vm3584_vm10, %v15901_v20, %v8083_v44  ;;  %v8090_v11 = vsel %vm3582_vm9, %v16020_v34, %v16000_v50  ;;  %11348 = vmatprep.subr.bf16.mxu0 %v12112_v25  ;;  %v16136_v9 = vunpack.c.l.b16 %v7074_v30 }
 0x61a   : > { %v7822_v56 = vsel %vm3594_vm15, %v16035_v5, %v7821_v48  ;;  %v8085_v24 = vsel %vm3586_vm11, %v15906_v40, %v8084_v6  ;;  %v8091_v14 = vsel %vm3584_vm10, %v16023_v21, %v8090_v11  ;;  %v16134_v18 = vsel %vm3582_vm9, %v16023_v21, %v16020_v34 }
 0x61b   : > { %v7824_v57 = vpack.c.b16 %v7822_v56, %v7815_v63  ;;  %v8086_v41 = vsel %vm3588_vm12, %v15908_v10, %v8085_v24  ;;  %v8092_v27 = vsel %vm3586_vm11, %v16025_v38, %v8091_v14  ;;  %v8220_v0 = vsel %vm3584_vm10, %v16025_v38, %v16134_v18  ;;  %v12118_v63 = vld [vmem:[#allocation7 + $0x628] sm:$0xff]  }
 0x61c   : > { %v8087_v37 = vsel %vm3590_vm13, %v15937_v29, %v8086_v41  ;;  %v8093_v13 = vsel %vm3588_vm12, %v16030_v61, %v8092_v27  ;;  %11349 = vmatpush3.bf16.msra.mxu0 %v12112_v25  ;;  %v7398_v42 = vsel %vm3582_vm9, %v15930_v2, %v15928_v62  ;;  %v16155_v43 = vunpack.c.l.b16 %v7075_v59  ;;  %v12117_v41 = vld [vmem:[#allocation7 + $0x7d8] sm:$0xff]  }
 0x61d   : > { %11440 = vmatprep.mubr.bf16.mxu1 %v7824_v57  ;;  %v8088_v31 = vsel %vm3592_vm14, %v15962_v8, %v8087_v37  ;;  %v8094_v52 = vsel %vm3590_vm13, %v16035_v5, %v8093_v13  ;;  %11350 = vmatprep.subr.bf16.mxu0 %v12114_v49  ;;  %v16163_v33 = vsel %vm3586_vm11, %v16030_v61, %v8220_v0  ;;  %v7047_v57 = vrot.slane %v16016_v4, 2 }
 0x61e   : > { %11441 = vmatmul.mubr.bf16.vlgmr.msra.gmra.mrb[64].mxu1 %v7825_v19  ;;  %v8089_v62 = vsel %vm3594_vm15, %v15998_v12, %v8088_v31  ;;  %v8095_v55 = vsel %vm3592_vm14, %v16056_v54, %v8094_v52  ;;  %v7399_v59 = vsel %vm3584_vm10, %v15945_v16, %v7398_v42  ;;  %v7405_v36 = vsel %vm3582_vm9, %v15908_v10, %v15906_v40 }
 0x61f   : > { %11465 = vmatpush3.bf16.msra.mxu1 %v15838_v51  ;;  %v8096_v25 = vsel %vm3594_vm15, %v16076_v26, %v8095_v55  ;;  %v7400_v17 = vsel %vm3586_vm11, %v15948_v35, %v7399_v59  ;;  %v7406_v7 = vsel %vm3584_vm10, %v15937_v29, %v7405_v36  ;;  %v16184_v32 = vsel %vm3582_vm9, %v16155_v43, %v16136_v9 }
 0x620   : > { %v8098_v30 = vpack.c.b16 %v8096_v25, %v8089_v62  ;;  %11466 = vmatprep.subr.bf16.mxu1 %v12113_v47  ;;  %11351 = vmatpush3.bf16.msra.mxu0 %v12114_v49  ;;  %v7401_v51 = vsel %vm3588_vm12, %v15964_v39, %v7400_v17  ;;  %v7407_v28 = vsel %vm3586_vm11, %v15962_v8, %v7406_v7  ;;  %v12119_v25 = vld [vmem:[#allocation7 + $0x7e0] sm:$0xff]  }
 0x621   : > { %11352 = vmatprep.subr.bf16.mxu0 %v12116_v23  ;;  %v7402_v3 = vsel %vm3590_vm13, %v15970_v46, %v7401_v51  ;;  %v7408_v19 = vsel %vm3588_vm12, %v15998_v12, %v7407_v28  ;;  %v16197_v44 = vsel %vm3582_vm9, %v16030_v61, %v16025_v38  ;;  %v7535_v24 = vsel %vm3582_vm9, %v15945_v16, %v15930_v2  ;;  %v12120_v2 = vld [vmem:[#allocation7 + $0x630] sm:$0xff]   ;;  %v12122_v51 = vld [vmem:[#allocation7 + $0x638] sm:$0xff]  }
 0x622   : > { %11480 = vmatprep.mubr.bf16.mxu1 %v8098_v30  ;;  %v7403_v48 = vsel %vm3592_vm14, %v15889_v45, %v7402_v3  ;;  %v7409_v6 = vsel %vm3590_vm13, %v16000_v50, %v7408_v19  ;;  %v8592_v11 = vsel %vm3584_vm10, %v16035_v5, %v16197_v44  ;;  %v7542_v14 = vsel %vm3582_vm9, %v15937_v29, %v15908_v10 }
 0x623   : > { %11467 = vmatpush3.bf16.msra.mxu1 %v12113_v47  ;;  %v7404_v49 = vsel %vm3594_vm15, %v15901_v20, %v7403_v48  ;;  %v7410_v56 = vsel %vm3592_vm14, %v16020_v34, %v7409_v6  ;;  %v7536_v37 = vsel %vm3584_vm10, %v15948_v35, %v7535_v24  ;;  %v7543_v13 = vsel %vm3584_vm10, %v15962_v8, %v7542_v14 }
 0x624   : > { %11468 = vmatprep.subr.bf16.mxu1 %v12115_v58  ;;  %11353 = vmatpush3.bf16.msra.mxu0 %v12116_v23  ;;  %v7411_v27 = vsel %vm3594_vm15, %v16023_v21, %v7410_v56  ;;  %v7537_v0 = vsel %vm3586_vm11, %v15964_v39, %v7536_v37  ;;  %v7544_v42 = vsel %vm3586_vm11, %v15998_v12, %v7543_v13 }
 0x625   : > { %11354 = vmatprep.subr.bf16.mxu0 %v12118_v63  ;;  %v16223_v47 = vpack.c.b16 %v7411_v27, %v7404_v49  ;;  %v8375_v31 = vsel %vm3584_vm10, %v16030_v61, %v16042_v22  ;;  %v7538_v52 = vsel %vm3588_vm12, %v15970_v46, %v7537_v0  ;;  %v7545_v23 = vsel %vm3588_vm12, %v16000_v50, %v7544_v42  ;;  %v12124_v27 = vld [vmem:[#allocation7 + $0x680] sm:$0xff]  }
 0x626   : > { %v8376_v62 = vsel %vm3586_vm11, %v16035_v5, %v8375_v31  ;;  %v16241_v55 = vsel %vm3582_vm9, %v16035_v5, %v16030_v61  ;;  %v7539_v59 = vsel %vm3590_vm13, %v15889_v45, %v7538_v52  ;;  %v7546_v22 = vsel %vm3590_vm13, %v16020_v34, %v7545_v23 }
 0x627   : > { %11469 = vmatpush3.bf16.msra.mxu1 %v12115_v58  ;;  %v8377_v36 = vsel %vm3588_vm12, %v16056_v54, %v8376_v62  ;;  %v7540_v17 = vsel %vm3592_vm14, %v15901_v20, %v7539_v59  ;;  %v7547_v7 = vsel %vm3592_vm14, %v16023_v21, %v7546_v22  ;;  %v7048_v58 = vmax.f32 %v16016_v4, %v7047_v57  ;;  %v12123_v22 = vld [vmem:[#allocation7 + $0x7f0] sm:$0xff]  }
 0x628   : > { %11470 = vmatprep.subr.bf16.mxu1 %v12117_v41  ;;  %11355 = vmatpush3.bf16.msra.mxu0 %v12118_v63  ;;  %v16255_v30 = vsel %vm3590_vm13, %v16076_v26, %v8377_v36  ;;  %v7541_v28 = vsel %vm3594_vm15, %v15906_v40, %v7540_v17  ;;  %v7548_v63 = vsel %vm3594_vm15, %v16025_v38, %v7547_v7 }
 0x629   : > { %11356 = vmatprep.subr.bf16.mxu0 %v12120_v2  ;;  %v16265_v3 = vsel %vm3584_vm10, %v16056_v54, %v16241_v55  ;;  %v16267_v19 = vpack.c.b16 %v7548_v63, %v7541_v28  ;;  %v7672_v48 = vsel %vm3582_vm9, %v15948_v35, %v15945_v16  ;;  %v7679_v4 = vsel %vm3582_vm9, %v15962_v8, %v15937_v29  ;;  %v12121_v35 = vld [vmem:[#allocation7 + $0x7e8] sm:$0xff]  }
 0x62a   : > { %v8593_v6 = vsel %vm3586_vm11, %v16056_v54, %v8592_v11  ;;  %v7673_v49 = vsel %vm3584_vm10, %v15964_v39, %v7672_v48  ;;  %v7680_v56 = vsel %vm3584_vm10, %v15998_v12, %v7679_v4  ;;  %v16286_v16 = vsel %vm3582_vm9, %v16056_v54, %v16035_v5 }
 0x62b   : > { %11471 = vmatpush3.bf16.msra.mxu1 %v12117_v41  ;;  %v8594_v24 = vsel %vm3588_vm12, %v16076_v26, %v8593_v6  ;;  %v7674_v11 = vsel %vm3586_vm11, %v15970_v46, %v7673_v49  ;;  %v7681_v14 = vsel %vm3586_vm11, %v16000_v50, %v7680_v56  ;;  %v7280_v41 = vpack.c.b16 %v16134_v18, %v16134_v18 }
 0x62c   : > { %11472 = vmatprep.subr.bf16.mxu1 %v12119_v25  ;;  %11357 = vmatpush3.bf16.msra.mxu0 %v12120_v2  ;;  %v16294_v57 = vsel %vm3590_vm13, %v16136_v9, %v8594_v24  ;;  %v7675_v37 = vsel %vm3588_vm12, %v15889_v45, %v7674_v11  ;;  %v7682_v13 = vsel %vm3588_vm12, %v16020_v34, %v7681_v14  ;;  %v7049_v2 = vrot.slane %v7048_v58, 1 }
 0x62d   : > { %11358 = vmatprep.subr.bf16.mxu0 %v12122_v51  ;;  %v7676_v0 = vsel %vm3590_vm13, %v15901_v20, %v7675_v37  ;;  %v7683_v42 = vsel %vm3590_vm13, %v16023_v21, %v7682_v13  ;;  %v8836_v31 = vsel %vm3584_vm10, %v16076_v26, %v16286_v16  ;;  %v7946_v18 = vsel %vm3582_vm9, %v15970_v46, %v15964_v39  ;;  %v12132_v37 = vld [vmem:[#allocation7 + $0x6a0] sm:$0xff]   ;;  %v12131_v13 = vld [vmem:[#allocation7 + $0x890] sm:$0xff]  }
 0x62e   : > { %v7677_v52 = vsel %vm3592_vm14, %v15906_v40, %v7676_v0  ;;  %v7684_v23 = vsel %vm3592_vm14, %v16025_v38, %v7683_v42  ;;  %v7947_v62 = vsel %vm3584_vm10, %v15889_v45, %v7946_v18  ;;  %v7953_v59 = vsel %vm3582_vm9, %v16000_v50, %v15998_v12  ;;  %v12138_v0 = vld [vmem:[#allocation7 + $0x6b8] sm:$0xff]   ;;  %v12140_v42 = vld [vmem:[#allocation7 + $0x6c0] sm:$0xff]  }
 0x62f   : > { %11473 = vmatpush3.bf16.msra.mxu1 %v12119_v25  ;;  %v7678_v39 = vsel %vm3594_vm15, %v15908_v10, %v7677_v52  ;;  %v7685_v46 = vsel %vm3594_vm15, %v16030_v61, %v7684_v23  ;;  %v7948_v36 = vsel %vm3586_vm11, %v15901_v20, %v7947_v62  ;;  %v12126_v25 = vld [vmem:[#allocation7 + $0x688] sm:$0xff]   ;;  %v7954_v12 = vsel %vm3584_vm10, %v16020_v34, %v7953_v59  ;;  %v12141_v23 = vld [vmem:[#allocation7 + $0x8b8] sm:$0xff]   ;;  %v12144_v62 = vld [vmem:[#allocation7 + $0x6d0] sm:$0xff]  }
 0x630   : > { %11474 = vmatprep.subr.bf16.mxu1 %v12121_v35  ;;  %11359 = vmatpush3.bf16.msra.mxu0 %v12122_v51  ;;  %v16327_v17 = vpack.c.b16 %v7685_v46, %v7678_v39  ;;  %v7949_v45 = vsel %vm3588_vm12, %v15906_v40, %v7948_v36  ;;  %v7050_v50 = vmax.f32 %v7048_v58, %v7049_v2  ;;  %v12125_v58 = vld [vmem:[#allocation7 + $0x7f8] sm:$0xff]   ;;  %v12135_v2 = vld [vmem:[#allocation7 + $0x8a0] sm:$0xff]   ;;  %v12142_v52 = vld [vmem:[#allocation7 + $0x6c8] sm:$0xff]  }
 0x631   : > { %11364 = vmatprep.subr.bf16.mxu0 %v12124_v27  ;;  %v7950_v7 = vsel %vm3590_vm13, %v15908_v10, %v7949_v45  ;;  %v7955_v51 = vsel %vm3586_vm11, %v16023_v21, %v7954_v12  ;;  %v8837_v20 = vsel %vm3586_vm11, %v16136_v9, %v8836_v31  ;;  %v16342_v28 = vsel %vm3582_vm9, %v16136_v9, %v16076_v26  ;;  %v12139_v31 = vld [vmem:[#allocation7 + $0x8b0] sm:$0xff]   ;;  %v12143_v59 = vld [vmem:[#allocation7 + $0x8c0] sm:$0xff]   ;;  %v12145_v39 = vld [vmem:[#allocation7 + $0x8c8] sm:$0xff]  }
 0x632   : > { %v7951_v40 = vsel %vm3592_vm14, %v15937_v29, %v7950_v7  ;;  %v7956_v34 = vsel %vm3588_vm12, %v16025_v38, %v7955_v51  ;;  %v7076_v10 = vpack.c.bf16 %v7050_v50, %v7050_v50  ;;  %v8838_v48 = vsel %vm3588_vm12, %v16155_v43, %v8837_v20  ;;  %v12128_v29 = vld [vmem:[#allocation7 + $0x690] sm:$0xff]   ;;  %v12148_v46 = vld [vmem:[#allocation7 + $0x6e0] sm:$0xff]   ;;  %v12149_v45 = vld [vmem:[#allocation7 + $0x8d8] sm:$0xff]  }
 0x633   : > { %11475 = vmatpush3.bf16.msra.mxu1 %v12121_v35  ;;  %11361 = vmatmul.mubr.bf16.vlgmr.msra.gmra.mrb[60].mxu0 %v7280_v41  ;;  %v16350_v21 = vsel %vm3594_vm15, %v15962_v8, %v7951_v40  ;;  %v7957_v63 = vsel %vm3590_vm13, %v16030_v61, %v7956_v34  ;;  %v8222_v6 = vsel %vm3588_vm12, %v16035_v5, %v16163_v33  ;;  %v12130_v35 = vld [vmem:[#allocation7 + $0x698] sm:$0xff]   ;;  %v12147_v36 = vld [vmem:[#allocation7 + $0x8d0] sm:$0xff]   ;;  %v12151_v12 = vld [vmem:[#allocation7 + $0x8e0] sm:$0xff]  }
 0x634   : > { %11476 = vmatprep.subr.bf16.mxu1 %v12123_v22  ;;  %11365 = vmatpush3.bf16.msra.mxu0 %v12124_v27  ;;  %v7958_v38 = vsel %vm3592_vm14, %v16035_v5, %v7957_v63  ;;  %v8219_v4 = vunpack.c.l.b16 %v7076_v10  ;;  %v16368_v61 = vsel %vm3590_vm13, %v16056_v54, %v8222_v6  ;;  %v8715_v49 = vsel %vm3586_vm11, %v16076_v26, %v16265_v3  ;;  %v12129_v27 = vld [vmem:[#allocation7 + $0x888] sm:$0xff]   ;;  %v12154_v50 = vld [vmem:[#allocation7 + $0x6f8] sm:$0xff]   ;;  %v12156_v7 = vld [vmem:[#allocation7 + $0x700] sm:$0xff]  }
 0x635   : > { %11380 = vmatprep.mubr.bf16.mxu0 %v16223_v47  ;;  %11366 = vmatprep.subr.bf16.mxu0 %v12126_v25  ;;  %v16364_v8 = vsel %vm3594_vm15, %v16056_v54, %v7958_v38  ;;  %v8224_v5 = vsel %vm3592_vm14, %v16076_v26, %v16368_v61  ;;  %v12127_v54 = vld [vmem:[#allocation7 + $0x880] sm:$0xff]   ;;  %v8716_v14 = vsel %vm3588_vm12, %v16136_v9, %v8715_v49  ;;  %v12155_v51 = vld [vmem:[#allocation7 + $0x8f0] sm:$0xff]   ;;  %v12158_v40 = vld [vmem:[#allocation7 + $0x708] sm:$0xff]  }
 0x636   : > { %v7961_v56 = vpack.c.b16 %v16364_v8, %v16350_v21  ;;  %v16376_v24 = vsel %vm3590_vm13, %v8219_v4, %v8838_v48  ;;  %v16383_v33 = vsel %vm3582_vm9, %v8219_v4, %v16155_v43  ;;  %v16387_v3 = vsel %vm3594_vm15, %v16136_v9, %v8224_v5  ;;  %v12134_v9 = vld [vmem:[#allocation7 + $0x6a8] sm:$0xff]   ;;  %v12157_v34 = vld [vmem:[#allocation7 + $0x8f8] sm:$0xff]   ;;  %v12160_v10 = vld [vmem:[#allocation7 + $0x710] sm:$0xff]  }
 0x637   : > { %11477 = vmatpush3.bf16.msra.mxu1 %v12123_v22  ;;  %v8227_v11 = vpack.c.b16 %v16387_v3, %v16094_v15  ;;  %v16395_v26 = vsel %vm3590_vm13, %v16155_v43, %v8716_v14  ;;  %v8099_v41 = vpack.c.b16 %v16184_v32, %v16184_v32  ;;  %v12133_v43 = vld [vmem:[#allocation7 + $0x898] sm:$0xff]   ;;  %v12136_v32 = vld [vmem:[#allocation7 + $0x6b0] sm:$0xff]   ;;  %v7414_v18 = vpack.c.b16 %v16197_v44, %v16197_v44  ;;  %v12161_v48 = vld [vmem:[#allocation7 + $0x948] sm:$0xff]  }
 0x638   : > { %11478 = vmatprep.subr.bf16.mxu1 %v12125_v58  ;;  %11367 = vmatpush3.bf16.msra.mxu0 %v12126_v25  ;;  %v12146_v22 = vld [vmem:[#allocation7 + $0x6d8] sm:$0xff]   ;;  %v8379_v44 = vpack.c.b16 %v16255_v30, %v16255_v30  ;;  %v12150_v25 = vld [vmem:[#allocation7 + $0x6e8] sm:$0xff]   ;;  %v12152_v30 = vld [vmem:[#allocation7 + $0x6f0] sm:$0xff]   ;;  %v7551_v20 = vpack.c.b16 %v16241_v55, %v16241_v55  ;;  %v8596_v55 = vpack.c.b16 %v16294_v57, %v16294_v57 }
 0x639   : > { %11368 = vmatprep.subr.bf16.mxu0 %v12128_v29  ;;  %v12162_v63 = vld [vmem:[#allocation7 + $0x718] sm:$0xff]   ;;  %v12163_v38 = vld [vmem:[#allocation7 + $0x950] sm:$0xff]   ;;  %v12166_v4 = vld [vmem:[#allocation7 + $0x728] sm:$0xff]   ;;  %v7688_v14 = vpack.c.b16 %v16286_v16, %v16286_v16  ;;  %v8840_v16 = vpack.c.b16 %v16376_v24, %v16376_v24  ;;  %v7962_v24 = vpack.c.b16 %v16342_v28, %v16342_v28  ;;  %v8228_v3 = vpack.c.b16 %v16383_v33, %v16383_v33 }
 0x63a   : > { %v12165_v6 = vld [vmem:[#allocation7 + $0x958] sm:$0xff]   ;;  %v12168_v57 = vld [vmem:[#allocation7 + $0x730] sm:$0xff]   ;;  %v12167_v49 = vld [vmem:[#allocation7 + $0x960] sm:$0xff]  }
 0x63b   : > { %11479 = vmatpush3.bf16.msra.mxu1 %v12125_v58  ;;  %v12159_v58 = vld [vmem:[#allocation7 + $0x940] sm:$0xff]   ;;  %v12170_v5 = vld [vmem:[#allocation7 + $0x738] sm:$0xff]   ;;  %v12179_v21 = vld [vmem:[#allocation7 + $0x7b0] sm:$0xff]  }
 0x63c   : > { %11504 = vmatprep.subr.bf16.mxu1 %v12127_v54  ;;  %11369 = vmatpush3.bf16.msra.mxu0 %v12128_v29  ;;  %v12164_v29 = vld [vmem:[#allocation7 + $0x720] sm:$0xff]   ;;  %v12180_v8 = vld [vmem:[#allocation7 + $0x7b8] sm:$0xff]   ;;  %v12187_v28 = vld [vmem:[#allocation7 + $0x830] sm:$0xff]  }
 0x63d   : > { %11370 = vmatprep.subr.bf16.mxu0 %v12130_v35  ;;  %v12189_v15 = vld [vmem:[#allocation7 + $0x840] sm:$0xff]   ;;  %v12195_v33 = vld [vmem:[#allocation7 + $0x870] sm:$0xff]  }
 0x63e   : > { %11481 = vmatmul.mubr.bf16.vlgmr.msra.gmra.mrb[68].mxu1 %v8099_v41  ;;  %v12174_v41 = vld [vmem:[#allocation7 + $0x788] sm:$0xff]  }
 0x63f   : > { %11505 = vmatpush3.bf16.msra.mxu1 %v12127_v54  ;;  %11520 = vmatprep.mubr.bf16.mxu1 %v16048_v60  ;;  %v12137_v60 = vld [vmem:[#allocation7 + $0x8a8] sm:$0xff]   ;;  %v12172_v54 = vld [vmem:[#allocation7 + $0x780] sm:$0xff]  }
 0x640   : > { %11506 = vmatprep.subr.bf16.mxu1 %v12129_v27  ;;  %11371 = vmatpush3.bf16.msra.mxu0 %v12130_v35  ;;  %v12171_v35 = vld [vmem:[#allocation7 + $0x970] sm:$0xff]  }
 0x641   : > { %11372 = vmatprep.subr.bf16.mxu0 %v12132_v37 }
 0x643   : > { %11507 = vmatpush3.bf16.msra.mxu1 %v12129_v27  ;;  %v12173_v27 = vld [vmem:[#allocation7 + $0x978] sm:$0xff]  }
 0x644   : > { %11508 = vmatprep.subr.bf16.mxu1 %v12131_v13  ;;  %11373 = vmatpush3.bf16.msra.mxu0 %v12132_v37  ;;  %v12175_v37 = vld [vmem:[#allocation7 + $0x790] sm:$0xff]  }
 0x645   : > { %11374 = vmatprep.subr.bf16.mxu0 %v12134_v9 }
 0x647   : > { %11509 = vmatpush3.bf16.msra.mxu1 %v12131_v13  ;;  %v12176_v13 = vld [vmem:[#allocation7 + $0x798] sm:$0xff]  }
 0x648   : > { %11510 = vmatprep.subr.bf16.mxu1 %v12133_v43  ;;  %11375 = vmatpush3.bf16.msra.mxu0 %v12134_v9  ;;  %v12177_v9 = vld [vmem:[#allocation7 + $0x7a0] sm:$0xff]  }
 0x649   : > { %11376 = vmatprep.subr.bf16.mxu0 %v12136_v32 }
 0x64b   : > { %11511 = vmatpush3.bf16.msra.mxu1 %v12133_v43  ;;  %v12178_v43 = vld [vmem:[#allocation7 + $0x7a8] sm:$0xff]  }
 0x64c   : > { %11512 = vmatprep.subr.bf16.mxu1 %v12135_v2  ;;  %11377 = vmatpush3.bf16.msra.mxu0 %v12136_v32  ;;  %v12182_v32 = vld [vmem:[#allocation7 + $0x808] sm:$0xff]  }
 0x64d   : > { %11378 = vmatprep.subr.bf16.mxu0 %v12138_v0 }
 0x64f   : > { %11513 = vmatpush3.bf16.msra.mxu1 %v12135_v2  ;;  %v12183_v2 = vld [vmem:[#allocation7 + $0x810] sm:$0xff]  }
 0x650   : > { %11514 = vmatprep.subr.bf16.mxu1 %v12137_v60  ;;  %11379 = vmatpush3.bf16.msra.mxu0 %v12138_v0  ;;  %v12184_v0 = vld [vmem:[#allocation7 + $0x818] sm:$0xff]  }
 0x651   : > { %11384 = vmatprep.subr.bf16.mxu0 %v12140_v42 }
 0x653   : > { %11515 = vmatpush3.bf16.msra.mxu1 %v12137_v60  ;;  %11381 = vmatmul.mubr.bf16.vlgmr.msra.gmra.mrb[64].mxu0 %v7414_v18  ;;  %v12185_v60 = vld [vmem:[#allocation7 + $0x820] sm:$0xff]   ;;  %v12191_v18 = vld [vmem:[#allocation7 + $0x850] sm:$0xff]  }
 0x654   : > { %11516 = vmatprep.subr.bf16.mxu1 %v12139_v31  ;;  %11385 = vmatpush3.bf16.msra.mxu0 %v12140_v42  ;;  %v12186_v42 = vld [vmem:[#allocation7 + $0x828] sm:$0xff]  }
 0x655   : > { %11400 = vmatprep.mubr.bf16.mxu0 %v16267_v19  ;;  %11386 = vmatprep.subr.bf16.mxu0 %v12142_v52 }
 0x657   : > { %11517 = vmatpush3.bf16.msra.mxu1 %v12139_v31  ;;  %v12188_v31 = vld [vmem:[#allocation7 + $0x838] sm:$0xff]  }
 0x658   : > { %11518 = vmatprep.subr.bf16.mxu1 %v12141_v23  ;;  %11387 = vmatpush3.bf16.msra.mxu0 %v12142_v52  ;;  %v12192_v52 = vld [vmem:[#allocation7 + $0x858] sm:$0xff]  }
 0x659   : > { %11388 = vmatprep.subr.bf16.mxu0 %v12144_v62 }
 0x65b   : > { %11519 = vmatpush3.bf16.msra.mxu1 %v12141_v23  ;;  %v12193_v23 = vld [vmem:[#allocation7 + $0x860] sm:$0xff]  }
 0x65c   : > { %11544 = vmatprep.subr.bf16.mxu1 %v12143_v59  ;;  %11389 = vmatpush3.bf16.msra.mxu0 %v12144_v62  ;;  %v12194_v62 = vld [vmem:[#allocation7 + $0x868] sm:$0xff]  }
 0x65d   : > { %11390 = vmatprep.subr.bf16.mxu0 %v12146_v22 }
 0x65e   : > { %11521 = vmatmul.mubr.bf16.vlgmr.msra.gmra.mrb[72].mxu1 %v8379_v44 }
 0x65f   : > { %11545 = vmatpush3.bf16.msra.mxu1 %v12143_v59  ;;  %11560 = vmatprep.mubr.bf16.mxu1 %v16223_v47  ;;  %v12153_v47 = vld [vmem:[#allocation7 + $0x8e8] sm:$0xff]  }
 0x660   : > { %11546 = vmatprep.subr.bf16.mxu1 %v12145_v39  ;;  %11391 = vmatpush3.bf16.msra.mxu0 %v12146_v22 }
 0x661   : > { %11392 = vmatprep.subr.bf16.mxu0 %v12148_v46 }
 0x663   : > { %11547 = vmatpush3.bf16.msra.mxu1 %v12145_v39 }
 0x664   : > { %11548 = vmatprep.subr.bf16.mxu1 %v12147_v36  ;;  %11393 = vmatpush3.bf16.msra.mxu0 %v12148_v46  ;;  %v12197_v46 = vld [vmem:[#allocation7 + $0x900] sm:$0xff]  }
 0x665   : > { %11394 = vmatprep.subr.bf16.mxu0 %v12150_v25 }
 0x667   : > { %11549 = vmatpush3.bf16.msra.mxu1 %v12147_v36 }
 0x668   : > { %11550 = vmatprep.subr.bf16.mxu1 %v12149_v45  ;;  %11395 = vmatpush3.bf16.msra.mxu0 %v12150_v25  ;;  %v8477_v25 = vpack.c.b16 %v16368_v61, %v16368_v61  ;;  %v12202_v61 = vld [vmem:[#allocation7 + $0x928] sm:$0xff]  }
 0x669   : > { %11396 = vmatprep.subr.bf16.mxu0 %v12152_v30 }
 0x66b   : > { %11551 = vmatpush3.bf16.msra.mxu1 %v12149_v45  ;;  %v12198_v45 = vld [vmem:[#allocation7 + $0x908] sm:$0xff]  }
 0x66c   : > { %11552 = vmatprep.subr.bf16.mxu1 %v12151_v12  ;;  %11397 = vmatpush3.bf16.msra.mxu0 %v12152_v30 }
 0x66d   : > { %11398 = vmatprep.subr.bf16.mxu0 %v12154_v50 }
 0x66f   : > { %11553 = vmatpush3.bf16.msra.mxu1 %v12151_v12 }
 0x670   : > { %11554 = vmatprep.subr.bf16.mxu1 %v12153_v47  ;;  %11399 = vmatpush3.bf16.msra.mxu0 %v12154_v50 }
 0x671   : > { %11404 = vmatprep.subr.bf16.mxu0 %v12156_v7 }
 0x673   : > { %11555 = vmatpush3.bf16.msra.mxu1 %v12153_v47  ;;  %11401 = vmatmul.mubr.bf16.vlgmr.msra.gmra.mrb[68].mxu0 %v7551_v20  ;;  %v12199_v47 = vld [vmem:[#allocation7 + $0x910] sm:$0xff]  }
 0x674   : > { %11556 = vmatprep.subr.bf16.mxu1 %v12155_v51  ;;  %11405 = vmatpush3.bf16.msra.mxu0 %v12156_v7  ;;  %v12200_v7 = vld [vmem:[#allocation7 + $0x918] sm:$0xff]   ;;  %v12203_v20 = vld [vmem:[#allocation7 + $0x930] sm:$0xff]  }
 0x675   : > { %11420 = vmatprep.mubr.bf16.mxu0 %v16327_v17  ;;  %11406 = vmatprep.subr.bf16.mxu0 %v12158_v40 }
 0x677   : > { %11557 = vmatpush3.bf16.msra.mxu1 %v12155_v51  ;;  %v12201_v51 = vld [vmem:[#allocation7 + $0x920] sm:$0xff]  }
 0x678   : > { %11558 = vmatprep.subr.bf16.mxu1 %v12157_v34  ;;  %11407 = vmatpush3.bf16.msra.mxu0 %v12158_v40 }
 0x679   : > { %11408 = vmatprep.subr.bf16.mxu0 %v12160_v10 }
 0x67b   : > { %11559 = vmatpush3.bf16.msra.mxu1 %v12157_v34 }
 0x67c   : > { %11584 = vmatprep.subr.bf16.mxu1 %v12159_v58  ;;  %11409 = vmatpush3.bf16.msra.mxu0 %v12160_v10 }
 0x67d   : > { %11410 = vmatprep.subr.bf16.mxu0 %v12162_v63 }
 0x67e   : > { %11561 = vmatmul.mubr.bf16.vlgmr.msra.gmra.mrb[76].mxu1 %v8596_v55  ;;  %v12204_v55 = vld [vmem:[#allocation7 + $0x938] sm:$0xff]  }
 0x67f   : > { %11585 = vmatpush3.bf16.msra.mxu1 %v12159_v58  ;;  %11600 = vmatprep.mubr.bf16.mxu1 %v16327_v17  ;;  %v12169_v17 = vld [vmem:[#allocation7 + $0x968] sm:$0xff]  }
 0x680   : > { %11586 = vmatprep.subr.bf16.mxu1 %v12161_v48  ;;  %11411 = vmatpush3.bf16.msra.mxu0 %v12162_v63 }
 0x681   : > { %11412 = vmatprep.subr.bf16.mxu0 %v12164_v29 }
 0x683   : > { %11587 = vmatpush3.bf16.msra.mxu1 %v12161_v48 }
 0x684   : > { %11588 = vmatprep.subr.bf16.mxu1 %v12163_v38  ;;  %11413 = vmatpush3.bf16.msra.mxu0 %v12164_v29 }
 0x685   : > { %11414 = vmatprep.subr.bf16.mxu0 %v12166_v4 }
 0x687   : > { %11589 = vmatpush3.bf16.msra.mxu1 %v12163_v38  ;;  %v8718_v38 = vpack.c.b16 %v16395_v26, %v16395_v26 }
 0x688   : > { %11590 = vmatprep.subr.bf16.mxu1 %v12165_v6  ;;  %11415 = vmatpush3.bf16.msra.mxu0 %v12166_v4 }
 0x689   : > { %11416 = vmatprep.subr.bf16.mxu0 %v12168_v57 }
 0x68b   : > { %11591 = vmatpush3.bf16.msra.mxu1 %v12165_v6 }
 0x68c   : > { %11592 = vmatprep.subr.bf16.mxu1 %v12167_v49  ;;  %11417 = vmatpush3.bf16.msra.mxu0 %v12168_v57 }
 0x68d   : > { %11418 = vmatprep.subr.bf16.mxu0 %v12170_v5 }
 0x68f   : > { %11593 = vmatpush3.bf16.msra.mxu1 %v12167_v49 }
 0x690   : > { %11594 = vmatprep.subr.bf16.mxu1 %v12169_v17  ;;  %11419 = vmatpush3.bf16.msra.mxu0 %v12170_v5 }
 0x691   : > { %11444 = vmatprep.subr.bf16.mxu0 %v12172_v54 }
 0x693   : > { %11595 = vmatpush3.bf16.msra.mxu1 %v12169_v17  ;;  %11421 = vmatmul.mubr.bf16.vlgmr.msra.gmra.mrb[72].mxu0 %v7688_v14 }
 0x694   : > { %11596 = vmatprep.subr.bf16.mxu1 %v12171_v35  ;;  %11445 = vmatpush3.bf16.msra.mxu0 %v12172_v54 }
 0x695   : > { %11460 = vmatprep.mubr.bf16.mxu0 %v7961_v56  ;;  %11446 = vmatprep.subr.bf16.mxu0 %v12174_v41  ;;  %v12181_v56 = vld [vmem:[#allocation7 + $0x800] sm:$0xff]  }
 0x697   : > { %11597 = vmatpush3.bf16.msra.mxu1 %v12171_v35 }
 0x698   : > { %11598 = vmatprep.subr.bf16.mxu1 %v12173_v27  ;;  %11447 = vmatpush3.bf16.msra.mxu0 %v12174_v41 }
 0x699   : > { %11448 = vmatprep.subr.bf16.mxu0 %v12175_v37 }
 0x69b   : > { %11599 = vmatpush3.bf16.msra.mxu1 %v12173_v27 }
 0x69c   : > { %11449 = vmatpush3.bf16.msra.mxu0 %v12175_v37 }
 0x69d   : > { %11450 = vmatprep.subr.bf16.mxu0 %v12176_v13 }
 0x69e   : > { %11601 = vmatmul.mubr.bf16.vlgmr.msra.gmra.mrb[80].mxu1 %v8840_v16 }
 0x6a0   : > { %11451 = vmatpush3.bf16.msra.mxu0 %v12176_v13 }
 0x6a1   : > { %11452 = vmatprep.subr.bf16.mxu0 %v12177_v9 }
 0x6a4   : > { %11453 = vmatpush3.bf16.msra.mxu0 %v12177_v9 }
 0x6a5   : > { %11454 = vmatprep.subr.bf16.mxu0 %v12178_v43 }
 0x6a8   : > { %11455 = vmatpush3.bf16.msra.mxu0 %v12178_v43 }
 0x6a9   : > { %11456 = vmatprep.subr.bf16.mxu0 %v12179_v21 }
 0x6ac   : > { %11457 = vmatpush3.bf16.msra.mxu0 %v12179_v21 }
 0x6ad   : > { %11458 = vmatprep.subr.bf16.mxu0 %v12180_v8 }
 0x6b0   : > { %11459 = vmatpush3.bf16.msra.mxu0 %v12180_v8 }
 0x6b1   : > { %11484 = vmatprep.subr.bf16.mxu0 %v12181_v56 }
 0x6b3   : > { %11461 = vmatmul.mubr.bf16.vlgmr.msra.gmra.mrb[76].mxu0 %v7962_v24 }
 0x6b4   : > { %11485 = vmatpush3.bf16.msra.mxu0 %v12181_v56  ;;  %11500 = vmatprep.mubr.bf16.mxu0 %v8227_v11  ;;  %v12190_v11 = vld [vmem:[#allocation7 + $0x848] sm:$0xff]  }
 0x6b5   : > { %11486 = vmatprep.subr.bf16.mxu0 %v12182_v32 }
 0x6b8   : > { %11487 = vmatpush3.bf16.msra.mxu0 %v12182_v32  ;;  %v12205_v32 = vld [vmem:[#allocation7 + $0x980] sm:$0xff]  }
 0x6b9   : > { %11488 = vmatprep.subr.bf16.mxu0 %v12183_v2  ;;  %11624 = vmatprep.subr.bf16.mxu1 %v12205_v32 }
 0x6ba   : > { %11625 = vmatpush3.bf16.msra.mxu1 %v12205_v32 }
 0x6bc   : > { %11489 = vmatpush3.bf16.msra.mxu0 %v12183_v2  ;;  %v12206_v2 = vld [vmem:[#allocation7 + $0x988] sm:$0xff]  }
 0x6bd   : > { %11490 = vmatprep.subr.bf16.mxu0 %v12184_v0  ;;  %11626 = vmatprep.subr.bf16.mxu1 %v12206_v2 }
 0x6be   : > { %11627 = vmatpush3.bf16.msra.mxu1 %v12206_v2 }
 0x6c0   : > { %11491 = vmatpush3.bf16.msra.mxu0 %v12184_v0  ;;  %v12207_v0 = vld [vmem:[#allocation7 + $0x9c0] sm:$0xff]  }
 0x6c1   : > { %11492 = vmatprep.subr.bf16.mxu0 %v12185_v60 }
 0x6c4   : > { %11493 = vmatpush3.bf16.msra.mxu0 %v12185_v60  ;;  %v12209_v60 = vld [vmem:[#allocation7 + $0x9c8] sm:$0xff]  }
 0x6c5   : > { %11494 = vmatprep.subr.bf16.mxu0 %v12186_v42 }
 0x6c8   : > { %11495 = vmatpush3.bf16.msra.mxu0 %v12186_v42  ;;  %v12208_v42 = vld [vmem:[#allocation7 + $0x990] sm:$0xff]  }
 0x6c9   : > { %11496 = vmatprep.subr.bf16.mxu0 %v12187_v28  ;;  %11628 = vmatprep.subr.bf16.mxu1 %v12208_v42 }
 0x6ca   : > { %11629 = vmatpush3.bf16.msra.mxu1 %v12208_v42 }
 0x6cc   : > { %11497 = vmatpush3.bf16.msra.mxu0 %v12187_v28  ;;  %v12211_v28 = vld [vmem:[#allocation7 + $0x9d0] sm:$0xff]  }
 0x6cd   : > { %11498 = vmatprep.subr.bf16.mxu0 %v12188_v31 }
 0x6d0   : > { %11499 = vmatpush3.bf16.msra.mxu0 %v12188_v31 }
 0x6d1   : > { %11524 = vmatprep.subr.bf16.mxu0 %v12189_v15 }
 0x6d3   : > { %11501 = vmatmul.mubr.bf16.vlgmr.msra.gmra.mrb[80].mxu0 %v8228_v3  ;;  %v12210_v3 = vld [vmem:[#allocation7 + $0x998] sm:$0xff]  }
 0x6d4   : > { %11525 = vmatpush3.bf16.msra.mxu0 %v12189_v15  ;;  %11540 = vmatprep.mubr.bf16.mxu0 %v16104_v1  ;;  %v12196_v1 = vld [vmem:[#allocation7 + $0x878] sm:$0xff]  }
 0x6d5   : > { %11526 = vmatprep.subr.bf16.mxu0 %v12190_v11  ;;  %11630 = vmatprep.subr.bf16.mxu1 %v12210_v3 }
 0x6d6   : > { %11631 = vmatpush3.bf16.msra.mxu1 %v12210_v3  ;;  %v10164_v3 = vld [vmem:[#allocation9 + $0x7] ss:$0 sm:$0xff] }
 0x6d8   : > { %11527 = vmatpush3.bf16.msra.mxu0 %v12190_v11 }
 0x6d9   : > { %11528 = vmatprep.subr.bf16.mxu0 %v12191_v18 }
 0x6dc   : > { %11529 = vmatpush3.bf16.msra.mxu0 %v12191_v18 }
 0x6dd   : > { %11530 = vmatprep.subr.bf16.mxu0 %v12192_v52 }
 0x6e0   : > { %11531 = vmatpush3.bf16.msra.mxu0 %v12192_v52  ;;  %v12212_v52 = vld [vmem:[#allocation7 + $0x9a0] sm:$0xff]  }
 0x6e1   : > { %11532 = vmatprep.subr.bf16.mxu0 %v12193_v23  ;;  %11632 = vmatprep.subr.bf16.mxu1 %v12212_v52 }
 0x6e2   : > { %11633 = vmatpush3.bf16.msra.mxu1 %v12212_v52 }
 0x6e4   : > { %11533 = vmatpush3.bf16.msra.mxu0 %v12193_v23 }
 0x6e5   : > { %11534 = vmatprep.subr.bf16.mxu0 %v12194_v62 }
 0x6e6   : > { %v11342_v59 = vpop.f32.mrb[56].mxu0 }
 0x6e7   : > { %v7248_v22 = vpop.f32.mrb[57].mxu0 }
 0x6e8   : > { %11535 = vmatpush3.bf16.msra.mxu0 %v12194_v62  ;;  %v11343_v44 = vpop.f32.mrb[58].mxu0 }
 0x6e9   : > { %v7251_v39 = vpop.f32.mrb[59].mxu0  ;;  %11536 = vmatprep.subr.bf16.mxu0 %v12195_v33 }
 0x6ec   : > { %11537 = vmatpush3.bf16.msra.mxu0 %v12195_v33 }
 0x6ed   : > { %11538 = vmatprep.subr.bf16.mxu0 %v12196_v1 }
 0x6f0   : > { %11539 = vmatpush3.bf16.msra.mxu0 %v12196_v1 }
 0x6f1   : > { %v16427_v36 = vpop.f32.mrb[64].mxu1  ;;  %11564 = vmatprep.subr.bf16.mxu0 %v12197_v46 }
 0x6f2   : > { %v16431_v30 = vpop.f32.mrb[65].mxu1 }
 0x6f3   : > { %v11443_v12 = vpop.f32.mrb[66].mxu1  ;;  %11541 = vmatmul.mubr.bf16.vlgmr.msra.gmra.mrb[84].mxu0 %v8477_v25 }
 0x6f4   : > { %v16433_v50 = vpop.f32.mrb[67].mxu1  ;;  %11565 = vmatpush3.bf16.msra.mxu0 %v12197_v46  ;;  %11580 = vmatprep.mubr.bf16.mxu0 %v16267_v19  ;;  %v12214_v12 = vld [vmem:[#allocation7 + $0x9a8] sm:$0xff]  }
 0x6f5   : > { %11566 = vmatprep.subr.bf16.mxu0 %v12198_v45  ;;  %11634 = vmatprep.subr.bf16.mxu1 %v12214_v12 }
 0x6f6   : > { %11635 = vmatpush3.bf16.msra.mxu1 %v12214_v12 }
 0x6f8   : > { %11567 = vmatpush3.bf16.msra.mxu0 %v12198_v45  ;;  %v12213_v45 = vld [vmem:[#allocation7 + $0x9d8] sm:$0xff]  }
 0x6f9   : > { %11568 = vmatprep.subr.bf16.mxu0 %v12199_v47 }
 0x6fc   : > { %11569 = vmatpush3.bf16.msra.mxu0 %v12199_v47 }
 0x6fd   : > { %11570 = vmatprep.subr.bf16.mxu0 %v12200_v7 }
 0x700   : > { %11571 = vmatpush3.bf16.msra.mxu0 %v12200_v7 }
 0x701   : > { %11572 = vmatprep.subr.bf16.mxu0 %v12201_v51 }
 0x704   : > { %11573 = vmatpush3.bf16.msra.mxu0 %v12201_v51  ;;  %v12215_v51 = vld [vmem:[#allocation7 + $0x9e0] sm:$0xff]  }
 0x705   : > { %11574 = vmatprep.subr.bf16.mxu0 %v12202_v61 }
 0x706   : > { %v11362_v40 = vpop.f32.mrb[60].mxu0 }
 0x707   : > { %v7374_v34 = vadd.f32 %v11362_v40, %v11342_v59  ;;  %v7365_v10 = vpop.f32.mrb[61].mxu0  ;;  %v12217_v40 = vld [vmem:[#allocation7 + $0x9e8] sm:$0xff]  }
 0x708   : > { %v7366_v58 = vadd.f32 %v7365_v10, %v7248_v22  ;;  %v11363_v63 = vpop.f32.mrb[62].mxu0  ;;  %11575 = vmatpush3.bf16.msra.mxu0 %v12202_v61  ;;  %v12216_v61 = vld [vmem:[#allocation7 + $0x9b0] sm:$0xff]   ;;  %v12221_v10 = vld [vmem:[#allocation7 + $0x9f8] sm:$0xff]  }
 0x709   : > { %v7368_v19 = vpop.f32.mrb[63].mxu0  ;;  %11576 = vmatprep.subr.bf16.mxu0 %v12203_v20  ;;  %11636 = vmatprep.subr.bf16.mxu1 %v12216_v61 }
 0x70a   : > { %v7369_v48 = vadd.f32 %v7368_v19, %v7251_v39  ;;  %11637 = vmatpush3.bf16.msra.mxu1 %v12216_v61 }
 0x70c   : > { %11577 = vmatpush3.bf16.msra.mxu0 %v12203_v20 }
 0x70d   : > { %11578 = vmatprep.subr.bf16.mxu0 %v12204_v55 }
 0x710   : > { %11579 = vmatpush3.bf16.msra.mxu0 %v12204_v55 }
 0x711   : > { %v16436_v29 = vpop.f32.mrb[68].mxu1  ;;  %11604 = vmatprep.subr.bf16.mxu0 %v12207_v0 }
 0x712   : > { %v16440_v4 = vpop.f32.mrb[69].mxu1 }
 0x713   : > { %v11483_v6 = vpop.f32.mrb[70].mxu1  ;;  %11581 = vmatmul.mubr.bf16.vlgmr.msra.gmra.mrb[88].mxu0 %v8718_v38 }
 0x714   : > { %v16442_v57 = vpop.f32.mrb[71].mxu1  ;;  %11605 = vmatpush3.bf16.msra.mxu0 %v12207_v0 }
 0x715   : > { %11606 = vmatprep.subr.bf16.mxu0 %v12209_v60 }
 0x718   : > { %11607 = vmatpush3.bf16.msra.mxu0 %v12209_v60 }
 0x719   : > { %11608 = vmatprep.subr.bf16.mxu0 %v12211_v28 }
 0x71c   : > { %11609 = vmatpush3.bf16.msra.mxu0 %v12211_v28 }
 0x71d   : > { %11610 = vmatprep.subr.bf16.mxu0 %v12213_v45 }
 0x720   : > { %11611 = vmatpush3.bf16.msra.mxu0 %v12213_v45 }
 0x721   : > { %11612 = vmatprep.subr.bf16.mxu0 %v12215_v51 }
 0x724   : > { %11613 = vmatpush3.bf16.msra.mxu0 %v12215_v51 }
 0x725   : > { %11614 = vmatprep.subr.bf16.mxu0 %v12217_v40 }
 0x726   : > { %v11382_v49 = vpop.f32.mrb[64].mxu0 }
 0x727   : > { %v7515_v5 = vadd.f32 %v11382_v49, %v7374_v34  ;;  %v7499_v17 = vpop.f32.mrb[65].mxu0  ;;  %v12218_v34 = vld [vmem:[#allocation7 + $0x9b8] sm:$0xff]  }
 0x728   : > { %v7513_v54 = vadd.f32 %v7499_v17, %v7366_v58  ;;  %v11383_v35 = vpop.f32.mrb[66].mxu0  ;;  %11638 = vmatprep.subr.bf16.mxu1 %v12218_v34  ;;  %11615 = vmatpush3.bf16.msra.mxu0 %v12217_v40  ;;  %v16464_v58 = vld [vmem:[#allocation7 + $0xa00] sm:$0xff]  }
 0x729   : > { %v7502_v14 = vpop.f32.mrb[67].mxu0  ;;  %11639 = vmatpush3.bf16.msra.mxu1 %v12218_v34 }
 0x72a   : > { %v7514_v41 = vadd.f32 %v7502_v14, %v7369_v48 }
 0x731   : > { %v16444_v27 = vpop.f32.mrb[72].mxu1 }
 0x732   : > { %v16446_v37 = vpop.f32.mrb[73].mxu1 }
 0x733   : > { %v11523_v13 = vpop.f32.mrb[74].mxu1 }
 0x734   : > { %v16448_v16 = vpop.f32.mrb[75].mxu1 }
 0x746   : > { %v11402_v26 = vpop.f32.mrb[68].mxu0 }
 0x747   : > { %v7652_v9 = vadd.f32 %v11402_v26, %v7515_v5  ;;  %v7636_v43 = vpop.f32.mrb[69].mxu0 }
 0x748   : > { %v7650_v21 = vadd.f32 %v7636_v43, %v7513_v54  ;;  %v11403_v8 = vpop.f32.mrb[70].mxu0 }
 0x749   : > { %v7639_v56 = vpop.f32.mrb[71].mxu0 }
 0x74a   : > { %v7651_v24 = vadd.f32 %v7639_v56, %v7514_v41 }
 0x751   : > { %v16450_v31 = vpop.f32.mrb[76].mxu1 }
 0x752   : > { %v16452_v15 = vpop.f32.mrb[77].mxu1 }
 0x753   : > { %v11563_v11 = vpop.f32.mrb[78].mxu1 }
 0x754   : > { %v16454_v18 = vpop.f32.mrb[79].mxu1 }
 0x766   : > { %v11422_v23 = vpop.f32.mrb[72].mxu0 }
 0x767   : > { %v7789_v62 = vadd.f32 %v11422_v23, %v7652_v9  ;;  %v7773_v33 = vpop.f32.mrb[73].mxu0 }
 0x768   : > { %v7787_v59 = vadd.f32 %v7773_v33, %v7650_v21  ;;  %v11423_v22 = vpop.f32.mrb[74].mxu0 }
 0x769   : > { %v7776_v44 = vpop.f32.mrb[75].mxu0  ;;  %v7926_v39 = vadd.f32 %v16427_v36, %v7789_v62 }
 0x76a   : > { %v7788_v1 = vadd.f32 %v7776_v44, %v7651_v24  ;;  %v7924_v46 = vadd.f32 %v16431_v30, %v7787_v59  ;;  %v12219_v30 = vld [vmem:[#allocation7 + $0x9f0] sm:$0xff]  }
 0x76b   : > { %11616 = vmatprep.subr.bf16.mxu0 %v12219_v30 }
 0x76c   : > { %v7925_v25 = vadd.f32 %v16433_v50, %v7788_v1  ;;  %v16461_v50 = vld [vmem:[#allocation7 + $0xa40] sm:$0xff]   ;;  %11617 = vmatpush3.bf16.msra.mxu0 %v12219_v30 }
 0x76d   : > { %11664 = vmatprep.subr.bf16.mxu1 %v16461_v50  ;;  %11618 = vmatprep.subr.bf16.mxu0 %v12221_v10 }
 0x770   : > { %11619 = vmatpush3.bf16.msra.mxu0 %v12221_v10 }
 0x771   : > { %v16459_v47 = vpop.f32.mrb[80].mxu1  ;;  %11644 = vmatprep.subr.bf16.mxu0 %v16464_v58 }
 0x772   : > { %v8924_v7 = vpop.f32.mrb[81].mxu1 }
 0x773   : > { %v11603_v20 = vpop.f32.mrb[82].mxu1 }
 0x774   : > { %v8927_v36 = vpop.f32.mrb[83].mxu1 }
 0x786   : > { %v11462_v63 = vpop.f32.mrb[76].mxu0 }
 0x787   : > { %v8063_v19 = vadd.f32 %v11462_v63, %v7926_v39  ;;  %v8047_v55 = vpop.f32.mrb[77].mxu0 }
 0x788   : > { %v8061_v48 = vadd.f32 %v8047_v55, %v7924_v46  ;;  %v11463_v38 = vpop.f32.mrb[78].mxu0 }
 0x789   : > { %v8050_v6 = vpop.f32.mrb[79].mxu0  ;;  %v8200_v49 = vadd.f32 %v16436_v29, %v8063_v19 }
 0x78a   : > { %v8062_v5 = vadd.f32 %v8050_v6, %v7925_v25  ;;  %v8198_v17 = vadd.f32 %v16440_v4, %v8061_v48  ;;  %v12222_v25 = vld [vmem:[#allocation7 + $0xa48] sm:$0xff]   ;;  %v12224_v6 = vld [vmem:[#allocation7 + $0xa50] sm:$0xff]  }
 0x78c   : > { %v8199_v54 = vadd.f32 %v16442_v57, %v8062_v5 }
 0x7a6   : > { %v11502_v35 = vpop.f32.mrb[80].mxu0 }
 0x7a7   : > { %v16470_v14 = vadd.f32 %v11502_v35, %v8200_v49  ;;  %v8313_v41 = vpop.f32.mrb[81].mxu0  ;;  %v12227_v35 = vld [vmem:[#allocation7 + $0xa10] sm:$0xff]  }
 0x7a8   : > { %v16472_v13 = vadd.f32 %v8313_v41, %v8198_v17  ;;  %v11503_v26 = vpop.f32.mrb[82].mxu0  ;;  %v12225_v17 = vld [vmem:[#allocation7 + $0xa08] sm:$0xff]   ;;  %v12228_v41 = vld [vmem:[#allocation7 + $0xa60] sm:$0xff]  }
 0x7a9   : > { %v8316_v9 = vpop.f32.mrb[83].mxu0  ;;  %v12229_v26 = vld [vmem:[#allocation7 + $0xa18] sm:$0xff]  }
 0x7aa   : > { %v16474_v43 = vadd.f32 %v8316_v9, %v8199_v54  ;;  %v12226_v54 = vld [vmem:[#allocation7 + $0xa58] sm:$0xff]   ;;  %v12230_v9 = vld [vmem:[#allocation7 + $0xa68] sm:$0xff]  }
 0x7c6   : > { %v11542_v21 = vpop.f32.mrb[84].mxu0 }
 0x7c7   : > { %v8570_v8 = vadd.f32 %v11542_v21, %v16444_v27  ;;  %v8561_v56 = vpop.f32.mrb[85].mxu0  ;;  %v12231_v21 = vld [vmem:[#allocation7 + $0xa20] sm:$0xff]  }
 0x7c8   : > { %v8562_v29 = vadd.f32 %v8561_v56, %v16446_v37  ;;  %v11543_v24 = vpop.f32.mrb[86].mxu0  ;;  %v12234_v56 = vld [vmem:[#allocation7 + $0xa78] sm:$0xff]  }
 0x7c9   : > { %v8564_v4 = vpop.f32.mrb[87].mxu0  ;;  %v8696_v57 = vadd.f32 %v16450_v31, %v8570_v8  ;;  %v12232_v8 = vld [vmem:[#allocation7 + $0xa70] sm:$0xff]   ;;  %v12236_v24 = vld [vmem:[#allocation7 + $0xa38] sm:$0xff]  }
 0x7ca   : > { %v8565_v32 = vadd.f32 %v8564_v4, %v16448_v16  ;;  %v8694_v2 = vadd.f32 %v16452_v15, %v8562_v29  ;;  %v12235_v29 = vld [vmem:[#allocation7 + $0xa30] sm:$0xff]   ;;  %v12237_v4 = vld [vmem:[#allocation7 + $0xa80] sm:$0xff]  }
 0x7cc   : > { %v8695_v0 = vadd.f32 %v16454_v18, %v8565_v32  ;;  %v12239_v32 = vld [vmem:[#allocation7 + $0xa90] sm:$0xff]  }
 0x7e6   : > { %v11582_v60 = vpop.f32.mrb[88].mxu0 }
 0x7e7   : > { %v8818_v42 = vadd.f32 %v11582_v60, %v8696_v57  ;;  %v8802_v28 = vpop.f32.mrb[89].mxu0  ;;  %v12238_v57 = vld [vmem:[#allocation7 + $0xa88] sm:$0xff]  }
 0x7e8   : > { %v8816_v11 = vadd.f32 %v8802_v28, %v8694_v2  ;;  %v11583_v52 = vpop.f32.mrb[90].mxu0  ;;  %v12240_v2 = vld [vmem:[#allocation7 + $0xa98] sm:$0xff]   ;;  %v12242_v60 = vld [vmem:[#allocation7 + $0xaa8] sm:$0xff]  }
 0x7e9   : > { %v8940_v27 = vadd.f32 %v16459_v47, %v8818_v42  ;;  %v8805_v23 = vpop.f32.mrb[91].mxu0  ;;  %v12243_v42 = vld [vmem:[#allocation7 + $0xab0] sm:$0xff]   ;;  %v12244_v28 = vld [vmem:[#allocation7 + $0xab8] sm:$0xff]  }
 0x7ea   : > { %v8938_v37 = vadd.f32 %v8924_v7, %v8816_v11  ;;  %v8817_v62 = vadd.f32 %v8805_v23, %v8695_v0  ;;  %v12241_v0 = vld [vmem:[#allocation7 + $0xaa0] sm:$0xff]  }
 0x7eb   : > { %v8948_v33 = vadd.f32 %v10164_v3, %v8940_v27 }
 0x7ec   : > { %v8946_v59 = vadd.f32 %v10164_v3, %v8938_v37  ;;  %v8939_v31 = vadd.f32 %v8927_v36, %v8817_v62 }
 0x7ed   : > { %v8951_v22 = vmax.f32 %v8948_v33, 0.0 }
 0x7ee   : > { %v8947_v16 = vadd.f32 %v10164_v3, %v8939_v31  ;;  %v8949_v15 = vmax.f32 %v8946_v59, 0.0 }
 0x7ef   : > { %v16483_v44 = vpack.c.bf16 %v8951_v22, %v8951_v22 }
 0x7f0   : > { %v8950_v18 = vmax.f32 %v8947_v16, 0.0 }
 0x7f1   : > { %v8996_v39 = vshll.u32 %v16483_v44, 16  ;;  %v9000_v1 = vshrl.u32 %v16483_v44, 16  ;;  %v9217_v47 = vrot.slane %v16483_v44, 1  ;;  %v9463_v34 = vrot.slane %v16483_v44, 2 }
 0x7f2   : > { %v8952_v46 = vpack.c.bf16 %v8950_v18, %v8949_v15 }
 0x7f3   : > { %v9340_v45 = vrot.slane %v9000_v1, 1  ;;  %v9341_v12 = vrot.slane %v8996_v39, 2  ;;  %v8998_v40 = vrot.slane %v8996_v39, 1 }
 0x7f4   : > { %11640 = vmatprep.mubr.bf16.mxu1 %v8952_v46  ;;  %v8989_v7 = vshrl.u32 %v8952_v46, 16  ;;  %v8991_v51 = vshll.u32 %v8952_v46, 16  ;;  %v9216_v61 = vrot.slane %v8952_v46, 1  ;;  %v9462_v20 = vrot.slane %v8952_v46, 2 }
 0x7f5   : > { %11641 = vmatmul.mubr.bf16.vlgmr.msra.gmra.mrb[84].mxu1 %v16483_v44  ;;  %v9342_v38 = vor.u32 %v9341_v12, %v9340_v45  ;;  %v9002_v5 = vor.u32 %v9000_v1, %v8998_v40 }
 0x7f6   : > { %11665 = vmatpush3.bf16.msra.mxu1 %v16461_v50  ;;  %v8993_v36 = vrot.slane %v8991_v51, 1  ;;  %v9337_v30 = vrot.slane %v8989_v7, 1  ;;  %v9338_v10 = vrot.slane %v8991_v51, 2  ;;  %v9218_v63 = vsel %vm375_vm0, %v9216_v61, %v9217_v47 }
 0x7f7   : > { %11666 = vmatprep.subr.bf16.mxu1 %v12222_v25  ;;  %v9464_v19 = vsel %vm474_vm1, %v9462_v20, %v9463_v34  ;;  %v10123_v20 = vld [vmem:[#allocation9 + $0x6] ss:$0 sm:$0xff] }
 0x7f8   : > { %v8994_v55 = vor.u32 %v8993_v36, %v8989_v7  ;;  %v9339_v48 = vor.u32 %v9338_v10, %v9337_v30  ;;  %v8337_v36 = vadd.f32 %v10123_v20, %v16470_v14 }
 0x7fa   : > { %11667 = vmatpush3.bf16.msra.mxu1 %v12222_v25  ;;  %v8999_v49 = vsel %vm1600_vm4, %v8994_v55, %v8998_v40  ;;  %v9343_v50 = vsel %vm2185_vm5, %v9339_v48, %v9342_v38 }
 0x7fb   : > { %11620 = vmatprep.mubr.bf16.mxu0 %v8999_v49  ;;  %11680 = vmatprep.mubr.bf16.mxu1 %v9343_v50 }
 0x7fc   : > { %11621 = vmatmul.mubr.bf16.vlgmr.msra.gmra.mrb[92].mxu0 %v9002_v5  ;;  %11668 = vmatprep.subr.bf16.mxu1 %v12224_v6  ;;  %v8340_v5 = vmax.f32 %v8337_v36, 0.0 }
 0x7fd   : > { %11645 = vmatpush3.bf16.msra.mxu0 %v16464_v58  ;;  %11660 = vmatprep.mubr.bf16.mxu0 %v9218_v63  ;;  %v12233_v58 = vld [vmem:[#allocation7 + $0xa28] sm:$0xff]   ;;  %v8335_v63 = vadd.f32 %v10123_v20, %v16472_v13 }
 0x7fe   : > { %11669 = vmatpush3.bf16.msra.mxu1 %v12224_v6  ;;  %11646 = vmatprep.subr.bf16.mxu0 %v12225_v17  ;;  %v8336_v6 = vadd.f32 %v10123_v20, %v16474_v43 }
 0x7ff   : > { %11670 = vmatprep.subr.bf16.mxu1 %v12226_v54 }
 0x800   : > { %v8339_v14 = vmax.f32 %v8336_v6, 0.0 }
 0x801   : > { %11647 = vmatpush3.bf16.msra.mxu0 %v12225_v17 }
 0x802   : > { %11671 = vmatpush3.bf16.msra.mxu1 %v12226_v54  ;;  %11648 = vmatprep.subr.bf16.mxu0 %v12227_v35  ;;  %v8338_v54 = vmax.f32 %v8335_v63, 0.0 }
 0x803   : > { %11672 = vmatprep.subr.bf16.mxu1 %v12228_v41 }
 0x805   : > { %11649 = vmatpush3.bf16.msra.mxu0 %v12227_v35 }
 0x806   : > { %11673 = vmatpush3.bf16.msra.mxu1 %v12228_v41  ;;  %11650 = vmatprep.subr.bf16.mxu0 %v12229_v26 }
 0x807   : > { %11674 = vmatprep.subr.bf16.mxu1 %v12230_v9 }
 0x809   : > { %11651 = vmatpush3.bf16.msra.mxu0 %v12229_v26 }
 0x80a   : > { %11675 = vmatpush3.bf16.msra.mxu1 %v12230_v9  ;;  %11652 = vmatprep.subr.bf16.mxu0 %v12231_v21 }
 0x80b   : > { %11676 = vmatprep.subr.bf16.mxu1 %v12232_v8 }
 0x80d   : > { %11653 = vmatpush3.bf16.msra.mxu0 %v12231_v21 }
 0x80e   : > { %11677 = vmatpush3.bf16.msra.mxu1 %v12232_v8  ;;  %11654 = vmatprep.subr.bf16.mxu0 %v12233_v58 }
 0x80f   : > { %11678 = vmatprep.subr.bf16.mxu1 %v12234_v56 }
 0x811   : > { %11655 = vmatpush3.bf16.msra.mxu0 %v12233_v58 }
 0x812   : > { %11679 = vmatpush3.bf16.msra.mxu1 %v12234_v56  ;;  %11656 = vmatprep.subr.bf16.mxu0 %v12235_v29 }
 0x815   : > { %11657 = vmatpush3.bf16.msra.mxu0 %v12235_v29  ;;  %11681 = vmatmul.mubr.bf16.vlgmr.msra.gmra.mrb[88].mxu1 %v9342_v38 }
 0x816   : > { %11658 = vmatprep.subr.bf16.mxu0 %v12236_v24 }
 0x819   : > { %11659 = vmatpush3.bf16.msra.mxu0 %v12236_v24 }
 0x81a   : > { %11684 = vmatprep.subr.bf16.mxu0 %v12237_v4 }
 0x81c   : > { %11661 = vmatmul.mubr.bf16.vlgmr.msra.gmra.mrb[96].mxu0 %v9217_v47 }
 0x81d   : > { %11685 = vmatpush3.bf16.msra.mxu0 %v12237_v4  ;;  %11700 = vmatprep.mubr.bf16.mxu0 %v9464_v19 }
 0x81e   : > { %11686 = vmatprep.subr.bf16.mxu0 %v12238_v57 }
 0x821   : > { %11687 = vmatpush3.bf16.msra.mxu0 %v12238_v57 }
 0x822   : > { %11688 = vmatprep.subr.bf16.mxu0 %v12239_v32 }
 0x825   : > { %11689 = vmatpush3.bf16.msra.mxu0 %v12239_v32 }
 0x826   : > { %11690 = vmatprep.subr.bf16.mxu0 %v12240_v2 }
 0x829   : > { %11691 = vmatpush3.bf16.msra.mxu0 %v12240_v2 }
 0x82a   : > { %11692 = vmatprep.subr.bf16.mxu0 %v12241_v0 }
 0x82d   : > { %11693 = vmatpush3.bf16.msra.mxu0 %v12241_v0 }
 0x82e   : > { %11694 = vmatprep.subr.bf16.mxu0 %v12242_v60 }
 0x831   : > { %11695 = vmatpush3.bf16.msra.mxu0 %v12242_v60 }
 0x832   : > { %11696 = vmatprep.subr.bf16.mxu0 %v12243_v42 }
 0x835   : > { %11697 = vmatpush3.bf16.msra.mxu0 %v12243_v42 }
 0x836   : > { %11698 = vmatprep.subr.bf16.mxu0 %v12244_v28 }
 0x839   : > { %11699 = vmatpush3.bf16.msra.mxu0 %v12244_v28 }
 0x83c   : > { %11701 = vmatmul.mubr.bf16.vlgmr.msra.gmra.mrb[100].mxu0 %v9463_v34  ;;  %v10205_v34 = vld [vmem:[#allocation9 + $0x8] ss:$0 sm:$0xff] }
 0x8c8   : > { %v11642_v3 = vpop.f32.mrb[84].mxu1 }
 0x8c9   : > { %v9183_v11 = vpop.f32.mrb[85].mxu1 }
 0x8ca   : > { %v11643_v52 = vpop.f32.mrb[86].mxu1 }
 0x8cb   : > { %v9186_v27 = vpop.f32.mrb[87].mxu1 }
 0x8cf   : > { %v11622_v23 = vpop.f32.mrb[92].mxu0 }
 0x8d0   : > { %v9192_v37 = vadd.f32 %v11642_v3, %v11622_v23  ;;  %v9087_v62 = vpop.f32.mrb[93].mxu0 }
 0x8d1   : > { %v9184_v33 = vadd.f32 %v9183_v11, %v9087_v62  ;;  %v11623_v59 = vpop.f32.mrb[94].mxu0 }
 0x8d2   : > { %v9090_v31 = vpop.f32.mrb[95].mxu0 }
 0x8d3   : > { %v9187_v22 = vadd.f32 %v9186_v27, %v9090_v31 }
 0x8e8   : > { %v11682_v16 = vpop.f32.mrb[88].mxu1 }
 0x8e9   : > { %v9428_v15 = vpop.f32.mrb[89].mxu1 }
 0x8ea   : > { %v11683_v18 = vpop.f32.mrb[90].mxu1 }
 0x8eb   : > { %v9431_v39 = vpop.f32.mrb[91].mxu1 }
 0x8ef   : > { %v11662_v1 = vpop.f32.mrb[96].mxu0 }
 0x8f0   : > { %v9319_v46 = vadd.f32 %v11662_v1, %v9192_v37  ;;  %v9303_v25 = vpop.f32.mrb[97].mxu0 }
 0x8f1   : > { %v9317_v44 = vadd.f32 %v9303_v25, %v9184_v33  ;;  %v11663_v45 = vpop.f32.mrb[98].mxu0 }
 0x8f2   : > { %v9306_v12 = vpop.f32.mrb[99].mxu0  ;;  %v9444_v47 = vadd.f32 %v11682_v16, %v9319_v46 }
 0x8f3   : > { %v9318_v7 = vadd.f32 %v9306_v12, %v9187_v22  ;;  %v9442_v51 = vadd.f32 %v9428_v15, %v9317_v44 }
 0x8f5   : > { %v9443_v61 = vadd.f32 %v9431_v39, %v9318_v7 }
 0x90f   : > { %v11702_v40 = vpop.f32.mrb[100].mxu0 }
 0x910   : > { %v9565_v30 = vadd.f32 %v11702_v40, %v9444_v47  ;;  %v9549_v10 = vpop.f32.mrb[101].mxu0 }
 0x911   : > { %v9563_v19 = vadd.f32 %v9549_v10, %v9442_v51  ;;  %v11703_v55 = vpop.f32.mrb[102].mxu0 }
 0x912   : > { %v9573_v48 = vadd.f32 %v10205_v34, %v9565_v30  ;;  %v9552_v38 = vpop.f32.mrb[103].mxu0 }
 0x913   : > { %v9571_v49 = vadd.f32 %v10205_v34, %v9563_v19  ;;  %v9564_v50 = vadd.f32 %v9552_v38, %v9443_v61 }
 0x914   : > { %v9576_v17 = vmax.f32 %v9573_v48, 0.0 }
 0x915   : > { %v9574_v35 = vmax.f32 %v9571_v49, 0.0  ;;  %v9572_v41 = vadd.f32 %v10205_v34, %v9564_v50 }
 0x916   : > { %v9579_v26 = vadd.f32 %v9576_v17, %v8340_v5 }
 0x917   : > { %v9577_v9 = vadd.f32 %v9574_v35, %v8338_v54  ;;  %v9575_v21 = vmax.f32 %v9572_v41, 0.0 }
 0x918   : > { %v9623_v13 = vrot.slane %v9579_v26, %v17006_v53 }
 0x919   : > { %v9583_v8 = vcombine.high %v9577_v9, %v9577_v9  ;;  %v9590_v58 = vrot.slane %v9577_v9, %v17006_v53  ;;  %v9578_v56 = vadd.f32 %v9575_v21, %v8339_v14 }
 0x91a   : > { %v9689_v43 = vsel %vm870_vm7, %v9623_v13, -inf }
 0x91b   : > { %v9690_v29 = vrot.slane %v9689_v43, 4  ;;  %v9597_v24 = vrot.slane %v9583_v8, %v17006_v53  ;;  %v9598_v4 = vcombine.high %v9590_v58, %v9590_v58  ;;  %v9633_v57 = vsel %vm870_vm7, %v9590_v58, -inf }
 0x91c   : > { %v9634_v32 = vrot.slane %v9633_v57, 4  ;;  %v9600_v2 = vcombine.high %v9578_v56, %v9578_v56  ;;  %v9607_v0 = vrot.slane %v9578_v56, %v17006_v53 }
 0x91d   : > { %v9691_v60 = vmax.f32 %v9689_v43, %v9690_v29  ;;  %v9599_v42 = vcombine.high %v9597_v24, %v9597_v24  ;;  %v9640_v28 = vsel %vm870_vm7, %v9598_v4, -inf  ;;  %v9647_v3 = vsel %vm870_vm7, %v9597_v24, -inf }
 0x91e   : > { %v9635_v11 = vmax.f32 %v9633_v57, %v9634_v32  ;;  %v9641_v52 = vrot.slane %v9640_v28, 4  ;;  %v9648_v27 = vrot.slane %v9647_v3, 4  ;;  %v9614_v23 = vrot.slane %v9600_v2, %v17006_v53 }
 0x91f   : > { %v9692_v37 = vrot.slane %v9691_v60, 2  ;;  %v9654_v62 = vsel %vm870_vm7, %v9599_v42, -inf  ;;  %v9615_v33 = vcombine.high %v9607_v0, %v9607_v0  ;;  %v9661_v59 = vsel %vm870_vm7, %v9607_v0, -inf }
 0x920   : > { %v9636_v31 = vrot.slane %v9635_v11, 2  ;;  %v9642_v22 = vmax.f32 %v9640_v28, %v9641_v52  ;;  %v9649_v16 = vmax.f32 %v9647_v3, %v9648_v27  ;;  %v9655_v15 = vrot.slane %v9654_v62, 4 }
 0x921   : > { %v9693_v18 = vmax.f32 %v9691_v60, %v9692_v37  ;;  %v9616_v39 = vcombine.high %v9614_v23, %v9614_v23  ;;  %v9662_v1 = vrot.slane %v9661_v59, 4  ;;  %v9668_v46 = vsel %vm870_vm7, %v9615_v33, -inf }
 0x922   : > { %v9637_v25 = vmax.f32 %v9635_v11, %v9636_v31  ;;  %v9643_v44 = vrot.slane %v9642_v22, 2  ;;  %v9650_v45 = vrot.slane %v9649_v16, 2  ;;  %v9656_v53 = vmax.f32 %v9654_v62, %v9655_v15 }
 0x923   : > { %v9694_v12 = vrot.slane %v9693_v18, 1  ;;  %v9663_v47 = vmax.f32 %v9661_v59, %v9662_v1  ;;  %v9669_v7 = vrot.slane %v9668_v46, 4  ;;  %v9675_v51 = vsel %vm870_vm7, %v9614_v23, -inf }
 0x924   : > { %v9638_v61 = vrot.slane %v9637_v25, 1  ;;  %v9644_v20 = vmax.f32 %v9642_v22, %v9643_v44  ;;  %v9651_v40 = vmax.f32 %v9649_v16, %v9650_v45  ;;  %v9657_v34 = vrot.slane %v9656_v53, 2 }
 0x925   : > { %v9695_v36 = vmax.f32 %v9693_v18, %v9694_v12  ;;  %v9664_v30 = vrot.slane %v9663_v47, 2  ;;  %v9670_v10 = vmax.f32 %v9668_v46, %v9669_v7  ;;  %v9676_v63 = vrot.slane %v9675_v51, 4 }
 0x926   : > { %v9639_v19 = vmax.f32 %v9637_v25, %v9638_v61  ;;  %v9645_v55 = vrot.slane %v9644_v20, 1  ;;  %v9652_v48 = vrot.slane %v9651_v40, 1  ;;  %v9658_v38 = vmax.f32 %v9656_v53, %v9657_v34 }
 0x927   : > { %9715 = vst [vmem:[%s16528_s15 + $0x8] sm:$0x1] %v9695_v36  ;;  %v9665_v6 = vmax.f32 %v9663_v47, %v9664_v30  ;;  %v9671_v49 = vrot.slane %v9670_v10, 2  ;;  %v9677_v50 = vmax.f32 %v9675_v51, %v9676_v63  ;;  %v9682_v5 = vsel %vm870_vm7, %v9616_v39, -inf }
 0x928   : > { %v9646_v17 = vmax.f32 %v9644_v20, %v9645_v55  ;;  %v9653_v54 = vmax.f32 %v9651_v40, %v9652_v48  ;;  %v9659_v35 = vrot.slane %v9658_v38, 1  ;;  %v9683_v41 = vrot.slane %v9682_v5, 4 }
 0x929   : > { %v9666_v26 = vrot.slane %v9665_v6, 1  ;;  %v9672_v14 = vmax.f32 %v9670_v10, %v9671_v49  ;;  %v9678_v9 = vrot.slane %v9677_v50, 2 }
 0x92a   : > { %v9660_v21 = vmax.f32 %v9658_v38, %v9659_v35  ;;  %v9705_v13 = vsel %vm3582_vm9, %v9646_v17, %v9639_v19  ;;  %v9684_v8 = vmax.f32 %v9682_v5, %v9683_v41 }
 0x92b   : > { %v9706_v58 = vsel %vm3584_vm10, %v9653_v54, %v9705_v13  ;;  %v9667_v56 = vmax.f32 %v9665_v6, %v9666_v26  ;;  %v9673_v43 = vrot.slane %v9672_v14, 1  ;;  %v9679_v29 = vmax.f32 %v9677_v50, %v9678_v9 }
 0x92c   : > { %v9685_v24 = vrot.slane %v9684_v8, 2  ;;  %v9707_v4 = vsel %vm3586_vm11, %v9660_v21, %v9706_v58 }
 0x92d   : > { %v9674_v57 = vmax.f32 %v9672_v14, %v9673_v43  ;;  %v9680_v32 = vrot.slane %v9679_v29, 1  ;;  %v9708_v2 = vsel %vm3588_vm12, %v9667_v56, %v9707_v4 }
 0x92e   : > { %v9686_v0 = vmax.f32 %v9684_v8, %v9685_v24 }
 0x92f   : > { %v9681_v60 = vmax.f32 %v9679_v29, %v9680_v32  ;;  %v9709_v42 = vsel %vm3590_vm13, %v9674_v57, %v9708_v2 }
 0x930   : > { %v9687_v28 = vrot.slane %v9686_v0, 1 }
 0x931   : > { %v9710_v3 = vsel %vm3592_vm14, %v9681_v60, %v9709_v42 }
 0x932   : > { %v9688_v11 = vmax.f32 %v9686_v0, %v9687_v28 }
 0x934   : > { %v9711_v52 = vsel %vm3594_vm15, %v9688_v11, %v9710_v3 }
 0x935   : > { %9714 = vst [vmem:[%s16528_s15] sm:$0xff] %v9711_v52 }
 0x936 PF: > { %p17_p4 = scmp.ge.s32.totalorder %s12638_s10, 4   ;;  %s17007_s18 = smov %s12446_s19 }
 0x937   : > { %s17008_s19 = smov %s12450_s20  ;;  %s17009_s20 = smov %s12647_s9 }
 0x938   : > { %s17010_s21 = smov %s12638_s10  ;;  %19 = sbr.rel (!%p17_p4) target bundleno = 5 (0x5), region = 138 }
 0x93f   :  { %9737 = vsyncpa [#allocation3], 1 }
 0x940   :  { %9739 = vsyncpa [#allocation3 + $0x1], 1 }
 0x941   :  { %9740 = vsyncpa [#allocation5], 1 }
 0x942   :  { %9741 = vsyncpa [#allocation8], 1 }

</bundles_post_ra>
